<compile_context>
chip_gen: v5e
topology: v5e:2x2
jax: 0.10.0
libtpu: 0.0.40
codegen_flags: <defaults>
</compile_context>

<pallas_src>
import functools

import jax
import jax.numpy as jnp
from jax.experimental import pallas as pl
from jax.experimental.pallas import tpu as pltpu

LANE = 128      # pad channel / K dims to multiples of 128 (valid on v5e/v6e/v7x)
TM_MAX = 512    # row-tile size: ~85% of HBM roofline, small enough for v7x VMEM


def _ru(x, m):
    return ((x + m - 1) // m) * m


def _pad1(v, n):
    return jnp.pad(v, (0, n - v.shape[0]))


# ---------------------------------------------------------------------------
# Pallas kernel bodies
# ---------------------------------------------------------------------------
def _conv_kernel(a_ref, w_ref, sc_ref, sh_ref, o_ref, *, relu):
    """out = act(A @ W * scale + shift)   (bias-free conv + folded BN)."""
    y = jnp.dot(a_ref[...], w_ref[...], preferred_element_type=jnp.float32)
    y = y * sc_ref[...] + sh_ref[...]
    if relu:
        y = jnp.maximum(y, 0.0)
    o_ref[...] = y.astype(o_ref.dtype)


def _conv_res_kernel(a_ref, w_ref, sc_ref, sh_ref, r_ref, o_ref):
    """out = relu(A @ W * scale + shift + residual)   (identity skip)."""
    y = jnp.dot(a_ref[...], w_ref[...], preferred_element_type=jnp.float32)
    y = y * sc_ref[...] + sh_ref[...] + r_ref[...].astype(jnp.float32)
    o_ref[...] = jnp.maximum(y, 0.0).astype(o_ref.dtype)


def _conv_dual_kernel(a_ref, w_ref, sc_ref, sh_ref,
                      ad_ref, wd_ref, scd_ref, shd_ref, o_ref):
    """out = relu(A@W*sc+sh + Ad@Wd*scd+shd)   (conv2 + fused 1x1 downsample)."""
    y = jnp.dot(a_ref[...], w_ref[...], preferred_element_type=jnp.float32)
    y = y * sc_ref[...] + sh_ref[...]
    yd = jnp.dot(ad_ref[...], wd_ref[...], preferred_element_type=jnp.float32)
    y = y + yd * scd_ref[...] + shd_ref[...]
    o_ref[...] = jnp.maximum(y, 0.0).astype(o_ref.dtype)


def _head_kernel(x_ref, w_ref, b_ref, o_ref, acc_ref, *, inv_hw):
    """Global-average-pool (tiled over HW) fused with the fc matmul."""
    @pl.when(pl.program_id(0) == 0)
    def _():
        acc_ref[...] = jnp.zeros_like(acc_ref)

    acc_ref[...] += jnp.sum(x_ref[...].astype(jnp.float32), axis=1)

    @pl.when(pl.program_id(0) == pl.num_programs(0) - 1)
    def _():
        feats = (acc_ref[...] * inv_hw).astype(jnp.bfloat16)
        o_ref[...] = (jnp.dot(feats, w_ref[...],
                              preferred_element_type=jnp.float32)
                      + b_ref[...])


# ---------------------------------------------------------------------------
# Fused conv wrapper: row-tiled grid, MXU matmul + epilogue in one kernel
# ---------------------------------------------------------------------------
def fused_conv(a, w, scale, shift, *, relu=True, residual=None, ds=None,
               out_dtype=jnp.bfloat16):
    """a: (M, Kp) bf16 im2col rows, w: (Kp, Np) bf16.  Returns (M, Np)."""
    M, Kp = a.shape
    Np = w.shape[1]
    tm = min(TM_MAX, _ru(M, 8))
    Mp = _ru(M, tm)

    a = jnp.pad(a, ((0, Mp - M), (0, 0)))
    sc = _pad1(scale, Np).reshape(1, Np).astype(jnp.float32)
    sh = _pad1(shift, Np).reshape(1, Np).astype(jnp.float32)

    def row_spec(k):
        return pl.BlockSpec((tm, k), lambda i: (i, 0))

    def whole(shape):
        return pl.BlockSpec(shape, lambda i: (0, 0))

    inputs = [a, w, sc, sh]
    in_specs = [row_spec(Kp), whole(w.shape), whole((1, Np)), whole((1, Np))]
    flops = 2 * Mp * Kp * Np
    bytes_acc = a.size * 2 + w.size * 2 + Mp * Np * jnp.dtype(out_dtype).itemsize

    if ds is not None:
        a_ds, w_ds, scale_ds, shift_ds = ds
        Kd = a_ds.shape[1]
        a_ds = jnp.pad(a_ds, ((0, Mp - a_ds.shape[0]), (0, 0)))
        scd = _pad1(scale_ds, Np).reshape(1, Np).astype(jnp.float32)
        shd = _pad1(shift_ds, Np).reshape(1, Np).astype(jnp.float32)
        inputs += [a_ds, w_ds, scd, shd]
        in_specs += [row_spec(Kd), whole(w_ds.shape), whole((1, Np)),
                     whole((1, Np))]
        flops += 2 * Mp * Kd * Np
        bytes_acc += a_ds.size * 2 + w_ds.size * 2
        kernel = _conv_dual_kernel
    elif residual is not None:
        r = jnp.pad(residual, ((0, Mp - residual.shape[0]), (0, 0)))
        inputs.append(r)
        in_specs.append(row_spec(Np))
        bytes_acc += r.size * 2
        kernel = _conv_res_kernel
    else:
        kernel = functools.partial(_conv_kernel, relu=relu)

    out = pl.pallas_call(
        kernel,
        out_shape=jax.ShapeDtypeStruct((Mp, Np), out_dtype),
        grid=(Mp // tm,),
        in_specs=in_specs,
        out_specs=pl.BlockSpec((tm, Np), lambda i: (i, 0)),
        compiler_params=pltpu.CompilerParams(
            dimension_semantics=("parallel",)),
        cost_estimate=pl.CostEstimate(flops=int(flops), transcendentals=0,
                                      bytes_accessed=int(bytes_acc)),
    )(*inputs)
    return out[:M]


# ---------------------------------------------------------------------------
# Plain-JAX glue: im2col lowering + channel/K padding (bf16)
# ---------------------------------------------------------------------------
def _im2col(x, k, stride, pad):
    """x: (N,H,W,C) -> rows (N*Ho*Wo, k*k*C), plus Ho, Wo."""
    N, H, W, C = x.shape
    xp = jnp.pad(x, ((0, 0), (pad, pad), (pad, pad), (0, 0)))
    Ho = (H + 2 * pad - k) // stride + 1
    Wo = (W + 2 * pad - k) // stride + 1
    cols = []
    for i in range(k):
        for j in range(k):
            cols.append(xp[:, i:i + stride * Ho:stride,
                           j:j + stride * Wo:stride, :])
    p = jnp.stack(cols, axis=3)  # (N, Ho, Wo, k*k, C)
    return p.reshape(N * Ho * Wo, k * k * C), Ho, Wo


def _conv_rows(x, cin, k, stride, pad):
    """im2col of the real `cin` channels of x, K-padded to 128, bf16."""
    rows, Ho, Wo = _im2col(x[..., :cin], k, stride, pad)
    K = rows.shape[1]
    Kp = _ru(K, LANE)
    rows = jnp.pad(rows, ((0, 0), (0, Kp - K))).astype(jnp.bfloat16)
    return rows, Ho, Wo


def _prep_w(w):
    """(kh,kw,cin,cout) -> (Kp, Np) bf16, zero-padded to 128 multiples."""
    kh, kw, cin, cout = w.shape
    wm = w.reshape(kh * kw * cin, cout)
    Kp, Np = _ru(wm.shape[0], LANE), _ru(cout, LANE)
    return jnp.pad(wm, ((0, Kp - wm.shape[0]),
                        (0, Np - cout))).astype(jnp.bfloat16)


def conv_bn(x, cin, w, bn, stride, pad, relu=True):
    rows, Ho, Wo = _conv_rows(x, cin, w.shape[0], stride, pad)
    wp = _prep_w(w)
    out = fused_conv(rows, wp, bn[0], bn[1], relu=relu)
    return out.reshape(x.shape[0], Ho, Wo, wp.shape[1])


def basic_block(x, cin, p, stride):
    """ResNet BasicBlock with all epilogues fused into the conv matmuls."""
    N = x.shape[0]
    cout = p["w1"].shape[-1]
    h = conv_bn(x, cin, p["w1"], p["bn1"], stride, 1, relu=True)
    rows2, Ho, Wo = _conv_rows(h, cout, 3, 1, 1)
    w2 = _prep_w(p["w2"])
    if "wd" in p:
        # 1x1 strided downsample fused into the same kernel / output tile.
        a_ds = x[:, ::stride, ::stride, :cin].reshape(N * Ho * Wo, cin)
        Kd = _ru(cin, LANE)
        a_ds = jnp.pad(a_ds, ((0, 0), (0, Kd - cin))).astype(jnp.bfloat16)
        wd = _prep_w(p["wd"])
        out = fused_conv(rows2, w2, p["bn2"][0], p["bn2"][1],
                         ds=(a_ds, wd, p["bnd"][0], p["bnd"][1]))
    else:
        # Identity skip: input already stored channel-padded to 128 lanes.
        res = x.reshape(N * x.shape[1] * x.shape[2], x.shape[3])
        out = fused_conv(rows2, w2, p["bn2"][0], p["bn2"][1], residual=res)
    return out.reshape(N, Ho, Wo, w2.shape[1])


def gap_fc_head(x, w_fc, b_fc):
    """x: (N, Ho, Wo, Cp) -> logits (N, num_classes). GAP + fc in one kernel."""
    N, H, W, Cp = x.shape
    HW = H * W
    nc = w_fc.shape[1]
    NCp = _ru(nc, LANE)
    Bp = _ru(N, 8)
    THW = min(512, _ru(HW, 8))
    HWp = _ru(HW, THW)

    xr = jnp.pad(x.reshape(N, HW, Cp), ((0, Bp - N), (0, HWp - HW), (0, 0)))
    wp = jnp.pad(w_fc, ((0, Cp - w_fc.shape[0]),
                        (0, NCp - nc))).astype(jnp.bfloat16)
    bp = _pad1(b_fc, NCp).reshape(1, NCp).astype(jnp.float32)

    out = pl.pallas_call(
        functools.partial(_head_kernel, inv_hw=1.0 / HW),
        out_shape=jax.ShapeDtypeStruct((Bp, NCp), jnp.float32),
        grid=(HWp // THW,),
        in_specs=[pl.BlockSpec((Bp, THW, Cp), lambda i: (0, i, 0)),
                  pl.BlockSpec((Cp, NCp), lambda i: (0, 0)),
                  pl.BlockSpec((1, NCp), lambda i: (0, 0))],
        out_specs=pl.BlockSpec((Bp, NCp), lambda i: (0, 0)),
        scratch_shapes=[pltpu.VMEM((Bp, Cp), jnp.float32)],
        compiler_params=pltpu.CompilerParams(
            dimension_semantics=("arbitrary",)),
    )(xr, wp, bp)
    return out[:N, :nc]


def forward(params, x_nchw):
    """Equivalent of SimpleResNetClassifier.forward: (B,3,H,W) -> (B,classes)."""
    x = jnp.transpose(x_nchw, (0, 2, 3, 1)).astype(jnp.float32)  # NCHW -> NHWC
    c1 = params["stem"]["w"].shape[-1]
    x = conv_bn(x, 3, params["stem"]["w"], params["stem"]["bn"], 1, 1,
                relu=True)
    x = basic_block(x, c1, params["block1"], stride=1)
    x = basic_block(x, c1, params["block2"], stride=2)
    return gap_fc_head(x, params["fc"]["w"], params["fc"]["b"])


# ---------------------------------------------------------------------------
# Deterministic parameter init (synthetic weights, not a checkpoint)
# ---------------------------------------------------------------------------
def _conv_w(key, kh, kw, cin, cout):
    fan_in = kh * kw * cin
    return (jax.random.normal(key, (kh, kw, cin, cout), jnp.float32)
            * (2.0 / fan_in) ** 0.5)


def _bn_init(key, c, eps=1e-5):
    k1, k2, k3, k4 = jax.random.split(key, 4)
    gamma = 1.0 + 0.1 * jax.random.normal(k1, (c,), jnp.float32)
    beta = 0.1 * jax.random.normal(k2, (c,), jnp.float32)
    mean = 0.1 * jax.random.normal(k3, (c,), jnp.float32)
    var = jnp.abs(jax.random.normal(k4, (c,), jnp.float32)) + 0.5
    scale = gamma * jax.lax.rsqrt(var + eps)
    shift = beta - mean * scale
    return (scale, shift)


def init_params(key, c1=32, c2=64, num_classes=8):
    ks = jax.random.split(key, 12)
    return {
        "stem": {"w": _conv_w(ks[0], 3, 3, 3, c1), "bn": _bn_init(ks[1], c1)},
        "block1": {
            "w1": _conv_w(ks[2], 3, 3, c1, c1), "bn1": _bn_init(ks[3], c1),
            "w2": _conv_w(ks[4], 3, 3, c1, c1), "bn2": _bn_init(ks[5], c1),
        },
        "block2": {
            "w1": _conv_w(ks[6], 3, 3, c1, c2), "bn1": _bn_init(ks[7], c2),
            "w2": _conv_w(ks[8], 3, 3, c2, c2), "bn2": _bn_init(ks[9], c2),
            "wd": _conv_w(ks[10], 1, 1, c1, c2), "bnd": _bn_init(ks[11], c2),
        },
        "fc": {
            "w": (jax.random.normal(jax.random.fold_in(key, 99),
                                    (c2, num_classes), jnp.float32)
                  * (1.0 / c2) ** 0.5),
            "b": jnp.zeros((num_classes,), jnp.float32),
        },
    }


if __name__ == "__main__":
    key = jax.random.PRNGKey(0)
    k_param, k_x = jax.random.split(key)
    params = init_params(k_param, c1=32, c2=64, num_classes=8)

    # Small input consistent with forward(): (batch, 3, H, W)
    x = jax.random.normal(k_x, (2, 3, 16, 16), jnp.float32)

    logits = jax.jit(forward)(params, x)
    logits = jax.block_until_ready(logits)
    assert logits.shape == (2, 8) and logits.dtype == jnp.float32
    assert bool(jnp.all(jnp.isfinite(logits)))
    print("KERNEL_OK")
</pallas_src>

<mosaic_0001>
module attributes {stable_mosaic.version = 11 : i64} {
  func.func @_conv_kernel(%arg0: i32, %arg1: memref<512x128xbf16, #tpu.memory_space<vmem>>, %arg2: memref<128x128xbf16, #tpu.memory_space<vmem>>, %arg3: memref<1x128xf32, #tpu.memory_space<vmem>>, %arg4: memref<1x128xf32, #tpu.memory_space<vmem>>, %arg5: memref<512x128xbf16, #tpu.memory_space<vmem>>) attributes {dimension_semantics = [#tpu.dimension_semantics<parallel>], iteration_bounds = array<i64: 1>, scalar_prefetch = 0 : i64, scratch_operands = 0 : i64, tpu.core_type = #tpu.core_type<tc>, window_params = [{transform_indices = @transform_0, window_bounds = array<i64: 512, 128>}, {pipeline_mode = #tpu.pipeline_mode<synchronous>, transform_indices = @transform_1, window_bounds = array<i64: 128, 128>}, {pipeline_mode = #tpu.pipeline_mode<synchronous>, transform_indices = @transform_2, window_bounds = array<i64: 1, 128>}, {pipeline_mode = #tpu.pipeline_mode<synchronous>, transform_indices = @transform_3, window_bounds = array<i64: 1, 128>}, {transform_indices = @transform_4, window_bounds = array<i64: 512, 128>}]} {
    %c0 = arith.constant 0 : index
    %c0_0 = arith.constant 0 : index
    %0 = vector.load %arg1[%c0, %c0_0] : memref<512x128xbf16, #tpu.memory_space<vmem>>, vector<512x128xbf16>
    %c0_1 = arith.constant 0 : index
    %c0_2 = arith.constant 0 : index
    %1 = vector.load %arg2[%c0_1, %c0_2] : memref<128x128xbf16, #tpu.memory_space<vmem>>, vector<128x128xbf16>
    %cst = arith.constant dense<0.000000e+00> : vector<512x128xf32>
    %2 = tpu.matmul %0, %1, %cst {dimension_numbers = #tpu.dot_dimension_numbers<[1], [0], [0], [1], [0, 0, 1, 1], [], []>} : vector<512x128xbf16>, vector<128x128xbf16>, vector<512x128xf32> -> vector<512x128xf32>
    %c0_3 = arith.constant 0 : index
    %c0_4 = arith.constant 0 : index
    %3 = vector.load %arg3[%c0_3, %c0_4] : memref<1x128xf32, #tpu.memory_space<vmem>>, vector<1x128xf32>
    %4 = vector.broadcast %3 : vector<1x128xf32> to vector<512x128xf32>
    %5 = arith.mulf %2, %4 : vector<512x128xf32>
    %c0_5 = arith.constant 0 : index
    %c0_6 = arith.constant 0 : index
    %6 = vector.load %arg4[%c0_5, %c0_6] : memref<1x128xf32, #tpu.memory_space<vmem>>, vector<1x128xf32>
    %7 = vector.broadcast %6 : vector<1x128xf32> to vector<512x128xf32>
    %8 = arith.addf %5, %7 : vector<512x128xf32>
    %cst_7 = arith.constant 0.000000e+00 : f32
    %9 = vector.broadcast %cst_7 : f32 to vector<512x128xf32>
    %10 = arith.maximumf %8, %9 : vector<512x128xf32>
    %11 = arith.truncf %10 : vector<512x128xf32> to vector<512x128xbf16>
    %c0_8 = arith.constant 0 : index
    %c0_9 = arith.constant 0 : index
    %12 = vector.load %arg5[%c0_8, %c0_9] : memref<512x128xbf16, #tpu.memory_space<vmem>>, vector<512x128xbf16>
    tpu.vector_store %arg5[%c0_8, %c0_9], %11 {strides = array<i32>} : memref<512x128xbf16, #tpu.memory_space<vmem>>, vector<512x128xbf16>,
    return
  }
  func.func @transform_0(%arg0: i32) -> (i32, i32) {
    %c0_i32 = arith.constant 0 : i32
    %c0_i32_0 = arith.constant 0 : i32
    return %arg0, %c0_i32 : i32, i32
  }
  func.func @transform_1(%arg0: i32) -> (i32, i32) {
    %c0_i32 = arith.constant 0 : i32
    %c0_i32_0 = arith.constant 0 : i32
    %c0_i32_1 = arith.constant 0 : i32
    return %c0_i32, %c0_i32_0 : i32, i32
  }
  func.func @transform_2(%arg0: i32) -> (i32, i32) {
    %c0_i32 = arith.constant 0 : i32
    %c0_i32_0 = arith.constant 0 : i32
    %c0_i32_1 = arith.constant 0 : i32
    return %c0_i32, %c0_i32_0 : i32, i32
  }
  func.func @transform_3(%arg0: i32) -> (i32, i32) {
    %c0_i32 = arith.constant 0 : i32
    %c0_i32_0 = arith.constant 0 : i32
    %c0_i32_1 = arith.constant 0 : i32
    return %c0_i32, %c0_i32_0 : i32, i32
  }
  func.func @transform_4(%arg0: i32) -> (i32, i32) {
    %c0_i32 = arith.constant 0 : i32
    %c0_i32_0 = arith.constant 0 : i32
    return %arg0, %c0_i32 : i32, i32
  }
}

module attributes {stable_mosaic.version = 11 : i64} {
  func.func @_conv_kernel(%arg0: i32, %arg1: memref<512x384xbf16, #tpu.memory_space<vmem>>, %arg2: memref<384x128xbf16, #tpu.memory_space<vmem>>, %arg3: memref<1x128xf32, #tpu.memory_space<vmem>>, %arg4: memref<1x128xf32, #tpu.memory_space<vmem>>, %arg5: memref<512x128xbf16, #tpu.memory_space<vmem>>) attributes {dimension_semantics = [#tpu.dimension_semantics<parallel>], iteration_bounds = array<i64: 1>, scalar_prefetch = 0 : i64, scratch_operands = 0 : i64, tpu.core_type = #tpu.core_type<tc>, window_params = [{transform_indices = @transform_0, window_bounds = array<i64: 512, 384>}, {pipeline_mode = #tpu.pipeline_mode<synchronous>, transform_indices = @transform_1, window_bounds = array<i64: 384, 128>}, {pipeline_mode = #tpu.pipeline_mode<synchronous>, transform_indices = @transform_2, window_bounds = array<i64: 1, 128>}, {pipeline_mode = #tpu.pipeline_mode<synchronous>, transform_indices = @transform_3, window_bounds = array<i64: 1, 128>}, {transform_indices = @transform_4, window_bounds = array<i64: 512, 128>}]} {
    %c0 = arith.constant 0 : index
    %c0_0 = arith.constant 0 : index
    %0 = vector.load %arg1[%c0, %c0_0] : memref<512x384xbf16, #tpu.memory_space<vmem>>, vector<512x384xbf16>
    %c0_1 = arith.constant 0 : index
    %c0_2 = arith.constant 0 : index
    %1 = vector.load %arg2[%c0_1, %c0_2] : memref<384x128xbf16, #tpu.memory_space<vmem>>, vector<384x128xbf16>
    %cst = arith.constant dense<0.000000e+00> : vector<512x128xf32>
    %2 = tpu.matmul %0, %1, %cst {dimension_numbers = #tpu.dot_dimension_numbers<[1], [0], [0], [1], [0, 0, 1, 1], [], []>} : vector<512x384xbf16>, vector<384x128xbf16>, vector<512x128xf32> -> vector<512x128xf32>
    %c0_3 = arith.constant 0 : index
    %c0_4 = arith.constant 0 : index
    %3 = vector.load %arg3[%c0_3, %c0_4] : memref<1x128xf32, #tpu.memory_space<vmem>>, vector<1x128xf32>
    %4 = vector.broadcast %3 : vector<1x128xf32> to vector<512x128xf32>
    %5 = arith.mulf %2, %4 : vector<512x128xf32>
    %c0_5 = arith.constant 0 : index
    %c0_6 = arith.constant 0 : index
    %6 = vector.load %arg4[%c0_5, %c0_6] : memref<1x128xf32, #tpu.memory_space<vmem>>, vector<1x128xf32>
    %7 = vector.broadcast %6 : vector<1x128xf32> to vector<512x128xf32>
    %8 = arith.addf %5, %7 : vector<512x128xf32>
    %cst_7 = arith.constant 0.000000e+00 : f32
    %9 = vector.broadcast %cst_7 : f32 to vector<512x128xf32>
    %10 = arith.maximumf %8, %9 : vector<512x128xf32>
    %11 = arith.truncf %10 : vector<512x128xf32> to vector<512x128xbf16>
    %c0_8 = arith.constant 0 : index
    %c0_9 = arith.constant 0 : index
    %12 = vector.load %arg5[%c0_8, %c0_9] : memref<512x128xbf16, #tpu.memory_space<vmem>>, vector<512x128xbf16>
    tpu.vector_store %arg5[%c0_8, %c0_9], %11 {strides = array<i32>} : memref<512x128xbf16, #tpu.memory_space<vmem>>, vector<512x128xbf16>,
    return
  }
  func.func @transform_0(%arg0: i32) -> (i32, i32) {
    %c0_i32 = arith.constant 0 : i32
    %c0_i32_0 = arith.constant 0 : i32
    return %arg0, %c0_i32 : i32, i32
  }
  func.func @transform_1(%arg0: i32) -> (i32, i32) {
    %c0_i32 = arith.constant 0 : i32
    %c0_i32_0 = arith.constant 0 : i32
    %c0_i32_1 = arith.constant 0 : i32
    return %c0_i32, %c0_i32_0 : i32, i32
  }
  func.func @transform_2(%arg0: i32) -> (i32, i32) {
    %c0_i32 = arith.constant 0 : i32
    %c0_i32_0 = arith.constant 0 : i32
    %c0_i32_1 = arith.constant 0 : i32
    return %c0_i32, %c0_i32_0 : i32, i32
  }
  func.func @transform_3(%arg0: i32) -> (i32, i32) {
    %c0_i32 = arith.constant 0 : i32
    %c0_i32_0 = arith.constant 0 : i32
    %c0_i32_1 = arith.constant 0 : i32
    return %c0_i32, %c0_i32_0 : i32, i32
  }
  func.func @transform_4(%arg0: i32) -> (i32, i32) {
    %c0_i32 = arith.constant 0 : i32
    %c0_i32_0 = arith.constant 0 : i32
    return %arg0, %c0_i32 : i32, i32
  }
}

module attributes {stable_mosaic.version = 11 : i64} {
  func.func @_conv_res_kernel(%arg0: i32, %arg1: memref<512x384xbf16, #tpu.memory_space<vmem>>, %arg2: memref<384x128xbf16, #tpu.memory_space<vmem>>, %arg3: memref<1x128xf32, #tpu.memory_space<vmem>>, %arg4: memref<1x128xf32, #tpu.memory_space<vmem>>, %arg5: memref<512x128xbf16, #tpu.memory_space<vmem>>, %arg6: memref<512x128xbf16, #tpu.memory_space<vmem>>) attributes {dimension_semantics = [#tpu.dimension_semantics<parallel>], iteration_bounds = array<i64: 1>, scalar_prefetch = 0 : i64, scratch_operands = 0 : i64, tpu.core_type = #tpu.core_type<tc>, window_params = [{transform_indices = @transform_0, window_bounds = array<i64: 512, 384>}, {pipeline_mode = #tpu.pipeline_mode<synchronous>, transform_indices = @transform_1, window_bounds = array<i64: 384, 128>}, {pipeline_mode = #tpu.pipeline_mode<synchronous>, transform_indices = @transform_2, window_bounds = array<i64: 1, 128>}, {pipeline_mode = #tpu.pipeline_mode<synchronous>, transform_indices = @transform_3, window_bounds = array<i64: 1, 128>}, {transform_indices = @transform_4, window_bounds = array<i64: 512, 128>}, {transform_indices = @transform_5, window_bounds = array<i64: 512, 128>}]} {
    %c0 = arith.constant 0 : index
    %c0_0 = arith.constant 0 : index
    %0 = vector.load %arg1[%c0, %c0_0] : memref<512x384xbf16, #tpu.memory_space<vmem>>, vector<512x384xbf16>
    %c0_1 = arith.constant 0 : index
    %c0_2 = arith.constant 0 : index
    %1 = vector.load %arg2[%c0_1, %c0_2] : memref<384x128xbf16, #tpu.memory_space<vmem>>, vector<384x128xbf16>
    %cst = arith.constant dense<0.000000e+00> : vector<512x128xf32>
    %2 = tpu.matmul %0, %1, %cst {dimension_numbers = #tpu.dot_dimension_numbers<[1], [0], [0], [1], [0, 0, 1, 1], [], []>} : vector<512x384xbf16>, vector<384x128xbf16>, vector<512x128xf32> -> vector<512x128xf32>
    %c0_3 = arith.constant 0 : index
    %c0_4 = arith.constant 0 : index
    %3 = vector.load %arg3[%c0_3, %c0_4] : memref<1x128xf32, #tpu.memory_space<vmem>>, vector<1x128xf32>
    %4 = vector.broadcast %3 : vector<1x128xf32> to vector<512x128xf32>
    %5 = arith.mulf %2, %4 : vector<512x128xf32>
    %c0_5 = arith.constant 0 : index
    %c0_6 = arith.constant 0 : index
    %6 = vector.load %arg4[%c0_5, %c0_6] : memref<1x128xf32, #tpu.memory_space<vmem>>, vector<1x128xf32>
    %7 = vector.broadcast %6 : vector<1x128xf32> to vector<512x128xf32>
    %8 = arith.addf %5, %7 : vector<512x128xf32>
    %c0_7 = arith.constant 0 : index
    %c0_8 = arith.constant 0 : index
    %9 = vector.load %arg5[%c0_7, %c0_8] : memref<512x128xbf16, #tpu.memory_space<vmem>>, vector<512x128xbf16>
    %10 = arith.extf %9 : vector<512x128xbf16> to vector<512x128xf32>
    %11 = arith.addf %8, %10 : vector<512x128xf32>
    %cst_9 = arith.constant 0.000000e+00 : f32
    %12 = vector.broadcast %cst_9 : f32 to vector<512x128xf32>
    %13 = arith.maximumf %11, %12 : vector<512x128xf32>
    %14 = arith.truncf %13 : vector<512x128xf32> to vector<512x128xbf16>
    %c0_10 = arith.constant 0 : index
    %c0_11 = arith.constant 0 : index
    %15 = vector.load %arg6[%c0_10, %c0_11] : memref<512x128xbf16, #tpu.memory_space<vmem>>, vector<512x128xbf16>
    tpu.vector_store %arg6[%c0_10, %c0_11], %14 {strides = array<i32>} : memref<512x128xbf16, #tpu.memory_space<vmem>>, vector<512x128xbf16>,
    return
  }
  func.func @transform_0(%arg0: i32) -> (i32, i32) {
    %c0_i32 = arith.constant 0 : i32
    %c0_i32_0 = arith.constant 0 : i32
    return %arg0, %c0_i32 : i32, i32
  }
  func.func @transform_1(%arg0: i32) -> (i32, i32) {
    %c0_i32 = arith.constant 0 : i32
    %c0_i32_0 = arith.constant 0 : i32
    %c0_i32_1 = arith.constant 0 : i32
    return %c0_i32, %c0_i32_0 : i32, i32
  }
  func.func @transform_2(%arg0: i32) -> (i32, i32) {
    %c0_i32 = arith.constant 0 : i32
    %c0_i32_0 = arith.constant 0 : i32
    %c0_i32_1 = arith.constant 0 : i32
    return %c0_i32, %c0_i32_0 : i32, i32
  }
  func.func @transform_3(%arg0: i32) -> (i32, i32) {
    %c0_i32 = arith.constant 0 : i32
    %c0_i32_0 = arith.constant 0 : i32
    %c0_i32_1 = arith.constant 0 : i32
    return %c0_i32, %c0_i32_0 : i32, i32
  }
  func.func @transform_4(%arg0: i32) -> (i32, i32) {
    %c0_i32 = arith.constant 0 : i32
    %c0_i32_0 = arith.constant 0 : i32
    return %arg0, %c0_i32 : i32, i32
  }
  func.func @transform_5(%arg0: i32) -> (i32, i32) {
    %c0_i32 = arith.constant 0 : i32
    %c0_i32_0 = arith.constant 0 : i32
    return %arg0, %c0_i32 : i32, i32
  }
}

module attributes {stable_mosaic.version = 11 : i64} {
  func.func @_conv_kernel(%arg0: i32, %arg1: memref<128x384xbf16, #tpu.memory_space<vmem>>, %arg2: memref<384x128xbf16, #tpu.memory_space<vmem>>, %arg3: memref<1x128xf32, #tpu.memory_space<vmem>>, %arg4: memref<1x128xf32, #tpu.memory_space<vmem>>, %arg5: memref<128x128xbf16, #tpu.memory_space<vmem>>) attributes {dimension_semantics = [#tpu.dimension_semantics<parallel>], iteration_bounds = array<i64: 1>, scalar_prefetch = 0 : i64, scratch_operands = 0 : i64, tpu.core_type = #tpu.core_type<tc>, window_params = [{transform_indices = @transform_0, window_bounds = array<i64: 128, 384>}, {pipeline_mode = #tpu.pipeline_mode<synchronous>, transform_indices = @transform_1, window_bounds = array<i64: 384, 128>}, {pipeline_mode = #tpu.pipeline_mode<synchronous>, transform_indices = @transform_2, window_bounds = array<i64: 1, 128>}, {pipeline_mode = #tpu.pipeline_mode<synchronous>, transform_indices = @transform_3, window_bounds = array<i64: 1, 128>}, {transform_indices = @transform_4, window_bounds = array<i64: 128, 128>}]} {
    %c0 = arith.constant 0 : index
    %c0_0 = arith.constant 0 : index
    %0 = vector.load %arg1[%c0, %c0_0] : memref<128x384xbf16, #tpu.memory_space<vmem>>, vector<128x384xbf16>
    %c0_1 = arith.constant 0 : index
    %c0_2 = arith.constant 0 : index
    %1 = vector.load %arg2[%c0_1, %c0_2] : memref<384x128xbf16, #tpu.memory_space<vmem>>, vector<384x128xbf16>
    %cst = arith.constant dense<0.000000e+00> : vector<128x128xf32>
    %2 = tpu.matmul %0, %1, %cst {dimension_numbers = #tpu.dot_dimension_numbers<[1], [0], [0], [1], [0, 0, 1, 1], [], []>} : vector<128x384xbf16>, vector<384x128xbf16>, vector<128x128xf32> -> vector<128x128xf32>
    %c0_3 = arith.constant 0 : index
    %c0_4 = arith.constant 0 : index
    %3 = vector.load %arg3[%c0_3, %c0_4] : memref<1x128xf32, #tpu.memory_space<vmem>>, vector<1x128xf32>
    %4 = vector.broadcast %3 : vector<1x128xf32> to vector<128x128xf32>
    %5 = arith.mulf %2, %4 : vector<128x128xf32>
    %c0_5 = arith.constant 0 : index
    %c0_6 = arith.constant 0 : index
    %6 = vector.load %arg4[%c0_5, %c0_6] : memref<1x128xf32, #tpu.memory_space<vmem>>, vector<1x128xf32>
    %7 = vector.broadcast %6 : vector<1x128xf32> to vector<128x128xf32>
    %8 = arith.addf %5, %7 : vector<128x128xf32>
    %cst_7 = arith.constant 0.000000e+00 : f32
    %9 = vector.broadcast %cst_7 : f32 to vector<128x128xf32>
    %10 = arith.maximumf %8, %9 : vector<128x128xf32>
    %11 = arith.truncf %10 : vector<128x128xf32> to vector<128x128xbf16>
    %c0_8 = arith.constant 0 : index
    %c0_9 = arith.constant 0 : index
    %12 = vector.load %arg5[%c0_8, %c0_9] : memref<128x128xbf16, #tpu.memory_space<vmem>>, vector<128x128xbf16>
    tpu.vector_store %arg5[%c0_8, %c0_9], %11 {strides = array<i32>} : memref<128x128xbf16, #tpu.memory_space<vmem>>, vector<128x128xbf16>,
    return
  }
  func.func @transform_0(%arg0: i32) -> (i32, i32) {
    %c0_i32 = arith.constant 0 : i32
    %c0_i32_0 = arith.constant 0 : i32
    return %arg0, %c0_i32 : i32, i32
  }
  func.func @transform_1(%arg0: i32) -> (i32, i32) {
    %c0_i32 = arith.constant 0 : i32
    %c0_i32_0 = arith.constant 0 : i32
    %c0_i32_1 = arith.constant 0 : i32
    return %c0_i32, %c0_i32_0 : i32, i32
  }
  func.func @transform_2(%arg0: i32) -> (i32, i32) {
    %c0_i32 = arith.constant 0 : i32
    %c0_i32_0 = arith.constant 0 : i32
    %c0_i32_1 = arith.constant 0 : i32
    return %c0_i32, %c0_i32_0 : i32, i32
  }
  func.func @transform_3(%arg0: i32) -> (i32, i32) {
    %c0_i32 = arith.constant 0 : i32
    %c0_i32_0 = arith.constant 0 : i32
    %c0_i32_1 = arith.constant 0 : i32
    return %c0_i32, %c0_i32_0 : i32, i32
  }
  func.func @transform_4(%arg0: i32) -> (i32, i32) {
    %c0_i32 = arith.constant 0 : i32
    %c0_i32_0 = arith.constant 0 : i32
    return %arg0, %c0_i32 : i32, i32
  }
}

module attributes {stable_mosaic.version = 11 : i64} {
  func.func @_conv_dual_kernel(%arg0: i32, %arg1: memref<128x640xbf16, #tpu.memory_space<vmem>>, %arg2: memref<640x128xbf16, #tpu.memory_space<vmem>>, %arg3: memref<1x128xf32, #tpu.memory_space<vmem>>, %arg4: memref<1x128xf32, #tpu.memory_space<vmem>>, %arg5: memref<128x128xbf16, #tpu.memory_space<vmem>>, %arg6: memref<128x128xbf16, #tpu.memory_space<vmem>>, %arg7: memref<1x128xf32, #tpu.memory_space<vmem>>, %arg8: memref<1x128xf32, #tpu.memory_space<vmem>>, %arg9: memref<128x128xbf16, #tpu.memory_space<vmem>>) attributes {dimension_semantics = [#tpu.dimension_semantics<parallel>], iteration_bounds = array<i64: 1>, scalar_prefetch = 0 : i64, scratch_operands = 0 : i64, tpu.core_type = #tpu.core_type<tc>, window_params = [{transform_indices = @transform_0, window_bounds = array<i64: 128, 640>}, {pipeline_mode = #tpu.pipeline_mode<synchronous>, transform_indices = @transform_1, window_bounds = array<i64: 640, 128>}, {pipeline_mode = #tpu.pipeline_mode<synchronous>, transform_indices = @transform_2, window_bounds = array<i64: 1, 128>}, {pipeline_mode = #tpu.pipeline_mode<synchronous>, transform_indices = @transform_3, window_bounds = array<i64: 1, 128>}, {transform_indices = @transform_4, window_bounds = array<i64: 128, 128>}, {pipeline_mode = #tpu.pipeline_mode<synchronous>, transform_indices = @transform_5, window_bounds = array<i64: 128, 128>}, {pipeline_mode = #tpu.pipeline_mode<synchronous>, transform_indices = @transform_6, window_bounds = array<i64: 1, 128>}, {pipeline_mode = #tpu.pipeline_mode<synchronous>, transform_indices = @transform_7, window_bounds = array<i64: 1, 128>}, {transform_indices = @transform_8, window_bounds = array<i64: 128, 128>}]} {
    %c0 = arith.constant 0 : index
    %c0_0 = arith.constant 0 : index
    %0 = vector.load %arg1[%c0, %c0_0] : memref<128x640xbf16, #tpu.memory_space<vmem>>, vector<128x640xbf16>
    %c0_1 = arith.constant 0 : index
    %c0_2 = arith.constant 0 : index
    %1 = vector.load %arg2[%c0_1, %c0_2] : memref<640x128xbf16, #tpu.memory_space<vmem>>, vector<640x128xbf16>
    %cst = arith.constant dense<0.000000e+00> : vector<128x128xf32>
    %2 = tpu.matmul %0, %1, %cst {dimension_numbers = #tpu.dot_dimension_numbers<[1], [0], [0], [1], [0, 0, 1, 1], [], []>} : vector<128x640xbf16>, vector<640x128xbf16>, vector<128x128xf32> -> vector<128x128xf32>
    %c0_3 = arith.constant 0 : index
    %c0_4 = arith.constant 0 : index
    %3 = vector.load %arg3[%c0_3, %c0_4] : memref<1x128xf32, #tpu.memory_space<vmem>>, vector<1x128xf32>
    %4 = vector.broadcast %3 : vector<1x128xf32> to vector<128x128xf32>
    %5 = arith.mulf %2, %4 : vector<128x128xf32>
    %c0_5 = arith.constant 0 : index
    %c0_6 = arith.constant 0 : index
    %6 = vector.load %arg4[%c0_5, %c0_6] : memref<1x128xf32, #tpu.memory_space<vmem>>, vector<1x128xf32>
    %7 = vector.broadcast %6 : vector<1x128xf32> to vector<128x128xf32>
    %8 = arith.addf %5, %7 : vector<128x128xf32>
    %c0_7 = arith.constant 0 : index
    %c0_8 = arith.constant 0 : index
    %9 = vector.load %arg5[%c0_7, %c0_8] : memref<128x128xbf16, #tpu.memory_space<vmem>>, vector<128x128xbf16>
    %c0_9 = arith.constant 0 : index
    %c0_10 = arith.constant 0 : index
    %10 = vector.load %arg6[%c0_9, %c0_10] : memref<128x128xbf16, #tpu.memory_space<vmem>>, vector<128x128xbf16>
    %cst_11 = arith.constant dense<0.000000e+00> : vector<128x128xf32>
    %11 = tpu.matmul %9, %10, %cst_11 {dimension_numbers = #tpu.dot_dimension_numbers<[1], [0], [0], [1], [0, 0, 1, 1], [], []>} : vector<128x128xbf16>, vector<128x128xbf16>, vector<128x128xf32> -> vector<128x128xf32>
    %c0_12 = arith.constant 0 : index
    %c0_13 = arith.constant 0 : index
    %12 = vector.load %arg7[%c0_12, %c0_13] : memref<1x128xf32, #tpu.memory_space<vmem>>, vector<1x128xf32>
    %13 = vector.broadcast %12 : vector<1x128xf32> to vector<128x128xf32>
    %14 = arith.mulf %11, %13 : vector<128x128xf32>
    %15 = arith.addf %8, %14 : vector<128x128xf32>
    %c0_14 = arith.constant 0 : index
    %c0_15 = arith.constant 0 : index
    %16 = vector.load %arg8[%c0_14, %c0_15] : memref<1x128xf32, #tpu.memory_space<vmem>>, vector<1x128xf32>
    %17 = vector.broadcast %16 : vector<1x128xf32> to vector<128x128xf32>
    %18 = arith.addf %15, %17 : vector<128x128xf32>
    %cst_16 = arith.constant 0.000000e+00 : f32
    %19 = vector.broadcast %cst_16 : f32 to vector<128x128xf32>
    %20 = arith.maximumf %18, %19 : vector<128x128xf32>
    %21 = arith.truncf %20 : vector<128x128xf32> to vector<128x128xbf16>
    %c0_17 = arith.constant 0 : index
    %c0_18 = arith.constant 0 : index
    %22 = vector.load %arg9[%c0_17, %c0_18] : memref<128x128xbf16, #tpu.memory_space<vmem>>, vector<128x128xbf16>
    tpu.vector_store %arg9[%c0_17, %c0_18], %21 {strides = array<i32>} : memref<128x128xbf16, #tpu.memory_space<vmem>>, vector<128x128xbf16>,
    return
  }
  func.func @transform_0(%arg0: i32) -> (i32, i32) {
    %c0_i32 = arith.constant 0 : i32
    %c0_i32_0 = arith.constant 0 : i32
    return %arg0, %c0_i32 : i32, i32
  }
  func.func @transform_1(%arg0: i32) -> (i32, i32) {
    %c0_i32 = arith.constant 0 : i32
    %c0_i32_0 = arith.constant 0 : i32
    %c0_i32_1 = arith.constant 0 : i32
    return %c0_i32, %c0_i32_0 : i32, i32
  }
  func.func @transform_2(%arg0: i32) -> (i32, i32) {
    %c0_i32 = arith.constant 0 : i32
    %c0_i32_0 = arith.constant 0 : i32
    %c0_i32_1 = arith.constant 0 : i32
    return %c0_i32, %c0_i32_0 : i32, i32
  }
  func.func @transform_3(%arg0: i32) -> (i32, i32) {
    %c0_i32 = arith.constant 0 : i32
    %c0_i32_0 = arith.constant 0 : i32
    %c0_i32_1 = arith.constant 0 : i32
    return %c0_i32, %c0_i32_0 : i32, i32
  }
  func.func @transform_4(%arg0: i32) -> (i32, i32) {
    %c0_i32 = arith.constant 0 : i32
    %c0_i32_0 = arith.constant 0 : i32
    return %arg0, %c0_i32 : i32, i32
  }
  func.func @transform_5(%arg0: i32) -> (i32, i32) {
    %c0_i32 = arith.constant 0 : i32
    %c0_i32_0 = arith.constant 0 : i32
    %c0_i32_1 = arith.constant 0 : i32
    return %c0_i32, %c0_i32_0 : i32, i32
  }
  func.func @transform_6(%arg0: i32) -> (i32, i32) {
    %c0_i32 = arith.constant 0 : i32
    %c0_i32_0 = arith.constant 0 : i32
    %c0_i32_1 = arith.constant 0 : i32
    return %c0_i32, %c0_i32_0 : i32, i32
  }
  func.func @transform_7(%arg0: i32) -> (i32, i32) {
    %c0_i32 = arith.constant 0 : i32
    %c0_i32_0 = arith.constant 0 : i32
    %c0_i32_1 = arith.constant 0 : i32
    return %c0_i32, %c0_i32_0 : i32, i32
  }
  func.func @transform_8(%arg0: i32) -> (i32, i32) {
    %c0_i32 = arith.constant 0 : i32
    %c0_i32_0 = arith.constant 0 : i32
    return %arg0, %c0_i32 : i32, i32
  }
}

module attributes {stable_mosaic.version = 11 : i64} {
  func.func @_head_kernel(%arg0: i32, %arg1: memref<8x64x128xbf16, #tpu.memory_space<vmem>>, %arg2: memref<128x128xbf16, #tpu.memory_space<vmem>>, %arg3: memref<1x128xf32, #tpu.memory_space<vmem>>, %arg4: memref<8x128xf32, #tpu.memory_space<vmem>>, %arg5: memref<8x128xf32, #tpu.memory_space<vmem>>) attributes {dimension_semantics = [#tpu.dimension_semantics<arbitrary>], iteration_bounds = array<i64: 1>, scalar_prefetch = 0 : i64, scratch_operands = 1 : i64, tpu.core_type = #tpu.core_type<tc>, window_params = [{transform_indices = @transform_0, window_bounds = array<i64: 8, 64, 128>}, {pipeline_mode = #tpu.pipeline_mode<synchronous>, transform_indices = @transform_1, window_bounds = array<i64: 128, 128>}, {pipeline_mode = #tpu.pipeline_mode<synchronous>, transform_indices = @transform_2, window_bounds = array<i64: 1, 128>}, {pipeline_mode = #tpu.pipeline_mode<synchronous>, transform_indices = @transform_3, window_bounds = array<i64: 8, 128>}]} {
    %c0_i32 = arith.constant 0 : i32
    %0 = arith.cmpi eq, %arg0, %c0_i32 : i32
    %1 = arith.extui %0 : i1 to i32
    %c0_i32_0 = arith.constant 0 : i32
    %2 = arith.cmpi ne, %1, %c0_i32_0 : i32
    scf.if %2 {
      %cst_9 = arith.constant 0.000000e+00 : f32
      %12 = vector.broadcast %cst_9 : f32 to vector<8x128xf32>
      %c0_10 = arith.constant 0 : index
      %c0_11 = arith.constant 0 : index
      %13 = vector.load %arg5[%c0_10, %c0_11] : memref<8x128xf32, #tpu.memory_space<vmem>>, vector<8x128xf32>
      tpu.vector_store %arg5[%c0_10, %c0_11], %12 {strides = array<i32>} : memref<8x128xf32, #tpu.memory_space<vmem>>, vector<8x128xf32>,
    } else {
    }
    %c0 = arith.constant 0 : index
    %c0_1 = arith.constant 0 : index
    %3 = vector.load %arg5[%c0, %c0_1] : memref<8x128xf32, #tpu.memory_space<vmem>>, vector<8x128xf32>
    %c0_2 = arith.constant 0 : index
    %c0_3 = arith.constant 0 : index
    %c0_4 = arith.constant 0 : index
    %4 = vector.load %arg1[%c0_2, %c0_3, %c0_4] : memref<8x64x128xbf16, #tpu.memory_space<vmem>>, vector<8x64x128xbf16>
    %5 = arith.extf %4 : vector<8x64x128xbf16> to vector<8x64x128xf32>
    %cst = arith.constant dense<0.000000e+00> : vector<8x128xf32>
    %6 = vector.multi_reduction <add>, %5, %cst [1] : vector<8x64x128xf32> to vector<8x128xf32>
    %7 = arith.addf %3, %6 : vector<8x128xf32>
    %c0_5 = arith.constant 0 : index
    %c0_6 = arith.constant 0 : index
    %8 = vector.load %arg5[%c0_5, %c0_6] : memref<8x128xf32, #tpu.memory_space<vmem>>, vector<8x128xf32>
    tpu.vector_store %arg5[%c0_5, %c0_6], %7 {strides = array<i32>} : memref<8x128xf32, #tpu.memory_space<vmem>>, vector<8x128xf32>,
    %c0_i32_7 = arith.constant 0 : i32
    %9 = arith.cmpi eq, %arg0, %c0_i32_7 : i32
    %10 = arith.extui %9 : i1 to i32
    %c0_i32_8 = arith.constant 0 : i32
    %11 = arith.cmpi ne, %10, %c0_i32_8 : i32
    scf.if %11 {
      %c0_9 = arith.constant 0 : index
      %c0_10 = arith.constant 0 : index
      %12 = vector.load %arg5[%c0_9, %c0_10] : memref<8x128xf32, #tpu.memory_space<vmem>>, vector<8x128xf32>
      %cst_11 = arith.constant 1.562500e-02 : f32
      %13 = vector.broadcast %cst_11 : f32 to vector<8x128xf32>
      %14 = arith.mulf %12, %13 : vector<8x128xf32>
      %15 = arith.truncf %14 : vector<8x128xf32> to vector<8x128xbf16>
      %c0_12 = arith.constant 0 : index
      %c0_13 = arith.constant 0 : index
      %16 = vector.load %arg2[%c0_12, %c0_13] : memref<128x128xbf16, #tpu.memory_space<vmem>>, vector<128x128xbf16>
      %cst_14 = arith.constant dense<0.000000e+00> : vector<8x128xf32>
      %17 = tpu.matmul %15, %16, %cst_14 {dimension_numbers = #tpu.dot_dimension_numbers<[1], [0], [0], [1], [0, 0, 1, 1], [], []>} : vector<8x128xbf16>, vector<128x128xbf16>, vector<8x128xf32> -> vector<8x128xf32>
      %c0_15 = arith.constant 0 : index
      %c0_16 = arith.constant 0 : index
      %18 = vector.load %arg3[%c0_15, %c0_16] : memref<1x128xf32, #tpu.memory_space<vmem>>, vector<1x128xf32>
      %19 = vector.broadcast %18 : vector<1x128xf32> to vector<8x128xf32>
      %20 = arith.addf %17, %19 : vector<8x128xf32>
      %c0_17 = arith.constant 0 : index
      %c0_18 = arith.constant 0 : index
      %21 = vector.load %arg4[%c0_17, %c0_18] : memref<8x128xf32, #tpu.memory_space<vmem>>, vector<8x128xf32>
      tpu.vector_store %arg4[%c0_17, %c0_18], %20 {strides = array<i32>} : memref<8x128xf32, #tpu.memory_space<vmem>>, vector<8x128xf32>,
    } else {
    }
    return
  }
  func.func @transform_0(%arg0: i32) -> (i32, i32, i32) {
    %c0_i32 = arith.constant 0 : i32
    %c0_i32_0 = arith.constant 0 : i32
    %c0_i32_1 = arith.constant 0 : i32
    return %c0_i32, %arg0, %c0_i32_0 : i32, i32, i32
  }
  func.func @transform_1(%arg0: i32) -> (i32, i32) {
    %c0_i32 = arith.constant 0 : i32
    %c0_i32_0 = arith.constant 0 : i32
    %c0_i32_1 = arith.constant 0 : i32
    return %c0_i32, %c0_i32_0 : i32, i32
  }
  func.func @transform_2(%arg0: i32) -> (i32, i32) {
    %c0_i32 = arith.constant 0 : i32
    %c0_i32_0 = arith.constant 0 : i32
    %c0_i32_1 = arith.constant 0 : i32
    return %c0_i32, %c0_i32_0 : i32, i32
  }
  func.func @transform_3(%arg0: i32) -> (i32, i32) {
    %c0_i32 = arith.constant 0 : i32
    %c0_i32_0 = arith.constant 0 : i32
    %c0_i32_1 = arith.constant 0 : i32
    return %c0_i32, %c0_i32_0 : i32, i32
  }
}

</mosaic_0001>

<bundles_post_ra>
// kernel: forward.6
= control target key start
LH: loop header
LB: loop body
LE: loop exit
PB: predicated region body
PF: predicated region fallthrough
CT: control target
= control target key end

     0   :  { %s1634_s1 = inlined_call_operand.vmem [shape: bf16[128,128], index: 1, kind: input, shape index: {}]   ;;  %s1635_s2 = inlined_call_operand.vmem [shape: f32[1,128], index: 2, kind: input, shape index: {}]   ;;  %s1636_s3 = inlined_call_operand.vmem [shape: f32[1,128], index: 3, kind: input, shape index: {}]   ;;  %s1637_s0 = inlined_call_operand.vmem [shape: bf16[512,128], index: 0, kind: input, shape index: {}]   ;;  %s1638_s4 = inlined_call_operand.vmem [shape: bf16[512,128], index: 4, kind: output, shape index: {}]  }
   0x1   :  { %v1037_v0 = vld [vmem:[%s1634_s1 + $0x38] sm:$0xff]  ;;  %v1036_v1 = vld [vmem:[%s1634_s1 + $0x30] sm:$0xff]  ;;  %v1035_v2 = vld [vmem:[%s1634_s1 + $0x28] sm:$0xff] }
   0x2   :  { %337 = vmatpush.bf16.msra.mxu0 %v1037_v0  ;;  %1229 = vmatpush.bf16.msra.mxu1 %v1037_v0  ;;  %v1034_v3 = vld [vmem:[%s1634_s1 + $0x20] sm:$0xff]  ;;  %v1033_v4 = vld [vmem:[%s1634_s1 + $0x18] sm:$0xff]  ;;  %v1032_v5 = vld [vmem:[%s1634_s1 + $0x10] sm:$0xff] }
   0x3   :  { %1230 = vmatpush.bf16.msra.mxu2 %v1037_v0  ;;  %1231 = vmatpush.bf16.msra.mxu3 %v1037_v0  ;;  %v1031_v6 = vld [vmem:[%s1634_s1 + $0x8] sm:$0xff]  ;;  %v1030_v7 = vld [vmem:[%s1634_s1] sm:$0xff]  ;;  %v1000_v16 = vld [vmem:[%s1637_s0 + $0x10] sm:$0xff] }
   0x4   :  { %v998_v8 = vld [vmem:[%s1637_s0] sm:$0xff]  ;;  %v999_v12 = vld [vmem:[%s1637_s0 + $0x8] sm:$0xff]  ;;  %v1008_v17 = vld [vmem:[%s1637_s0 + $0x50] sm:$0xff] }
   0x5   :  { %v1006_v9 = vld [vmem:[%s1637_s0 + $0x40] sm:$0xff]  ;;  %v1007_v13 = vld [vmem:[%s1637_s0 + $0x48] sm:$0xff]  ;;  %v1016_v18 = vld [vmem:[%s1637_s0 + $0x90] sm:$0xff] }
   0x6   :  { %338 = vmatpush.bf16.msra.mxu0 %v1036_v1  ;;  %1232 = vmatpush.bf16.msra.mxu1 %v1036_v1  ;;  %v1014_v10 = vld [vmem:[%s1637_s0 + $0x80] sm:$0xff]  ;;  %v1015_v14 = vld [vmem:[%s1637_s0 + $0x88] sm:$0xff]  ;;  %v1024_v19 = vld [vmem:[%s1637_s0 + $0xd0] sm:$0xff] }
   0x7   :  { %1233 = vmatpush.bf16.msra.mxu2 %v1036_v1  ;;  %1234 = vmatpush.bf16.msra.mxu3 %v1036_v1  ;;  %v1022_v11 = vld [vmem:[%s1637_s0 + $0xc0] sm:$0xff]  ;;  %v1023_v15 = vld [vmem:[%s1637_s0 + $0xc8] sm:$0xff]  ;;  %v1001_v20 = vld [vmem:[%s1637_s0 + $0x18] sm:$0xff] }
   0x8   :  { %v1009_v21 = vld [vmem:[%s1637_s0 + $0x58] sm:$0xff]  ;;  %v1002_v24 = vld [vmem:[%s1637_s0 + $0x20] sm:$0xff]  ;;  %v1003_v28 = vld [vmem:[%s1637_s0 + $0x28] sm:$0xff] }
   0x9   :  { %v1017_v22 = vld [vmem:[%s1637_s0 + $0x98] sm:$0xff]  ;;  %v1010_v25 = vld [vmem:[%s1637_s0 + $0x60] sm:$0xff]  ;;  %v1011_v29 = vld [vmem:[%s1637_s0 + $0x68] sm:$0xff] }
   0xa   :  { %339 = vmatpush.bf16.msra.mxu0 %v1035_v2  ;;  %1235 = vmatpush.bf16.msra.mxu1 %v1035_v2  ;;  %v1025_v23 = vld [vmem:[%s1637_s0 + $0xd8] sm:$0xff]  ;;  %v1018_v26 = vld [vmem:[%s1637_s0 + $0xa0] sm:$0xff]  ;;  %v1019_v30 = vld [vmem:[%s1637_s0 + $0xa8] sm:$0xff] }
   0xb   :  { %1236 = vmatpush.bf16.msra.mxu2 %v1035_v2  ;;  %1237 = vmatpush.bf16.msra.mxu3 %v1035_v2  ;;  %v1026_v27 = vld [vmem:[%s1637_s0 + $0xe0] sm:$0xff]  ;;  %v1027_v31 = vld [vmem:[%s1637_s0 + $0xe8] sm:$0xff]  ;;  %v1004_v32 = vld [vmem:[%s1637_s0 + $0x30] sm:$0xff] }
   0xc   :  { %v1012_v33 = vld [vmem:[%s1637_s0 + $0x70] sm:$0xff]  ;;  %v1005_v36 = vld [vmem:[%s1637_s0 + $0x38] sm:$0xff]  ;;  %v1403_v42 = vld [vmem:[%s1635_s2] ss:$0 sm:$0xff] }
   0xd   :  { %v1020_v34 = vld [vmem:[%s1637_s0 + $0xb0] sm:$0xff]  ;;  %v1013_v37 = vld [vmem:[%s1637_s0 + $0x78] sm:$0xff]  ;;  %v1409_v44 = vld [vmem:[%s1636_s3] ss:$0 sm:$0xff] }
   0xe   :  { %340 = vmatpush.bf16.msra.mxu0 %v1034_v3  ;;  %1238 = vmatpush.bf16.msra.mxu1 %v1034_v3  ;;  %v1028_v35 = vld [vmem:[%s1637_s0 + $0xf0] sm:$0xff]  ;;  %v1021_v38 = vld [vmem:[%s1637_s0 + $0xb8] sm:$0xff] }
   0xf   :  { %1239 = vmatpush.bf16.msra.mxu2 %v1034_v3  ;;  %1240 = vmatpush.bf16.msra.mxu3 %v1034_v3  ;;  %v1029_v39 = vld [vmem:[%s1637_s0 + $0xf8] sm:$0xff] }
  0x12   :  { %341 = vmatpush.bf16.msra.mxu0 %v1033_v4  ;;  %1241 = vmatpush.bf16.msra.mxu1 %v1033_v4 }
  0x13   :  { %1242 = vmatpush.bf16.msra.mxu2 %v1033_v4  ;;  %1243 = vmatpush.bf16.msra.mxu3 %v1033_v4 }
  0x16   :  { %342 = vmatpush.bf16.msra.mxu0 %v1032_v5  ;;  %1244 = vmatpush.bf16.msra.mxu1 %v1032_v5 }
  0x17   :  { %1245 = vmatpush.bf16.msra.mxu2 %v1032_v5  ;;  %1246 = vmatpush.bf16.msra.mxu3 %v1032_v5 }
  0x1a   :  { %343 = vmatpush.bf16.msra.mxu0 %v1031_v6  ;;  %1247 = vmatpush.bf16.msra.mxu1 %v1031_v6 }
  0x1b   :  { %1248 = vmatpush.bf16.msra.mxu2 %v1031_v6  ;;  %1249 = vmatpush.bf16.msra.mxu3 %v1031_v6 }
  0x1e   :  { %344 = vmatpush.bf16.msra.mxu0 %v1030_v7  ;;  %1250 = vmatpush.bf16.msra.mxu1 %v1030_v7 }
  0x1f   :  { %1251 = vmatpush.bf16.msra.mxu2 %v1030_v7  ;;  %1252 = vmatpush.bf16.msra.mxu3 %v1030_v7 }
  0x21   :  { %345 = vmatmul.bf16.vlgmr.msra.gmra.mxu0 %v998_v8  ;;  %385 = vmatmul.bf16.vlgmr.msra.gmra.mxu1 %v1006_v9 }
  0x22   :  { %425 = vmatmul.bf16.vlgmr.msra.gmra.mxu2 %v1014_v10  ;;  %465 = vmatmul.bf16.vlgmr.msra.gmra.mxu3 %v1022_v11 }
  0x31   :  { %350 = vmatmul.bf16.gmra.mxu0 %v999_v12  ;;  %390 = vmatmul.bf16.gmra.mxu1 %v1007_v13 }
  0x32   :  { %430 = vmatmul.bf16.gmra.mxu2 %v1015_v14  ;;  %470 = vmatmul.bf16.gmra.mxu3 %v1023_v15 }
  0x41   :  { %355 = vmatmul.bf16.gmra.mxu0 %v1000_v16  ;;  %395 = vmatmul.bf16.gmra.mxu1 %v1008_v17 }
  0x42   :  { %435 = vmatmul.bf16.gmra.mxu2 %v1016_v18  ;;  %475 = vmatmul.bf16.gmra.mxu3 %v1024_v19 }
  0x51   :  { %360 = vmatmul.bf16.gmra.mxu0 %v1001_v20  ;;  %400 = vmatmul.bf16.gmra.mxu1 %v1009_v21 }
  0x52   :  { %440 = vmatmul.bf16.gmra.mxu2 %v1017_v22  ;;  %480 = vmatmul.bf16.gmra.mxu3 %v1025_v23 }
  0x61   :  { %365 = vmatmul.bf16.gmra.mxu0 %v1002_v24  ;;  %405 = vmatmul.bf16.gmra.mxu1 %v1010_v25 }
  0x62   :  { %445 = vmatmul.bf16.gmra.mxu2 %v1018_v26  ;;  %485 = vmatmul.bf16.gmra.mxu3 %v1026_v27 }
  0x71   :  { %370 = vmatmul.bf16.gmra.mxu0 %v1003_v28  ;;  %410 = vmatmul.bf16.gmra.mxu1 %v1011_v29 }
  0x72   :  { %450 = vmatmul.bf16.gmra.mxu2 %v1019_v30  ;;  %490 = vmatmul.bf16.gmra.mxu3 %v1027_v31 }
  0x81   :  { %375 = vmatmul.bf16.gmra.mxu0 %v1004_v32  ;;  %415 = vmatmul.bf16.gmra.mxu1 %v1012_v33 }
  0x82   :  { %455 = vmatmul.bf16.gmra.mxu2 %v1020_v34  ;;  %495 = vmatmul.bf16.gmra.mxu3 %v1028_v35 }
  0x91   :  { %380 = vmatmul.bf16.gmra.mxu0 %v1005_v36  ;;  %420 = vmatmul.bf16.gmra.mxu1 %v1013_v37 }
  0x92   :  { %460 = vmatmul.bf16.gmra.mxu2 %v1021_v38  ;;  %500 = vmatmul.bf16.gmra.mxu3 %v1029_v39 }
  0x9e   :  { %v346_v40 = vpop.f32.mrf.mxu0  ;;  %v386_v41 = vpop.f32.mrf.mxu1 }
  0x9f   :  { %v510_v43 = vmul.f32 %v1403_v42, %v346_v40  ;;  %v526_v45 = vmul.f32 %v1403_v42, %v386_v41 }
  0xa1   :  { %v578_v50 = vadd.f32 %v1409_v44, %v510_v43  ;;  %v594_v51 = vadd.f32 %v1409_v44, %v526_v45 }
  0xa3   :  { %v642_v58 = vmax.f32 %v578_v50, 0.0  ;;  %v658_v59 = vmax.f32 %v594_v51, 0.0 }
  0xa5   :  { %v426_v46 = vpop.f32.mrf.mxu2  ;;  %v466_v47 = vpop.f32.mrf.mxu3 }
  0xa6   :  { %v348_v48 = vpop.f32.mrf.mxu0  ;;  %v388_v49 = vpop.f32.mrf.mxu1  ;;  %v542_v56 = vmul.f32 %v1403_v42, %v426_v46  ;;  %v558_v57 = vmul.f32 %v1403_v42, %v466_v47 }
  0xa7   :  { %v511_v52 = vmul.f32 %v1403_v42, %v348_v48  ;;  %v527_v53 = vmul.f32 %v1403_v42, %v388_v49 }
  0xa8   :  { %v610_v2 = vadd.f32 %v1409_v44, %v542_v56  ;;  %v626_v3 = vadd.f32 %v1409_v44, %v558_v57 }
  0xa9   :  { %v579_v54 = vadd.f32 %v1409_v44, %v511_v52  ;;  %v595_v55 = vadd.f32 %v1409_v44, %v527_v53 }
  0xaa   :  { %v674_v10 = vmax.f32 %v610_v2, 0.0  ;;  %v690_v11 = vmax.f32 %v626_v3, 0.0 }
  0xab   :  { %v643_v60 = vmax.f32 %v579_v54, 0.0  ;;  %v659_v61 = vmax.f32 %v595_v55, 0.0 }
  0xad   :  { %v1041_v62 = vpack.c.bf16 %v643_v60, %v642_v58  ;;  %v1081_v63 = vpack.c.bf16 %v659_v61, %v658_v59  ;;  %v428_v0 = vpop.f32.mrf.mxu2  ;;  %v468_v1 = vpop.f32.mrf.mxu3 }
  0xae   :  { %v543_v4 = vmul.f32 %v1403_v42, %v428_v0  ;;  %v559_v5 = vmul.f32 %v1403_v42, %v468_v1  ;;  %v351_v6 = vpop.f32.mrf.mxu0  ;;  %v391_v7 = vpop.f32.mrf.mxu1 }
  0xaf   :  { %1042 = vst [vmem:[%s1638_s4] sm:$0xff] %v1041_v62   ;;  %v512_v14 = vmul.f32 %v1403_v42, %v351_v6  ;;  %v528_v15 = vmul.f32 %v1403_v42, %v391_v7 }
  0xb0   :  { %1205 = vst [vmem:[%s1638_s4 + $0x40] sm:$0xff] %v1081_v63   ;;  %v611_v8 = vadd.f32 %v1409_v44, %v543_v4  ;;  %v627_v9 = vadd.f32 %v1409_v44, %v559_v5 }
  0xb1   :  { %v580_v22 = vadd.f32 %v1409_v44, %v512_v14  ;;  %v596_v23 = vadd.f32 %v1409_v44, %v528_v15 }
  0xb2   :  { %v675_v12 = vmax.f32 %v611_v8, 0.0  ;;  %v691_v13 = vmax.f32 %v627_v9, 0.0 }
  0xb3   :  { %v644_v30 = vmax.f32 %v580_v22, 0.0  ;;  %v660_v31 = vmax.f32 %v596_v23, 0.0 }
  0xb4   :  { %v1121_v16 = vpack.c.bf16 %v675_v12, %v674_v10  ;;  %v1161_v17 = vpack.c.bf16 %v691_v13, %v690_v11 }
  0xb5   :  { %v431_v18 = vpop.f32.mrf.mxu2  ;;  %v471_v19 = vpop.f32.mrf.mxu3 }
  0xb6   :  { %1213 = vst [vmem:[%s1638_s4 + $0x80] sm:$0xff] %v1121_v16   ;;  %v353_v20 = vpop.f32.mrf.mxu0  ;;  %v393_v21 = vpop.f32.mrf.mxu1  ;;  %v544_v28 = vmul.f32 %v1403_v42, %v431_v18  ;;  %v560_v29 = vmul.f32 %v1403_v42, %v471_v19 }
  0xb7   :  { %1221 = vst [vmem:[%s1638_s4 + $0xc0] sm:$0xff] %v1161_v17   ;;  %v513_v24 = vmul.f32 %v1403_v42, %v353_v20  ;;  %v529_v25 = vmul.f32 %v1403_v42, %v393_v21 }
  0xb8   :  { %v612_v38 = vadd.f32 %v1409_v44, %v544_v28  ;;  %v628_v39 = vadd.f32 %v1409_v44, %v560_v29 }
  0xb9   :  { %v581_v26 = vadd.f32 %v1409_v44, %v513_v24  ;;  %v597_v27 = vadd.f32 %v1409_v44, %v529_v25 }
  0xba   :  { %v676_v48 = vmax.f32 %v612_v38, 0.0  ;;  %v692_v49 = vmax.f32 %v628_v39, 0.0 }
  0xbb   :  { %v645_v32 = vmax.f32 %v581_v26, 0.0  ;;  %v661_v33 = vmax.f32 %v597_v27, 0.0 }
  0xbd   :  { %v1046_v34 = vpack.c.bf16 %v645_v32, %v644_v30  ;;  %v1086_v35 = vpack.c.bf16 %v661_v33, %v660_v31  ;;  %v433_v36 = vpop.f32.mrf.mxu2  ;;  %v473_v37 = vpop.f32.mrf.mxu3 }
  0xbe   :  { %v545_v40 = vmul.f32 %v1403_v42, %v433_v36  ;;  %v561_v41 = vmul.f32 %v1403_v42, %v473_v37  ;;  %v356_v43 = vpop.f32.mrf.mxu0  ;;  %v396_v45 = vpop.f32.mrf.mxu1 }
  0xbf   :  { %1198 = vst [vmem:[%s1638_s4 + $0x8] sm:$0xff] %v1046_v34   ;;  %v514_v52 = vmul.f32 %v1403_v42, %v356_v43  ;;  %v530_v53 = vmul.f32 %v1403_v42, %v396_v45 }
  0xc0   :  { %1206 = vst [vmem:[%s1638_s4 + $0x48] sm:$0xff] %v1086_v35   ;;  %v613_v46 = vadd.f32 %v1409_v44, %v545_v40  ;;  %v629_v47 = vadd.f32 %v1409_v44, %v561_v41 }
  0xc1   :  { %v582_v60 = vadd.f32 %v1409_v44, %v514_v52  ;;  %v598_v61 = vadd.f32 %v1409_v44, %v530_v53 }
  0xc2   :  { %v677_v50 = vmax.f32 %v613_v46, 0.0  ;;  %v693_v51 = vmax.f32 %v629_v47, 0.0 }
  0xc3   :  { %v646_v4 = vmax.f32 %v582_v60, 0.0  ;;  %v662_v5 = vmax.f32 %v598_v61, 0.0 }
  0xc4   :  { %v1126_v54 = vpack.c.bf16 %v677_v50, %v676_v48  ;;  %v1166_v55 = vpack.c.bf16 %v693_v51, %v692_v49 }
  0xc5   :  { %v436_v56 = vpop.f32.mrf.mxu2  ;;  %v476_v57 = vpop.f32.mrf.mxu3 }
  0xc6   :  { %1214 = vst [vmem:[%s1638_s4 + $0x88] sm:$0xff] %v1126_v54   ;;  %v358_v58 = vpop.f32.mrf.mxu0  ;;  %v398_v59 = vpop.f32.mrf.mxu1  ;;  %v546_v2 = vmul.f32 %v1403_v42, %v436_v56  ;;  %v562_v3 = vmul.f32 %v1403_v42, %v476_v57 }
  0xc7   :  { %1222 = vst [vmem:[%s1638_s4 + $0xc8] sm:$0xff] %v1166_v55   ;;  %v515_v62 = vmul.f32 %v1403_v42, %v358_v58  ;;  %v531_v63 = vmul.f32 %v1403_v42, %v398_v59 }
  0xc8   :  { %v614_v12 = vadd.f32 %v1409_v44, %v546_v2  ;;  %v630_v13 = vadd.f32 %v1409_v44, %v562_v3 }
  0xc9   :  { %v583_v0 = vadd.f32 %v1409_v44, %v515_v62  ;;  %v599_v1 = vadd.f32 %v1409_v44, %v531_v63 }
  0xca   :  { %v678_v20 = vmax.f32 %v614_v12, 0.0  ;;  %v694_v21 = vmax.f32 %v630_v13, 0.0 }
  0xcb   :  { %v647_v6 = vmax.f32 %v583_v0, 0.0  ;;  %v663_v7 = vmax.f32 %v599_v1, 0.0 }
  0xcd   :  { %v1051_v8 = vpack.c.bf16 %v647_v6, %v646_v4  ;;  %v1091_v9 = vpack.c.bf16 %v663_v7, %v662_v5  ;;  %v438_v10 = vpop.f32.mrf.mxu2  ;;  %v478_v11 = vpop.f32.mrf.mxu3 }
  0xce   :  { %v547_v14 = vmul.f32 %v1403_v42, %v438_v10  ;;  %v563_v15 = vmul.f32 %v1403_v42, %v478_v11  ;;  %v361_v16 = vpop.f32.mrf.mxu0  ;;  %v401_v17 = vpop.f32.mrf.mxu1 }
  0xcf   :  { %1199 = vst [vmem:[%s1638_s4 + $0x10] sm:$0xff] %v1051_v8   ;;  %v516_v24 = vmul.f32 %v1403_v42, %v361_v16  ;;  %v532_v25 = vmul.f32 %v1403_v42, %v401_v17 }
  0xd0   :  { %1207 = vst [vmem:[%s1638_s4 + $0x50] sm:$0xff] %v1091_v9   ;;  %v615_v18 = vadd.f32 %v1409_v44, %v547_v14  ;;  %v631_v19 = vadd.f32 %v1409_v44, %v563_v15 }
  0xd1   :  { %v584_v32 = vadd.f32 %v1409_v44, %v516_v24  ;;  %v600_v33 = vadd.f32 %v1409_v44, %v532_v25 }
  0xd2   :  { %v679_v22 = vmax.f32 %v615_v18, 0.0  ;;  %v695_v23 = vmax.f32 %v631_v19, 0.0 }
  0xd3   :  { %v648_v40 = vmax.f32 %v584_v32, 0.0  ;;  %v664_v41 = vmax.f32 %v600_v33, 0.0 }
  0xd4   :  { %v1131_v26 = vpack.c.bf16 %v679_v22, %v678_v20  ;;  %v1171_v27 = vpack.c.bf16 %v695_v23, %v694_v21 }
  0xd5   :  { %v441_v28 = vpop.f32.mrf.mxu2  ;;  %v481_v29 = vpop.f32.mrf.mxu3 }
  0xd6   :  { %1215 = vst [vmem:[%s1638_s4 + $0x90] sm:$0xff] %v1131_v26   ;;  %v363_v30 = vpop.f32.mrf.mxu0  ;;  %v403_v31 = vpop.f32.mrf.mxu1  ;;  %v548_v38 = vmul.f32 %v1403_v42, %v441_v28  ;;  %v564_v39 = vmul.f32 %v1403_v42, %v481_v29 }
  0xd7   :  { %1223 = vst [vmem:[%s1638_s4 + $0xd0] sm:$0xff] %v1171_v27   ;;  %v517_v34 = vmul.f32 %v1403_v42, %v363_v30  ;;  %v533_v35 = vmul.f32 %v1403_v42, %v403_v31 }
  0xd8   :  { %v616_v50 = vadd.f32 %v1409_v44, %v548_v38  ;;  %v632_v51 = vadd.f32 %v1409_v44, %v564_v39 }
  0xd9   :  { %v585_v36 = vadd.f32 %v1409_v44, %v517_v34  ;;  %v601_v37 = vadd.f32 %v1409_v44, %v533_v35 }
  0xda   :  { %v680_v58 = vmax.f32 %v616_v50, 0.0  ;;  %v696_v59 = vmax.f32 %v632_v51, 0.0 }
  0xdb   :  { %v649_v43 = vmax.f32 %v585_v36, 0.0  ;;  %v665_v45 = vmax.f32 %v601_v37, 0.0 }
  0xdd   :  { %v1056_v46 = vpack.c.bf16 %v649_v43, %v648_v40  ;;  %v1096_v47 = vpack.c.bf16 %v665_v45, %v664_v41  ;;  %v443_v48 = vpop.f32.mrf.mxu2  ;;  %v483_v49 = vpop.f32.mrf.mxu3 }
  0xde   :  { %v549_v52 = vmul.f32 %v1403_v42, %v443_v48  ;;  %v565_v53 = vmul.f32 %v1403_v42, %v483_v49  ;;  %v366_v54 = vpop.f32.mrf.mxu0  ;;  %v406_v55 = vpop.f32.mrf.mxu1 }
  0xdf   :  { %1200 = vst [vmem:[%s1638_s4 + $0x18] sm:$0xff] %v1056_v46   ;;  %v518_v62 = vmul.f32 %v1403_v42, %v366_v54  ;;  %v534_v63 = vmul.f32 %v1403_v42, %v406_v55 }
  0xe0   :  { %1208 = vst [vmem:[%s1638_s4 + $0x58] sm:$0xff] %v1096_v47   ;;  %v617_v56 = vadd.f32 %v1409_v44, %v549_v52  ;;  %v633_v57 = vadd.f32 %v1409_v44, %v565_v53 }
  0xe1   :  { %v586_v6 = vadd.f32 %v1409_v44, %v518_v62  ;;  %v602_v7 = vadd.f32 %v1409_v44, %v534_v63 }
  0xe2   :  { %v681_v60 = vmax.f32 %v617_v56, 0.0  ;;  %v697_v61 = vmax.f32 %v633_v57, 0.0 }
  0xe3   :  { %v650_v14 = vmax.f32 %v586_v6, 0.0  ;;  %v666_v15 = vmax.f32 %v602_v7, 0.0 }
  0xe4   :  { %v1136_v0 = vpack.c.bf16 %v681_v60, %v680_v58  ;;  %v1176_v1 = vpack.c.bf16 %v697_v61, %v696_v59 }
  0xe5   :  { %v446_v2 = vpop.f32.mrf.mxu2  ;;  %v486_v3 = vpop.f32.mrf.mxu3 }
  0xe6   :  { %1216 = vst [vmem:[%s1638_s4 + $0x98] sm:$0xff] %v1136_v0   ;;  %v368_v4 = vpop.f32.mrf.mxu0  ;;  %v408_v5 = vpop.f32.mrf.mxu1  ;;  %v550_v12 = vmul.f32 %v1403_v42, %v446_v2  ;;  %v566_v13 = vmul.f32 %v1403_v42, %v486_v3 }
  0xe7   :  { %1224 = vst [vmem:[%s1638_s4 + $0xd8] sm:$0xff] %v1176_v1   ;;  %v519_v8 = vmul.f32 %v1403_v42, %v368_v4  ;;  %v535_v9 = vmul.f32 %v1403_v42, %v408_v5 }
  0xe8   :  { %v618_v22 = vadd.f32 %v1409_v44, %v550_v12  ;;  %v634_v23 = vadd.f32 %v1409_v44, %v566_v13 }
  0xe9   :  { %v587_v10 = vadd.f32 %v1409_v44, %v519_v8  ;;  %v603_v11 = vadd.f32 %v1409_v44, %v535_v9 }
  0xea   :  { %v682_v30 = vmax.f32 %v618_v22, 0.0  ;;  %v698_v31 = vmax.f32 %v634_v23, 0.0 }
  0xeb   :  { %v651_v16 = vmax.f32 %v587_v10, 0.0  ;;  %v667_v17 = vmax.f32 %v603_v11, 0.0 }
  0xed   :  { %v1061_v18 = vpack.c.bf16 %v651_v16, %v650_v14  ;;  %v1101_v19 = vpack.c.bf16 %v667_v17, %v666_v15  ;;  %v448_v20 = vpop.f32.mrf.mxu2  ;;  %v488_v21 = vpop.f32.mrf.mxu3 }
  0xee   :  { %v551_v24 = vmul.f32 %v1403_v42, %v448_v20  ;;  %v567_v25 = vmul.f32 %v1403_v42, %v488_v21  ;;  %v371_v26 = vpop.f32.mrf.mxu0  ;;  %v411_v27 = vpop.f32.mrf.mxu1 }
  0xef   :  { %1201 = vst [vmem:[%s1638_s4 + $0x20] sm:$0xff] %v1061_v18   ;;  %v520_v34 = vmul.f32 %v1403_v42, %v371_v26  ;;  %v536_v35 = vmul.f32 %v1403_v42, %v411_v27 }
  0xf0   :  { %1209 = vst [vmem:[%s1638_s4 + $0x60] sm:$0xff] %v1101_v19   ;;  %v619_v28 = vadd.f32 %v1409_v44, %v551_v24  ;;  %v635_v29 = vadd.f32 %v1409_v44, %v567_v25 }
  0xf1   :  { %v588_v43 = vadd.f32 %v1409_v44, %v520_v34  ;;  %v604_v45 = vadd.f32 %v1409_v44, %v536_v35 }
  0xf2   :  { %v683_v32 = vmax.f32 %v619_v28, 0.0  ;;  %v699_v33 = vmax.f32 %v635_v29, 0.0 }
  0xf3   :  { %v652_v52 = vmax.f32 %v588_v43, 0.0  ;;  %v668_v53 = vmax.f32 %v604_v45, 0.0 }
  0xf4   :  { %v1141_v36 = vpack.c.bf16 %v683_v32, %v682_v30  ;;  %v1181_v37 = vpack.c.bf16 %v699_v33, %v698_v31 }
  0xf5   :  { %v451_v38 = vpop.f32.mrf.mxu2  ;;  %v491_v39 = vpop.f32.mrf.mxu3 }
  0xf6   :  { %1217 = vst [vmem:[%s1638_s4 + $0xa0] sm:$0xff] %v1141_v36   ;;  %v373_v40 = vpop.f32.mrf.mxu0  ;;  %v413_v41 = vpop.f32.mrf.mxu1  ;;  %v552_v50 = vmul.f32 %v1403_v42, %v451_v38  ;;  %v568_v51 = vmul.f32 %v1403_v42, %v491_v39 }
  0xf7   :  { %1225 = vst [vmem:[%s1638_s4 + $0xe0] sm:$0xff] %v1181_v37   ;;  %v521_v46 = vmul.f32 %v1403_v42, %v373_v40  ;;  %v537_v47 = vmul.f32 %v1403_v42, %v413_v41 }
  0xf8   :  { %v620_v60 = vadd.f32 %v1409_v44, %v552_v50  ;;  %v636_v61 = vadd.f32 %v1409_v44, %v568_v51 }
  0xf9   :  { %v589_v48 = vadd.f32 %v1409_v44, %v521_v46  ;;  %v605_v49 = vadd.f32 %v1409_v44, %v537_v47 }
  0xfa   :  { %v684_v4 = vmax.f32 %v620_v60, 0.0  ;;  %v700_v5 = vmax.f32 %v636_v61, 0.0 }
  0xfb   :  { %v653_v54 = vmax.f32 %v589_v48, 0.0  ;;  %v669_v55 = vmax.f32 %v605_v49, 0.0 }
  0xfd   :  { %v1066_v56 = vpack.c.bf16 %v653_v54, %v652_v52  ;;  %v1106_v57 = vpack.c.bf16 %v669_v55, %v668_v53  ;;  %v453_v58 = vpop.f32.mrf.mxu2  ;;  %v493_v59 = vpop.f32.mrf.mxu3 }
  0xfe   :  { %v553_v62 = vmul.f32 %v1403_v42, %v453_v58  ;;  %v569_v63 = vmul.f32 %v1403_v42, %v493_v59  ;;  %v376_v0 = vpop.f32.mrf.mxu0  ;;  %v416_v1 = vpop.f32.mrf.mxu1 }
  0xff   :  { %1202 = vst [vmem:[%s1638_s4 + $0x28] sm:$0xff] %v1066_v56   ;;  %v522_v8 = vmul.f32 %v1403_v42, %v376_v0  ;;  %v538_v9 = vmul.f32 %v1403_v42, %v416_v1 }
 0x100   :  { %1210 = vst [vmem:[%s1638_s4 + $0x68] sm:$0xff] %v1106_v57   ;;  %v621_v2 = vadd.f32 %v1409_v44, %v553_v62  ;;  %v637_v3 = vadd.f32 %v1409_v44, %v569_v63 }
 0x101   :  { %v590_v16 = vadd.f32 %v1409_v44, %v522_v8  ;;  %v606_v17 = vadd.f32 %v1409_v44, %v538_v9 }
 0x102   :  { %v685_v6 = vmax.f32 %v621_v2, 0.0  ;;  %v701_v7 = vmax.f32 %v637_v3, 0.0 }
 0x103   :  { %v654_v24 = vmax.f32 %v590_v16, 0.0  ;;  %v670_v25 = vmax.f32 %v606_v17, 0.0 }
 0x104   :  { %v1146_v10 = vpack.c.bf16 %v685_v6, %v684_v4  ;;  %v1186_v11 = vpack.c.bf16 %v701_v7, %v700_v5 }
 0x105   :  { %v456_v12 = vpop.f32.mrf.mxu2  ;;  %v496_v13 = vpop.f32.mrf.mxu3 }
 0x106   :  { %1218 = vst [vmem:[%s1638_s4 + $0xa8] sm:$0xff] %v1146_v10   ;;  %v378_v14 = vpop.f32.mrf.mxu0  ;;  %v418_v15 = vpop.f32.mrf.mxu1  ;;  %v554_v22 = vmul.f32 %v1403_v42, %v456_v12  ;;  %v570_v23 = vmul.f32 %v1403_v42, %v496_v13 }
 0x107   :  { %1226 = vst [vmem:[%s1638_s4 + $0xe8] sm:$0xff] %v1186_v11   ;;  %v523_v18 = vmul.f32 %v1403_v42, %v378_v14  ;;  %v539_v19 = vmul.f32 %v1403_v42, %v418_v15 }
 0x108   :  { %v622_v32 = vadd.f32 %v1409_v44, %v554_v22  ;;  %v638_v33 = vadd.f32 %v1409_v44, %v570_v23 }
 0x109   :  { %v591_v20 = vadd.f32 %v1409_v44, %v523_v18  ;;  %v607_v21 = vadd.f32 %v1409_v44, %v539_v19 }
 0x10a   :  { %v686_v40 = vmax.f32 %v622_v32, 0.0  ;;  %v702_v41 = vmax.f32 %v638_v33, 0.0 }
 0x10b   :  { %v655_v26 = vmax.f32 %v591_v20, 0.0  ;;  %v671_v27 = vmax.f32 %v607_v21, 0.0 }
 0x10d   :  { %v1071_v28 = vpack.c.bf16 %v655_v26, %v654_v24  ;;  %v1111_v29 = vpack.c.bf16 %v671_v27, %v670_v25  ;;  %v458_v30 = vpop.f32.mrf.mxu2  ;;  %v498_v31 = vpop.f32.mrf.mxu3 }
 0x10e   :  { %v555_v34 = vmul.f32 %v1403_v42, %v458_v30  ;;  %v571_v35 = vmul.f32 %v1403_v42, %v498_v31  ;;  %v381_v36 = vpop.f32.mrf.mxu0  ;;  %v421_v37 = vpop.f32.mrf.mxu1 }
 0x10f   :  { %1203 = vst [vmem:[%s1638_s4 + $0x30] sm:$0xff] %v1071_v28   ;;  %v524_v46 = vmul.f32 %v1403_v42, %v381_v36  ;;  %v540_v47 = vmul.f32 %v1403_v42, %v421_v37 }
 0x110   :  { %1211 = vst [vmem:[%s1638_s4 + $0x70] sm:$0xff] %v1111_v29   ;;  %v623_v38 = vadd.f32 %v1409_v44, %v555_v34  ;;  %v639_v39 = vadd.f32 %v1409_v44, %v571_v35 }
 0x111   :  { %v592_v54 = vadd.f32 %v1409_v44, %v524_v46  ;;  %v608_v55 = vadd.f32 %v1409_v44, %v540_v47 }
 0x112   :  { %v687_v43 = vmax.f32 %v623_v38, 0.0  ;;  %v703_v45 = vmax.f32 %v639_v39, 0.0 }
 0x113   :  { %v656_v62 = vmax.f32 %v592_v54, 0.0  ;;  %v672_v63 = vmax.f32 %v608_v55, 0.0 }
 0x114   :  { %v1151_v48 = vpack.c.bf16 %v687_v43, %v686_v40  ;;  %v1191_v49 = vpack.c.bf16 %v703_v45, %v702_v41 }
 0x115   :  { %v461_v50 = vpop.f32.mrf.mxu2  ;;  %v501_v51 = vpop.f32.mrf.mxu3 }
 0x116   :  { %1219 = vst [vmem:[%s1638_s4 + $0xb0] sm:$0xff] %v1151_v48   ;;  %v383_v52 = vpop.f32.mrf.mxu0  ;;  %v423_v53 = vpop.f32.mrf.mxu1  ;;  %v556_v60 = vmul.f32 %v1403_v42, %v461_v50  ;;  %v572_v61 = vmul.f32 %v1403_v42, %v501_v51 }
 0x117   :  { %1227 = vst [vmem:[%s1638_s4 + $0xf0] sm:$0xff] %v1191_v49   ;;  %v525_v56 = vmul.f32 %v1403_v42, %v383_v52  ;;  %v541_v57 = vmul.f32 %v1403_v42, %v423_v53 }
 0x118   :  { %v624_v6 = vadd.f32 %v1409_v44, %v556_v60  ;;  %v640_v7 = vadd.f32 %v1409_v44, %v572_v61 }
 0x119   :  { %v593_v58 = vadd.f32 %v1409_v44, %v525_v56  ;;  %v609_v59 = vadd.f32 %v1409_v44, %v541_v57 }
 0x11a   :  { %v688_v12 = vmax.f32 %v624_v6, 0.0  ;;  %v704_v13 = vmax.f32 %v640_v7, 0.0 }
 0x11b   :  { %v657_v0 = vmax.f32 %v593_v58, 0.0  ;;  %v673_v1 = vmax.f32 %v609_v59, 0.0 }
 0x11d   :  { %v1076_v2 = vpack.c.bf16 %v657_v0, %v656_v62  ;;  %v1116_v3 = vpack.c.bf16 %v673_v1, %v672_v63  ;;  %v463_v4 = vpop.f32.mrf.mxu2  ;;  %v503_v5 = vpop.f32.mrf.mxu3 }
 0x11e   :  { %v557_v8 = vmul.f32 %v1403_v42, %v463_v4  ;;  %v573_v9 = vmul.f32 %v1403_v42, %v503_v5 }
 0x11f   :  { %1204 = vst [vmem:[%s1638_s4 + $0x38] sm:$0xff] %v1076_v2  }
 0x120   :  { %1212 = vst [vmem:[%s1638_s4 + $0x78] sm:$0xff] %v1116_v3   ;;  %v625_v10 = vadd.f32 %v1409_v44, %v557_v8  ;;  %v641_v11 = vadd.f32 %v1409_v44, %v573_v9 }
 0x122   :  { %v689_v14 = vmax.f32 %v625_v10, 0.0  ;;  %v705_v15 = vmax.f32 %v641_v11, 0.0 }
 0x124   :  { %v1156_v16 = vpack.c.bf16 %v689_v14, %v688_v12  ;;  %v1196_v17 = vpack.c.bf16 %v705_v15, %v704_v13 }
 0x126   :  { %1220 = vst [vmem:[%s1638_s4 + $0xb8] sm:$0xff] %v1156_v16  }
 0x127   :  { %1228 = vst [vmem:[%s1638_s4 + $0xf8] sm:$0xff] %v1196_v17  }

// kernel: forward.7
= control target key start
LH: loop header
LB: loop body
LE: loop exit
PB: predicated region body
PF: predicated region fallthrough
CT: control target
= control target key end

     0   :  { %s3564_s1 = inlined_call_operand.vmem [shape: bf16[384,128], index: 1, kind: input, shape index: {}]   ;;  %s3565_s0 = inlined_call_operand.vmem [shape: bf16[512,384], index: 0, kind: input, shape index: {}]   ;;  %s3566_s2 = inlined_call_operand.vmem [shape: f32[1,128], index: 2, kind: input, shape index: {}]   ;;  %s3567_s3 = inlined_call_operand.vmem [shape: f32[1,128], index: 3, kind: input, shape index: {}]   ;;  %s3568_s4 = inlined_call_operand.vmem [shape: bf16[512,128], index: 4, kind: output, shape index: {}]  }
   0x1   :  { %v2271_v0 = vld [vmem:[%s3564_s1 + $0x38] sm:$0xff]  ;;  %v2270_v3 = vld [vmem:[%s3564_s1 + $0x30] sm:$0xff]  ;;  %v2269_v6 = vld [vmem:[%s3564_s1 + $0x28] sm:$0xff] }
   0x2   :  { %v2538_v1 = vld [vmem:[%s3564_s1 + $0x78] sm:$0xff]  ;;  %849 = vmatpush.bf16.msra.mxu0 %v2271_v0  ;;  %2479 = vmatpush.bf16.msra.mxu3 %v2271_v0  ;;  %v2553_v4 = vld [vmem:[%s3564_s1 + $0x70] sm:$0xff]  ;;  %v2277_v7 = vld [vmem:[%s3564_s1 + $0x68] sm:$0xff] }
   0x3   :  { %v2543_v2 = vld [vmem:[%s3564_s1 + $0xb8] sm:$0xff]  ;;  %1018 = vmatpush.bf16.msra.mxu1 %v2538_v1  ;;  %v2558_v5 = vld [vmem:[%s3564_s1 + $0xb0] sm:$0xff]  ;;  %v2571_v8 = vld [vmem:[%s3564_s1 + $0xa8] sm:$0xff] }
   0x4   :  { %1187 = vmatpush.bf16.msra.mxu2 %v2543_v2  ;;  %v2268_v9 = vld [vmem:[%s3564_s1 + $0x20] sm:$0xff]  ;;  %v2267_v12 = vld [vmem:[%s3564_s1 + $0x18] sm:$0xff]  ;;  %v2266_v15 = vld [vmem:[%s3564_s1 + $0x10] sm:$0xff] }
   0x5   :  { %v2580_v10 = vld [vmem:[%s3564_s1 + $0x60] sm:$0xff]  ;;  %v2275_v13 = vld [vmem:[%s3564_s1 + $0x58] sm:$0xff]  ;;  %v2274_v16 = vld [vmem:[%s3564_s1 + $0x50] sm:$0xff] }
   0x6   :  { %850 = vmatpush.bf16.msra.mxu0 %v2270_v3  ;;  %2480 = vmatpush.bf16.msra.mxu3 %v2270_v3  ;;  %v2585_v11 = vld [vmem:[%s3564_s1 + $0xa0] sm:$0xff]  ;;  %v2598_v14 = vld [vmem:[%s3564_s1 + $0x98] sm:$0xff]  ;;  %v2610_v17 = vld [vmem:[%s3564_s1 + $0x90] sm:$0xff] }
   0x7   :  { %1019 = vmatpush.bf16.msra.mxu1 %v2553_v4  ;;  %v2265_v18 = vld [vmem:[%s3564_s1 + $0x8] sm:$0xff]  ;;  %v2264_v21 = vld [vmem:[%s3564_s1] sm:$0xff]  ;;  %v1692_v29 = vld [vmem:[%s3565_s0 + $0xc] sm:$0xf0] }
   0x8   :  { %1188 = vmatpush.bf16.msra.mxu2 %v2558_v5  ;;  %v2273_v19 = vld [vmem:[%s3564_s1 + $0x48] sm:$0xff]  ;;  %v2272_v22 = vld [vmem:[%s3564_s1 + $0x40] sm:$0xff]  ;;  %v2170_v31 = vld [vmem:[%s3565_s0 + $0x10] sm:$0xf0] }
   0x9   :  { %v2622_v20 = vld [vmem:[%s3564_s1 + $0x88] sm:$0xff]  ;;  %v2633_v23 = vld [vmem:[%s3564_s1 + $0x80] sm:$0xff]  ;;  %v1702_v36 = vld [vmem:[%s3565_s0 + $0x18] sm:$0xf] }
   0xa   :  { %851 = vmatpush.bf16.msra.mxu0 %v2269_v6  ;;  %2481 = vmatpush.bf16.msra.mxu3 %v2269_v6  ;;  %v1690_v24 = vld [vmem:[%s3565_s0] sm:$0xf]  ;;  %v2169_v25 = vld [vmem:[%s3565_s0 + $0x8] sm:$0xf0]  ;;  %v2168_v28 = vld [vmem:[%s3565_s0 + $0x4] sm:$0xf] }
   0xb   :  { %1020 = vmatpush.bf16.msra.mxu1 %v2277_v7  ;;  %v1978_v26 = vld [vmem:[%s3565_s0 + $0x240] sm:$0xf]  ;;  %v2241_v27 = vld [vmem:[%s3565_s0 + $0x248] sm:$0xf0]  ;;  %v1698_v30 = vld [vmem:[%s3565_s0 + $0x8] sm:$0xf]  ;;  %v1691_v32 = vor.u32 %v2169_v25, %v1690_v24  ;;  %v1695_v34 = vor.u32 %v2168_v28, %v1692_v29 }
   0xc   :  { %1189 = vmatpush.bf16.msra.mxu2 %v2571_v8  ;;  %v1979_v33 = vor.u32 %v2241_v27, %v1978_v26  ;;  %v1699_v35 = vor.u32 %v2170_v31, %v1698_v30  ;;  %v2172_v37 = vld [vmem:[%s3565_s0 + $0x20] sm:$0xf0]  ;;  %v1990_v38 = vld [vmem:[%s3565_s0 + $0x258] sm:$0xf]  ;;  %v2171_v40 = vld [vmem:[%s3565_s0 + $0x1c] sm:$0xf] }
   0xd   :  { %v2244_v39 = vld [vmem:[%s3565_s0 + $0x260] sm:$0xf0]  ;;  %v1704_v41 = vld [vmem:[%s3565_s0 + $0x24] sm:$0xf0]  ;;  %v1710_v42 = vld [vmem:[%s3565_s0 + $0x20] sm:$0xf]  ;;  %v1703_v44 = vor.u32 %v2172_v37, %v1702_v36 }
   0xe   :  { %852 = vmatpush.bf16.msra.mxu0 %v2268_v9  ;;  %2482 = vmatpush.bf16.msra.mxu3 %v2268_v9  ;;  %v2173_v43 = vld [vmem:[%s3565_s0 + $0x28] sm:$0xf0]  ;;  %v1991_v45 = vor.u32 %v2244_v39, %v1990_v38  ;;  %v1707_v46 = vor.u32 %v2171_v40, %v1704_v41  ;;  %v1714_v48 = vld [vmem:[%s3565_s0 + $0x30] sm:$0xf]  ;;  %v2175_v49 = vld [vmem:[%s3565_s0 + $0x38] sm:$0xf0] }
   0xf   :  { %1021 = vmatpush.bf16.msra.mxu1 %v2580_v10  ;;  %v1711_v47 = vor.u32 %v2173_v43, %v1710_v42  ;;  %v2002_v50 = vld [vmem:[%s3565_s0 + $0x270] sm:$0xf]  ;;  %v2247_v51 = vld [vmem:[%s3565_s0 + $0x278] sm:$0xf0]  ;;  %v2174_v52 = vld [vmem:[%s3565_s0 + $0x34] sm:$0xf]  ;;  %v1715_v56 = vor.u32 %v2175_v49, %v1714_v48 }
  0x10   :  { %1190 = vmatpush.bf16.msra.mxu2 %v2585_v11  ;;  %v1716_v53 = vld [vmem:[%s3565_s0 + $0x3c] sm:$0xf0]  ;;  %v1722_v54 = vld [vmem:[%s3565_s0 + $0x38] sm:$0xf]  ;;  %v2176_v55 = vld [vmem:[%s3565_s0 + $0x40] sm:$0xf0]  ;;  %v2003_v57 = vor.u32 %v2247_v51, %v2002_v50 }
  0x11   :  { %v1719_v58 = vor.u32 %v2174_v52, %v1716_v53  ;;  %v1723_v59 = vor.u32 %v2176_v55, %v1722_v54  ;;  %v1726_v60 = vld [vmem:[%s3565_s0 + $0x48] sm:$0xf]  ;;  %v2178_v61 = vld [vmem:[%s3565_s0 + $0x50] sm:$0xf0]  ;;  %v2177_v0 = vld [vmem:[%s3565_s0 + $0x4c] sm:$0xf] }
  0x12   :  { %853 = vmatpush.bf16.msra.mxu0 %v2267_v12  ;;  %2483 = vmatpush.bf16.msra.mxu3 %v2267_v12  ;;  %v2014_v62 = vld [vmem:[%s3565_s0 + $0x288] sm:$0xf]  ;;  %v2250_v63 = vld [vmem:[%s3565_s0 + $0x290] sm:$0xf0]  ;;  %v2179_v3 = vld [vmem:[%s3565_s0 + $0x58] sm:$0xf0] }
  0x13   :  { %1022 = vmatpush.bf16.msra.mxu1 %v2275_v13  ;;  %v2181_v9 = vld [vmem:[%s3565_s0 + $0x68] sm:$0xf0]  ;;  %v2180_v12 = vld [vmem:[%s3565_s0 + $0x64] sm:$0xf]  ;;  %v2183_v24 = vld [vmem:[%s3565_s0 + $0x7c] sm:$0xf] }
  0x14   :  { %1191 = vmatpush.bf16.msra.mxu2 %v2598_v14  ;;  %v1752_v25 = vld [vmem:[%s3565_s0 + $0x84] sm:$0xf0]  ;;  %v1758_v26 = vld [vmem:[%s3565_s0 + $0x80] sm:$0xf]  ;;  %v2185_v27 = vld [vmem:[%s3565_s0 + $0x88] sm:$0xf0] }
  0x15   :  { %v1755_v30 = vor.u32 %v2183_v24, %v1752_v25  ;;  %v1759_v31 = vor.u32 %v2185_v27, %v1758_v26  ;;  %v2186_v36 = vld [vmem:[%s3565_s0 + $0x94] sm:$0xf]  ;;  %v1764_v37 = vld [vmem:[%s3565_s0 + $0x9c] sm:$0xf0]  ;;  %v1770_v38 = vld [vmem:[%s3565_s0 + $0x98] sm:$0xf] }
  0x16   :  { %854 = vmatpush.bf16.msra.mxu0 %v2266_v15  ;;  %2484 = vmatpush.bf16.msra.mxu3 %v2266_v15  ;;  %v2182_v15 = vld [vmem:[%s3565_s0 + $0x70] sm:$0xf0]  ;;  %v2188_v39 = vld [vmem:[%s3565_s0 + $0xa0] sm:$0xf0]  ;;  %v1767_v42 = vor.u32 %v2186_v36, %v1764_v37  ;;  %v2189_v48 = vld [vmem:[%s3565_s0 + $0xac] sm:$0xf] }
  0x17   :  { %1023 = vmatpush.bf16.msra.mxu1 %v2274_v16  ;;  %v1771_v43 = vor.u32 %v2188_v39, %v1770_v38  ;;  %v1776_v49 = vld [vmem:[%s3565_s0 + $0xb4] sm:$0xf0]  ;;  %v1782_v50 = vld [vmem:[%s3565_s0 + $0xb0] sm:$0xf]  ;;  %v2191_v51 = vld [vmem:[%s3565_s0 + $0xb8] sm:$0xf0] }
  0x18   :  { %1192 = vmatpush.bf16.msra.mxu2 %v2610_v17  ;;  %v1779_v54 = vor.u32 %v2189_v48, %v1776_v49  ;;  %v1783_v55 = vor.u32 %v2191_v51, %v1782_v50  ;;  %v2246_v48 = vld [vmem:[%s3565_s0 + $0x274] sm:$0xf]  ;;  %v2004_v49 = vld [vmem:[%s3565_s0 + $0x27c] sm:$0xf0]  ;;  %v1818_v51 = vld [vmem:[%s3565_s0 + $0xf8] sm:$0xf] }
  0x19   :  { %v1812_v50 = vld [vmem:[%s3565_s0 + $0xfc] sm:$0xf0] }
  0x1a   :  { %855 = vmatpush.bf16.msra.mxu0 %v2265_v18  ;;  %2485 = vmatpush.bf16.msra.mxu3 %v2265_v18 }
  0x1b   :  { %1024 = vmatpush.bf16.msra.mxu1 %v2273_v19 }
  0x1c   :  { %1193 = vmatpush.bf16.msra.mxu2 %v2622_v20 }
  0x1e   :  { %856 = vmatpush.bf16.msra.mxu0 %v2264_v21  ;;  %2486 = vmatpush.bf16.msra.mxu3 %v2264_v21  ;;  %v2184_v21 = vld [vmem:[%s3565_s0 + $0x80] sm:$0xf0] }
  0x1f   :  { %1025 = vmatpush.bf16.msra.mxu1 %v2272_v22 }
  0x20   :  { %1194 = vmatpush.bf16.msra.mxu2 %v2633_v23 }
  0x21   :  { %857 = vmatmul.bf16.vlgmr.msra.gmra.mxu0 %v1691_v32  ;;  %977 = vmatmul.bf16.vlgmr.msra.gmra.mxu3 %v1979_v33  ;;  %v1762_v32 = vld [vmem:[%s3565_s0 + $0x90] sm:$0xf]  ;;  %v2187_v33 = vld [vmem:[%s3565_s0 + $0x98] sm:$0xf0] }
  0x22   :  { %2487 = vmatpush.bf16.msrb.mxu3 %v2538_v1  ;;  %1026 = vmatmul.bf16.vlgmr.msra.gmra.mxu1 %v1695_v34  ;;  %v1728_v1 = vld [vmem:[%s3565_s0 + $0x54] sm:$0xf0]  ;;  %v2050_v34 = vld [vmem:[%s3565_s0 + $0x2d0] sm:$0xf]  ;;  %v1763_v40 = vor.u32 %v2187_v33, %v1762_v32 }
  0x23   :  { %1195 = vmatmul.bf16.vlgmr.msra.gmra.mxu2 %v1699_v35  ;;  %v1731_v6 = vor.u32 %v2177_v0, %v1728_v1  ;;  %v2259_v35 = vld [vmem:[%s3565_s0 + $0x2d8] sm:$0xf0] }
  0x24   :  { %v2051_v41 = vor.u32 %v2259_v35, %v2050_v34 }
  0x26   :  { %2488 = vmatpush.bf16.msrb.mxu3 %v2553_v4  ;;  %v1727_v4 = vor.u32 %v2178_v61, %v1726_v60  ;;  %v1980_v60 = vld [vmem:[%s3565_s0 + $0x24c] sm:$0xf0] }
  0x27   :  { %v1788_v61 = vld [vmem:[%s3565_s0 + $0xcc] sm:$0xf0] }
  0x2a   :  { %2489 = vmatpush.bf16.msrb.mxu3 %v2277_v7 }
  0x2e   :  { %2490 = vmatpush.bf16.msrb.mxu3 %v2580_v10  ;;  %v2026_v10 = vld [vmem:[%s3565_s0 + $0x2a0] sm:$0xf] }
  0x31   :  { %862 = vmatmul.bf16.gmra.mxu0 %v1703_v44  ;;  %982 = vmatmul.bf16.gmra.mxu3 %v1991_v45  ;;  %v1774_v44 = vld [vmem:[%s3565_s0 + $0xa8] sm:$0xf]  ;;  %v2190_v45 = vld [vmem:[%s3565_s0 + $0xb0] sm:$0xf0] }
  0x32   :  { %2491 = vmatpush.bf16.msrb.mxu3 %v2275_v13  ;;  %1031 = vmatmul.bf16.gmra.mxu1 %v1707_v46  ;;  %v1740_v13 = vld [vmem:[%s3565_s0 + $0x6c] sm:$0xf0]  ;;  %v2062_v46 = vld [vmem:[%s3565_s0 + $0x2e8] sm:$0xf]  ;;  %v1775_v52 = vor.u32 %v2190_v45, %v1774_v44 }
  0x33   :  { %1200 = vmatmul.bf16.gmra.mxu2 %v1711_v47  ;;  %v1743_v18 = vor.u32 %v2180_v12, %v1740_v13  ;;  %v2262_v47 = vld [vmem:[%s3565_s0 + $0x2f0] sm:$0xf0]  ;;  %v2869_v12 = vld [vmem:[%s3566_s2] ss:$0 sm:$0xff]  ;;  %v1798_v13 = vld [vmem:[%s3565_s0 + $0xd8] sm:$0xf] }
  0x34   :  { %v2063_v53 = vor.u32 %v2262_v47, %v2062_v46  ;;  %v1810_v45 = vld [vmem:[%s3565_s0 + $0xf0] sm:$0xf]  ;;  %v2199_v46 = vld [vmem:[%s3565_s0 + $0xf8] sm:$0xf0]  ;;  %v2198_v47 = vld [vmem:[%s3565_s0 + $0xf4] sm:$0xf] }
  0x36   :  { %2492 = vmatpush.bf16.msrb.mxu3 %v2274_v16 }
  0x3a   :  { %2493 = vmatpush.bf16.msrb.mxu3 %v2273_v19 }
  0x3e   :  { %2494 = vmatpush.bf16.msrb.mxu3 %v2272_v22  ;;  %v2038_v22 = vld [vmem:[%s3565_s0 + $0x2b8] sm:$0xf] }
  0x41   :  { %867 = vmatmul.bf16.gmra.mxu0 %v1715_v56  ;;  %987 = vmatmul.bf16.gmra.mxu3 %v2003_v57  ;;  %v1786_v56 = vld [vmem:[%s3565_s0 + $0xc0] sm:$0xf]  ;;  %v2193_v57 = vld [vmem:[%s3565_s0 + $0xc8] sm:$0xf0] }
  0x42   :  { %2495 = vmatpush.bf16.msra.mxu3 %v2543_v2  ;;  %1036 = vmatmul.bf16.gmra.mxu1 %v1719_v58  ;;  %v1734_v2 = vld [vmem:[%s3565_s0 + $0x50] sm:$0xf]  ;;  %v2192_v58 = vld [vmem:[%s3565_s0 + $0xc4] sm:$0xf]  ;;  %v1787_v0 = vor.u32 %v2193_v57, %v1786_v56  ;;  %v1811_v57 = vor.u32 %v2199_v46, %v1810_v45 }
  0x43   :  { %1205 = vmatmul.bf16.gmra.mxu2 %v1723_v59  ;;  %v1735_v7 = vor.u32 %v2179_v3, %v1734_v2  ;;  %v2240_v59 = vld [vmem:[%s3565_s0 + $0x244] sm:$0xf]  ;;  %v1791_v3 = vor.u32 %v2192_v58, %v1788_v61  ;;  %v2007_v58 = vor.u32 %v2246_v48, %v2004_v49  ;;  %v1815_v61 = vor.u32 %v2198_v47, %v1812_v50  ;;  %v1834_v48 = vld [vmem:[%s3565_s0 + $0x120] sm:$0xf]  ;;  %v2205_v49 = vld [vmem:[%s3565_s0 + $0x128] sm:$0xf0] }
  0x44   :  { %v1983_v1 = vor.u32 %v2240_v59, %v1980_v60  ;;  %v2204_v50 = vld [vmem:[%s3565_s0 + $0x124] sm:$0xf] }
  0x46   :  { %2496 = vmatpush.bf16.msra.mxu3 %v2558_v5  ;;  %v2015_v5 = vor.u32 %v2250_v63, %v2014_v62  ;;  %v1794_v62 = vld [vmem:[%s3565_s0 + $0xc8] sm:$0xf]  ;;  %v2194_v63 = vld [vmem:[%s3565_s0 + $0xd0] sm:$0xf0] }
  0x4a   :  { %2497 = vmatpush.bf16.msra.mxu3 %v2571_v8  ;;  %v1738_v8 = vld [vmem:[%s3565_s0 + $0x60] sm:$0xf] }
  0x4b   :  { %v1739_v16 = vor.u32 %v2181_v9, %v1738_v8 }
  0x4e   :  { %2498 = vmatpush.bf16.msra.mxu3 %v2585_v11  ;;  %v2253_v11 = vld [vmem:[%s3565_s0 + $0x2a8] sm:$0xf0] }
  0x51   :  { %872 = vmatmul.bf16.gmra.mxu0 %v1727_v4  ;;  %992 = vmatmul.bf16.gmra.mxu3 %v2015_v5  ;;  %v1795_v4 = vor.u32 %v2194_v63, %v1794_v62 }
  0x52   :  { %2499 = vmatpush.bf16.msra.mxu3 %v2598_v14  ;;  %1041 = vmatmul.bf16.gmra.mxu1 %v1731_v6  ;;  %v1746_v14 = vld [vmem:[%s3565_s0 + $0x68] sm:$0xf] }
  0x53   :  { %1210 = vmatmul.bf16.gmra.mxu2 %v1735_v7  ;;  %v1747_v19 = vor.u32 %v2182_v15, %v1746_v14  ;;  %v2196_v14 = vld [vmem:[%s3565_s0 + $0xe0] sm:$0xf0]  ;;  %v2195_v15 = vld [vmem:[%s3565_s0 + $0xdc] sm:$0xf] }
  0x54   :  { %v1799_v26 = vor.u32 %v2196_v14, %v1798_v13  ;;  %v1822_v14 = vld [vmem:[%s3565_s0 + $0x108] sm:$0xf] }
  0x56   :  { %2500 = vmatpush.bf16.msra.mxu3 %v2610_v17  ;;  %v2027_v17 = vor.u32 %v2253_v11, %v2026_v10 }
  0x5a   :  { %2501 = vmatpush.bf16.msra.mxu3 %v2622_v20  ;;  %v1750_v20 = vld [vmem:[%s3565_s0 + $0x78] sm:$0xf] }
  0x5b   :  { %v1751_v28 = vor.u32 %v2184_v21, %v1750_v20  ;;  %v2197_v20 = vld [vmem:[%s3565_s0 + $0xe8] sm:$0xf0] }
  0x5e   :  { %2502 = vmatpush.bf16.msra.mxu3 %v2633_v23  ;;  %v2256_v23 = vld [vmem:[%s3565_s0 + $0x2c0] sm:$0xf0] }
  0x5f   :  { %v2039_v29 = vor.u32 %v2256_v23, %v2038_v22  ;;  %v2899_v22 = vld [vmem:[%s3567_s3] ss:$0 sm:$0xff] }
  0x61   :  { %877 = vmatmul.bf16.gmra.mxu0 %v1739_v16  ;;  %997 = vmatmul.bf16.gmra.mxu3 %v2027_v17  ;;  %v2243_v16 = vld [vmem:[%s3565_s0 + $0x25c] sm:$0xf]  ;;  %v1992_v17 = vld [vmem:[%s3565_s0 + $0x264] sm:$0xf0] }
  0x62   :  { %1046 = vmatmul.bf16.gmra.mxu1 %v1743_v18  ;;  %v1800_v18 = vld [vmem:[%s3565_s0 + $0xe4] sm:$0xf0]  ;;  %v1995_v27 = vor.u32 %v2243_v16, %v1992_v17  ;;  %v2201_v16 = vld [vmem:[%s3565_s0 + $0x10c] sm:$0xf] }
  0x63   :  { %1215 = vmatmul.bf16.gmra.mxu2 %v1747_v19  ;;  %v1806_v19 = vld [vmem:[%s3565_s0 + $0xe0] sm:$0xf]  ;;  %v2249_v17 = vld [vmem:[%s3565_s0 + $0x28c] sm:$0xf] }
  0x71   :  { %882 = vmatmul.bf16.gmra.mxu0 %v1751_v28  ;;  %1002 = vmatmul.bf16.gmra.mxu3 %v2039_v29 }
  0x72   :  { %1051 = vmatmul.bf16.gmra.mxu1 %v1755_v30  ;;  %v1803_v30 = vor.u32 %v2195_v15, %v1800_v18  ;;  %v2202_v15 = vld [vmem:[%s3565_s0 + $0x110] sm:$0xf0]  ;;  %v2016_v18 = vld [vmem:[%s3565_s0 + $0x294] sm:$0xf0] }
  0x73   :  { %1220 = vmatmul.bf16.gmra.mxu2 %v1759_v31  ;;  %v1807_v31 = vor.u32 %v2197_v20, %v1806_v19  ;;  %v1824_v19 = vld [vmem:[%s3565_s0 + $0x114] sm:$0xf0]  ;;  %v1830_v20 = vld [vmem:[%s3565_s0 + $0x110] sm:$0xf] }
  0x81   :  { %887 = vmatmul.bf16.gmra.mxu0 %v1763_v40  ;;  %1007 = vmatmul.bf16.gmra.mxu3 %v2051_v41 }
  0x82   :  { %1056 = vmatmul.bf16.gmra.mxu1 %v1767_v42 }
  0x83   :  { %1225 = vmatmul.bf16.gmra.mxu2 %v1771_v43 }
  0x91   :  { %892 = vmatmul.bf16.gmra.mxu0 %v1775_v52  ;;  %1012 = vmatmul.bf16.gmra.mxu3 %v2063_v53  ;;  %v2200_v52 = vld [vmem:[%s3565_s0 + $0x100] sm:$0xf0] }
  0x92   :  { %1061 = vmatmul.bf16.gmra.mxu1 %v1779_v54  ;;  %v1819_v62 = vor.u32 %v2200_v52, %v1818_v51  ;;  %v2252_v51 = vld [vmem:[%s3565_s0 + $0x2a4] sm:$0xf]  ;;  %v2028_v52 = vld [vmem:[%s3565_s0 + $0x2ac] sm:$0xf0] }
  0x93   :  { %1230 = vmatmul.bf16.gmra.mxu2 %v1783_v55 }
  0x9e   :  { %v858_v2 = vpop.f32.mrf.mxu0 }
  0x9f   :  { %v1027_v5 = vpop.f32.mrf.mxu1 }
  0xa0   :  { %v1028_v6 = vadd.f32 %v1027_v5, %v858_v2 }
  0xa1   :  { %897 = vmatmul.bf16.gmra.mxu0 %v1787_v0  ;;  %1146 = vmatmul.bf16.vlgmr.msrb.gmra.mxu3 %v1983_v1 }
  0xa2   :  { %1066 = vmatmul.bf16.gmra.mxu1 %v1791_v3 }
  0xa3   :  { %1235 = vmatmul.bf16.gmra.mxu2 %v1795_v4 }
  0xa4   :  { %v2864_v7 = vpop.f32.mrf.mxu3 }
  0xa6   :  { %v1196_v8 = vpop.f32.mrf.mxu2  ;;  %v860_v9 = vpop.f32.mrf.mxu0 }
  0xa7   :  { %v1029_v10 = vpop.f32.mrf.mxu1  ;;  %v1197_v11 = vadd.f32 %v1196_v8, %v1028_v6 }
  0xa8   :  { %v1030_v23 = vadd.f32 %v1029_v10, %v860_v9 }
  0xa9   :  { %v1360_v21 = vmul.f32 %v2869_v12, %v1197_v11 }
  0xab   :  { %v1428_v33 = vadd.f32 %v2899_v22, %v1360_v21  ;;  %v2203_v21 = vld [vmem:[%s3565_s0 + $0x118] sm:$0xf0] }
  0xac   :  { %v2901_v24 = vpop.f32.mrf.mxu3 }
  0xad   :  { %v1492_v36 = vmax.f32 %v1428_v33, 0.0  ;;  %v1831_v33 = vor.u32 %v2203_v21, %v1830_v20  ;;  %v2208_v20 = vld [vmem:[%s3565_s0 + $0x140] sm:$0xf0]  ;;  %v2207_v21 = vld [vmem:[%s3565_s0 + $0x13c] sm:$0xf] }
  0xae   :  { %v1198_v25 = vpop.f32.mrf.mxu2  ;;  %v863_v29 = vpop.f32.mrf.mxu0 }
  0xaf   :  { %v1199_v28 = vadd.f32 %v1198_v25, %v1030_v23  ;;  %v1032_v32 = vpop.f32.mrf.mxu1 }
  0xb0   :  { %v1033_v38 = vadd.f32 %v1032_v32, %v863_v29  ;;  %v2019_v29 = vor.u32 %v2249_v17, %v2016_v18  ;;  %v1827_v32 = vor.u32 %v2201_v16, %v1824_v19  ;;  %v1846_v19 = vld [vmem:[%s3565_s0 + $0x138] sm:$0xf] }
  0xb1   :  { %v1361_v34 = vmul.f32 %v2869_v12, %v1199_v28  ;;  %902 = vmatmul.bf16.gmra.mxu0 %v1799_v26  ;;  %1151 = vmatmul.bf16.gmra.mxu3 %v1995_v27  ;;  %v1823_v28 = vor.u32 %v2202_v15, %v1822_v14 }
  0xb2   :  { %1071 = vmatmul.bf16.gmra.mxu1 %v1803_v30 }
  0xb3   :  { %v1429_v35 = vadd.f32 %v2899_v22, %v1361_v34  ;;  %1240 = vmatmul.bf16.gmra.mxu2 %v1807_v31 }
  0xb4   :  { %v2906_v39 = vpop.f32.mrf.mxu3 }
  0xb5   :  { %v1493_v37 = vmax.f32 %v1429_v35, 0.0 }
  0xb6   :  { %v1201_v40 = vpop.f32.mrf.mxu2  ;;  %v865_v42 = vpop.f32.mrf.mxu0 }
  0xb7   :  { %v2291_v41 = vpack.c.bf16 %v1493_v37, %v1492_v36  ;;  %v1034_v43 = vpop.f32.mrf.mxu1  ;;  %v1202_v44 = vadd.f32 %v1201_v40, %v1033_v38 }
  0xb8   :  { %v1035_v54 = vadd.f32 %v1034_v43, %v865_v42 }
  0xb9   :  { %2292 = vst [vmem:[%s3568_s4] sm:$0xff] %v2291_v41   ;;  %v1362_v53 = vmul.f32 %v2869_v12, %v1202_v44 }
  0xbb   :  { %v1430_v0 = vadd.f32 %v2899_v22, %v1362_v53  ;;  %v1836_v53 = vld [vmem:[%s3565_s0 + $0x12c] sm:$0xf0] }
  0xbc   :  { %v2936_v55 = vpop.f32.mrf.mxu3 }
  0xbd   :  { %v1494_v3 = vmax.f32 %v1430_v0, 0.0 }
  0xbe   :  { %v1203_v56 = vpop.f32.mrf.mxu2  ;;  %v868_v60 = vpop.f32.mrf.mxu0 }
  0xbf   :  { %v1204_v59 = vadd.f32 %v1203_v56, %v1035_v54  ;;  %v1037_v63 = vpop.f32.mrf.mxu1  ;;  %v1842_v54 = vld [vmem:[%s3565_s0 + $0x128] sm:$0xf]  ;;  %v2206_v56 = vld [vmem:[%s3565_s0 + $0x130] sm:$0xf0] }
  0xc0   :  { %v1038_v5 = vadd.f32 %v1037_v63, %v868_v60 }
  0xc1   :  { %v1363_v1 = vmul.f32 %v2869_v12, %v1204_v59  ;;  %907 = vmatmul.bf16.gmra.mxu0 %v1811_v57  ;;  %1156 = vmatmul.bf16.gmra.mxu3 %v2007_v58 }
  0xc2   :  { %1076 = vmatmul.bf16.gmra.mxu1 %v1815_v61  ;;  %v1835_v61 = vor.u32 %v2205_v49, %v1834_v48 }
  0xc3   :  { %v1431_v2 = vadd.f32 %v2899_v22, %v1363_v1  ;;  %1245 = vmatmul.bf16.gmra.mxu2 %v1819_v62  ;;  %v2031_v62 = vor.u32 %v2252_v51, %v2028_v52  ;;  %v1839_v1 = vor.u32 %v2204_v50, %v1836_v53 }
  0xc4   :  { %v2941_v6 = vpop.f32.mrf.mxu3 }
  0xc5   :  { %v1495_v4 = vmax.f32 %v1431_v2, 0.0  ;;  %v1843_v2 = vor.u32 %v2206_v56, %v1842_v54  ;;  %v1858_v56 = vld [vmem:[%s3565_s0 + $0x150] sm:$0xf] }
  0xc6   :  { %v1206_v8 = vpop.f32.mrf.mxu2  ;;  %v870_v10 = vpop.f32.mrf.mxu0 }
  0xc7   :  { %v2296_v9 = vpack.c.bf16 %v1495_v4, %v1494_v3  ;;  %v1039_v11 = vpop.f32.mrf.mxu1  ;;  %v1207_v13 = vadd.f32 %v1206_v8, %v1038_v5 }
  0xc8   :  { %v1040_v25 = vadd.f32 %v1039_v11, %v870_v10 }
  0xc9   :  { %2448 = vst [vmem:[%s3568_s4 + $0x8] sm:$0xff] %v2296_v9   ;;  %v1364_v23 = vmul.f32 %v2869_v12, %v1207_v13 }
  0xcb   :  { %v1432_v35 = vadd.f32 %v2899_v22, %v1364_v23  ;;  %v2255_v23 = vld [vmem:[%s3565_s0 + $0x2bc] sm:$0xf] }
  0xcc   :  { %v2971_v26 = vpop.f32.mrf.mxu3 }
  0xcd   :  { %v1496_v38 = vmax.f32 %v1432_v35, 0.0 }
  0xce   :  { %v1208_v27 = vpop.f32.mrf.mxu2  ;;  %v873_v31 = vpop.f32.mrf.mxu0 }
  0xcf   :  { %v1209_v30 = vadd.f32 %v1208_v27, %v1040_v25  ;;  %v1042_v34 = vpop.f32.mrf.mxu1  ;;  %v2040_v25 = vld [vmem:[%s3565_s0 + $0x2c4] sm:$0xf0] }
  0xd0   :  { %v1043_v41 = vadd.f32 %v1042_v34, %v873_v31  ;;  %v1848_v27 = vld [vmem:[%s3565_s0 + $0x144] sm:$0xf0]  ;;  %v1847_v34 = vor.u32 %v2208_v20, %v1846_v19  ;;  %v2043_v35 = vor.u32 %v2255_v23, %v2040_v25 }
  0xd1   :  { %v1365_v36 = vmul.f32 %v2869_v12, %v1209_v30  ;;  %912 = vmatmul.bf16.gmra.mxu0 %v1823_v28  ;;  %1161 = vmatmul.bf16.gmra.mxu3 %v2019_v29  ;;  %v1854_v28 = vld [vmem:[%s3565_s0 + $0x140] sm:$0xf]  ;;  %v2209_v29 = vld [vmem:[%s3565_s0 + $0x148] sm:$0xf0] }
  0xd2   :  { %1081 = vmatmul.bf16.gmra.mxu1 %v1827_v32 }
  0xd3   :  { %v1433_v37 = vadd.f32 %v2899_v22, %v1365_v36  ;;  %1250 = vmatmul.bf16.gmra.mxu2 %v1831_v33 }
  0xd4   :  { %v2976_v42 = vpop.f32.mrf.mxu3 }
  0xd5   :  { %v1497_v40 = vmax.f32 %v1433_v37, 0.0 }
  0xd6   :  { %v1211_v43 = vpop.f32.mrf.mxu2  ;;  %v875_v45 = vpop.f32.mrf.mxu0 }
  0xd7   :  { %v2301_v44 = vpack.c.bf16 %v1497_v40, %v1496_v38  ;;  %v1044_v46 = vpop.f32.mrf.mxu1  ;;  %v1212_v47 = vadd.f32 %v1211_v43, %v1043_v41  ;;  %v1851_v38 = vor.u32 %v2207_v21, %v1848_v27  ;;  %v1855_v40 = vor.u32 %v2209_v29, %v1854_v28 }
  0xd8   :  { %v1045_v58 = vadd.f32 %v1044_v46, %v875_v45 }
  0xd9   :  { %2449 = vst [vmem:[%s3568_s4 + $0x10] sm:$0xff] %v2301_v44   ;;  %v1366_v57 = vmul.f32 %v2869_v12, %v1212_v47 }
  0xdb   :  { %v1434_v4 = vadd.f32 %v2899_v22, %v1366_v57  ;;  %v2211_v57 = vld [vmem:[%s3565_s0 + $0x158] sm:$0xf0] }
  0xdc   :  { %v3006_v59 = vpop.f32.mrf.mxu3 }
  0xdd   :  { %v1498_v9 = vmax.f32 %v1434_v4, 0.0 }
  0xde   :  { %v1213_v60 = vpop.f32.mrf.mxu2  ;;  %v878_v0 = vpop.f32.mrf.mxu0 }
  0xdf   :  { %v1214_v63 = vadd.f32 %v1213_v60, %v1045_v58  ;;  %v1047_v3 = vpop.f32.mrf.mxu1  ;;  %v2210_v58 = vld [vmem:[%s3565_s0 + $0x154] sm:$0xf] }
  0xe0   :  { %v1048_v11 = vadd.f32 %v1047_v3, %v878_v0  ;;  %v2258_v60 = vld [vmem:[%s3565_s0 + $0x2d4] sm:$0xf]  ;;  %v2212_v0 = vld [vmem:[%s3565_s0 + $0x160] sm:$0xf0] }
  0xe1   :  { %v1367_v5 = vmul.f32 %v2869_v12, %v1214_v63  ;;  %917 = vmatmul.bf16.gmra.mxu0 %v1835_v61  ;;  %1166 = vmatmul.bf16.gmra.mxu3 %v2031_v62  ;;  %v2052_v61 = vld [vmem:[%s3565_s0 + $0x2dc] sm:$0xf0]  ;;  %v1866_v63 = vld [vmem:[%s3565_s0 + $0x158] sm:$0xf] }
  0xe2   :  { %1086 = vmatmul.bf16.gmra.mxu1 %v1839_v1  ;;  %v1860_v62 = vld [vmem:[%s3565_s0 + $0x15c] sm:$0xf0] }
  0xe3   :  { %v1435_v8 = vadd.f32 %v2899_v22, %v1367_v5  ;;  %1255 = vmatmul.bf16.gmra.mxu2 %v1843_v2  ;;  %v1859_v5 = vor.u32 %v2211_v57, %v1858_v56 }
  0xe4   :  { %v3011_v13 = vpop.f32.mrf.mxu3 }
  0xe5   :  { %v1499_v10 = vmax.f32 %v1435_v8, 0.0  ;;  %v2055_v8 = vor.u32 %v2258_v60, %v2052_v61 }
  0xe6   :  { %v1216_v14 = vpop.f32.mrf.mxu2  ;;  %v880_v16 = vpop.f32.mrf.mxu0 }
  0xe7   :  { %v2306_v15 = vpack.c.bf16 %v1499_v10, %v1498_v9  ;;  %v1049_v17 = vpop.f32.mrf.mxu1  ;;  %v1217_v18 = vadd.f32 %v1216_v14, %v1048_v11  ;;  %v1863_v11 = vor.u32 %v2210_v58, %v1860_v62  ;;  %v1867_v14 = vor.u32 %v2212_v0, %v1866_v63 }
  0xe8   :  { %v1050_v31 = vadd.f32 %v1049_v17, %v880_v16 }
  0xe9   :  { %2450 = vst [vmem:[%s3568_s4 + $0x18] sm:$0xff] %v2306_v15   ;;  %v1368_v30 = vmul.f32 %v2869_v12, %v1217_v18 }
  0xeb   :  { %v1436_v43 = vadd.f32 %v2899_v22, %v1368_v30 }
  0xec   :  { %v3041_v32 = vpop.f32.mrf.mxu3 }
  0xed   :  { %v1500_v46 = vmax.f32 %v1436_v43, 0.0 }
  0xee   :  { %v1218_v33 = vpop.f32.mrf.mxu2  ;;  %v883_v37 = vpop.f32.mrf.mxu0 }
  0xef   :  { %v1219_v36 = vadd.f32 %v1218_v33, %v1050_v31  ;;  %v1052_v41 = vpop.f32.mrf.mxu1  ;;  %v1870_v31 = vld [vmem:[%s3565_s0 + $0x168] sm:$0xf]  ;;  %v2214_v33 = vld [vmem:[%s3565_s0 + $0x170] sm:$0xf0] }
  0xf0   :  { %v1053_v48 = vadd.f32 %v1052_v41, %v883_v37  ;;  %v1872_v37 = vld [vmem:[%s3565_s0 + $0x174] sm:$0xf0] }
  0xf1   :  { %v1369_v44 = vmul.f32 %v2869_v12, %v1219_v36  ;;  %922 = vmatmul.bf16.gmra.mxu0 %v1847_v34  ;;  %1171 = vmatmul.bf16.gmra.mxu3 %v2043_v35  ;;  %v2213_v34 = vld [vmem:[%s3565_s0 + $0x16c] sm:$0xf]  ;;  %v2064_v36 = vld [vmem:[%s3565_s0 + $0x2f4] sm:$0xf0] }
  0xf2   :  { %1091 = vmatmul.bf16.gmra.mxu1 %v1851_v38  ;;  %v2261_v35 = vld [vmem:[%s3565_s0 + $0x2ec] sm:$0xf]  ;;  %v1878_v38 = vld [vmem:[%s3565_s0 + $0x170] sm:$0xf] }
  0xf3   :  { %v1437_v45 = vadd.f32 %v2899_v22, %v1369_v44  ;;  %1260 = vmatmul.bf16.gmra.mxu2 %v1855_v40  ;;  %v2215_v40 = vld [vmem:[%s3565_s0 + $0x178] sm:$0xf0] }
  0xf4   :  { %v3046_v49 = vpop.f32.mrf.mxu3 }
  0xf5   :  { %v1501_v47 = vmax.f32 %v1437_v45, 0.0 }
  0xf6   :  { %v1221_v50 = vpop.f32.mrf.mxu2  ;;  %v885_v52 = vpop.f32.mrf.mxu0 }
  0xf7   :  { %v2311_v51 = vpack.c.bf16 %v1501_v47, %v1500_v46  ;;  %v1054_v53 = vpop.f32.mrf.mxu1  ;;  %v1222_v54 = vadd.f32 %v1221_v50, %v1053_v48  ;;  %v1871_v46 = vor.u32 %v2214_v33, %v1870_v31  ;;  %v2067_v47 = vor.u32 %v2261_v35, %v2064_v36 }
  0xf8   :  { %v1055_v2 = vadd.f32 %v1054_v53, %v885_v52  ;;  %v1879_v52 = vor.u32 %v2215_v40, %v1878_v38 }
  0xf9   :  { %2451 = vst [vmem:[%s3568_s4 + $0x20] sm:$0xff] %v2311_v51   ;;  %v1370_v1 = vmul.f32 %v2869_v12, %v1222_v54  ;;  %v1875_v51 = vor.u32 %v2213_v34, %v1872_v37 }
  0xfb   :  { %v1438_v16 = vadd.f32 %v2899_v22, %v1370_v1 }
  0xfc   :  { %v3076_v3 = vpop.f32.mrf.mxu3 }
  0xfd   :  { %v1502_v19 = vmax.f32 %v1438_v16, 0.0  ;;  %v2218_v16 = vld [vmem:[%s3565_s0 + $0x190] sm:$0xf0] }
  0xfe   :  { %v1223_v4 = vpop.f32.mrf.mxu2  ;;  %v888_v10 = vpop.f32.mrf.mxu0 }
  0xff   :  { %v1224_v9 = vadd.f32 %v1223_v4, %v1055_v2  ;;  %v1057_v15 = vpop.f32.mrf.mxu1 }
 0x100   :  { %v1058_v21 = vadd.f32 %v1057_v15, %v888_v10  ;;  %v1986_v10 = vld [vmem:[%s3565_s0 + $0x248] sm:$0xf] }
 0x101   :  { %v1371_v17 = vmul.f32 %v2869_v12, %v1224_v9  ;;  %927 = vmatmul.bf16.gmra.mxu0 %v1859_v5  ;;  %1176 = vmatmul.bf16.gmra.mxu3 %v2055_v8  ;;  %v1882_v5 = vld [vmem:[%s3565_s0 + $0x180] sm:$0xf]  ;;  %v2217_v8 = vld [vmem:[%s3565_s0 + $0x188] sm:$0xf0]  ;;  %v2216_v9 = vld [vmem:[%s3565_s0 + $0x184] sm:$0xf] }
 0x102   :  { %1096 = vmatmul.bf16.gmra.mxu1 %v1863_v11  ;;  %v2242_v11 = vld [vmem:[%s3565_s0 + $0x250] sm:$0xf0]  ;;  %v1890_v15 = vld [vmem:[%s3565_s0 + $0x188] sm:$0xf] }
 0x103   :  { %v1439_v18 = vadd.f32 %v2899_v22, %v1371_v17  ;;  %1265 = vmatmul.bf16.gmra.mxu2 %v1867_v14  ;;  %v1884_v14 = vld [vmem:[%s3565_s0 + $0x18c] sm:$0xf0] }
 0x104   :  { %v3081_v23 = vpop.f32.mrf.mxu3 }
 0x105   :  { %v1503_v20 = vmax.f32 %v1439_v18, 0.0 }
 0x106   :  { %v1226_v25 = vpop.f32.mrf.mxu2  ;;  %v890_v28 = vpop.f32.mrf.mxu0 }
 0x107   :  { %v2316_v27 = vpack.c.bf16 %v1503_v20, %v1502_v19  ;;  %v1059_v29 = vpop.f32.mrf.mxu1  ;;  %v1227_v30 = vadd.f32 %v1226_v25, %v1058_v21  ;;  %v1883_v21 = vor.u32 %v2217_v8, %v1882_v5  ;;  %v1987_v25 = vor.u32 %v2242_v11, %v1986_v10 }
 0x108   :  { %v1060_v43 = vadd.f32 %v1059_v29, %v890_v28  ;;  %v1887_v29 = vor.u32 %v2216_v9, %v1884_v14 }
 0x109   :  { %2452 = vst [vmem:[%s3568_s4 + $0x28] sm:$0xff] %v2316_v27   ;;  %v1372_v41 = vmul.f32 %v2869_v12, %v1227_v30  ;;  %v1891_v30 = vor.u32 %v2218_v16, %v1890_v15 }
 0x10b   :  { %v1440_v54 = vadd.f32 %v2899_v22, %v1372_v41 }
 0x10c   :  { %v3111_v44 = vpop.f32.mrf.mxu3 }
 0x10d   :  { %v1504_v58 = vmax.f32 %v1440_v54, 0.0  ;;  %v1896_v54 = vld [vmem:[%s3565_s0 + $0x1a4] sm:$0xf0] }
 0x10e   :  { %v1228_v45 = vpop.f32.mrf.mxu2  ;;  %v893_v50 = vpop.f32.mrf.mxu0 }
 0x10f   :  { %v1229_v48 = vadd.f32 %v1228_v45, %v1060_v43  ;;  %v1062_v53 = vpop.f32.mrf.mxu1 }
 0x110   :  { %v1063_v61 = vadd.f32 %v1062_v53, %v893_v50  ;;  %v2220_v50 = vld [vmem:[%s3565_s0 + $0x1a0] sm:$0xf0]  ;;  %v2245_v53 = vld [vmem:[%s3565_s0 + $0x268] sm:$0xf0] }
 0x111   :  { %v1373_v56 = vmul.f32 %v2869_v12, %v1229_v48  ;;  %932 = vmatmul.bf16.gmra.mxu0 %v1871_v46  ;;  %1181 = vmatmul.bf16.gmra.mxu3 %v2067_v47  ;;  %v1894_v48 = vld [vmem:[%s3565_s0 + $0x198] sm:$0xf] }
 0x112   :  { %1101 = vmatmul.bf16.gmra.mxu1 %v1875_v51  ;;  %v2219_v51 = vld [vmem:[%s3565_s0 + $0x19c] sm:$0xf] }
 0x113   :  { %v1441_v57 = vadd.f32 %v2899_v22, %v1373_v56  ;;  %1270 = vmatmul.bf16.gmra.mxu2 %v1879_v52  ;;  %v1998_v52 = vld [vmem:[%s3565_s0 + $0x260] sm:$0xf]  ;;  %v1899_v5 = vor.u32 %v2219_v51, %v1896_v54 }
 0x114   :  { %v3116_v62 = vpop.f32.mrf.mxu3  ;;  %v1902_v56 = vld [vmem:[%s3565_s0 + $0x1a0] sm:$0xf] }
 0x115   :  { %v1505_v60 = vmax.f32 %v1441_v57, 0.0  ;;  %v2221_v57 = vld [vmem:[%s3565_s0 + $0x1a8] sm:$0xf0] }
 0x116   :  { %v1231_v63 = vpop.f32.mrf.mxu2  ;;  %v895_v1 = vpop.f32.mrf.mxu0  ;;  %v1903_v8 = vor.u32 %v2221_v57, %v1902_v56 }
 0x117   :  { %v2321_v0 = vpack.c.bf16 %v1505_v60, %v1504_v58  ;;  %v1064_v2 = vpop.f32.mrf.mxu1  ;;  %v1232_v4 = vadd.f32 %v1231_v63, %v1063_v61 }
 0x118   :  { %v1065_v18 = vadd.f32 %v1064_v2, %v895_v1  ;;  %v1999_v1 = vor.u32 %v2245_v53, %v1998_v52 }
 0x119   :  { %2453 = vst [vmem:[%s3568_s4 + $0x30] sm:$0xff] %v2321_v0   ;;  %v1374_v17 = vmul.f32 %v2869_v12, %v1232_v4  ;;  %v1895_v0 = vor.u32 %v2220_v50, %v1894_v48 }
 0x11b   :  { %v1442_v33 = vadd.f32 %v2899_v22, %v1374_v17 }
 0x11c   :  { %v3146_v19 = vpop.f32.mrf.mxu3 }
 0x11d   :  { %v1506_v36 = vmax.f32 %v1442_v33, 0.0  ;;  %v2010_v33 = vld [vmem:[%s3565_s0 + $0x278] sm:$0xf] }
 0x11e   :  { %v1233_v20 = vpop.f32.mrf.mxu2  ;;  %v898_v28 = vpop.f32.mrf.mxu0 }
 0x11f   :  { %v1234_v27 = vadd.f32 %v1233_v20, %v1065_v18  ;;  %v1067_v31 = vpop.f32.mrf.mxu1 }
 0x120   :  { %v1068_v38 = vadd.f32 %v1067_v31, %v898_v28  ;;  %v2222_v31 = vld [vmem:[%s3565_s0 + $0x1b4] sm:$0xf] }
 0x121   :  { %v1375_v34 = vmul.f32 %v2869_v12, %v1234_v27  ;;  %937 = vmatmul.bf16.gmra.mxu0 %v1883_v21  ;;  %1315 = vmatmul.bf16.vlgmr.msra.gmra.mxu3 %v1987_v25 }
 0x122   :  { %1106 = vmatmul.bf16.gmra.mxu1 %v1887_v29  ;;  %v1906_v29 = vld [vmem:[%s3565_s0 + $0x1b0] sm:$0xf] }
 0x123   :  { %v1443_v35 = vadd.f32 %v2899_v22, %v1375_v34  ;;  %1275 = vmatmul.bf16.gmra.mxu2 %v1891_v30  ;;  %v2223_v30 = vld [vmem:[%s3565_s0 + $0x1b8] sm:$0xf0]  ;;  %v2248_v34 = vld [vmem:[%s3565_s0 + $0x280] sm:$0xf0] }
 0x124   :  { %v3151_v40 = vpop.f32.mrf.mxu3 }
 0x125   :  { %v1507_v37 = vmax.f32 %v1443_v35, 0.0  ;;  %v1908_v35 = vld [vmem:[%s3565_s0 + $0x1bc] sm:$0xf0] }
 0x126   :  { %v1236_v41 = vpop.f32.mrf.mxu2  ;;  %v900_v45 = vpop.f32.mrf.mxu0  ;;  %v1911_v51 = vor.u32 %v2222_v31, %v1908_v35 }
 0x127   :  { %v2326_v43 = vpack.c.bf16 %v1507_v37, %v1506_v36  ;;  %v1069_v46 = vpop.f32.mrf.mxu1  ;;  %v1237_v47 = vadd.f32 %v1236_v41, %v1068_v38  ;;  %v1914_v36 = vld [vmem:[%s3565_s0 + $0x1b8] sm:$0xf]  ;;  %v2224_v37 = vld [vmem:[%s3565_s0 + $0x1c0] sm:$0xf0] }
 0x128   :  { %v1070_v60 = vadd.f32 %v1069_v46, %v900_v45  ;;  %v1907_v46 = vor.u32 %v2223_v30, %v1906_v29  ;;  %v1915_v52 = vor.u32 %v2224_v37, %v1914_v36 }
 0x129   :  { %2454 = vst [vmem:[%s3568_s4 + $0x38] sm:$0xff] %v2326_v43   ;;  %v1376_v58 = vmul.f32 %v2869_v12, %v1237_v47  ;;  %v2011_v47 = vor.u32 %v2248_v34, %v2010_v33 }
 0x12b   :  { %v1444_v10 = vadd.f32 %v2899_v22, %v1376_v58 }
 0x12c   :  { %v3181_v61 = vpop.f32.mrf.mxu3 }
 0x12d   :  { %v1508_v15 = vmax.f32 %v1444_v10, 0.0  ;;  %v2226_v10 = vld [vmem:[%s3565_s0 + $0x1d0] sm:$0xf0] }
 0x12e   :  { %v1238_v63 = vpop.f32.mrf.mxu2  ;;  %v903_v4 = vpop.f32.mrf.mxu0 }
 0x12f   :  { %v1239_v2 = vadd.f32 %v1238_v63, %v1070_v60  ;;  %v1072_v9 = vpop.f32.mrf.mxu1 }
 0x130   :  { %v1073_v17 = vadd.f32 %v1072_v9, %v903_v4  ;;  %v1918_v9 = vld [vmem:[%s3565_s0 + $0x1c8] sm:$0xf] }
 0x131   :  { %v1377_v11 = vmul.f32 %v2869_v12, %v1239_v2  ;;  %942 = vmatmul.bf16.gmra.mxu0 %v1895_v0  ;;  %1320 = vmatmul.bf16.gmra.mxu3 %v1999_v1  ;;  %v1919_v29 = vor.u32 %v2226_v10, %v1918_v9 }
 0x132   :  { %1111 = vmatmul.bf16.gmra.mxu1 %v1899_v5 }
 0x133   :  { %v1445_v14 = vadd.f32 %v2899_v22, %v1377_v11  ;;  %1280 = vmatmul.bf16.gmra.mxu2 %v1903_v8  ;;  %v2225_v11 = vld [vmem:[%s3565_s0 + $0x1cc] sm:$0xf] }
 0x134   :  { %v3186_v18 = vpop.f32.mrf.mxu3 }
 0x135   :  { %v1509_v16 = vmax.f32 %v1445_v14, 0.0  ;;  %v2022_v14 = vld [vmem:[%s3565_s0 + $0x290] sm:$0xf] }
 0x136   :  { %v1241_v20 = vpop.f32.mrf.mxu2  ;;  %v905_v25 = vpop.f32.mrf.mxu0 }
 0x137   :  { %v2331_v21 = vpack.c.bf16 %v1509_v16, %v1508_v15  ;;  %v1074_v27 = vpop.f32.mrf.mxu1  ;;  %v1242_v28 = vadd.f32 %v1241_v20, %v1073_v17  ;;  %v2251_v15 = vld [vmem:[%s3565_s0 + $0x298] sm:$0xf0]  ;;  %v1920_v16 = vld [vmem:[%s3565_s0 + $0x1d4] sm:$0xf0]  ;;  %v1926_v17 = vld [vmem:[%s3565_s0 + $0x1d0] sm:$0xf] }
 0x138   :  { %v1075_v41 = vadd.f32 %v1074_v27, %v905_v25  ;;  %v2227_v20 = vld [vmem:[%s3565_s0 + $0x1d8] sm:$0xf0]  ;;  %v2023_v30 = vor.u32 %v2251_v15, %v2022_v14  ;;  %v1923_v34 = vor.u32 %v2225_v11, %v1920_v16 }
 0x139   :  { %2455 = vst [vmem:[%s3568_s4 + $0x40] sm:$0xff] %v2331_v21   ;;  %v1378_v38 = vmul.f32 %v2869_v12, %v1242_v28  ;;  %v1927_v35 = vor.u32 %v2227_v20, %v1926_v17 }
 0x13b   :  { %v1446_v54 = vadd.f32 %v2899_v22, %v1378_v38 }
 0x13c   :  { %v3216_v43 = vpop.f32.mrf.mxu3 }
 0x13d   :  { %v1510_v58 = vmax.f32 %v1446_v54, 0.0 }
 0x13e   :  { %v1243_v45 = vpop.f32.mrf.mxu2  ;;  %v908_v50 = vpop.f32.mrf.mxu0 }
 0x13f   :  { %v1244_v48 = vadd.f32 %v1243_v45, %v1075_v41  ;;  %v1077_v53 = vpop.f32.mrf.mxu1 }
 0x140   :  { %v1078_v63 = vadd.f32 %v1077_v53, %v908_v50 }
 0x141   :  { %v1379_v56 = vmul.f32 %v2869_v12, %v1244_v48  ;;  %947 = vmatmul.bf16.gmra.mxu0 %v1907_v46  ;;  %1325 = vmatmul.bf16.gmra.mxu3 %v2011_v47 }
 0x142   :  { %1116 = vmatmul.bf16.gmra.mxu1 %v1911_v51 }
 0x143   :  { %v1447_v57 = vadd.f32 %v2899_v22, %v1379_v56  ;;  %1285 = vmatmul.bf16.gmra.mxu2 %v1915_v52  ;;  %v1930_v56 = vld [vmem:[%s3565_s0 + $0x1e0] sm:$0xf] }
 0x144   :  { %v3221_v0 = vpop.f32.mrf.mxu3 }
 0x145   :  { %v1511_v60 = vmax.f32 %v1447_v57, 0.0  ;;  %v2229_v57 = vld [vmem:[%s3565_s0 + $0x1e8] sm:$0xf0] }
 0x146   :  { %v1246_v1 = vpop.f32.mrf.mxu2  ;;  %v910_v4 = vpop.f32.mrf.mxu0  ;;  %v1931_v11 = vor.u32 %v2229_v57, %v1930_v56 }
 0x147   :  { %v2336_v2 = vpack.c.bf16 %v1511_v60, %v1510_v58  ;;  %v1079_v5 = vpop.f32.mrf.mxu1  ;;  %v1247_v8 = vadd.f32 %v1246_v1, %v1078_v63  ;;  %v2228_v58 = vld [vmem:[%s3565_s0 + $0x1e4] sm:$0xf]  ;;  %v2034_v60 = vld [vmem:[%s3565_s0 + $0x2a8] sm:$0xf]  ;;  %v2254_v63 = vld [vmem:[%s3565_s0 + $0x2b0] sm:$0xf0] }
 0x148   :  { %v1080_v25 = vadd.f32 %v1079_v5, %v910_v4  ;;  %v1932_v1 = vld [vmem:[%s3565_s0 + $0x1ec] sm:$0xf0]  ;;  %v2230_v4 = vld [vmem:[%s3565_s0 + $0x1f0] sm:$0xf0]  ;;  %v2035_v14 = vor.u32 %v2254_v63, %v2034_v60 }
 0x149   :  { %2456 = vst [vmem:[%s3568_s4 + $0x48] sm:$0xff] %v2336_v2   ;;  %v1380_v21 = vmul.f32 %v2869_v12, %v1247_v8  ;;  %v1938_v2 = vld [vmem:[%s3565_s0 + $0x1e8] sm:$0xf]  ;;  %v1935_v17 = vor.u32 %v2228_v58, %v1932_v1 }
 0x14a   :  { %v1939_v20 = vor.u32 %v2230_v4, %v1938_v2 }
 0x14b   :  { %v1448_v37 = vadd.f32 %v2899_v22, %v1380_v21 }
 0x14c   :  { %v3251_v27 = vpop.f32.mrf.mxu3 }
 0x14d   :  { %v1512_v45 = vmax.f32 %v1448_v37, 0.0 }
 0x14e   :  { %v1248_v28 = vpop.f32.mrf.mxu2  ;;  %v913_v33 = vpop.f32.mrf.mxu0 }
 0x14f   :  { %v1249_v31 = vadd.f32 %v1248_v28, %v1080_v25  ;;  %v1082_v36 = vpop.f32.mrf.mxu1 }
 0x150   :  { %v1083_v47 = vadd.f32 %v1082_v36, %v913_v33 }
 0x151   :  { %v1381_v38 = vmul.f32 %v2869_v12, %v1249_v31  ;;  %952 = vmatmul.bf16.gmra.mxu0 %v1919_v29  ;;  %1330 = vmatmul.bf16.gmra.mxu3 %v2023_v30 }
 0x152   :  { %1121 = vmatmul.bf16.gmra.mxu1 %v1923_v34 }
 0x153   :  { %v1449_v41 = vadd.f32 %v2899_v22, %v1381_v38  ;;  %1290 = vmatmul.bf16.gmra.mxu2 %v1927_v35 }
 0x154   :  { %v3256_v48 = vpop.f32.mrf.mxu3 }
 0x155   :  { %v1513_v46 = vmax.f32 %v1449_v41, 0.0 }
 0x156   :  { %v1251_v50 = vpop.f32.mrf.mxu2  ;;  %v915_v52 = vpop.f32.mrf.mxu0 }
 0x157   :  { %v2341_v51 = vpack.c.bf16 %v1513_v46, %v1512_v45  ;;  %v1084_v53 = vpop.f32.mrf.mxu1  ;;  %v1252_v54 = vadd.f32 %v1251_v50, %v1083_v47  ;;  %v1942_v45 = vld [vmem:[%s3565_s0 + $0x1f8] sm:$0xf]  ;;  %v2232_v46 = vld [vmem:[%s3565_s0 + $0x200] sm:$0xf0]  ;;  %v2231_v47 = vld [vmem:[%s3565_s0 + $0x1fc] sm:$0xf] }
 0x158   :  { %v1085_v8 = vadd.f32 %v1084_v53, %v915_v52  ;;  %v2046_v50 = vld [vmem:[%s3565_s0 + $0x2c0] sm:$0xf]  ;;  %v1944_v52 = vld [vmem:[%s3565_s0 + $0x204] sm:$0xf0]  ;;  %v1943_v63 = vor.u32 %v2232_v46, %v1942_v45  ;;  %v1962_v45 = vld [vmem:[%s3565_s0 + $0x218] sm:$0xf] }
 0x159   :  { %2457 = vst [vmem:[%s3568_s4 + $0x50] sm:$0xff] %v2341_v51   ;;  %v1382_v5 = vmul.f32 %v2869_v12, %v1252_v54  ;;  %v2257_v51 = vld [vmem:[%s3565_s0 + $0x2c8] sm:$0xf0]  ;;  %v1950_v53 = vld [vmem:[%s3565_s0 + $0x200] sm:$0xf] }
 0x15a   :  { %v2233_v54 = vld [vmem:[%s3565_s0 + $0x208] sm:$0xf0]  ;;  %v2047_v1 = vor.u32 %v2257_v51, %v2046_v50  ;;  %v2236_v46 = vld [vmem:[%s3565_s0 + $0x220] sm:$0xf0] }
 0x15b   :  { %v1450_v25 = vadd.f32 %v2899_v22, %v1382_v5  ;;  %v1947_v5 = vor.u32 %v2231_v47, %v1944_v52 }
 0x15c   :  { %v3286_v9 = vpop.f32.mrf.mxu3 }
 0x15d   :  { %v1514_v30 = vmax.f32 %v1450_v25, 0.0 }
 0x15e   :  { %v1253_v10 = vpop.f32.mrf.mxu2  ;;  %v918_v16 = vpop.f32.mrf.mxu0 }
 0x15f   :  { %v1254_v15 = vadd.f32 %v1253_v10, %v1085_v8  ;;  %v1087_v21 = vpop.f32.mrf.mxu1  ;;  %v1951_v8 = vor.u32 %v2233_v54, %v1950_v53 }
 0x160   :  { %v1088_v33 = vadd.f32 %v1087_v21, %v918_v16 }
 0x161   :  { %v1383_v28 = vmul.f32 %v2869_v12, %v1254_v15  ;;  %957 = vmatmul.bf16.gmra.mxu0 %v1931_v11  ;;  %1335 = vmatmul.bf16.gmra.mxu3 %v2035_v14 }
 0x162   :  { %1126 = vmatmul.bf16.gmra.mxu1 %v1935_v17 }
 0x163   :  { %v1451_v29 = vadd.f32 %v2899_v22, %v1383_v28  ;;  %1295 = vmatmul.bf16.gmra.mxu2 %v1939_v20 }
 0x164   :  { %v3291_v34 = vpop.f32.mrf.mxu3 }
 0x165   :  { %v1515_v31 = vmax.f32 %v1451_v29, 0.0 }
 0x166   :  { %v1256_v35 = vpop.f32.mrf.mxu2  ;;  %v920_v37 = vpop.f32.mrf.mxu0 }
 0x167   :  { %v2346_v36 = vpack.c.bf16 %v1515_v31, %v1514_v30  ;;  %v1089_v38 = vpop.f32.mrf.mxu1  ;;  %v1257_v41 = vadd.f32 %v1256_v35, %v1088_v33  ;;  %v1954_v33 = vld [vmem:[%s3565_s0 + $0x210] sm:$0xf]  ;;  %v2235_v35 = vld [vmem:[%s3565_s0 + $0x218] sm:$0xf0] }
 0x168   :  { %v1090_v57 = vadd.f32 %v1089_v38, %v920_v37  ;;  %v2058_v37 = vld [vmem:[%s3565_s0 + $0x2d8] sm:$0xf]  ;;  %v2260_v38 = vld [vmem:[%s3565_s0 + $0x2e0] sm:$0xf0]  ;;  %v1955_v53 = vor.u32 %v2235_v35, %v1954_v33  ;;  %v1974_v33 = vld [vmem:[%s3565_s0 + $0x230] sm:$0xf] }
 0x169   :  { %2458 = vst [vmem:[%s3568_s4 + $0x58] sm:$0xff] %v2346_v36   ;;  %v1384_v56 = vmul.f32 %v2869_v12, %v1257_v41  ;;  %v2234_v36 = vld [vmem:[%s3565_s0 + $0x214] sm:$0xf]  ;;  %v1956_v41 = vld [vmem:[%s3565_s0 + $0x21c] sm:$0xf0]  ;;  %v2059_v54 = vor.u32 %v2260_v38, %v2058_v37 }
 0x16a   :  { %v2239_v35 = vld [vmem:[%s3565_s0 + $0x238] sm:$0xf0] }
 0x16b   :  { %v1452_v11 = vadd.f32 %v2899_v22, %v1384_v56 }
 0x16c   :  { %v3321_v58 = vpop.f32.mrf.mxu3 }
 0x16d   :  { %v1516_v16 = vmax.f32 %v1452_v11, 0.0 }
 0x16e   :  { %v1258_v60 = vpop.f32.mrf.mxu2  ;;  %v923_v4 = vpop.f32.mrf.mxu0 }
 0x16f   :  { %v1259_v2 = vadd.f32 %v1258_v60, %v1090_v57  ;;  %v1092_v10 = vpop.f32.mrf.mxu1  ;;  %v1959_v60 = vor.u32 %v2234_v36, %v1956_v41  ;;  %v3393_v36 = vld [vmem:[%s3566_s2] ss:$0 sm:$0xff] }
 0x170   :  { %v1093_v20 = vadd.f32 %v1092_v10, %v923_v4 }
 0x171   :  { %v1385_v14 = vmul.f32 %v2869_v12, %v1259_v2  ;;  %962 = vmatmul.bf16.gmra.mxu0 %v1943_v63  ;;  %1340 = vmatmul.bf16.gmra.mxu3 %v2047_v1  ;;  %v1963_v63 = vor.u32 %v2236_v46, %v1962_v45 }
 0x172   :  { %1131 = vmatmul.bf16.gmra.mxu1 %v1947_v5 }
 0x173   :  { %v1453_v15 = vadd.f32 %v2899_v22, %v1385_v14  ;;  %1300 = vmatmul.bf16.gmra.mxu2 %v1951_v8 }
 0x174   :  { %v3326_v21 = vpop.f32.mrf.mxu3 }
 0x175   :  { %v1517_v17 = vmax.f32 %v1453_v15, 0.0 }
 0x176   :  { %v1261_v25 = vpop.f32.mrf.mxu2  ;;  %v925_v29 = vpop.f32.mrf.mxu0 }
 0x177   :  { %v2351_v28 = vpack.c.bf16 %v1517_v17, %v1516_v16  ;;  %v1094_v30 = vpop.f32.mrf.mxu1  ;;  %v1262_v31 = vadd.f32 %v1261_v25, %v1093_v20  ;;  %v2238_v25 = vld [vmem:[%s3565_s0 + $0x230] sm:$0xf0] }
 0x178   :  { %v1095_v50 = vadd.f32 %v1094_v30, %v925_v29  ;;  %v2070_v29 = vld [vmem:[%s3565_s0 + $0x2f0] sm:$0xf]  ;;  %v2263_v30 = vld [vmem:[%s3565_s0 + $0x2f8] sm:$0xf0] }
 0x179   :  { %2459 = vst [vmem:[%s3568_s4 + $0x60] sm:$0xff] %v2351_v28   ;;  %v1386_v47 = vmul.f32 %v2869_v12, %v1262_v31  ;;  %v2237_v28 = vld [vmem:[%s3565_s0 + $0x22c] sm:$0xf]  ;;  %v1968_v31 = vld [vmem:[%s3565_s0 + $0x234] sm:$0xf0] }
 0x17b   :  { %v1454_v2 = vadd.f32 %v2899_v22, %v1386_v47  ;;  %v2071_v47 = vor.u32 %v2263_v30, %v2070_v29 }
 0x17c   :  { %v3356_v51 = vpop.f32.mrf.mxu3 }
 0x17d   :  { %v1518_v8 = vmax.f32 %v1454_v2, 0.0 }
 0x17e   :  { %v1263_v52 = vpop.f32.mrf.mxu2  ;;  %v928_v57 = vpop.f32.mrf.mxu0 }
 0x17f   :  { %v1264_v56 = vadd.f32 %v1263_v52, %v1095_v50  ;;  %v1097_v1 = vpop.f32.mrf.mxu1 }
 0x180   :  { %v1098_v11 = vadd.f32 %v1097_v1, %v928_v57  ;;  %v3401_v57 = vld [vmem:[%s3567_s3] ss:$0 sm:$0xff] }
 0x181   :  { %v1387_v4 = vmul.f32 %v2869_v12, %v1264_v56  ;;  %967 = vmatmul.bf16.gmra.mxu0 %v1955_v53  ;;  %1345 = vmatmul.bf16.gmra.mxu3 %v2059_v54  ;;  %v1971_v53 = vor.u32 %v2237_v28, %v1968_v31  ;;  %v1975_v54 = vor.u32 %v2239_v35, %v1974_v33 }
 0x182   :  { %1136 = vmatmul.bf16.gmra.mxu1 %v1959_v60 }
 0x183   :  { %v1455_v5 = vadd.f32 %v2899_v22, %v1387_v4  ;;  %1305 = vmatmul.bf16.gmra.mxu2 %v1963_v63  ;;  %v1966_v22 = vld [vmem:[%s3565_s0 + $0x228] sm:$0xf] }
 0x184   :  { %v3361_v14 = vpop.f32.mrf.mxu3  ;;  %v1967_v46 = vor.u32 %v2238_v25, %v1966_v22 }
 0x185   :  { %v1519_v10 = vmax.f32 %v1455_v5, 0.0 }
 0x186   :  { %v1266_v15 = vpop.f32.mrf.mxu2  ;;  %v930_v17 = vpop.f32.mrf.mxu0 }
 0x187   :  { %v2356_v16 = vpack.c.bf16 %v1519_v10, %v1518_v8  ;;  %v1099_v20 = vpop.f32.mrf.mxu1  ;;  %v1267_v12 = vadd.f32 %v1266_v15, %v1098_v11 }
 0x188   :  { %v1100_v38 = vadd.f32 %v1099_v20, %v930_v17 }
 0x189   :  { %2460 = vst [vmem:[%s3568_s4 + $0x68] sm:$0xff] %v2356_v16   ;;  %v1388_v37 = vmul.f32 %v3393_v36, %v1267_v12 }
 0x18b   :  { %v1456_v60 = vadd.f32 %v3401_v57, %v1388_v37 }
 0x18c   :  { %v3396_v41 = vpop.f32.mrf.mxu3 }
 0x18d   :  { %v1520_v2 = vmax.f32 %v1456_v60, 0.0 }
 0x18e   :  { %v1268_v45 = vpop.f32.mrf.mxu2  ;;  %v933_v52 = vpop.f32.mrf.mxu0 }
 0x18f   :  { %v1269_v50 = vadd.f32 %v1268_v45, %v1100_v38  ;;  %v1102_v56 = vpop.f32.mrf.mxu1 }
 0x190   :  { %v1103_v5 = vadd.f32 %v1102_v56, %v933_v52 }
 0x191   :  { %v1389_v63 = vmul.f32 %v3393_v36, %v1269_v50  ;;  %972 = vmatmul.bf16.gmra.mxu0 %v1967_v46  ;;  %1350 = vmatmul.bf16.gmra.mxu3 %v2071_v47  ;;  %v1148_v47 = vadd.f32 %v3151_v40, %v2864_v7 }
 0x192   :  { %1141 = vmatmul.bf16.gmra.mxu1 %v1971_v53 }
 0x193   :  { %v1457_v1 = vadd.f32 %v3401_v57, %v1389_v63  ;;  %1310 = vmatmul.bf16.gmra.mxu2 %v1975_v54  ;;  %v1150_v63 = vadd.f32 %v3181_v61, %v2901_v24 }
 0x194   :  { %v3406_v8 = vpop.f32.mrf.mxu3 }
 0x195   :  { %v1521_v4 = vmax.f32 %v1457_v1, 0.0 }
 0x196   :  { %v1271_v10 = vpop.f32.mrf.mxu2  ;;  %v935_v15 = vpop.f32.mrf.mxu0 }
 0x197   :  { %v2361_v11 = vpack.c.bf16 %v1521_v4, %v1520_v2  ;;  %v1104_v16 = vpop.f32.mrf.mxu1  ;;  %v1272_v17 = vadd.f32 %v1271_v10, %v1103_v5 }
 0x198   :  { %v1105_v12 = vadd.f32 %v1104_v16, %v935_v15 }
 0x199   :  { %2461 = vst [vmem:[%s3568_s4 + $0x70] sm:$0xff] %v2361_v11   ;;  %v1390_v20 = vmul.f32 %v3393_v36, %v1272_v17 }
 0x19b   :  { %v1458_v31 = vadd.f32 %v3401_v57, %v1390_v20 }
 0x19c   :  { %v3412_v22 = vpop.f32.mrf.mxu3 }
 0x19d   :  { %v1522_v37 = vmax.f32 %v1458_v31, 0.0 }
 0x19e   :  { %v1273_v25 = vpop.f32.mrf.mxu2  ;;  %v938_v29 = vpop.f32.mrf.mxu0 }
 0x19f   :  { %v1274_v28 = vadd.f32 %v1273_v25, %v1105_v12  ;;  %v1107_v30 = vpop.f32.mrf.mxu1 }
 0x1a0   :  { %v1108_v45 = vadd.f32 %v1107_v30, %v938_v29 }
 0x1a1   :  { %v1391_v33 = vmul.f32 %v3393_v36, %v1274_v28 }
 0x1a3   :  { %v1459_v35 = vadd.f32 %v3401_v57, %v1391_v33 }
 0x1a4   :  { %v1316_v46 = vpop.f32.mrf.mxu3 }
 0x1a5   :  { %v1523_v38 = vmax.f32 %v1459_v35, 0.0  ;;  %v1317_v54 = vadd.f32 %v1316_v46, %v1148_v47  ;;  %v1153_v35 = vadd.f32 %v3186_v18, %v2906_v39 }
 0x1a6   :  { %v1276_v50 = vpop.f32.mrf.mxu2  ;;  %v940_v53 = vpop.f32.mrf.mxu0 }
 0x1a7   :  { %v2366_v52 = vpack.c.bf16 %v1523_v38, %v1522_v37  ;;  %v1109_v56 = vpop.f32.mrf.mxu1  ;;  %v1277_v60 = vadd.f32 %v1276_v50, %v1108_v45  ;;  %v1408_v1 = vmul.f32 %v3393_v36, %v1317_v54 }
 0x1a8   :  { %v1110_v4 = vadd.f32 %v1109_v56, %v940_v53  ;;  %v1155_v53 = vadd.f32 %v3216_v43, %v2936_v55 }
 0x1a9   :  { %2462 = vst [vmem:[%s3568_s4 + $0x78] sm:$0xff] %v2366_v52   ;;  %v1392_v2 = vmul.f32 %v3393_v36, %v1277_v60  ;;  %v1476_v15 = vadd.f32 %v3401_v57, %v1408_v1 }
 0x1ab   :  { %v1460_v20 = vadd.f32 %v3401_v57, %v1392_v2  ;;  %v1540_v25 = vmax.f32 %v1476_v15, 0.0 }
 0x1ac   :  { %v1318_v5 = vpop.f32.mrf.mxu3 }
 0x1ad   :  { %v1319_v40 = vadd.f32 %v1318_v5, %v1150_v63  ;;  %v1524_v29 = vmax.f32 %v1460_v20, 0.0 }
 0x1ae   :  { %v1278_v7 = vpop.f32.mrf.mxu2  ;;  %v943_v11 = vpop.f32.mrf.mxu0 }
 0x1af   :  { %v1279_v10 = vadd.f32 %v1278_v7, %v1110_v4  ;;  %v1409_v16 = vmul.f32 %v3393_v36, %v1319_v40  ;;  %v1112_v17 = vpop.f32.mrf.mxu1 }
 0x1b0   :  { %v1113_v31 = vadd.f32 %v1112_v17, %v943_v11 }
 0x1b1   :  { %v1393_v12 = vmul.f32 %v3393_v36, %v1279_v10  ;;  %v1477_v24 = vadd.f32 %v3401_v57, %v1409_v16 }
 0x1b3   :  { %v1461_v61 = vadd.f32 %v3401_v57, %v1393_v12  ;;  %v1541_v28 = vmax.f32 %v1477_v24, 0.0  ;;  %v1158_v24 = vadd.f32 %v3221_v0, %v2941_v6 }
 0x1b4   :  { %v1321_v33 = vpop.f32.mrf.mxu3 }
 0x1b5   :  { %v1525_v30 = vmax.f32 %v1461_v61, 0.0  ;;  %v2411_v37 = vpack.c.bf16 %v1541_v28, %v1540_v25  ;;  %v1322_v47 = vadd.f32 %v1321_v33, %v1153_v35  ;;  %v1160_v35 = vadd.f32 %v3251_v27, %v2971_v26 }
 0x1b6   :  { %v1281_v38 = vpop.f32.mrf.mxu2  ;;  %v945_v46 = vpop.f32.mrf.mxu0 }
 0x1b7   :  { %v2371_v45 = vpack.c.bf16 %v1525_v30, %v1524_v29  ;;  %2471 = vst [vmem:[%s3568_s4 + $0xc0] sm:$0xff] %v2411_v37   ;;  %v1114_v50 = vpop.f32.mrf.mxu1  ;;  %v1282_v52 = vadd.f32 %v1281_v38, %v1113_v31  ;;  %v1410_v39 = vmul.f32 %v3393_v36, %v1322_v47 }
 0x1b8   :  { %v1115_v54 = vadd.f32 %v1114_v50, %v945_v46 }
 0x1b9   :  { %2463 = vst [vmem:[%s3568_s4 + $0x80] sm:$0xff] %v2371_v45   ;;  %v1394_v18 = vmul.f32 %v3393_v36, %v1282_v52  ;;  %v1478_v4 = vadd.f32 %v3401_v57, %v1410_v39 }
 0x1bb   :  { %v1462_v40 = vadd.f32 %v3401_v57, %v1394_v18  ;;  %v1542_v11 = vmax.f32 %v1478_v4, 0.0 }
 0x1bc   :  { %v1323_v56 = vpop.f32.mrf.mxu3 }
 0x1bd   :  { %v1324_v63 = vadd.f32 %v1323_v56, %v1155_v53  ;;  %v1526_v16 = vmax.f32 %v1462_v40, 0.0 }
 0x1be   :  { %v1283_v60 = vpop.f32.mrf.mxu2  ;;  %v948_v2 = vpop.f32.mrf.mxu0 }
 0x1bf   :  { %v1284_v1 = vadd.f32 %v1283_v60, %v1115_v54  ;;  %v1411_v5 = vmul.f32 %v3393_v36, %v1324_v63  ;;  %v1117_v7 = vpop.f32.mrf.mxu1 }
 0x1c0   :  { %v1118_v20 = vadd.f32 %v1117_v7, %v948_v2 }
 0x1c1   :  { %v1395_v10 = vmul.f32 %v3393_v36, %v1284_v1  ;;  %v1479_v55 = vadd.f32 %v3401_v57, %v1411_v5  ;;  %v1163_v5 = vadd.f32 %v3256_v48, %v2976_v42 }
 0x1c3   :  { %v1463_v43 = vadd.f32 %v3401_v57, %v1395_v10  ;;  %v1543_v15 = vmax.f32 %v1479_v55, 0.0 }
 0x1c4   :  { %v1326_v12 = vpop.f32.mrf.mxu3 }
 0x1c5   :  { %v1527_v17 = vmax.f32 %v1463_v43, 0.0  ;;  %v2416_v61 = vpack.c.bf16 %v1543_v15, %v1542_v11  ;;  %v1327_v30 = vadd.f32 %v1326_v12, %v1158_v24 }
 0x1c6   :  { %v1286_v25 = vpop.f32.mrf.mxu2  ;;  %v950_v29 = vpop.f32.mrf.mxu0 }
 0x1c7   :  { %v2376_v28 = vpack.c.bf16 %v1527_v17, %v1526_v16  ;;  %2472 = vst [vmem:[%s3568_s4 + $0xc8] sm:$0xff] %v2416_v61   ;;  %v1119_v31 = vpop.f32.mrf.mxu1  ;;  %v1287_v33 = vadd.f32 %v1286_v25, %v1118_v20  ;;  %v1412_v6 = vmul.f32 %v3393_v36, %v1327_v30  ;;  %v1165_v16 = vadd.f32 %v3286_v9, %v3006_v59 }
 0x1c8   :  { %v1120_v37 = vadd.f32 %v1119_v31, %v950_v29 }
 0x1c9   :  { %2464 = vst [vmem:[%s3568_s4 + $0x88] sm:$0xff] %v2376_v28   ;;  %v1396_v0 = vmul.f32 %v3393_v36, %v1287_v33  ;;  %v1480_v52 = vadd.f32 %v3401_v57, %v1412_v6 }
 0x1cb   :  { %v1464_v18 = vadd.f32 %v3401_v57, %v1396_v0  ;;  %v1544_v56 = vmax.f32 %v1480_v52, 0.0 }
 0x1cc   :  { %v1328_v38 = vpop.f32.mrf.mxu3 }
 0x1cd   :  { %v1329_v46 = vadd.f32 %v1328_v38, %v1160_v35  ;;  %v1528_v63 = vmax.f32 %v1464_v18, 0.0 }
 0x1ce   :  { %v1288_v45 = vpop.f32.mrf.mxu2  ;;  %v953_v50 = vpop.f32.mrf.mxu0 }
 0x1cf   :  { %v1289_v47 = vadd.f32 %v1288_v45, %v1120_v37  ;;  %v1413_v53 = vmul.f32 %v3393_v36, %v1329_v46  ;;  %v1122_v39 = vpop.f32.mrf.mxu1  ;;  %v1168_v46 = vadd.f32 %v3291_v34, %v3011_v13 }
 0x1d0   :  { %v1123_v2 = vadd.f32 %v1122_v39, %v953_v50 }
 0x1d1   :  { %v1397_v54 = vmul.f32 %v3393_v36, %v1289_v47  ;;  %v1481_v26 = vadd.f32 %v3401_v57, %v1413_v53 }
 0x1d3   :  { %v1465_v27 = vadd.f32 %v3401_v57, %v1397_v54  ;;  %v1545_v60 = vmax.f32 %v1481_v26, 0.0  ;;  %v1170_v26 = vadd.f32 %v3321_v58, %v3041_v32 }
 0x1d4   :  { %v1331_v4 = vpop.f32.mrf.mxu3 }
 0x1d5   :  { %v1529_v1 = vmax.f32 %v1465_v27, 0.0  ;;  %v2421_v7 = vpack.c.bf16 %v1545_v60, %v1544_v56  ;;  %v1332_v43 = vadd.f32 %v1331_v4, %v1163_v5 }
 0x1d6   :  { %v1291_v40 = vpop.f32.mrf.mxu2  ;;  %v955_v55 = vpop.f32.mrf.mxu0 }
 0x1d7   :  { %v2381_v10 = vpack.c.bf16 %v1529_v1, %v1528_v63  ;;  %2473 = vst [vmem:[%s3568_s4 + $0xd0] sm:$0xff] %v2421_v7   ;;  %v1124_v11 = vpop.f32.mrf.mxu1  ;;  %v1292_v15 = vadd.f32 %v1291_v40, %v1123_v2  ;;  %v1414_v42 = vmul.f32 %v3393_v36, %v1332_v43 }
 0x1d8   :  { %v1125_v17 = vadd.f32 %v1124_v11, %v955_v55 }
 0x1d9   :  { %2465 = vst [vmem:[%s3568_s4 + $0x90] sm:$0xff] %v2381_v10   ;;  %v1398_v48 = vmul.f32 %v3393_v36, %v1292_v15  ;;  %v1482_v28 = vadd.f32 %v3401_v57, %v1414_v42 }
 0x1db   :  { %v1466_v31 = vadd.f32 %v3401_v57, %v1398_v48  ;;  %v1546_v35 = vmax.f32 %v1482_v28, 0.0  ;;  %v1173_v48 = vadd.f32 %v3326_v21, %v3046_v49 }
 0x1dc   :  { %v1333_v20 = vpop.f32.mrf.mxu3 }
 0x1dd   :  { %v1334_v24 = vadd.f32 %v1333_v20, %v1165_v16  ;;  %v1530_v0 = vmax.f32 %v1466_v31, 0.0 }
 0x1de   :  { %v1293_v12 = vpop.f32.mrf.mxu2  ;;  %v958_v25 = vpop.f32.mrf.mxu0 }
 0x1df   :  { %v1294_v61 = vadd.f32 %v1293_v12, %v1125_v17  ;;  %v1415_v29 = vmul.f32 %v3393_v36, %v1334_v24  ;;  %v1127_v30 = vpop.f32.mrf.mxu1 }
 0x1e0   :  { %v1128_v38 = vadd.f32 %v1127_v30, %v958_v25 }
 0x1e1   :  { %v1399_v33 = vmul.f32 %v3393_v36, %v1294_v61  ;;  %v1483_v59 = vadd.f32 %v3401_v57, %v1415_v29  ;;  %v1175_v29 = vadd.f32 %v3356_v51, %v3076_v3 }
 0x1e3   :  { %v1467_v9 = vadd.f32 %v3401_v57, %v1399_v33  ;;  %v1547_v6 = vmax.f32 %v1483_v59, 0.0 }
 0x1e4   :  { %v1336_v45 = vpop.f32.mrf.mxu3 }
 0x1e5   :  { %v1531_v37 = vmax.f32 %v1467_v9, 0.0  ;;  %v2426_v47 = vpack.c.bf16 %v1547_v6, %v1546_v35  ;;  %v1337_v39 = vadd.f32 %v1336_v45, %v1168_v46 }
 0x1e6   :  { %v1296_v50 = vpop.f32.mrf.mxu2  ;;  %v960_v53 = vpop.f32.mrf.mxu0 }
 0x1e7   :  { %v2386_v52 = vpack.c.bf16 %v1531_v37, %v1530_v0  ;;  %2474 = vst [vmem:[%s3568_s4 + $0xd8] sm:$0xff] %v2426_v47   ;;  %v1129_v18 = vpop.f32.mrf.mxu1  ;;  %v1297_v54 = vadd.f32 %v1296_v50, %v1128_v38  ;;  %v1416_v13 = vmul.f32 %v3393_v36, %v1337_v39 }
 0x1e8   :  { %v1130_v27 = vadd.f32 %v1129_v18, %v960_v53  ;;  %v1178_v18 = vadd.f32 %v3361_v14, %v3081_v23 }
 0x1e9   :  { %2466 = vst [vmem:[%s3568_s4 + $0x98] sm:$0xff] %v2386_v52   ;;  %v1400_v34 = vmul.f32 %v3393_v36, %v1297_v54  ;;  %v1484_v4 = vadd.f32 %v3401_v57, %v1416_v13 }
 0x1eb   :  { %v1468_v40 = vadd.f32 %v3401_v57, %v1400_v34  ;;  %v1548_v55 = vmax.f32 %v1484_v4, 0.0 }
 0x1ec   :  { %v1338_v56 = vpop.f32.mrf.mxu3 }
 0x1ed   :  { %v1339_v63 = vadd.f32 %v1338_v56, %v1170_v26  ;;  %v1532_v11 = vmax.f32 %v1468_v40, 0.0 }
 0x1ee   :  { %v1298_v60 = vpop.f32.mrf.mxu2  ;;  %v963_v2 = vpop.f32.mrf.mxu0 }
 0x1ef   :  { %v1299_v1 = vadd.f32 %v1298_v60, %v1130_v27  ;;  %v1417_v5 = vmul.f32 %v3393_v36, %v1339_v63  ;;  %v1132_v7 = vpop.f32.mrf.mxu1  ;;  %v1180_v63 = vadd.f32 %v3396_v41, %v3111_v44 }
 0x1f0   :  { %v1133_v16 = vadd.f32 %v1132_v7, %v963_v2 }
 0x1f1   :  { %v1401_v10 = vmul.f32 %v3393_v36, %v1299_v1  ;;  %v1485_v32 = vadd.f32 %v3401_v57, %v1417_v5 }
 0x1f3   :  { %v1469_v58 = vadd.f32 %v3401_v57, %v1401_v10  ;;  %v1549_v43 = vmax.f32 %v1485_v32, 0.0 }
 0x1f4   :  { %v1341_v42 = vpop.f32.mrf.mxu3 }
 0x1f5   :  { %v1533_v15 = vmax.f32 %v1469_v58, 0.0  ;;  %v2431_v17 = vpack.c.bf16 %v1549_v43, %v1548_v55  ;;  %v1342_v61 = vadd.f32 %v1341_v42, %v1173_v48 }
 0x1f6   :  { %v1301_v20 = vpop.f32.mrf.mxu2  ;;  %v965_v24 = vpop.f32.mrf.mxu0 }
 0x1f7   :  { %v2391_v12 = vpack.c.bf16 %v1533_v15, %v1532_v11  ;;  %2475 = vst [vmem:[%s3568_s4 + $0xe0] sm:$0xff] %v2431_v17   ;;  %v1134_v25 = vpop.f32.mrf.mxu1  ;;  %v1302_v28 = vadd.f32 %v1301_v20, %v1133_v16  ;;  %v1418_v49 = vmul.f32 %v3393_v36, %v1342_v61  ;;  %v1183_v20 = vadd.f32 %v3406_v8, %v3116_v62 }
 0x1f8   :  { %v1135_v30 = vadd.f32 %v1134_v25, %v965_v24 }
 0x1f9   :  { %2467 = vst [vmem:[%s3568_s4 + $0xa0] sm:$0xff] %v2391_v12   ;;  %v1402_v21 = vmul.f32 %v3393_v36, %v1302_v28  ;;  %v1486_v6 = vadd.f32 %v3401_v57, %v1418_v49 }
 0x1fb   :  { %v1470_v38 = vadd.f32 %v3401_v57, %v1402_v21  ;;  %v1550_v46 = vmax.f32 %v1486_v6, 0.0  ;;  %v1185_v21 = vadd.f32 %v3412_v22, %v3146_v19 }
 0x1fc   :  { %v1343_v31 = vpop.f32.mrf.mxu3 }
 0x1fd   :  { %v1344_v59 = vadd.f32 %v1343_v31, %v1175_v29  ;;  %v1534_v50 = vmax.f32 %v1470_v38, 0.0 }
 0x1fe   :  { %v1303_v33 = vpop.f32.mrf.mxu2  ;;  %v968_v35 = vpop.f32.mrf.mxu0 }
 0x1ff   :  { %v1304_v9 = vadd.f32 %v1303_v33, %v1135_v30  ;;  %v1419_v0 = vmul.f32 %v3393_v36, %v1344_v59  ;;  %v1137_v37 = vpop.f32.mrf.mxu1 }
 0x200   :  { %v1138_v53 = vadd.f32 %v1137_v37, %v968_v35 }
 0x201   :  { %v1403_v45 = vmul.f32 %v3393_v36, %v1304_v9  ;;  %v1487_v3 = vadd.f32 %v3401_v57, %v1419_v0 }
 0x203   :  { %v1471_v51 = vadd.f32 %v3401_v57, %v1403_v45  ;;  %v1551_v47 = vmax.f32 %v1487_v3, 0.0 }
 0x204   :  { %v1346_v39 = vpop.f32.mrf.mxu3 }
 0x205   :  { %v1535_v52 = vmax.f32 %v1471_v51, 0.0  ;;  %v2436_v54 = vpack.c.bf16 %v1551_v47, %v1550_v46  ;;  %v1347_v27 = vadd.f32 %v1346_v39, %v1178_v18 }
 0x206   :  { %v1306_v26 = vpop.f32.mrf.mxu2  ;;  %v970_v34 = vpop.f32.mrf.mxu0 }
 0x207   :  { %v2396_v13 = vpack.c.bf16 %v1535_v52, %v1534_v50  ;;  %2476 = vst [vmem:[%s3568_s4 + $0xe8] sm:$0xff] %v2436_v54   ;;  %v1139_v56 = vpop.f32.mrf.mxu1  ;;  %v1307_v60 = vadd.f32 %v1306_v26, %v1138_v53  ;;  %v1420_v23 = vmul.f32 %v3393_v36, %v1347_v27 }
 0x208   :  { %v1140_v1 = vadd.f32 %v1139_v56, %v970_v34 }
 0x209   :  { %2468 = vst [vmem:[%s3568_s4 + $0xa8] sm:$0xff] %v2396_v13   ;;  %v1404_v14 = vmul.f32 %v3393_v36, %v1307_v60  ;;  %v1488_v40 = vadd.f32 %v3401_v57, %v1420_v23 }
 0x20b   :  { %v1472_v55 = vadd.f32 %v3401_v57, %v1404_v14  ;;  %v1552_v11 = vmax.f32 %v1488_v40, 0.0 }
 0x20c   :  { %v1348_v2 = vpop.f32.mrf.mxu3 }
 0x20d   :  { %v1349_v5 = vadd.f32 %v1348_v2, %v1180_v63  ;;  %v1536_v16 = vmax.f32 %v1472_v55, 0.0 }
 0x20e   :  { %v1308_v4 = vpop.f32.mrf.mxu2  ;;  %v973_v32 = vpop.f32.mrf.mxu0 }
 0x20f   :  { %v1309_v7 = vadd.f32 %v1308_v4, %v1140_v1  ;;  %v1421_v10 = vmul.f32 %v3393_v36, %v1349_v5  ;;  %v1142_v58 = vpop.f32.mrf.mxu1 }
 0x210   :  { %v1143_v48 = vadd.f32 %v1142_v58, %v973_v32 }
 0x211   :  { %v1405_v43 = vmul.f32 %v3393_v36, %v1309_v7  ;;  %v1489_v44 = vadd.f32 %v3401_v57, %v1421_v10 }
 0x213   :  { %v1473_v41 = vadd.f32 %v3401_v57, %v1405_v43  ;;  %v1553_v15 = vmax.f32 %v1489_v44, 0.0 }
 0x214   :  { %v1351_v17 = vpop.f32.mrf.mxu3 }
 0x215   :  { %v1537_v42 = vmax.f32 %v1473_v41, 0.0  ;;  %v2441_v12 = vpack.c.bf16 %v1553_v15, %v1552_v11  ;;  %v1352_v25 = vadd.f32 %v1351_v17, %v1183_v20 }
 0x216   :  { %v1311_v24 = vpop.f32.mrf.mxu2  ;;  %v975_v29 = vpop.f32.mrf.mxu0 }
 0x217   :  { %v2401_v61 = vpack.c.bf16 %v1537_v42, %v1536_v16  ;;  %2477 = vst [vmem:[%s3568_s4 + $0xf0] sm:$0xff] %v2441_v12   ;;  %v1312_v28 = vadd.f32 %v1311_v24, %v1143_v48  ;;  %v1144_v49 = vpop.f32.mrf.mxu1  ;;  %v1422_v62 = vmul.f32 %v3393_v36, %v1352_v25 }
 0x218   :  { %v1145_v30 = vadd.f32 %v1144_v49, %v975_v29 }
 0x219   :  { %2469 = vst [vmem:[%s3568_s4 + $0xb0] sm:$0xff] %v2401_v61   ;;  %v1406_v8 = vmul.f32 %v3393_v36, %v1312_v28  ;;  %v1490_v35 = vadd.f32 %v3401_v57, %v1422_v62 }
 0x21b   :  { %v1474_v0 = vadd.f32 %v3401_v57, %v1406_v8  ;;  %v1554_v22 = vmax.f32 %v1490_v35, 0.0 }
 0x21c   :  { %v1353_v31 = vpop.f32.mrf.mxu3 }
 0x21d   :  { %v1354_v59 = vadd.f32 %v1353_v31, %v1185_v21  ;;  %v1538_v3 = vmax.f32 %v1474_v0, 0.0 }
 0x21e   :  { %v1313_v33 = vpop.f32.mrf.mxu2 }
 0x21f   :  { %v1314_v9 = vadd.f32 %v1313_v33, %v1145_v30  ;;  %v1423_v6 = vmul.f32 %v3393_v36, %v1354_v59 }
 0x221   :  { %v1407_v37 = vmul.f32 %v3393_v36, %v1314_v9  ;;  %v1491_v38 = vadd.f32 %v3401_v57, %v1423_v6 }
 0x223   :  { %v1475_v19 = vadd.f32 %v3401_v57, %v1407_v37  ;;  %v1555_v45 = vmax.f32 %v1491_v38, 0.0 }
 0x225   :  { %v1539_v51 = vmax.f32 %v1475_v19, 0.0  ;;  %v2446_v46 = vpack.c.bf16 %v1555_v45, %v1554_v22 }
 0x227   :  { %v2406_v47 = vpack.c.bf16 %v1539_v51, %v1538_v3  ;;  %2478 = vst [vmem:[%s3568_s4 + $0xf8] sm:$0xff] %v2446_v46  }
 0x229   :  { %2470 = vst [vmem:[%s3568_s4 + $0xb8] sm:$0xff] %v2406_v47  }

// kernel: forward.8
= control target key start
LH: loop header
LB: loop body
LE: loop exit
PB: predicated region body
PF: predicated region fallthrough
CT: control target
= control target key end

     0   :  { %s4019_s1 = inlined_call_operand.vmem [shape: bf16[384,128], index: 1, kind: input, shape index: {}]   ;;  %s4020_s0 = inlined_call_operand.vmem [shape: bf16[512,384], index: 0, kind: input, shape index: {}]   ;;  %s4021_s2 = inlined_call_operand.vmem [shape: f32[1,128], index: 2, kind: input, shape index: {}]   ;;  %s4022_s3 = inlined_call_operand.vmem [shape: f32[1,128], index: 3, kind: input, shape index: {}]   ;;  %s4023_s4 = inlined_call_operand.vmem [shape: bf16[512,128], index: 4, kind: input, shape index: {}]   ;;  %s4024_s5 = inlined_call_operand.vmem [shape: bf16[512,128], index: 5, kind: output, shape index: {}]  }
   0x1   :  { %v2466_v0 = vld [vmem:[%s4019_s1 + $0x38] sm:$0xff]  ;;  %v2465_v3 = vld [vmem:[%s4019_s1 + $0x30] sm:$0xff]  ;;  %v2464_v6 = vld [vmem:[%s4019_s1 + $0x28] sm:$0xff] }
   0x2   :  { %v2897_v1 = vld [vmem:[%s4019_s1 + $0x78] sm:$0xff]  ;;  %852 = vmatpush.bf16.msra.mxu0 %v2466_v0  ;;  %2833 = vmatpush.bf16.msra.mxu3 %v2466_v0  ;;  %v2912_v4 = vld [vmem:[%s4019_s1 + $0x70] sm:$0xff]  ;;  %v2472_v7 = vld [vmem:[%s4019_s1 + $0x68] sm:$0xff] }
   0x3   :  { %v2902_v2 = vld [vmem:[%s4019_s1 + $0xb8] sm:$0xff]  ;;  %1021 = vmatpush.bf16.msra.mxu1 %v2897_v1  ;;  %v2917_v5 = vld [vmem:[%s4019_s1 + $0xb0] sm:$0xff]  ;;  %v2930_v8 = vld [vmem:[%s4019_s1 + $0xa8] sm:$0xff] }
   0x4   :  { %1190 = vmatpush.bf16.msra.mxu2 %v2902_v2  ;;  %v2463_v9 = vld [vmem:[%s4019_s1 + $0x20] sm:$0xff]  ;;  %v2462_v12 = vld [vmem:[%s4019_s1 + $0x18] sm:$0xff]  ;;  %v2461_v15 = vld [vmem:[%s4019_s1 + $0x10] sm:$0xff] }
   0x5   :  { %v2939_v10 = vld [vmem:[%s4019_s1 + $0x60] sm:$0xff]  ;;  %v2470_v13 = vld [vmem:[%s4019_s1 + $0x58] sm:$0xff]  ;;  %v2469_v16 = vld [vmem:[%s4019_s1 + $0x50] sm:$0xff] }
   0x6   :  { %853 = vmatpush.bf16.msra.mxu0 %v2465_v3  ;;  %2834 = vmatpush.bf16.msra.mxu3 %v2465_v3  ;;  %v2944_v11 = vld [vmem:[%s4019_s1 + $0xa0] sm:$0xff]  ;;  %v2957_v14 = vld [vmem:[%s4019_s1 + $0x98] sm:$0xff]  ;;  %v2969_v17 = vld [vmem:[%s4019_s1 + $0x90] sm:$0xff] }
   0x7   :  { %1022 = vmatpush.bf16.msra.mxu1 %v2912_v4  ;;  %v2460_v18 = vld [vmem:[%s4019_s1 + $0x8] sm:$0xff]  ;;  %v2459_v21 = vld [vmem:[%s4019_s1] sm:$0xff]  ;;  %v1887_v29 = vld [vmem:[%s4020_s0 + $0xc] sm:$0xf0] }
   0x8   :  { %1191 = vmatpush.bf16.msra.mxu2 %v2917_v5  ;;  %v2468_v19 = vld [vmem:[%s4019_s1 + $0x48] sm:$0xff]  ;;  %v2467_v22 = vld [vmem:[%s4019_s1 + $0x40] sm:$0xff]  ;;  %v2365_v31 = vld [vmem:[%s4020_s0 + $0x10] sm:$0xf0] }
   0x9   :  { %v2981_v20 = vld [vmem:[%s4019_s1 + $0x88] sm:$0xff]  ;;  %v2992_v23 = vld [vmem:[%s4019_s1 + $0x80] sm:$0xff]  ;;  %v1897_v36 = vld [vmem:[%s4020_s0 + $0x18] sm:$0xf] }
   0xa   :  { %854 = vmatpush.bf16.msra.mxu0 %v2464_v6  ;;  %2835 = vmatpush.bf16.msra.mxu3 %v2464_v6  ;;  %v1885_v24 = vld [vmem:[%s4020_s0] sm:$0xf]  ;;  %v2364_v25 = vld [vmem:[%s4020_s0 + $0x8] sm:$0xf0]  ;;  %v2363_v28 = vld [vmem:[%s4020_s0 + $0x4] sm:$0xf] }
   0xb   :  { %1023 = vmatpush.bf16.msra.mxu1 %v2472_v7  ;;  %v2173_v26 = vld [vmem:[%s4020_s0 + $0x240] sm:$0xf]  ;;  %v2436_v27 = vld [vmem:[%s4020_s0 + $0x248] sm:$0xf0]  ;;  %v1893_v30 = vld [vmem:[%s4020_s0 + $0x8] sm:$0xf]  ;;  %v1886_v32 = vor.u32 %v2364_v25, %v1885_v24  ;;  %v1890_v34 = vor.u32 %v2363_v28, %v1887_v29 }
   0xc   :  { %1192 = vmatpush.bf16.msra.mxu2 %v2930_v8  ;;  %v2174_v33 = vor.u32 %v2436_v27, %v2173_v26  ;;  %v1894_v35 = vor.u32 %v2365_v31, %v1893_v30  ;;  %v2367_v37 = vld [vmem:[%s4020_s0 + $0x20] sm:$0xf0]  ;;  %v2185_v38 = vld [vmem:[%s4020_s0 + $0x258] sm:$0xf]  ;;  %v2366_v40 = vld [vmem:[%s4020_s0 + $0x1c] sm:$0xf] }
   0xd   :  { %v2439_v39 = vld [vmem:[%s4020_s0 + $0x260] sm:$0xf0]  ;;  %v1899_v41 = vld [vmem:[%s4020_s0 + $0x24] sm:$0xf0]  ;;  %v1905_v42 = vld [vmem:[%s4020_s0 + $0x20] sm:$0xf]  ;;  %v1898_v44 = vor.u32 %v2367_v37, %v1897_v36 }
   0xe   :  { %855 = vmatpush.bf16.msra.mxu0 %v2463_v9  ;;  %2836 = vmatpush.bf16.msra.mxu3 %v2463_v9  ;;  %v2368_v43 = vld [vmem:[%s4020_s0 + $0x28] sm:$0xf0]  ;;  %v2186_v45 = vor.u32 %v2439_v39, %v2185_v38  ;;  %v1902_v46 = vor.u32 %v2366_v40, %v1899_v41  ;;  %v1909_v48 = vld [vmem:[%s4020_s0 + $0x30] sm:$0xf]  ;;  %v2370_v49 = vld [vmem:[%s4020_s0 + $0x38] sm:$0xf0] }
   0xf   :  { %1024 = vmatpush.bf16.msra.mxu1 %v2939_v10  ;;  %v1906_v47 = vor.u32 %v2368_v43, %v1905_v42  ;;  %v2197_v50 = vld [vmem:[%s4020_s0 + $0x270] sm:$0xf]  ;;  %v2442_v51 = vld [vmem:[%s4020_s0 + $0x278] sm:$0xf0]  ;;  %v2369_v52 = vld [vmem:[%s4020_s0 + $0x34] sm:$0xf]  ;;  %v1910_v56 = vor.u32 %v2370_v49, %v1909_v48 }
  0x10   :  { %1193 = vmatpush.bf16.msra.mxu2 %v2944_v11  ;;  %v1911_v53 = vld [vmem:[%s4020_s0 + $0x3c] sm:$0xf0]  ;;  %v1917_v54 = vld [vmem:[%s4020_s0 + $0x38] sm:$0xf]  ;;  %v2371_v55 = vld [vmem:[%s4020_s0 + $0x40] sm:$0xf0]  ;;  %v2198_v57 = vor.u32 %v2442_v51, %v2197_v50 }
  0x11   :  { %v1914_v58 = vor.u32 %v2369_v52, %v1911_v53  ;;  %v1918_v59 = vor.u32 %v2371_v55, %v1917_v54  ;;  %v1921_v60 = vld [vmem:[%s4020_s0 + $0x48] sm:$0xf]  ;;  %v2373_v61 = vld [vmem:[%s4020_s0 + $0x50] sm:$0xf0]  ;;  %v2372_v0 = vld [vmem:[%s4020_s0 + $0x4c] sm:$0xf] }
  0x12   :  { %856 = vmatpush.bf16.msra.mxu0 %v2462_v12  ;;  %2837 = vmatpush.bf16.msra.mxu3 %v2462_v12  ;;  %v2209_v62 = vld [vmem:[%s4020_s0 + $0x288] sm:$0xf]  ;;  %v2445_v63 = vld [vmem:[%s4020_s0 + $0x290] sm:$0xf0]  ;;  %v2374_v3 = vld [vmem:[%s4020_s0 + $0x58] sm:$0xf0] }
  0x13   :  { %1025 = vmatpush.bf16.msra.mxu1 %v2470_v13  ;;  %v2376_v9 = vld [vmem:[%s4020_s0 + $0x68] sm:$0xf0]  ;;  %v2375_v12 = vld [vmem:[%s4020_s0 + $0x64] sm:$0xf]  ;;  %v2378_v24 = vld [vmem:[%s4020_s0 + $0x7c] sm:$0xf] }
  0x14   :  { %1194 = vmatpush.bf16.msra.mxu2 %v2957_v14  ;;  %v1947_v25 = vld [vmem:[%s4020_s0 + $0x84] sm:$0xf0]  ;;  %v1953_v26 = vld [vmem:[%s4020_s0 + $0x80] sm:$0xf]  ;;  %v2380_v27 = vld [vmem:[%s4020_s0 + $0x88] sm:$0xf0] }
  0x15   :  { %v1950_v30 = vor.u32 %v2378_v24, %v1947_v25  ;;  %v1954_v31 = vor.u32 %v2380_v27, %v1953_v26  ;;  %v2381_v36 = vld [vmem:[%s4020_s0 + $0x94] sm:$0xf]  ;;  %v1959_v37 = vld [vmem:[%s4020_s0 + $0x9c] sm:$0xf0]  ;;  %v1965_v38 = vld [vmem:[%s4020_s0 + $0x98] sm:$0xf] }
  0x16   :  { %857 = vmatpush.bf16.msra.mxu0 %v2461_v15  ;;  %2838 = vmatpush.bf16.msra.mxu3 %v2461_v15  ;;  %v2377_v15 = vld [vmem:[%s4020_s0 + $0x70] sm:$0xf0]  ;;  %v2383_v39 = vld [vmem:[%s4020_s0 + $0xa0] sm:$0xf0]  ;;  %v1962_v42 = vor.u32 %v2381_v36, %v1959_v37  ;;  %v2384_v48 = vld [vmem:[%s4020_s0 + $0xac] sm:$0xf] }
  0x17   :  { %1026 = vmatpush.bf16.msra.mxu1 %v2469_v16  ;;  %v1966_v43 = vor.u32 %v2383_v39, %v1965_v38  ;;  %v1971_v49 = vld [vmem:[%s4020_s0 + $0xb4] sm:$0xf0]  ;;  %v1977_v50 = vld [vmem:[%s4020_s0 + $0xb0] sm:$0xf]  ;;  %v2386_v51 = vld [vmem:[%s4020_s0 + $0xb8] sm:$0xf0] }
  0x18   :  { %1195 = vmatpush.bf16.msra.mxu2 %v2969_v17  ;;  %v1974_v54 = vor.u32 %v2384_v48, %v1971_v49  ;;  %v1978_v55 = vor.u32 %v2386_v51, %v1977_v50  ;;  %v2771_v50 = vld [vmem:[%s4023_s4 + $0x8] sm:$0xff]   ;;  %v2005_v51 = vld [vmem:[%s4020_s0 + $0xf0] sm:$0xf] }
  0x1a   :  { %858 = vmatpush.bf16.msra.mxu0 %v2460_v18  ;;  %2839 = vmatpush.bf16.msra.mxu3 %v2460_v18 }
  0x1b   :  { %1027 = vmatpush.bf16.msra.mxu1 %v2468_v19 }
  0x1c   :  { %1196 = vmatpush.bf16.msra.mxu2 %v2981_v20 }
  0x1e   :  { %859 = vmatpush.bf16.msra.mxu0 %v2459_v21  ;;  %2840 = vmatpush.bf16.msra.mxu3 %v2459_v21  ;;  %v2379_v21 = vld [vmem:[%s4020_s0 + $0x80] sm:$0xf0] }
  0x1f   :  { %1028 = vmatpush.bf16.msra.mxu1 %v2467_v22 }
  0x20   :  { %1197 = vmatpush.bf16.msra.mxu2 %v2992_v23 }
  0x21   :  { %860 = vmatmul.bf16.vlgmr.msra.gmra.mxu0 %v1886_v32  ;;  %980 = vmatmul.bf16.vlgmr.msra.gmra.mxu3 %v2174_v33  ;;  %v1957_v32 = vld [vmem:[%s4020_s0 + $0x90] sm:$0xf]  ;;  %v2382_v33 = vld [vmem:[%s4020_s0 + $0x98] sm:$0xf0] }
  0x22   :  { %2841 = vmatpush.bf16.msrb.mxu3 %v2897_v1  ;;  %1029 = vmatmul.bf16.vlgmr.msra.gmra.mxu1 %v1890_v34  ;;  %v1923_v1 = vld [vmem:[%s4020_s0 + $0x54] sm:$0xf0]  ;;  %v2245_v34 = vld [vmem:[%s4020_s0 + $0x2d0] sm:$0xf]  ;;  %v1958_v40 = vor.u32 %v2382_v33, %v1957_v32 }
  0x23   :  { %1198 = vmatmul.bf16.vlgmr.msra.gmra.mxu2 %v1894_v35  ;;  %v1926_v6 = vor.u32 %v2372_v0, %v1923_v1  ;;  %v2454_v35 = vld [vmem:[%s4020_s0 + $0x2d8] sm:$0xf0] }
  0x24   :  { %v2246_v41 = vor.u32 %v2454_v35, %v2245_v34 }
  0x26   :  { %2842 = vmatpush.bf16.msrb.mxu3 %v2912_v4  ;;  %v1922_v4 = vor.u32 %v2373_v61, %v1921_v60  ;;  %v2175_v60 = vld [vmem:[%s4020_s0 + $0x24c] sm:$0xf0] }
  0x27   :  { %v1983_v61 = vld [vmem:[%s4020_s0 + $0xcc] sm:$0xf0] }
  0x2a   :  { %2843 = vmatpush.bf16.msrb.mxu3 %v2472_v7 }
  0x2e   :  { %2844 = vmatpush.bf16.msrb.mxu3 %v2939_v10  ;;  %v2221_v10 = vld [vmem:[%s4020_s0 + $0x2a0] sm:$0xf] }
  0x31   :  { %865 = vmatmul.bf16.gmra.mxu0 %v1898_v44  ;;  %985 = vmatmul.bf16.gmra.mxu3 %v2186_v45  ;;  %v1969_v44 = vld [vmem:[%s4020_s0 + $0xa8] sm:$0xf]  ;;  %v2385_v45 = vld [vmem:[%s4020_s0 + $0xb0] sm:$0xf0] }
  0x32   :  { %2845 = vmatpush.bf16.msrb.mxu3 %v2470_v13  ;;  %1034 = vmatmul.bf16.gmra.mxu1 %v1902_v46  ;;  %v1935_v13 = vld [vmem:[%s4020_s0 + $0x6c] sm:$0xf0]  ;;  %v2257_v46 = vld [vmem:[%s4020_s0 + $0x2e8] sm:$0xf]  ;;  %v1970_v52 = vor.u32 %v2385_v45, %v1969_v44 }
  0x33   :  { %1203 = vmatmul.bf16.gmra.mxu2 %v1906_v47  ;;  %v1938_v18 = vor.u32 %v2375_v12, %v1935_v13  ;;  %v2457_v47 = vld [vmem:[%s4020_s0 + $0x2f0] sm:$0xf0]  ;;  %v3233_v13 = vld [vmem:[%s4022_s3] ss:$0 sm:$0xff] }
  0x34   :  { %v2258_v53 = vor.u32 %v2457_v47, %v2257_v46 }
  0x36   :  { %2846 = vmatpush.bf16.msrb.mxu3 %v2469_v16 }
  0x3a   :  { %2847 = vmatpush.bf16.msrb.mxu3 %v2468_v19 }
  0x3e   :  { %2848 = vmatpush.bf16.msrb.mxu3 %v2467_v22  ;;  %v2233_v22 = vld [vmem:[%s4020_s0 + $0x2b8] sm:$0xf] }
  0x41   :  { %870 = vmatmul.bf16.gmra.mxu0 %v1910_v56  ;;  %990 = vmatmul.bf16.gmra.mxu3 %v2198_v57  ;;  %v1981_v56 = vld [vmem:[%s4020_s0 + $0xc0] sm:$0xf]  ;;  %v2388_v57 = vld [vmem:[%s4020_s0 + $0xc8] sm:$0xf0] }
  0x42   :  { %2849 = vmatpush.bf16.msra.mxu3 %v2902_v2  ;;  %1039 = vmatmul.bf16.gmra.mxu1 %v1914_v58  ;;  %v1929_v2 = vld [vmem:[%s4020_s0 + $0x50] sm:$0xf]  ;;  %v2387_v58 = vld [vmem:[%s4020_s0 + $0xc4] sm:$0xf]  ;;  %v1982_v0 = vor.u32 %v2388_v57, %v1981_v56  ;;  %v2199_v56 = vld [vmem:[%s4020_s0 + $0x27c] sm:$0xf0] }
  0x43   :  { %1208 = vmatmul.bf16.gmra.mxu2 %v1918_v59  ;;  %v1930_v7 = vor.u32 %v2374_v3, %v1929_v2  ;;  %v2435_v59 = vld [vmem:[%s4020_s0 + $0x244] sm:$0xf]  ;;  %v1986_v3 = vor.u32 %v2387_v58, %v1983_v61  ;;  %v2007_v57 = vld [vmem:[%s4020_s0 + $0xfc] sm:$0xf0]  ;;  %v2013_v58 = vld [vmem:[%s4020_s0 + $0xf8] sm:$0xf] }
  0x44   :  { %v2178_v1 = vor.u32 %v2435_v59, %v2175_v60  ;;  %v2395_v59 = vld [vmem:[%s4020_s0 + $0x100] sm:$0xf0] }
  0x46   :  { %2850 = vmatpush.bf16.msra.mxu3 %v2917_v5  ;;  %v2210_v5 = vor.u32 %v2445_v63, %v2209_v62  ;;  %v1989_v62 = vld [vmem:[%s4020_s0 + $0xc8] sm:$0xf]  ;;  %v2389_v63 = vld [vmem:[%s4020_s0 + $0xd0] sm:$0xf0] }
  0x4a   :  { %2851 = vmatpush.bf16.msra.mxu3 %v2930_v8  ;;  %v1933_v8 = vld [vmem:[%s4020_s0 + $0x60] sm:$0xf] }
  0x4b   :  { %v1934_v16 = vor.u32 %v2376_v9, %v1933_v8 }
  0x4e   :  { %2852 = vmatpush.bf16.msra.mxu3 %v2944_v11  ;;  %v2448_v11 = vld [vmem:[%s4020_s0 + $0x2a8] sm:$0xf0] }
  0x51   :  { %875 = vmatmul.bf16.gmra.mxu0 %v1922_v4  ;;  %995 = vmatmul.bf16.gmra.mxu3 %v2210_v5  ;;  %v1990_v4 = vor.u32 %v2389_v63, %v1989_v62  ;;  %v2489_v62 = vunpack.c.l.bf16 %v2771_v50 }
  0x52   :  { %2853 = vmatpush.bf16.msra.mxu3 %v2957_v14  ;;  %1044 = vmatmul.bf16.gmra.mxu1 %v1926_v6  ;;  %v1941_v14 = vld [vmem:[%s4020_s0 + $0x68] sm:$0xf] }
  0x53   :  { %1213 = vmatmul.bf16.gmra.mxu2 %v1930_v7  ;;  %v1942_v19 = vor.u32 %v2377_v15, %v1941_v14  ;;  %v2484_v14 = vld [vmem:[%s4023_s4] sm:$0xff]   ;;  %v1993_v15 = vld [vmem:[%s4020_s0 + $0xd8] sm:$0xf] }
  0x54   :  { %v2485_v26 = vunpack.c.l.bf16 %v2484_v14  ;;  %v2486_v37 = vunpack.c.h.bf16 %v2484_v14 }
  0x56   :  { %2854 = vmatpush.bf16.msra.mxu3 %v2969_v17  ;;  %v2222_v17 = vor.u32 %v2448_v11, %v2221_v10  ;;  %v3228_v10 = vld [vmem:[%s4021_s2] ss:$0 sm:$0xff] }
  0x5a   :  { %2855 = vmatpush.bf16.msra.mxu3 %v2981_v20  ;;  %v1945_v20 = vld [vmem:[%s4020_s0 + $0x78] sm:$0xf] }
  0x5b   :  { %v1946_v28 = vor.u32 %v2379_v21, %v1945_v20  ;;  %v2187_v20 = vld [vmem:[%s4020_s0 + $0x264] sm:$0xf0] }
  0x5c   :  { %v1995_v21 = vld [vmem:[%s4020_s0 + $0xe4] sm:$0xf0] }
  0x5e   :  { %2856 = vmatpush.bf16.msra.mxu3 %v2992_v23  ;;  %v2451_v23 = vld [vmem:[%s4020_s0 + $0x2c0] sm:$0xf0] }
  0x5f   :  { %v2234_v29 = vor.u32 %v2451_v23, %v2233_v22  ;;  %v2001_v22 = vld [vmem:[%s4020_s0 + $0xe0] sm:$0xf]  ;;  %v2392_v23 = vld [vmem:[%s4020_s0 + $0xe8] sm:$0xf0] }
  0x60   :  { %v2002_v34 = vor.u32 %v2392_v23, %v2001_v22 }
  0x61   :  { %880 = vmatmul.bf16.gmra.mxu0 %v1934_v16  ;;  %1000 = vmatmul.bf16.gmra.mxu3 %v2222_v17  ;;  %v2391_v16 = vld [vmem:[%s4020_s0 + $0xe0] sm:$0xf0] }
  0x62   :  { %1049 = vmatmul.bf16.gmra.mxu1 %v1938_v18  ;;  %v2390_v18 = vld [vmem:[%s4020_s0 + $0xdc] sm:$0xf] }
  0x63   :  { %1218 = vmatmul.bf16.gmra.mxu2 %v1942_v19  ;;  %v2438_v19 = vld [vmem:[%s4020_s0 + $0x25c] sm:$0xf]  ;;  %v1998_v33 = vor.u32 %v2390_v18, %v1995_v21 }
  0x71   :  { %885 = vmatmul.bf16.gmra.mxu0 %v1946_v28  ;;  %1005 = vmatmul.bf16.gmra.mxu3 %v2234_v29  ;;  %v1994_v28 = vor.u32 %v2391_v16, %v1993_v15  ;;  %v2190_v29 = vor.u32 %v2438_v19, %v2187_v20 }
  0x72   :  { %1054 = vmatmul.bf16.gmra.mxu1 %v1950_v30 }
  0x73   :  { %1223 = vmatmul.bf16.gmra.mxu2 %v1954_v31 }
  0x81   :  { %890 = vmatmul.bf16.gmra.mxu0 %v1958_v40  ;;  %1010 = vmatmul.bf16.gmra.mxu3 %v2246_v41 }
  0x82   :  { %1059 = vmatmul.bf16.gmra.mxu1 %v1962_v42 }
  0x83   :  { %1228 = vmatmul.bf16.gmra.mxu2 %v1966_v43 }
  0x91   :  { %895 = vmatmul.bf16.gmra.mxu0 %v1970_v52  ;;  %1015 = vmatmul.bf16.gmra.mxu3 %v2258_v53  ;;  %v2394_v52 = vld [vmem:[%s4020_s0 + $0xf8] sm:$0xf0] }
  0x92   :  { %1064 = vmatmul.bf16.gmra.mxu1 %v1974_v54  ;;  %v2393_v54 = vld [vmem:[%s4020_s0 + $0xf4] sm:$0xf] }
  0x93   :  { %1233 = vmatmul.bf16.gmra.mxu2 %v1978_v55  ;;  %v2441_v55 = vld [vmem:[%s4020_s0 + $0x274] sm:$0xf] }
  0x9e   :  { %v861_v2 = vpop.f32.mrf.mxu0 }
  0x9f   :  { %v1030_v5 = vpop.f32.mrf.mxu1 }
  0xa0   :  { %v1031_v6 = vadd.f32 %v1030_v5, %v861_v2  ;;  %v2010_v5 = vor.u32 %v2393_v54, %v2007_v57 }
  0xa1   :  { %900 = vmatmul.bf16.gmra.mxu0 %v1982_v0  ;;  %1149 = vmatmul.bf16.vlgmr.msrb.gmra.mxu3 %v2178_v1  ;;  %v2006_v0 = vor.u32 %v2394_v52, %v2005_v51  ;;  %v2202_v1 = vor.u32 %v2441_v55, %v2199_v56 }
  0xa2   :  { %1069 = vmatmul.bf16.gmra.mxu1 %v1986_v3 }
  0xa3   :  { %1238 = vmatmul.bf16.gmra.mxu2 %v1990_v4 }
  0xa4   :  { %v3223_v7 = vpop.f32.mrf.mxu3 }
  0xa6   :  { %v1199_v8 = vpop.f32.mrf.mxu2  ;;  %v863_v11 = vpop.f32.mrf.mxu0 }
  0xa7   :  { %v1200_v9 = vadd.f32 %v1199_v8, %v1031_v6  ;;  %v1032_v12 = vpop.f32.mrf.mxu1  ;;  %v2014_v6 = vor.u32 %v2395_v59, %v2013_v58 }
  0xa8   :  { %v1033_v24 = vadd.f32 %v1032_v12, %v863_v11  ;;  %v2490_v11 = vunpack.c.h.bf16 %v2771_v50 }
  0xa9   :  { %v1363_v17 = vmul.f32 %v3228_v10, %v1200_v9 }
  0xab   :  { %v1431_v30 = vadd.f32 %v3233_v13, %v1363_v17 }
  0xac   :  { %v3263_v25 = vpop.f32.mrf.mxu3 }
  0xad   :  { %v1623_v38 = vadd.f32 %v2485_v26, %v1431_v30  ;;  %v2017_v26 = vld [vmem:[%s4020_s0 + $0x108] sm:$0xf]  ;;  %v2772_v30 = vld [vmem:[%s4023_s4 + $0x10] sm:$0xff]  }
  0xae   :  { %v1201_v27 = vpop.f32.mrf.mxu2  ;;  %v866_v32 = vpop.f32.mrf.mxu0  ;;  %v2494_v50 = vunpack.c.h.bf16 %v2772_v30 }
  0xaf   :  { %v1202_v31 = vadd.f32 %v1201_v27, %v1033_v24  ;;  %v1035_v35 = vpop.f32.mrf.mxu1  ;;  %v1687_v44 = vmax.f32 %v1623_v38, 0.0  ;;  %v2397_v27 = vld [vmem:[%s4020_s0 + $0x110] sm:$0xf0]  ;;  %v2493_v38 = vunpack.c.l.bf16 %v2772_v30 }
  0xb0   :  { %v1036_v40 = vadd.f32 %v1035_v35, %v866_v32  ;;  %v2211_v32 = vld [vmem:[%s4020_s0 + $0x294] sm:$0xf0]  ;;  %v2398_v35 = vld [vmem:[%s4020_s0 + $0x118] sm:$0xf0] }
  0xb1   :  { %v1364_v36 = vmul.f32 %v3228_v10, %v1202_v31  ;;  %905 = vmatmul.bf16.gmra.mxu0 %v1994_v28  ;;  %1154 = vmatmul.bf16.gmra.mxu3 %v2190_v29  ;;  %v2396_v28 = vld [vmem:[%s4020_s0 + $0x10c] sm:$0xf] }
  0xb2   :  { %1074 = vmatmul.bf16.gmra.mxu1 %v1998_v33  ;;  %v2444_v31 = vld [vmem:[%s4020_s0 + $0x28c] sm:$0xf]  ;;  %v2019_v33 = vld [vmem:[%s4020_s0 + $0x114] sm:$0xf0] }
  0xb3   :  { %v1432_v39 = vadd.f32 %v3233_v13, %v1364_v36  ;;  %1243 = vmatmul.bf16.gmra.mxu2 %v2002_v34  ;;  %v2025_v34 = vld [vmem:[%s4020_s0 + $0x110] sm:$0xf] }
  0xb4   :  { %v3268_v42 = vpop.f32.mrf.mxu3 }
  0xb5   :  { %v1624_v41 = vadd.f32 %v2486_v37, %v1432_v39 }
  0xb6   :  { %v1204_v43 = vpop.f32.mrf.mxu2  ;;  %v868_v47 = vpop.f32.mrf.mxu0 }
  0xb7   :  { %v1688_v45 = vmax.f32 %v1624_v41, 0.0  ;;  %v1205_v46 = vadd.f32 %v1204_v43, %v1036_v40  ;;  %v1037_v48 = vpop.f32.mrf.mxu1  ;;  %v2018_v40 = vor.u32 %v2397_v27, %v2017_v26  ;;  %v2214_v41 = vor.u32 %v2444_v31, %v2211_v32 }
  0xb8   :  { %v1038_v60 = vadd.f32 %v1037_v48, %v868_v47  ;;  %v2026_v47 = vor.u32 %v2398_v35, %v2025_v34 }
  0xb9   :  { %v2614_v49 = vpack.c.bf16 %v1688_v45, %v1687_v44  ;;  %v1365_v53 = vmul.f32 %v3228_v10, %v1205_v46  ;;  %v2022_v46 = vor.u32 %v2396_v28, %v2019_v33 }
  0xbb   :  { %2615 = vst [vmem:[%s4024_s5] sm:$0xff] %v2614_v49   ;;  %v1433_v2 = vadd.f32 %v3233_v13, %v1365_v53 }
  0xbc   :  { %v3301_v61 = vpop.f32.mrf.mxu3 }
  0xbd   :  { %v1625_v12 = vadd.f32 %v2489_v62, %v1433_v2  ;;  %v2399_v2 = vld [vmem:[%s4020_s0 + $0x124] sm:$0xf] }
  0xbe   :  { %v1206_v63 = vpop.f32.mrf.mxu2  ;;  %v871_v4 = vpop.f32.mrf.mxu0 }
  0xbf   :  { %v1207_v3 = vadd.f32 %v1206_v63, %v1038_v60  ;;  %v1040_v8 = vpop.f32.mrf.mxu1  ;;  %v1689_v19 = vmax.f32 %v1625_v12, 0.0 }
  0xc0   :  { %v1041_v15 = vadd.f32 %v1040_v8, %v871_v4  ;;  %v2773_v4 = vld [vmem:[%s4023_s4 + $0x18] sm:$0xff]   ;;  %v2031_v8 = vld [vmem:[%s4020_s0 + $0x12c] sm:$0xf0] }
  0xc1   :  { %v1366_v9 = vmul.f32 %v3228_v10, %v1207_v3  ;;  %910 = vmatmul.bf16.gmra.mxu0 %v2006_v0  ;;  %1159 = vmatmul.bf16.gmra.mxu3 %v2202_v1  ;;  %v2029_v0 = vld [vmem:[%s4020_s0 + $0x120] sm:$0xf]  ;;  %v2400_v1 = vld [vmem:[%s4020_s0 + $0x128] sm:$0xf0]  ;;  %v2498_v28 = vunpack.c.h.bf16 %v2773_v4 }
  0xc2   :  { %1079 = vmatmul.bf16.gmra.mxu1 %v2010_v5  ;;  %v2447_v5 = vld [vmem:[%s4020_s0 + $0x2a4] sm:$0xf] }
  0xc3   :  { %v1434_v14 = vadd.f32 %v3233_v13, %v1366_v9  ;;  %1248 = vmatmul.bf16.gmra.mxu2 %v2014_v6  ;;  %v2223_v6 = vld [vmem:[%s4020_s0 + $0x2ac] sm:$0xf0]  ;;  %v2037_v9 = vld [vmem:[%s4020_s0 + $0x128] sm:$0xf] }
  0xc4   :  { %v3306_v17 = vpop.f32.mrf.mxu3 }
  0xc5   :  { %v1626_v16 = vadd.f32 %v2490_v11, %v1434_v14  ;;  %v2401_v11 = vld [vmem:[%s4020_s0 + $0x130] sm:$0xf0] }
  0xc6   :  { %v1209_v18 = vpop.f32.mrf.mxu2  ;;  %v873_v22 = vpop.f32.mrf.mxu0 }
  0xc7   :  { %v1690_v20 = vmax.f32 %v1626_v16, 0.0  ;;  %v1210_v21 = vadd.f32 %v1209_v18, %v1041_v15  ;;  %v1042_v23 = vpop.f32.mrf.mxu1  ;;  %v2497_v15 = vunpack.c.l.bf16 %v2773_v4  ;;  %v2030_v18 = vor.u32 %v2400_v1, %v2029_v0 }
  0xc8   :  { %v1043_v36 = vadd.f32 %v1042_v23, %v873_v22  ;;  %v2034_v23 = vor.u32 %v2399_v2, %v2031_v8 }
  0xc9   :  { %v2619_v24 = vpack.c.bf16 %v1690_v20, %v1689_v19  ;;  %v1367_v29 = vmul.f32 %v3228_v10, %v1210_v21  ;;  %v2226_v19 = vor.u32 %v2447_v5, %v2223_v6 }
  0xcb   :  { %2802 = vst [vmem:[%s4024_s5 + $0x8] sm:$0xff] %v2619_v24   ;;  %v1435_v43 = vadd.f32 %v3233_v13, %v1367_v29  ;;  %v2038_v24 = vor.u32 %v2401_v11, %v2037_v9 }
  0xcc   :  { %v3339_v37 = vpop.f32.mrf.mxu3 }
  0xcd   :  { %v1627_v51 = vadd.f32 %v2493_v38, %v1435_v43  ;;  %v2041_v43 = vld [vmem:[%s4020_s0 + $0x138] sm:$0xf] }
  0xce   :  { %v1211_v39 = vpop.f32.mrf.mxu2  ;;  %v876_v45 = vpop.f32.mrf.mxu0 }
  0xcf   :  { %v1212_v44 = vadd.f32 %v1211_v39, %v1043_v36  ;;  %v1045_v48 = vpop.f32.mrf.mxu1  ;;  %v1691_v57 = vmax.f32 %v1627_v51, 0.0  ;;  %v2049_v51 = vld [vmem:[%s4020_s0 + $0x140] sm:$0xf] }
  0xd0   :  { %v1046_v53 = vadd.f32 %v1045_v48, %v876_v45  ;;  %v2402_v45 = vld [vmem:[%s4020_s0 + $0x13c] sm:$0xf] }
  0xd1   :  { %v1368_v49 = vmul.f32 %v3228_v10, %v1212_v44  ;;  %915 = vmatmul.bf16.gmra.mxu0 %v2018_v40  ;;  %1164 = vmatmul.bf16.gmra.mxu3 %v2214_v41  ;;  %v2403_v44 = vld [vmem:[%s4020_s0 + $0x140] sm:$0xf0]  ;;  %v2450_v48 = vld [vmem:[%s4020_s0 + $0x2bc] sm:$0xf] }
  0xd2   :  { %1084 = vmatmul.bf16.gmra.mxu1 %v2022_v46 }
  0xd3   :  { %v1436_v52 = vadd.f32 %v3233_v13, %v1368_v49  ;;  %1253 = vmatmul.bf16.gmra.mxu2 %v2026_v47  ;;  %v2774_v47 = vld [vmem:[%s4023_s4 + $0x20] sm:$0xff]   ;;  %v2235_v49 = vld [vmem:[%s4020_s0 + $0x2c4] sm:$0xf0] }
  0xd4   :  { %v3344_v55 = vpop.f32.mrf.mxu3  ;;  %v2502_v4 = vunpack.c.h.bf16 %v2774_v47 }
  0xd5   :  { %v1628_v54 = vadd.f32 %v2494_v50, %v1436_v52  ;;  %v2043_v50 = vld [vmem:[%s4020_s0 + $0x144] sm:$0xf0]  ;;  %v2404_v52 = vld [vmem:[%s4020_s0 + $0x148] sm:$0xf0] }
  0xd6   :  { %v1214_v56 = vpop.f32.mrf.mxu2  ;;  %v878_v60 = vpop.f32.mrf.mxu0  ;;  %v2046_v0 = vor.u32 %v2402_v45, %v2043_v50  ;;  %v2050_v1 = vor.u32 %v2404_v52, %v2049_v51 }
  0xd7   :  { %v1692_v58 = vmax.f32 %v1628_v54, 0.0  ;;  %v1215_v59 = vadd.f32 %v1214_v56, %v1046_v53  ;;  %v1047_v62 = vpop.f32.mrf.mxu1  ;;  %v2501_v56 = vunpack.c.l.bf16 %v2774_v47 }
  0xd8   :  { %v1048_v12 = vadd.f32 %v1047_v62, %v878_v60 }
  0xd9   :  { %v2624_v63 = vpack.c.bf16 %v1692_v58, %v1691_v57  ;;  %v1369_v3 = vmul.f32 %v3228_v10, %v1215_v59  ;;  %v2042_v58 = vor.u32 %v2403_v44, %v2041_v43  ;;  %v2238_v59 = vor.u32 %v2450_v48, %v2235_v49 }
  0xdb   :  { %2803 = vst [vmem:[%s4024_s5 + $0x10] sm:$0xff] %v2624_v63   ;;  %v1437_v20 = vadd.f32 %v3233_v13, %v1369_v3 }
  0xdc   :  { %v3377_v14 = vpop.f32.mrf.mxu3 }
  0xdd   :  { %v1629_v29 = vadd.f32 %v2497_v15, %v1437_v20 }
  0xde   :  { %v1216_v16 = vpop.f32.mrf.mxu2  ;;  %v881_v22 = vpop.f32.mrf.mxu0 }
  0xdf   :  { %v1217_v21 = vadd.f32 %v1216_v16, %v1048_v12  ;;  %v1050_v26 = vpop.f32.mrf.mxu1  ;;  %v1693_v35 = vmax.f32 %v1629_v29, 0.0  ;;  %v2247_v29 = vld [vmem:[%s4020_s0 + $0x2dc] sm:$0xf0] }
  0xe0   :  { %v1051_v31 = vadd.f32 %v1050_v26, %v881_v22  ;;  %v2053_v22 = vld [vmem:[%s4020_s0 + $0x150] sm:$0xf] }
  0xe1   :  { %v1370_v27 = vmul.f32 %v3228_v10, %v1217_v21  ;;  %920 = vmatmul.bf16.gmra.mxu0 %v2030_v18  ;;  %1169 = vmatmul.bf16.gmra.mxu3 %v2226_v19 }
  0xe2   :  { %1089 = vmatmul.bf16.gmra.mxu1 %v2034_v23  ;;  %v2406_v23 = vld [vmem:[%s4020_s0 + $0x158] sm:$0xf0] }
  0xe3   :  { %v1438_v30 = vadd.f32 %v3233_v13, %v1370_v27  ;;  %1258 = vmatmul.bf16.gmra.mxu2 %v2038_v24  ;;  %v2405_v24 = vld [vmem:[%s4020_s0 + $0x154] sm:$0xf]  ;;  %v2775_v27 = vld [vmem:[%s4023_s4 + $0x28] sm:$0xff]  }
  0xe4   :  { %v3382_v33 = vpop.f32.mrf.mxu3  ;;  %v2506_v49 = vunpack.c.h.bf16 %v2775_v27 }
  0xe5   :  { %v1630_v32 = vadd.f32 %v2498_v28, %v1438_v30  ;;  %v2453_v28 = vld [vmem:[%s4020_s0 + $0x2d4] sm:$0xf]  ;;  %v2055_v30 = vld [vmem:[%s4020_s0 + $0x15c] sm:$0xf0] }
  0xe6   :  { %v1219_v34 = vpop.f32.mrf.mxu2  ;;  %v883_v39 = vpop.f32.mrf.mxu0  ;;  %v2058_v45 = vor.u32 %v2405_v24, %v2055_v30 }
  0xe7   :  { %v1694_v36 = vmax.f32 %v1630_v32, 0.0  ;;  %v1220_v38 = vadd.f32 %v1219_v34, %v1051_v31  ;;  %v1052_v40 = vpop.f32.mrf.mxu1  ;;  %v2061_v31 = vld [vmem:[%s4020_s0 + $0x158] sm:$0xf]  ;;  %v2407_v32 = vld [vmem:[%s4020_s0 + $0x160] sm:$0xf0] }
  0xe8   :  { %v1053_v53 = vadd.f32 %v1052_v40, %v883_v39  ;;  %v2054_v39 = vor.u32 %v2406_v23, %v2053_v22  ;;  %v2250_v40 = vor.u32 %v2453_v28, %v2247_v29 }
  0xe9   :  { %v2629_v41 = vpack.c.bf16 %v1694_v36, %v1693_v35  ;;  %v1371_v46 = vmul.f32 %v3228_v10, %v1220_v38  ;;  %v2505_v36 = vunpack.c.l.bf16 %v2775_v27 }
  0xeb   :  { %2804 = vst [vmem:[%s4024_s5 + $0x18] sm:$0xff] %v2629_v41   ;;  %v1439_v60 = vadd.f32 %v3233_v13, %v1371_v46  ;;  %v2062_v46 = vor.u32 %v2407_v32, %v2061_v31 }
  0xec   :  { %v3415_v54 = vpop.f32.mrf.mxu3 }
  0xed   :  { %v1631_v5 = vadd.f32 %v2501_v56, %v1439_v60 }
  0xee   :  { %v1221_v57 = vpop.f32.mrf.mxu2  ;;  %v886_v63 = vpop.f32.mrf.mxu0 }
  0xef   :  { %v1222_v62 = vadd.f32 %v1221_v57, %v1053_v53  ;;  %v1055_v2 = vpop.f32.mrf.mxu1  ;;  %v1695_v15 = vmax.f32 %v1631_v5, 0.0  ;;  %v2776_v5 = vld [vmem:[%s4023_s4 + $0x30] sm:$0xff]  }
  0xf0   :  { %v1056_v8 = vadd.f32 %v1055_v2, %v886_v63  ;;  %v2409_v2 = vld [vmem:[%s4020_s0 + $0x170] sm:$0xf0]  ;;  %v2510_v31 = vunpack.c.h.bf16 %v2776_v5 }
  0xf1   :  { %v1372_v3 = vmul.f32 %v3228_v10, %v1222_v62  ;;  %925 = vmatmul.bf16.gmra.mxu0 %v2042_v58  ;;  %1174 = vmatmul.bf16.gmra.mxu3 %v2238_v59 }
  0xf2   :  { %1094 = vmatmul.bf16.gmra.mxu1 %v2046_v0 }
  0xf3   :  { %v1440_v6 = vadd.f32 %v3233_v13, %v1372_v3  ;;  %1263 = vmatmul.bf16.gmra.mxu2 %v2050_v1  ;;  %v2065_v1 = vld [vmem:[%s4020_s0 + $0x168] sm:$0xf]  ;;  %v2408_v3 = vld [vmem:[%s4020_s0 + $0x16c] sm:$0xf] }
  0xf4   :  { %v3420_v11 = vpop.f32.mrf.mxu3 }
  0xf5   :  { %v1632_v9 = vadd.f32 %v2502_v4, %v1440_v6  ;;  %v2456_v6 = vld [vmem:[%s4020_s0 + $0x2ec] sm:$0xf] }
  0xf6   :  { %v1224_v12 = vpop.f32.mrf.mxu2  ;;  %v888_v19 = vpop.f32.mrf.mxu0 }
  0xf7   :  { %v1696_v16 = vmax.f32 %v1632_v9, 0.0  ;;  %v1225_v18 = vadd.f32 %v1224_v12, %v1056_v8  ;;  %v1057_v20 = vpop.f32.mrf.mxu1  ;;  %v2259_v8 = vld [vmem:[%s4020_s0 + $0x2f4] sm:$0xf0]  ;;  %v2073_v12 = vld [vmem:[%s4020_s0 + $0x170] sm:$0xf] }
  0xf8   :  { %v1058_v34 = vadd.f32 %v1057_v20, %v888_v19  ;;  %v2067_v9 = vld [vmem:[%s4020_s0 + $0x174] sm:$0xf0]  ;;  %v2509_v19 = vunpack.c.l.bf16 %v2776_v5  ;;  %v2262_v22 = vor.u32 %v2456_v6, %v2259_v8 }
  0xf9   :  { %v2634_v21 = vpack.c.bf16 %v1696_v16, %v1695_v15  ;;  %v1373_v26 = vmul.f32 %v3228_v10, %v1225_v18  ;;  %v2410_v15 = vld [vmem:[%s4020_s0 + $0x178] sm:$0xf0]  ;;  %v2070_v27 = vor.u32 %v2408_v3, %v2067_v9 }
  0xfa   :  { %v2074_v28 = vor.u32 %v2410_v15, %v2073_v12 }
  0xfb   :  { %2805 = vst [vmem:[%s4024_s5 + $0x20] sm:$0xff] %v2634_v21   ;;  %v1441_v41 = vadd.f32 %v3233_v13, %v1373_v26  ;;  %v2066_v21 = vor.u32 %v2409_v2, %v2065_v1 }
  0xfc   :  { %v3453_v35 = vpop.f32.mrf.mxu3 }
  0xfd   :  { %v1633_v50 = vadd.f32 %v2505_v36, %v1441_v41 }
  0xfe   :  { %v1226_v38 = vpop.f32.mrf.mxu2  ;;  %v891_v44 = vpop.f32.mrf.mxu0 }
  0xff   :  { %v1227_v43 = vadd.f32 %v1226_v38, %v1058_v34  ;;  %v1060_v47 = vpop.f32.mrf.mxu1  ;;  %v1697_v58 = vmax.f32 %v1633_v50, 0.0  ;;  %v2411_v50 = vld [vmem:[%s4020_s0 + $0x184] sm:$0xf] }
 0x100   :  { %v1061_v52 = vadd.f32 %v1060_v47, %v891_v44 }
 0x101   :  { %v1374_v48 = vmul.f32 %v3228_v10, %v1227_v43  ;;  %930 = vmatmul.bf16.gmra.mxu0 %v2054_v39  ;;  %1179 = vmatmul.bf16.gmra.mxu3 %v2250_v40 }
 0x102   :  { %1099 = vmatmul.bf16.gmra.mxu1 %v2058_v45 }
 0x103   :  { %v1442_v51 = vadd.f32 %v3233_v13, %v1374_v48  ;;  %1268 = vmatmul.bf16.gmra.mxu2 %v2062_v46  ;;  %v2077_v48 = vld [vmem:[%s4020_s0 + $0x180] sm:$0xf] }
 0x104   :  { %v3458_v56 = vpop.f32.mrf.mxu3 }
 0x105   :  { %v1634_v53 = vadd.f32 %v2506_v49, %v1442_v51  ;;  %v2412_v49 = vld [vmem:[%s4020_s0 + $0x188] sm:$0xf0] }
 0x106   :  { %v1229_v57 = vpop.f32.mrf.mxu2  ;;  %v893_v62 = vpop.f32.mrf.mxu0  ;;  %v2078_v2 = vor.u32 %v2412_v49, %v2077_v48 }
 0x107   :  { %v1698_v59 = vmax.f32 %v1634_v53, 0.0  ;;  %v1230_v60 = vadd.f32 %v1229_v57, %v1061_v52  ;;  %v1062_v63 = vpop.f32.mrf.mxu1  ;;  %v2777_v52 = vld [vmem:[%s4023_s4 + $0x38] sm:$0xff]   ;;  %v2181_v53 = vld [vmem:[%s4020_s0 + $0x248] sm:$0xf]  ;;  %v2437_v57 = vld [vmem:[%s4020_s0 + $0x250] sm:$0xf0] }
 0x108   :  { %v1063_v16 = vadd.f32 %v1062_v63, %v893_v62  ;;  %v2182_v3 = vor.u32 %v2437_v57, %v2181_v53 }
 0x109   :  { %v2639_v0 = vpack.c.bf16 %v1698_v59, %v1697_v58  ;;  %v1375_v4 = vmul.f32 %v3228_v10, %v1230_v60  ;;  %v2079_v58 = vld [vmem:[%s4020_s0 + $0x18c] sm:$0xf0]  ;;  %v2085_v59 = vld [vmem:[%s4020_s0 + $0x188] sm:$0xf]  ;;  %v2413_v60 = vld [vmem:[%s4020_s0 + $0x190] sm:$0xf0] }
 0x10a   :  { %v2082_v8 = vor.u32 %v2411_v50, %v2079_v58  ;;  %v2086_v9 = vor.u32 %v2413_v60, %v2085_v59 }
 0x10b   :  { %2806 = vst [vmem:[%s4024_s5 + $0x28] sm:$0xff] %v2639_v0   ;;  %v1443_v23 = vadd.f32 %v3233_v13, %v1375_v4  ;;  %v2513_v0 = vunpack.c.l.bf16 %v2777_v52 }
 0x10c   :  { %v3491_v18 = vpop.f32.mrf.mxu3 }
 0x10d   :  { %v1635_v32 = vadd.f32 %v2509_v19, %v1443_v23 }
 0x10e   :  { %v1231_v20 = vpop.f32.mrf.mxu2  ;;  %v896_v26 = vpop.f32.mrf.mxu0 }
 0x10f   :  { %v1232_v24 = vadd.f32 %v1231_v20, %v1063_v16  ;;  %v1065_v29 = vpop.f32.mrf.mxu1  ;;  %v1699_v41 = vmax.f32 %v1635_v32, 0.0  ;;  %v2514_v16 = vunpack.c.h.bf16 %v2777_v52  ;;  %v2089_v32 = vld [vmem:[%s4020_s0 + $0x198] sm:$0xf] }
 0x110   :  { %v1066_v36 = vadd.f32 %v1065_v29, %v896_v26 }
 0x111   :  { %v1376_v30 = vmul.f32 %v3228_v10, %v1232_v24  ;;  %935 = vmatmul.bf16.gmra.mxu0 %v2066_v21  ;;  %1184 = vmatmul.bf16.gmra.mxu3 %v2262_v22 }
 0x112   :  { %1104 = vmatmul.bf16.gmra.mxu1 %v2070_v27 }
 0x113   :  { %v1444_v34 = vadd.f32 %v3233_v13, %v1376_v30  ;;  %1273 = vmatmul.bf16.gmra.mxu2 %v2074_v28 }
 0x114   :  { %v3496_v39 = vpop.f32.mrf.mxu3 }
 0x115   :  { %v1636_v38 = vadd.f32 %v2510_v31, %v1444_v34  ;;  %v2415_v34 = vld [vmem:[%s4020_s0 + $0x1a0] sm:$0xf0] }
 0x116   :  { %v1234_v40 = vpop.f32.mrf.mxu2  ;;  %v898_v45 = vpop.f32.mrf.mxu0 }
 0x117   :  { %v1700_v43 = vmax.f32 %v1636_v38, 0.0  ;;  %v1235_v44 = vadd.f32 %v1234_v40, %v1066_v36  ;;  %v1067_v46 = vpop.f32.mrf.mxu1  ;;  %v2414_v36 = vld [vmem:[%s4020_s0 + $0x19c] sm:$0xf]  ;;  %v2778_v40 = vld [vmem:[%s4023_s4 + $0x40] sm:$0xff]  }
 0x118   :  { %v1068_v62 = vadd.f32 %v1067_v46, %v898_v45  ;;  %v2097_v45 = vld [vmem:[%s4020_s0 + $0x1a0] sm:$0xf]  ;;  %v2416_v46 = vld [vmem:[%s4020_s0 + $0x1a8] sm:$0xf0]  ;;  %v2517_v49 = vunpack.c.l.bf16 %v2778_v40 }
 0x119   :  { %v2644_v47 = vpack.c.bf16 %v1700_v43, %v1699_v41  ;;  %v1377_v51 = vmul.f32 %v3228_v10, %v1235_v44  ;;  %v2193_v41 = vld [vmem:[%s4020_s0 + $0x260] sm:$0xf]  ;;  %v2440_v43 = vld [vmem:[%s4020_s0 + $0x268] sm:$0xf0]  ;;  %v2091_v44 = vld [vmem:[%s4020_s0 + $0x1a4] sm:$0xf0]  ;;  %v2098_v60 = vor.u32 %v2416_v46, %v2097_v45 }
 0x11a   :  { %v2194_v52 = vor.u32 %v2440_v43, %v2193_v41  ;;  %v2094_v59 = vor.u32 %v2414_v36, %v2091_v44 }
 0x11b   :  { %2807 = vst [vmem:[%s4024_s5 + $0x30] sm:$0xff] %v2644_v47   ;;  %v1445_v4 = vadd.f32 %v3233_v13, %v1377_v51  ;;  %v2090_v51 = vor.u32 %v2415_v34, %v2089_v32  ;;  %v2419_v32 = vld [vmem:[%s4020_s0 + $0x1c0] sm:$0xf0] }
 0x11c   :  { %v3529_v63 = vpop.f32.mrf.mxu3 }
 0x11d   :  { %v1637_v19 = vadd.f32 %v2513_v0, %v1445_v4 }
 0x11e   :  { %v1236_v1 = vpop.f32.mrf.mxu2  ;;  %v901_v6 = vpop.f32.mrf.mxu0 }
 0x11f   :  { %v1237_v5 = vadd.f32 %v1236_v1, %v1068_v62  ;;  %v1070_v12 = vpop.f32.mrf.mxu1  ;;  %v1701_v26 = vmax.f32 %v1637_v19, 0.0  ;;  %v2518_v1 = vunpack.c.h.bf16 %v2778_v40 }
 0x120   :  { %v1071_v21 = vadd.f32 %v1070_v12, %v901_v6 }
 0x121   :  { %v1378_v15 = vmul.f32 %v3228_v10, %v1237_v5  ;;  %940 = vmatmul.bf16.gmra.mxu0 %v2078_v2  ;;  %1318 = vmatmul.bf16.vlgmr.msra.gmra.mxu3 %v2182_v3 }
 0x122   :  { %1109 = vmatmul.bf16.gmra.mxu1 %v2082_v8 }
 0x123   :  { %v1446_v20 = vadd.f32 %v3233_v13, %v1378_v15  ;;  %1278 = vmatmul.bf16.gmra.mxu2 %v2086_v9 }
 0x124   :  { %v3534_v23 = vpop.f32.mrf.mxu3 }
 0x125   :  { %v1638_v22 = vadd.f32 %v2514_v16, %v1446_v20 }
 0x126   :  { %v1239_v24 = vpop.f32.mrf.mxu2  ;;  %v903_v29 = vpop.f32.mrf.mxu0 }
 0x127   :  { %v1702_v27 = vmax.f32 %v1638_v22, 0.0  ;;  %v1240_v28 = vadd.f32 %v1239_v24, %v1071_v21  ;;  %v1072_v30 = vpop.f32.mrf.mxu1  ;;  %v2101_v21 = vld [vmem:[%s4020_s0 + $0x1b0] sm:$0xf]  ;;  %v2418_v22 = vld [vmem:[%s4020_s0 + $0x1b8] sm:$0xf0] }
 0x128   :  { %v1073_v47 = vadd.f32 %v1072_v30, %v903_v29  ;;  %v2417_v24 = vld [vmem:[%s4020_s0 + $0x1b4] sm:$0xf]  ;;  %v2443_v29 = vld [vmem:[%s4020_s0 + $0x280] sm:$0xf0]  ;;  %v2103_v30 = vld [vmem:[%s4020_s0 + $0x1bc] sm:$0xf0]  ;;  %v2102_v41 = vor.u32 %v2418_v22, %v2101_v21 }
 0x129   :  { %v2649_v31 = vpack.c.bf16 %v1702_v27, %v1701_v26  ;;  %v1379_v38 = vmul.f32 %v3228_v10, %v1240_v28  ;;  %v2779_v27 = vld [vmem:[%s4023_s4 + $0x48] sm:$0xff]   ;;  %v2205_v28 = vld [vmem:[%s4020_s0 + $0x278] sm:$0xf]  ;;  %v2121_v22 = vld [vmem:[%s4020_s0 + $0x1d0] sm:$0xf] }
 0x12a   :  { %v2206_v43 = vor.u32 %v2443_v29, %v2205_v28  ;;  %v2115_v21 = vld [vmem:[%s4020_s0 + $0x1d4] sm:$0xf0] }
 0x12b   :  { %2808 = vst [vmem:[%s4024_s5 + $0x38] sm:$0xff] %v2649_v31   ;;  %v1447_v53 = vadd.f32 %v3233_v13, %v1379_v38  ;;  %v2109_v31 = vld [vmem:[%s4020_s0 + $0x1b8] sm:$0xf]  ;;  %v2521_v38 = vunpack.c.l.bf16 %v2779_v27 }
 0x12c   :  { %v3567_v48 = vpop.f32.mrf.mxu3 }
 0x12d   :  { %v1639_v2 = vadd.f32 %v2517_v49, %v1447_v53  ;;  %v2110_v49 = vor.u32 %v2419_v32, %v2109_v31 }
 0x12e   :  { %v1241_v50 = vpop.f32.mrf.mxu2  ;;  %v906_v58 = vpop.f32.mrf.mxu0 }
 0x12f   :  { %v1242_v57 = vadd.f32 %v1241_v50, %v1073_v47  ;;  %v1075_v62 = vpop.f32.mrf.mxu1  ;;  %v1703_v9 = vmax.f32 %v1639_v2, 0.0  ;;  %v2106_v47 = vor.u32 %v2417_v24, %v2103_v30  ;;  %v2422_v24 = vld [vmem:[%s4020_s0 + $0x1d8] sm:$0xf0] }
 0x130   :  { %v1076_v4 = vadd.f32 %v1075_v62, %v906_v58 }
 0x131   :  { %v1380_v0 = vmul.f32 %v3228_v10, %v1242_v57  ;;  %945 = vmatmul.bf16.gmra.mxu0 %v2090_v51  ;;  %1323 = vmatmul.bf16.gmra.mxu3 %v2194_v52  ;;  %v2522_v52 = vunpack.c.h.bf16 %v2779_v27 }
 0x132   :  { %1114 = vmatmul.bf16.gmra.mxu1 %v2094_v59 }
 0x133   :  { %v1448_v3 = vadd.f32 %v3233_v13, %v1380_v0  ;;  %1283 = vmatmul.bf16.gmra.mxu2 %v2098_v60 }
 0x134   :  { %v3572_v6 = vpop.f32.mrf.mxu3 }
 0x135   :  { %v1640_v5 = vadd.f32 %v2518_v1, %v1448_v3 }
 0x136   :  { %v1244_v8 = vpop.f32.mrf.mxu2  ;;  %v908_v16 = vpop.f32.mrf.mxu0 }
 0x137   :  { %v1704_v12 = vmax.f32 %v1640_v5, 0.0  ;;  %v1245_v15 = vadd.f32 %v1244_v8, %v1076_v4  ;;  %v1077_v19 = vpop.f32.mrf.mxu1  ;;  %v2113_v8 = vld [vmem:[%s4020_s0 + $0x1c8] sm:$0xf] }
 0x138   :  { %v1078_v34 = vadd.f32 %v1077_v19, %v908_v16  ;;  %v2780_v16 = vld [vmem:[%s4023_s4 + $0x50] sm:$0xff]  }
 0x139   :  { %v2654_v20 = vpack.c.bf16 %v1704_v12, %v1703_v9  ;;  %v1381_v26 = vmul.f32 %v3228_v10, %v1245_v15  ;;  %v2421_v9 = vld [vmem:[%s4020_s0 + $0x1d0] sm:$0xf0]  ;;  %v2420_v12 = vld [vmem:[%s4020_s0 + $0x1cc] sm:$0xf]  ;;  %v2217_v19 = vld [vmem:[%s4020_s0 + $0x290] sm:$0xf]  ;;  %v2525_v28 = vunpack.c.l.bf16 %v2780_v16 }
 0x13a   :  { %v2114_v30 = vor.u32 %v2421_v9, %v2113_v8  ;;  %v2229_v8 = vld [vmem:[%s4020_s0 + $0x2a8] sm:$0xf]  ;;  %v2449_v9 = vld [vmem:[%s4020_s0 + $0x2b0] sm:$0xf0] }
 0x13b   :  { %2809 = vst [vmem:[%s4024_s5 + $0x40] sm:$0xff] %v2654_v20   ;;  %v1449_v44 = vadd.f32 %v3233_v13, %v1381_v26  ;;  %v2446_v20 = vld [vmem:[%s4020_s0 + $0x298] sm:$0xf0] }
 0x13c   :  { %v3605_v36 = vpop.f32.mrf.mxu3  ;;  %v2218_v31 = vor.u32 %v2446_v20, %v2217_v19 }
 0x13d   :  { %v1641_v53 = vadd.f32 %v2521_v38, %v1449_v44 }
 0x13e   :  { %v1246_v40 = vpop.f32.mrf.mxu2  ;;  %v911_v46 = vpop.f32.mrf.mxu0 }
 0x13f   :  { %v1247_v45 = vadd.f32 %v1246_v40, %v1078_v34  ;;  %v1080_v50 = vpop.f32.mrf.mxu1  ;;  %v1705_v0 = vmax.f32 %v1641_v53, 0.0  ;;  %v2118_v40 = vor.u32 %v2420_v12, %v2115_v21  ;;  %v2127_v12 = vld [vmem:[%s4020_s0 + $0x1ec] sm:$0xf0] }
 0x140   :  { %v1081_v58 = vadd.f32 %v1080_v50, %v911_v46 }
 0x141   :  { %v1382_v51 = vmul.f32 %v3228_v10, %v1247_v45  ;;  %950 = vmatmul.bf16.gmra.mxu0 %v2102_v41  ;;  %1328 = vmatmul.bf16.gmra.mxu3 %v2206_v43  ;;  %v2122_v41 = vor.u32 %v2422_v24, %v2121_v22  ;;  %v2526_v45 = vunpack.c.h.bf16 %v2780_v16  ;;  %v2425_v16 = vld [vmem:[%s4020_s0 + $0x1f0] sm:$0xf0] }
 0x142   :  { %1119 = vmatmul.bf16.gmra.mxu1 %v2106_v47 }
 0x143   :  { %v1450_v57 = vadd.f32 %v3233_v13, %v1382_v51  ;;  %1288 = vmatmul.bf16.gmra.mxu2 %v2110_v49 }
 0x144   :  { %v3610_v60 = vpop.f32.mrf.mxu3 }
 0x145   :  { %v1642_v59 = vadd.f32 %v2522_v52, %v1450_v57 }
 0x146   :  { %v1249_v62 = vpop.f32.mrf.mxu2  ;;  %v913_v3 = vpop.f32.mrf.mxu0 }
 0x147   :  { %v1706_v1 = vmax.f32 %v1642_v59, 0.0  ;;  %v1250_v2 = vadd.f32 %v1249_v62, %v1081_v58  ;;  %v1082_v4 = vpop.f32.mrf.mxu1 }
 0x148   :  { %v1083_v26 = vadd.f32 %v1082_v4, %v913_v3  ;;  %v2423_v3 = vld [vmem:[%s4020_s0 + $0x1e4] sm:$0xf] }
 0x149   :  { %v2659_v5 = vpack.c.bf16 %v1706_v1, %v1705_v0  ;;  %v1383_v15 = vmul.f32 %v3228_v10, %v1250_v2  ;;  %v2125_v1 = vld [vmem:[%s4020_s0 + $0x1e0] sm:$0xf]  ;;  %v2424_v2 = vld [vmem:[%s4020_s0 + $0x1e8] sm:$0xf0] }
 0x14a   :  { %v2126_v24 = vor.u32 %v2424_v2, %v2125_v1  ;;  %v2782_v2 = vld [vmem:[%s4023_s4 + $0x60] sm:$0xff]  }
 0x14b   :  { %2810 = vst [vmem:[%s4024_s5 + $0x48] sm:$0xff] %v2659_v5   ;;  %v1451_v32 = vadd.f32 %v3233_v13, %v1383_v15  ;;  %v2781_v5 = vld [vmem:[%s4023_s4 + $0x58] sm:$0xff]   ;;  %v2133_v15 = vld [vmem:[%s4020_s0 + $0x1e8] sm:$0xf] }
 0x14c   :  { %v3643_v27 = vpop.f32.mrf.mxu3  ;;  %v2529_v21 = vunpack.c.l.bf16 %v2781_v5 }
 0x14d   :  { %v1643_v46 = vadd.f32 %v2525_v28, %v1451_v32  ;;  %v2134_v32 = vor.u32 %v2425_v16, %v2133_v15  ;;  %v2533_v15 = vunpack.c.l.bf16 %v2782_v2 }
 0x14e   :  { %v1251_v29 = vpop.f32.mrf.mxu2  ;;  %v916_v38 = vpop.f32.mrf.mxu0 }
 0x14f   :  { %v1252_v34 = vadd.f32 %v1251_v29, %v1083_v26  ;;  %v1085_v43 = vpop.f32.mrf.mxu1  ;;  %v1707_v53 = vmax.f32 %v1643_v46, 0.0  ;;  %v2230_v26 = vor.u32 %v2449_v9, %v2229_v8  ;;  %v2428_v8 = vld [vmem:[%s4020_s0 + $0x208] sm:$0xf0] }
 0x150   :  { %v1086_v49 = vadd.f32 %v1085_v43, %v916_v38 }
 0x151   :  { %v1384_v44 = vmul.f32 %v3228_v10, %v1252_v34  ;;  %955 = vmatmul.bf16.gmra.mxu0 %v2114_v30  ;;  %1333 = vmatmul.bf16.gmra.mxu3 %v2218_v31  ;;  %v2130_v31 = vor.u32 %v2423_v3, %v2127_v12  ;;  %v2241_v3 = vld [vmem:[%s4020_s0 + $0x2c0] sm:$0xf] }
 0x152   :  { %1124 = vmatmul.bf16.gmra.mxu1 %v2118_v40  ;;  %v2530_v40 = vunpack.c.h.bf16 %v2781_v5  ;;  %v2139_v5 = vld [vmem:[%s4020_s0 + $0x204] sm:$0xf0] }
 0x153   :  { %v1452_v47 = vadd.f32 %v3233_v13, %v1384_v44  ;;  %1293 = vmatmul.bf16.gmra.mxu2 %v2122_v41 }
 0x154   :  { %v3648_v51 = vpop.f32.mrf.mxu3 }
 0x155   :  { %v1644_v50 = vadd.f32 %v2526_v45, %v1452_v47 }
 0x156   :  { %v1254_v52 = vpop.f32.mrf.mxu2  ;;  %v918_v59 = vpop.f32.mrf.mxu0 }
 0x157   :  { %v1708_v57 = vmax.f32 %v1644_v50, 0.0  ;;  %v1255_v58 = vadd.f32 %v1254_v52, %v1086_v49  ;;  %v1087_v62 = vpop.f32.mrf.mxu1 }
 0x158   :  { %v1088_v19 = vadd.f32 %v1087_v62, %v918_v59  ;;  %v2137_v59 = vld [vmem:[%s4020_s0 + $0x1f8] sm:$0xf]  ;;  %v2427_v62 = vld [vmem:[%s4020_s0 + $0x200] sm:$0xf0] }
 0x159   :  { %v2664_v0 = vpack.c.bf16 %v1708_v57, %v1707_v53  ;;  %v1385_v4 = vmul.f32 %v3228_v10, %v1255_v58 }
 0x15b   :  { %2811 = vst [vmem:[%s4024_s5 + $0x50] sm:$0xff] %v2664_v0   ;;  %v1453_v28 = vadd.f32 %v3233_v13, %v1385_v4  ;;  %v2426_v0 = vld [vmem:[%s4020_s0 + $0x1fc] sm:$0xf]  ;;  %v2452_v4 = vld [vmem:[%s4020_s0 + $0x2c8] sm:$0xf0] }
 0x15c   :  { %v3681_v20 = vpop.f32.mrf.mxu3 }
 0x15d   :  { %v1645_v41 = vadd.f32 %v2529_v21, %v1453_v28  ;;  %v2242_v21 = vor.u32 %v2452_v4, %v2241_v3  ;;  %v2142_v28 = vor.u32 %v2426_v0, %v2139_v5  ;;  %v2455_v3 = vld [vmem:[%s4020_s0 + $0x2e0] sm:$0xf0]  ;;  %v2151_v4 = vld [vmem:[%s4020_s0 + $0x21c] sm:$0xf0]  ;;  %v2157_v5 = vld [vmem:[%s4020_s0 + $0x218] sm:$0xf] }
 0x15e   :  { %v1256_v22 = vpop.f32.mrf.mxu2  ;;  %v921_v30 = vpop.f32.mrf.mxu0 }
 0x15f   :  { %v1257_v29 = vadd.f32 %v1256_v22, %v1088_v19  ;;  %v1090_v34 = vpop.f32.mrf.mxu1  ;;  %v1709_v49 = vmax.f32 %v1645_v41, 0.0  ;;  %v2138_v19 = vor.u32 %v2427_v62, %v2137_v59  ;;  %v2430_v59 = vld [vmem:[%s4020_s0 + $0x218] sm:$0xf0]  ;;  %v2429_v62 = vld [vmem:[%s4020_s0 + $0x214] sm:$0xf] }
 0x160   :  { %v1091_v44 = vadd.f32 %v1090_v34, %v921_v30  ;;  %v2534_v34 = vunpack.c.h.bf16 %v2782_v2  ;;  %v2253_v2 = vld [vmem:[%s4020_s0 + $0x2d8] sm:$0xf] }
 0x161   :  { %v1386_v38 = vmul.f32 %v3228_v10, %v1257_v29  ;;  %960 = vmatmul.bf16.gmra.mxu0 %v2126_v24  ;;  %1338 = vmatmul.bf16.gmra.mxu3 %v2230_v26 }
 0x162   :  { %1129 = vmatmul.bf16.gmra.mxu1 %v2130_v31  ;;  %v3725_v31 = vld [vmem:[%s4021_s2] ss:$0 sm:$0xff] }
 0x163   :  { %v1454_v43 = vadd.f32 %v3233_v13, %v1386_v38  ;;  %1298 = vmatmul.bf16.gmra.mxu2 %v2134_v32 }
 0x164   :  { %v3686_v46 = vpop.f32.mrf.mxu3 }
 0x165   :  { %v1646_v45 = vadd.f32 %v2530_v40, %v1454_v43 }
 0x166   :  { %v1259_v47 = vpop.f32.mrf.mxu2  ;;  %v923_v53 = vpop.f32.mrf.mxu0 }
 0x167   :  { %v1710_v50 = vmax.f32 %v1646_v45, 0.0  ;;  %v1260_v52 = vadd.f32 %v1259_v47, %v1091_v44  ;;  %v1092_v57 = vpop.f32.mrf.mxu1 }
 0x168   :  { %v1093_v9 = vadd.f32 %v1092_v57, %v923_v53 }
 0x169   :  { %v2669_v58 = vpack.c.bf16 %v1710_v50, %v1709_v49  ;;  %v1387_v1 = vmul.f32 %v3228_v10, %v1260_v52  ;;  %v2145_v10 = vld [vmem:[%s4020_s0 + $0x200] sm:$0xf] }
 0x16a   :  { %v2146_v29 = vor.u32 %v2428_v8, %v2145_v10  ;;  %v2431_v10 = vld [vmem:[%s4020_s0 + $0x220] sm:$0xf0] }
 0x16b   :  { %2812 = vst [vmem:[%s4024_s5 + $0x58] sm:$0xff] %v2669_v58   ;;  %v1455_v22 = vadd.f32 %v3233_v13, %v1387_v1  ;;  %v3731_v13 = vld [vmem:[%s4022_s3] ss:$0 sm:$0xff]  ;;  %v2149_v58 = vld [vmem:[%s4020_s0 + $0x210] sm:$0xf]  ;;  %v2783_v1 = vld [vmem:[%s4023_s4 + $0x68] sm:$0xff]  }
 0x16c   :  { %v3719_v12 = vpop.f32.mrf.mxu3 }
 0x16d   :  { %v1647_v38 = vadd.f32 %v2533_v15, %v1455_v22  ;;  %v2537_v15 = vunpack.c.l.bf16 %v2783_v1 }
 0x16e   :  { %v1261_v16 = vpop.f32.mrf.mxu2  ;;  %v926_v26 = vpop.f32.mrf.mxu0 }
 0x16f   :  { %v1262_v24 = vadd.f32 %v1261_v16, %v1093_v9  ;;  %v1095_v30 = vpop.f32.mrf.mxu1  ;;  %v1711_v47 = vmax.f32 %v1647_v38, 0.0 }
 0x170   :  { %v1096_v41 = vadd.f32 %v1095_v30, %v926_v26 }
 0x171   :  { %v1388_v32 = vmul.f32 %v3725_v31, %v1262_v24  ;;  %965 = vmatmul.bf16.gmra.mxu0 %v2138_v19  ;;  %1343 = vmatmul.bf16.gmra.mxu3 %v2242_v21  ;;  %v2150_v19 = vor.u32 %v2430_v59, %v2149_v58  ;;  %v2254_v21 = vor.u32 %v2455_v3, %v2253_v2  ;;  %v2161_v59 = vld [vmem:[%s4020_s0 + $0x228] sm:$0xf]  ;;  %v2784_v2 = vld [vmem:[%s4023_s4 + $0x70] sm:$0xff]  }
 0x172   :  { %1134 = vmatmul.bf16.gmra.mxu1 %v2142_v28  ;;  %v2154_v28 = vor.u32 %v2429_v62, %v2151_v4  ;;  %v2433_v62 = vld [vmem:[%s4020_s0 + $0x230] sm:$0xf0]  ;;  %v2265_v3 = vld [vmem:[%s4020_s0 + $0x2f0] sm:$0xf]  ;;  %v2458_v4 = vld [vmem:[%s4020_s0 + $0x2f8] sm:$0xf0] }
 0x173   :  { %v1456_v40 = vadd.f32 %v3731_v13, %v1388_v32  ;;  %1303 = vmatmul.bf16.gmra.mxu2 %v2146_v29  ;;  %v2158_v29 = vor.u32 %v2431_v10, %v2157_v5  ;;  %v2163_v5 = vld [vmem:[%s4020_s0 + $0x234] sm:$0xf0]  ;;  %v2169_v10 = vld [vmem:[%s4020_s0 + $0x230] sm:$0xf] }
 0x174   :  { %v3734_v44 = vpop.f32.mrf.mxu3 }
 0x175   :  { %v1648_v43 = vadd.f32 %v2534_v34, %v1456_v40  ;;  %v2538_v34 = vunpack.c.h.bf16 %v2783_v1 }
 0x176   :  { %v1264_v45 = vpop.f32.mrf.mxu2  ;;  %v928_v52 = vpop.f32.mrf.mxu0 }
 0x177   :  { %v1712_v49 = vmax.f32 %v1648_v43, 0.0  ;;  %v1265_v50 = vadd.f32 %v1264_v45, %v1096_v41  ;;  %v1097_v53 = vpop.f32.mrf.mxu1 }
 0x178   :  { %v1098_v8 = vadd.f32 %v1097_v53, %v928_v52 }
 0x179   :  { %v2674_v57 = vpack.c.bf16 %v1712_v49, %v1711_v47  ;;  %v1389_v0 = vmul.f32 %v3725_v31, %v1265_v50 }
 0x17b   :  { %2813 = vst [vmem:[%s4024_s5 + $0x60] sm:$0xff] %v2674_v57   ;;  %v1457_v22 = vadd.f32 %v3731_v13, %v1389_v0  ;;  %v2432_v0 = vld [vmem:[%s4020_s0 + $0x22c] sm:$0xf] }
 0x17c   :  { %v3767_v9 = vpop.f32.mrf.mxu3 }
 0x17d   :  { %v1649_v38 = vadd.f32 %v2537_v15, %v1457_v22  ;;  %v2162_v22 = vor.u32 %v2433_v62, %v2161_v59 }
 0x17e   :  { %v1266_v16 = vpop.f32.mrf.mxu2  ;;  %v931_v26 = vpop.f32.mrf.mxu0 }
 0x17f   :  { %v1267_v24 = vadd.f32 %v1266_v16, %v1098_v8  ;;  %v1100_v30 = vpop.f32.mrf.mxu1  ;;  %v1713_v49 = vmax.f32 %v1649_v38, 0.0  ;;  %v2434_v8 = vld [vmem:[%s4020_s0 + $0x238] sm:$0xf0] }
 0x180   :  { %v1101_v41 = vadd.f32 %v1100_v30, %v931_v26  ;;  %v2166_v30 = vor.u32 %v2432_v0, %v2163_v5 }
 0x181   :  { %v1390_v32 = vmul.f32 %v3725_v31, %v1267_v24  ;;  %970 = vmatmul.bf16.gmra.mxu0 %v2150_v19  ;;  %1348 = vmatmul.bf16.gmra.mxu3 %v2254_v21  ;;  %v2541_v19 = vunpack.c.l.bf16 %v2784_v2  ;;  %v2266_v24 = vor.u32 %v2458_v4, %v2265_v3 }
 0x182   :  { %1139 = vmatmul.bf16.gmra.mxu1 %v2154_v28 }
 0x183   :  { %v1458_v40 = vadd.f32 %v3731_v13, %v1390_v32  ;;  %1308 = vmatmul.bf16.gmra.mxu2 %v2158_v29  ;;  %v2170_v32 = vor.u32 %v2434_v8, %v2169_v10 }
 0x184   :  { %v3772_v45 = vpop.f32.mrf.mxu3 }
 0x185   :  { %v1650_v43 = vadd.f32 %v2538_v34, %v1458_v40  ;;  %v2542_v40 = vunpack.c.h.bf16 %v2784_v2  ;;  %v2785_v2 = vld [vmem:[%s4023_s4 + $0x78] sm:$0xff]  }
 0x186   :  { %v1269_v47 = vpop.f32.mrf.mxu2  ;;  %v933_v53 = vpop.f32.mrf.mxu0  ;;  %v2545_v8 = vunpack.c.l.bf16 %v2785_v2 }
 0x187   :  { %v1714_v50 = vmax.f32 %v1650_v43, 0.0  ;;  %v1270_v52 = vadd.f32 %v1269_v47, %v1101_v41  ;;  %v1102_v57 = vpop.f32.mrf.mxu1 }
 0x188   :  { %v1103_v15 = vadd.f32 %v1102_v57, %v933_v53 }
 0x189   :  { %v2679_v58 = vpack.c.bf16 %v1714_v50, %v1713_v49  ;;  %v1391_v1 = vmul.f32 %v3725_v31, %v1270_v52 }
 0x18b   :  { %2814 = vst [vmem:[%s4024_s5 + $0x68] sm:$0xff] %v2679_v58   ;;  %v1459_v26 = vadd.f32 %v3731_v13, %v1391_v1 }
 0x18c   :  { %v3805_v16 = vpop.f32.mrf.mxu3 }
 0x18d   :  { %v1651_v41 = vadd.f32 %v2541_v19, %v1459_v26 }
 0x18e   :  { %v1271_v21 = vpop.f32.mrf.mxu2  ;;  %v936_v29 = vpop.f32.mrf.mxu0 }
 0x18f   :  { %v1272_v28 = vadd.f32 %v1271_v21, %v1103_v15  ;;  %v1105_v34 = vpop.f32.mrf.mxu1  ;;  %v1715_v53 = vmax.f32 %v1651_v41, 0.0 }
 0x190   :  { %v1106_v47 = vadd.f32 %v1105_v34, %v936_v29 }
 0x191   :  { %v1392_v38 = vmul.f32 %v3725_v31, %v1272_v28  ;;  %975 = vmatmul.bf16.gmra.mxu0 %v2162_v22  ;;  %1353 = vmatmul.bf16.gmra.mxu3 %v2266_v24  ;;  %v2546_v24 = vunpack.c.h.bf16 %v2785_v2 }
 0x192   :  { %1144 = vmatmul.bf16.gmra.mxu1 %v2166_v30  ;;  %v1151_v30 = vadd.f32 %v3534_v23, %v3223_v7  ;;  %v2794_v7 = vld [vmem:[%s4023_s4 + $0xc0] sm:$0xff]   ;;  %v1153_v23 = vadd.f32 %v3567_v48, %v3263_v25 }
 0x193   :  { %v1460_v43 = vadd.f32 %v3731_v13, %v1392_v38  ;;  %1313 = vmatmul.bf16.gmra.mxu2 %v2170_v32  ;;  %v2581_v2 = vunpack.c.l.bf16 %v2794_v7 }
 0x194   :  { %v3810_v50 = vpop.f32.mrf.mxu3 }
 0x195   :  { %v1652_v49 = vadd.f32 %v2542_v40, %v1460_v43 }
 0x196   :  { %v1274_v52 = vpop.f32.mrf.mxu2  ;;  %v938_v59 = vpop.f32.mrf.mxu0 }
 0x197   :  { %v1716_v57 = vmax.f32 %v1652_v49, 0.0  ;;  %v1275_v58 = vadd.f32 %v1274_v52, %v1106_v47  ;;  %v1107_v62 = vpop.f32.mrf.mxu1 }
 0x198   :  { %v1108_v3 = vadd.f32 %v1107_v62, %v938_v59  ;;  %v2786_v59 = vld [vmem:[%s4023_s4 + $0x80] sm:$0xff]  }
 0x199   :  { %v2684_v0 = vpack.c.bf16 %v1716_v57, %v1715_v53  ;;  %v1393_v1 = vmul.f32 %v3725_v31, %v1275_v58 }
 0x19b   :  { %2815 = vst [vmem:[%s4024_s5 + $0x70] sm:$0xff] %v2684_v0   ;;  %v1461_v10 = vadd.f32 %v3731_v13, %v1393_v1 }
 0x19c   :  { %v3819_v4 = vpop.f32.mrf.mxu3 }
 0x19d   :  { %v1653_v26 = vadd.f32 %v2545_v8, %v1461_v10  ;;  %v2549_v8 = vunpack.c.l.bf16 %v2786_v59 }
 0x19e   :  { %v1276_v5 = vpop.f32.mrf.mxu2  ;;  %v941_v19 = vpop.f32.mrf.mxu0 }
 0x19f   :  { %v1277_v15 = vadd.f32 %v1276_v5, %v1108_v3  ;;  %v1110_v21 = vpop.f32.mrf.mxu1  ;;  %v1717_v41 = vmax.f32 %v1653_v26, 0.0 }
 0x1a0   :  { %v1111_v29 = vadd.f32 %v1110_v21, %v941_v19 }
 0x1a1   :  { %v1394_v22 = vmul.f32 %v3725_v31, %v1277_v15 }
 0x1a3   :  { %v1462_v28 = vadd.f32 %v3731_v13, %v1394_v22  ;;  %v2582_v22 = vunpack.c.h.bf16 %v2794_v7 }
 0x1a4   :  { %v1319_v34 = vpop.f32.mrf.mxu3 }
 0x1a5   :  { %v1654_v32 = vadd.f32 %v2546_v24, %v1462_v28  ;;  %v1320_v40 = vadd.f32 %v1319_v34, %v1151_v30  ;;  %v2550_v24 = vunpack.c.h.bf16 %v2786_v59  ;;  %v1156_v34 = vadd.f32 %v3572_v6, %v3268_v42 }
 0x1a6   :  { %v1279_v38 = vpop.f32.mrf.mxu2  ;;  %v943_v49 = vpop.f32.mrf.mxu0 }
 0x1a7   :  { %v1718_v43 = vmax.f32 %v1654_v32, 0.0  ;;  %v1280_v47 = vadd.f32 %v1279_v38, %v1111_v29  ;;  %v1112_v52 = vpop.f32.mrf.mxu1  ;;  %v1411_v57 = vmul.f32 %v3725_v31, %v1320_v40 }
 0x1a8   :  { %v1113_v62 = vadd.f32 %v1112_v52, %v943_v49 }
 0x1a9   :  { %v2689_v53 = vpack.c.bf16 %v1718_v43, %v1717_v41  ;;  %v1395_v58 = vmul.f32 %v3725_v31, %v1280_v47  ;;  %v1479_v1 = vadd.f32 %v3731_v13, %v1411_v57 }
 0x1ab   :  { %2816 = vst [vmem:[%s4024_s5 + $0x78] sm:$0xff] %v2689_v53   ;;  %v1463_v10 = vadd.f32 %v3731_v13, %v1395_v58  ;;  %v1671_v26 = vadd.f32 %v2581_v2, %v1479_v1  ;;  %v1158_v1 = vadd.f32 %v3605_v36, %v3301_v61  ;;  %v2787_v2 = vld [vmem:[%s4023_s4 + $0x88] sm:$0xff]  }
 0x1ac   :  { %v1321_v0 = vpop.f32.mrf.mxu3 }
 0x1ad   :  { %v1322_v5 = vadd.f32 %v1321_v0, %v1153_v23  ;;  %v1655_v29 = vadd.f32 %v2549_v8, %v1463_v10  ;;  %v1735_v43 = vmax.f32 %v1671_v26, 0.0  ;;  %v2795_v0 = vld [vmem:[%s4023_s4 + $0xc8] sm:$0xff]  }
 0x1ae   :  { %v1281_v3 = vpop.f32.mrf.mxu2  ;;  %v946_v19 = vpop.f32.mrf.mxu0  ;;  %v2585_v8 = vunpack.c.l.bf16 %v2795_v0  ;;  %v2586_v26 = vunpack.c.h.bf16 %v2795_v0  ;;  %v2796_v0 = vld [vmem:[%s4023_s4 + $0xd0] sm:$0xff]  }
 0x1af   :  { %v1282_v15 = vadd.f32 %v1281_v3, %v1113_v62  ;;  %v1412_v21 = vmul.f32 %v3725_v31, %v1322_v5  ;;  %v1115_v25 = vpop.f32.mrf.mxu1  ;;  %v1719_v53 = vmax.f32 %v1655_v29, 0.0 }
 0x1b0   :  { %v1116_v32 = vadd.f32 %v1115_v25, %v946_v19 }
 0x1b1   :  { %v1396_v48 = vmul.f32 %v3725_v31, %v1282_v15  ;;  %v1480_v28 = vadd.f32 %v3731_v13, %v1412_v21 }
 0x1b3   :  { %v1464_v30 = vadd.f32 %v3731_v13, %v1396_v48  ;;  %v1672_v38 = vadd.f32 %v2582_v22, %v1480_v28  ;;  %v2553_v22 = vunpack.c.l.bf16 %v2787_v2  ;;  %v2554_v28 = vunpack.c.h.bf16 %v2787_v2  ;;  %v2788_v2 = vld [vmem:[%s4023_s4 + $0x90] sm:$0xff]  }
 0x1b4   :  { %v1324_v41 = vpop.f32.mrf.mxu3 }
 0x1b5   :  { %v1656_v40 = vadd.f32 %v2550_v24, %v1464_v30  ;;  %v1736_v47 = vmax.f32 %v1672_v38, 0.0  ;;  %v1325_v52 = vadd.f32 %v1324_v41, %v1156_v34 }
 0x1b6   :  { %v1284_v49 = vpop.f32.mrf.mxu2  ;;  %v948_v7 = vpop.f32.mrf.mxu0 }
 0x1b7   :  { %v1720_v57 = vmax.f32 %v1656_v40, 0.0  ;;  %v1285_v58 = vadd.f32 %v1284_v49, %v1116_v32  ;;  %v2734_v23 = vpack.c.bf16 %v1736_v47, %v1735_v43  ;;  %v1117_v59 = vpop.f32.mrf.mxu1  ;;  %v1413_v42 = vmul.f32 %v3725_v31, %v1325_v52 }
 0x1b8   :  { %v1118_v3 = vadd.f32 %v1117_v59, %v948_v7  ;;  %v1161_v40 = vadd.f32 %v3610_v60, %v3306_v17 }
 0x1b9   :  { %v2694_v62 = vpack.c.bf16 %v1720_v57, %v1719_v53  ;;  %2825 = vst [vmem:[%s4024_s5 + $0xc0] sm:$0xff] %v2734_v23   ;;  %v1397_v6 = vmul.f32 %v3725_v31, %v1285_v58  ;;  %v1481_v10 = vadd.f32 %v3731_v13, %v1413_v42 }
 0x1bb   :  { %2817 = vst [vmem:[%s4024_s5 + $0x80] sm:$0xff] %v2694_v62   ;;  %v1465_v21 = vadd.f32 %v3731_v13, %v1397_v6  ;;  %v1673_v29 = vadd.f32 %v2585_v8, %v1481_v10  ;;  %v2589_v8 = vunpack.c.l.bf16 %v2796_v0 }
 0x1bc   :  { %v1326_v5 = vpop.f32.mrf.mxu3 }
 0x1bd   :  { %v1327_v19 = vadd.f32 %v1326_v5, %v1158_v1  ;;  %v1657_v32 = vadd.f32 %v2553_v22, %v1465_v21  ;;  %v1737_v49 = vmax.f32 %v1673_v29, 0.0  ;;  %v1163_v1 = vadd.f32 %v3643_v27, %v3339_v37 }
 0x1be   :  { %v1286_v15 = vpop.f32.mrf.mxu2  ;;  %v951_v48 = vpop.f32.mrf.mxu0  ;;  %v2557_v22 = vunpack.c.l.bf16 %v2788_v2 }
 0x1bf   :  { %v1287_v25 = vadd.f32 %v1286_v15, %v1118_v3  ;;  %v1414_v24 = vmul.f32 %v3725_v31, %v1327_v19  ;;  %v1120_v61 = vpop.f32.mrf.mxu1  ;;  %v1721_v58 = vmax.f32 %v1657_v32, 0.0 }
 0x1c0   :  { %v1121_v38 = vadd.f32 %v1120_v61, %v951_v48  ;;  %v2558_v61 = vunpack.c.h.bf16 %v2788_v2 }
 0x1c1   :  { %v1398_v36 = vmul.f32 %v3725_v31, %v1287_v25  ;;  %v1482_v30 = vadd.f32 %v3731_v13, %v1414_v24 }
 0x1c3   :  { %v1466_v34 = vadd.f32 %v3731_v13, %v1398_v36  ;;  %v1674_v41 = vadd.f32 %v2586_v26, %v1482_v30  ;;  %v2590_v26 = vunpack.c.h.bf16 %v2796_v0 }
 0x1c4   :  { %v1329_v47 = vpop.f32.mrf.mxu3 }
 0x1c5   :  { %v1658_v43 = vadd.f32 %v2554_v28, %v1466_v34  ;;  %v1738_v52 = vmax.f32 %v1674_v41, 0.0  ;;  %v1330_v57 = vadd.f32 %v1329_v47, %v1161_v40  ;;  %v1166_v34 = vadd.f32 %v3648_v51, %v3344_v55 }
 0x1c6   :  { %v1289_v53 = vpop.f32.mrf.mxu2  ;;  %v953_v59 = vpop.f32.mrf.mxu0 }
 0x1c7   :  { %v1722_v7 = vmax.f32 %v1658_v43, 0.0  ;;  %v1290_v23 = vadd.f32 %v1289_v53, %v1121_v38  ;;  %v2739_v62 = vpack.c.bf16 %v1738_v52, %v1737_v49  ;;  %v1122_v42 = vpop.f32.mrf.mxu1  ;;  %v1415_v17 = vmul.f32 %v3725_v31, %v1330_v57 }
 0x1c8   :  { %v1123_v3 = vadd.f32 %v1122_v42, %v953_v59  ;;  %v2797_v42 = vld [vmem:[%s4023_s4 + $0xd8] sm:$0xff]  }
 0x1c9   :  { %v2699_v6 = vpack.c.bf16 %v1722_v7, %v1721_v58  ;;  %2826 = vst [vmem:[%s4024_s5 + $0xc8] sm:$0xff] %v2739_v62   ;;  %v1399_v60 = vmul.f32 %v3725_v31, %v1290_v23  ;;  %v1483_v10 = vadd.f32 %v3731_v13, %v1415_v17  ;;  %v2789_v17 = vld [vmem:[%s4023_s4 + $0x98] sm:$0xff]   ;;  %v2593_v2 = vunpack.c.l.bf16 %v2797_v42 }
 0x1cb   :  { %2818 = vst [vmem:[%s4024_s5 + $0x88] sm:$0xff] %v2699_v6   ;;  %v1467_v21 = vadd.f32 %v3731_v13, %v1399_v60  ;;  %v1675_v36 = vadd.f32 %v2589_v8, %v1483_v10  ;;  %v1168_v6 = vadd.f32 %v3681_v20, %v3377_v14  ;;  %v2561_v8 = vunpack.c.l.bf16 %v2789_v17 }
 0x1cc   :  { %v1331_v5 = vpop.f32.mrf.mxu3 }
 0x1cd   :  { %v1332_v19 = vadd.f32 %v1331_v5, %v1163_v1  ;;  %v1659_v29 = vadd.f32 %v2557_v22, %v1467_v21  ;;  %v1739_v43 = vmax.f32 %v1675_v36, 0.0  ;;  %v2594_v22 = vunpack.c.h.bf16 %v2797_v42 }
 0x1ce   :  { %v1291_v15 = vpop.f32.mrf.mxu2  ;;  %v956_v48 = vpop.f32.mrf.mxu0 }
 0x1cf   :  { %v1292_v25 = vadd.f32 %v1291_v15, %v1123_v3  ;;  %v1416_v24 = vmul.f32 %v3725_v31, %v1332_v19  ;;  %v1125_v37 = vpop.f32.mrf.mxu1  ;;  %v1723_v53 = vmax.f32 %v1659_v29, 0.0 }
 0x1d0   :  { %v1126_v32 = vadd.f32 %v1125_v37, %v956_v48 }
 0x1d1   :  { %v1400_v27 = vmul.f32 %v3725_v31, %v1292_v25  ;;  %v1484_v28 = vadd.f32 %v3731_v13, %v1416_v24  ;;  %v2562_v25 = vunpack.c.h.bf16 %v2789_v17 }
 0x1d3   :  { %v1468_v30 = vadd.f32 %v3731_v13, %v1400_v27  ;;  %v1676_v38 = vadd.f32 %v2590_v26, %v1484_v28 }
 0x1d4   :  { %v1334_v41 = vpop.f32.mrf.mxu3 }
 0x1d5   :  { %v1660_v40 = vadd.f32 %v2558_v61, %v1468_v30  ;;  %v1740_v47 = vmax.f32 %v1676_v38, 0.0  ;;  %v1335_v52 = vadd.f32 %v1334_v41, %v1166_v34  ;;  %v1171_v61 = vadd.f32 %v3686_v46, %v3382_v33 }
 0x1d6   :  { %v1294_v49 = vpop.f32.mrf.mxu2  ;;  %v958_v7 = vpop.f32.mrf.mxu0 }
 0x1d7   :  { %v1724_v57 = vmax.f32 %v1660_v40, 0.0  ;;  %v1295_v58 = vadd.f32 %v1294_v49, %v1126_v32  ;;  %v2744_v23 = vpack.c.bf16 %v1740_v47, %v1739_v43  ;;  %v1127_v59 = vpop.f32.mrf.mxu1  ;;  %v1417_v55 = vmul.f32 %v3725_v31, %v1335_v52 }
 0x1d8   :  { %v1128_v60 = vadd.f32 %v1127_v59, %v958_v7  ;;  %v2790_v7 = vld [vmem:[%s4023_s4 + $0xa0] sm:$0xff]  }
 0x1d9   :  { %v2704_v62 = vpack.c.bf16 %v1724_v57, %v1723_v53  ;;  %2827 = vst [vmem:[%s4024_s5 + $0xd0] sm:$0xff] %v2744_v23   ;;  %v1401_v51 = vmul.f32 %v3725_v31, %v1295_v58  ;;  %v1485_v1 = vadd.f32 %v3731_v13, %v1417_v55  ;;  %v2798_v57 = vld [vmem:[%s4023_s4 + $0xe0] sm:$0xff]   ;;  %v1173_v58 = vadd.f32 %v3719_v12, %v3415_v54 }
 0x1da   :  { %v2597_v55 = vunpack.c.l.bf16 %v2798_v57  ;;  %v2565_v17 = vunpack.c.l.bf16 %v2790_v7 }
 0x1db   :  { %2819 = vst [vmem:[%s4024_s5 + $0x90] sm:$0xff] %v2704_v62   ;;  %v1469_v10 = vadd.f32 %v3731_v13, %v1401_v51  ;;  %v1677_v48 = vadd.f32 %v2593_v2, %v1485_v1  ;;  %v2598_v2 = vunpack.c.h.bf16 %v2798_v57 }
 0x1dc   :  { %v1336_v0 = vpop.f32.mrf.mxu3 }
 0x1dd   :  { %v1337_v5 = vadd.f32 %v1336_v0, %v1168_v6  ;;  %v1661_v26 = vadd.f32 %v2561_v8, %v1469_v10  ;;  %v1741_v30 = vmax.f32 %v1677_v48, 0.0 }
 0x1de   :  { %v1296_v3 = vpop.f32.mrf.mxu2  ;;  %v961_v19 = vpop.f32.mrf.mxu0 }
 0x1df   :  { %v1297_v15 = vadd.f32 %v1296_v3, %v1128_v60  ;;  %v1418_v21 = vmul.f32 %v3725_v31, %v1337_v5  ;;  %v1130_v14 = vpop.f32.mrf.mxu1  ;;  %v1725_v40 = vmax.f32 %v1661_v26, 0.0  ;;  %v2566_v3 = vunpack.c.h.bf16 %v2790_v7 }
 0x1e0   :  { %v1131_v27 = vadd.f32 %v1130_v14, %v961_v19 }
 0x1e1   :  { %v1402_v20 = vmul.f32 %v3725_v31, %v1297_v15  ;;  %v1486_v24 = vadd.f32 %v3731_v13, %v1418_v21  ;;  %v1176_v21 = vadd.f32 %v3734_v44, %v3420_v11 }
 0x1e3   :  { %v1470_v37 = vadd.f32 %v3731_v13, %v1402_v20  ;;  %v1678_v36 = vadd.f32 %v2594_v22, %v1486_v24 }
 0x1e4   :  { %v1339_v29 = vpop.f32.mrf.mxu3 }
 0x1e5   :  { %v1662_v28 = vadd.f32 %v2562_v25, %v1470_v37  ;;  %v1742_v32 = vmax.f32 %v1678_v36, 0.0  ;;  %v1340_v38 = vadd.f32 %v1339_v29, %v1171_v61 }
 0x1e6   :  { %v1299_v34 = vpop.f32.mrf.mxu2  ;;  %v963_v47 = vpop.f32.mrf.mxu0 }
 0x1e7   :  { %v1726_v41 = vmax.f32 %v1662_v28, 0.0  ;;  %v1300_v43 = vadd.f32 %v1299_v34, %v1131_v27  ;;  %v2749_v49 = vpack.c.bf16 %v1742_v32, %v1741_v30  ;;  %v1132_v52 = vpop.f32.mrf.mxu1  ;;  %v1419_v33 = vmul.f32 %v3725_v31, %v1340_v38  ;;  %v2799_v32 = vld [vmem:[%s4023_s4 + $0xe8] sm:$0xff]  }
 0x1e8   :  { %v1133_v23 = vadd.f32 %v1132_v52, %v963_v47  ;;  %v1178_v34 = vadd.f32 %v3767_v9, %v3453_v35  ;;  %v2791_v38 = vld [vmem:[%s4023_s4 + $0xa8] sm:$0xff]   ;;  %v2601_v47 = vunpack.c.l.bf16 %v2799_v32  ;;  %v2602_v7 = vunpack.c.h.bf16 %v2799_v32 }
 0x1e9   :  { %v2709_v53 = vpack.c.bf16 %v1726_v41, %v1725_v40  ;;  %2828 = vst [vmem:[%s4024_s5 + $0xd8] sm:$0xff] %v2749_v49   ;;  %v1403_v46 = vmul.f32 %v3725_v31, %v1300_v43  ;;  %v1487_v62 = vadd.f32 %v3731_v13, %v1419_v33  ;;  %v2569_v33 = vunpack.c.l.bf16 %v2791_v38 }
 0x1eb   :  { %2820 = vst [vmem:[%s4024_s5 + $0x98] sm:$0xff] %v2709_v53   ;;  %v1471_v6 = vadd.f32 %v3731_v13, %v1403_v46  ;;  %v1679_v5 = vadd.f32 %v2597_v55, %v1487_v62 }
 0x1ec   :  { %v1341_v59 = vpop.f32.mrf.mxu3 }
 0x1ed   :  { %v1342_v42 = vadd.f32 %v1341_v59, %v1173_v58  ;;  %v1663_v8 = vadd.f32 %v2565_v17, %v1471_v6  ;;  %v1743_v25 = vmax.f32 %v1679_v5, 0.0  ;;  %v1181_v6 = vadd.f32 %v3772_v45, %v3458_v56 }
 0x1ee   :  { %v1301_v51 = vpop.f32.mrf.mxu2  ;;  %v966_v0 = vpop.f32.mrf.mxu0 }
 0x1ef   :  { %v1302_v60 = vadd.f32 %v1301_v51, %v1133_v23  ;;  %v1420_v1 = vmul.f32 %v3725_v31, %v1342_v42  ;;  %v1135_v54 = vpop.f32.mrf.mxu1  ;;  %v1727_v37 = vmax.f32 %v1663_v8, 0.0  ;;  %v2570_v23 = vunpack.c.h.bf16 %v2791_v38 }
 0x1f0   :  { %v1136_v19 = vadd.f32 %v1135_v54, %v966_v0 }
 0x1f1   :  { %v1404_v12 = vmul.f32 %v3725_v31, %v1302_v60  ;;  %v1488_v10 = vadd.f32 %v3731_v13, %v1420_v1 }
 0x1f3   :  { %v1472_v15 = vadd.f32 %v3731_v13, %v1404_v12  ;;  %v1680_v22 = vadd.f32 %v2598_v2, %v1488_v10 }
 0x1f4   :  { %v1344_v20 = vpop.f32.mrf.mxu3 }
 0x1f5   :  { %v1664_v14 = vadd.f32 %v2566_v3, %v1472_v15  ;;  %v1744_v48 = vmax.f32 %v1680_v22, 0.0  ;;  %v1345_v26 = vadd.f32 %v1344_v20, %v1176_v21  ;;  %v2800_v22 = vld [vmem:[%s4023_s4 + $0xf0] sm:$0xff]  }
 0x1f6   :  { %v1304_v24 = vpop.f32.mrf.mxu2  ;;  %v968_v36 = vpop.f32.mrf.mxu0  ;;  %v2792_v20 = vld [vmem:[%s4023_s4 + $0xb0] sm:$0xff]  }
 0x1f7   :  { %v1728_v27 = vmax.f32 %v1664_v14, 0.0  ;;  %v1305_v61 = vadd.f32 %v1304_v24, %v1136_v19  ;;  %v2754_v28 = vpack.c.bf16 %v1744_v48, %v1743_v25  ;;  %v1137_v29 = vpop.f32.mrf.mxu1  ;;  %v1421_v11 = vmul.f32 %v3725_v31, %v1345_v26 }
 0x1f8   :  { %v1138_v40 = vadd.f32 %v1137_v29, %v968_v36  ;;  %v1183_v14 = vadd.f32 %v3805_v16, %v3491_v18  ;;  %v2605_v26 = vunpack.c.l.bf16 %v2800_v22  ;;  %v2573_v36 = vunpack.c.l.bf16 %v2792_v20 }
 0x1f9   :  { %v2714_v30 = vpack.c.bf16 %v1728_v27, %v1727_v37  ;;  %2829 = vst [vmem:[%s4024_s5 + $0xe0] sm:$0xff] %v2754_v28   ;;  %v1405_v44 = vmul.f32 %v3725_v31, %v1305_v61  ;;  %v1489_v43 = vadd.f32 %v3731_v13, %v1421_v11 }
 0x1fb   :  { %2821 = vst [vmem:[%s4024_s5 + $0xa0] sm:$0xff] %v2714_v30   ;;  %v1473_v53 = vadd.f32 %v3731_v13, %v1405_v44  ;;  %v1681_v59 = vadd.f32 %v2601_v47, %v1489_v43  ;;  %v2606_v30 = vunpack.c.h.bf16 %v2800_v22  ;;  %v2574_v44 = vunpack.c.h.bf16 %v2792_v20 }
 0x1fc   :  { %v1346_v41 = vpop.f32.mrf.mxu3  ;;  %v1186_v43 = vadd.f32 %v3810_v50, %v3496_v39 }
 0x1fd   :  { %v1347_v52 = vadd.f32 %v1346_v41, %v1178_v34  ;;  %v1665_v55 = vadd.f32 %v2569_v33, %v1473_v53  ;;  %v1745_v1 = vmax.f32 %v1681_v59, 0.0 }
 0x1fe   :  { %v1306_v49 = vpop.f32.mrf.mxu2  ;;  %v971_v57 = vpop.f32.mrf.mxu0 }
 0x1ff   :  { %v1307_v46 = vadd.f32 %v1306_v49, %v1138_v40  ;;  %v1422_v58 = vmul.f32 %v3725_v31, %v1347_v52  ;;  %v1140_v35 = vpop.f32.mrf.mxu1  ;;  %v1729_v3 = vmax.f32 %v1665_v55, 0.0  ;;  %v2801_v55 = vld [vmem:[%s4023_s4 + $0xf8] sm:$0xff]  }
 0x200   :  { %v1141_v42 = vadd.f32 %v1140_v35, %v971_v57 }
 0x201   :  { %v1406_v9 = vmul.f32 %v3725_v31, %v1307_v46  ;;  %v1490_v62 = vadd.f32 %v3731_v13, %v1422_v58 }
 0x203   :  { %v1474_v51 = vadd.f32 %v3731_v13, %v1406_v9  ;;  %v1682_v17 = vadd.f32 %v2602_v7, %v1490_v62 }
 0x204   :  { %v1349_v0 = vpop.f32.mrf.mxu3 }
 0x205   :  { %v1666_v60 = vadd.f32 %v2570_v23, %v1474_v51  ;;  %v1746_v2 = vmax.f32 %v1682_v17, 0.0  ;;  %v1350_v12 = vadd.f32 %v1349_v0, %v1181_v6  ;;  %v1188_v51 = vadd.f32 %v3819_v4, %v3529_v63 }
 0x206   :  { %v1309_v54 = vpop.f32.mrf.mxu2  ;;  %v973_v8 = vpop.f32.mrf.mxu0  ;;  %v2609_v0 = vunpack.c.l.bf16 %v2801_v55 }
 0x207   :  { %v1730_v5 = vmax.f32 %v1666_v60, 0.0  ;;  %v1310_v10 = vadd.f32 %v1309_v54, %v1141_v42  ;;  %v2759_v15 = vpack.c.bf16 %v1746_v2, %v1745_v1  ;;  %v1142_v19 = vpop.f32.mrf.mxu1  ;;  %v1423_v56 = vmul.f32 %v3725_v31, %v1350_v12  ;;  %v2793_v42 = vld [vmem:[%s4023_s4 + $0xb8] sm:$0xff]  }
 0x208   :  { %v1143_v25 = vadd.f32 %v1142_v19, %v973_v8  ;;  %v2577_v12 = vunpack.c.l.bf16 %v2793_v42  ;;  %v2578_v4 = vunpack.c.h.bf16 %v2793_v42 }
 0x209   :  { %v2719_v21 = vpack.c.bf16 %v1730_v5, %v1729_v3  ;;  %2830 = vst [vmem:[%s4024_s5 + $0xe8] sm:$0xff] %v2759_v15   ;;  %v1407_v45 = vmul.f32 %v3725_v31, %v1310_v10  ;;  %v1491_v24 = vadd.f32 %v3731_v13, %v1423_v56  ;;  %v2610_v10 = vunpack.c.h.bf16 %v2801_v55 }
 0x20b   :  { %2822 = vst [vmem:[%s4024_s5 + $0xa8] sm:$0xff] %v2719_v21   ;;  %v1475_v61 = vadd.f32 %v3731_v13, %v1407_v45  ;;  %v1683_v32 = vadd.f32 %v2605_v26, %v1491_v24 }
 0x20c   :  { %v1351_v48 = vpop.f32.mrf.mxu3 }
 0x20d   :  { %v1352_v27 = vadd.f32 %v1351_v48, %v1183_v14  ;;  %v1667_v38 = vadd.f32 %v2573_v36, %v1475_v61  ;;  %v1747_v53 = vmax.f32 %v1683_v32, 0.0 }
 0x20e   :  { %v1311_v37 = vpop.f32.mrf.mxu2  ;;  %v976_v11 = vpop.f32.mrf.mxu0 }
 0x20f   :  { %v1312_v28 = vadd.f32 %v1311_v37, %v1143_v25  ;;  %v1424_v29 = vmul.f32 %v3725_v31, %v1352_v27  ;;  %v1145_v18 = vpop.f32.mrf.mxu1  ;;  %v1731_v58 = vmax.f32 %v1667_v38, 0.0 }
 0x210   :  { %v1146_v41 = vadd.f32 %v1145_v18, %v976_v11 }
 0x211   :  { %v1408_v16 = vmul.f32 %v3725_v31, %v1312_v28  ;;  %v1492_v34 = vadd.f32 %v3731_v13, %v1424_v29 }
 0x213   :  { %v1476_v40 = vadd.f32 %v3731_v13, %v1408_v16  ;;  %v1684_v47 = vadd.f32 %v2606_v30, %v1492_v34 }
 0x214   :  { %v1354_v52 = vpop.f32.mrf.mxu3 }
 0x215   :  { %v1668_v49 = vadd.f32 %v2574_v44, %v1476_v40  ;;  %v1748_v33 = vmax.f32 %v1684_v47, 0.0  ;;  %v1355_v57 = vadd.f32 %v1354_v52, %v1186_v43 }
 0x216   :  { %v1314_v46 = vpop.f32.mrf.mxu2  ;;  %v978_v62 = vpop.f32.mrf.mxu0 }
 0x217   :  { %v1732_v7 = vmax.f32 %v1668_v49, 0.0  ;;  %v1315_v35 = vadd.f32 %v1314_v46, %v1146_v41  ;;  %v2764_v9 = vpack.c.bf16 %v1748_v33, %v1747_v53  ;;  %v1425_v59 = vmul.f32 %v3725_v31, %v1355_v57  ;;  %v1147_v39 = vpop.f32.mrf.mxu1 }
 0x218   :  { %v1148_v6 = vadd.f32 %v1147_v39, %v978_v62 }
 0x219   :  { %v2724_v23 = vpack.c.bf16 %v1732_v7, %v1731_v58  ;;  %2831 = vst [vmem:[%s4024_s5 + $0xf0] sm:$0xff] %v2764_v9   ;;  %v1409_v50 = vmul.f32 %v3725_v31, %v1315_v35  ;;  %v1493_v60 = vadd.f32 %v3731_v13, %v1425_v59 }
 0x21b   :  { %2823 = vst [vmem:[%s4024_s5 + $0xb0] sm:$0xff] %v2724_v23   ;;  %v1477_v54 = vadd.f32 %v3731_v13, %v1409_v50  ;;  %v1685_v8 = vadd.f32 %v2609_v0, %v1493_v60 }
 0x21c   :  { %v1356_v17 = vpop.f32.mrf.mxu3 }
 0x21d   :  { %v1357_v2 = vadd.f32 %v1356_v17, %v1188_v51  ;;  %v1669_v19 = vadd.f32 %v2577_v12, %v1477_v54  ;;  %v1749_v22 = vmax.f32 %v1685_v8, 0.0 }
 0x21e   :  { %v1316_v1 = vpop.f32.mrf.mxu2 }
 0x21f   :  { %v1317_v3 = vadd.f32 %v1316_v1, %v1148_v6  ;;  %v1426_v5 = vmul.f32 %v3725_v31, %v1357_v2  ;;  %v1733_v20 = vmax.f32 %v1669_v19, 0.0 }
 0x221   :  { %v1410_v63 = vmul.f32 %v3725_v31, %v1317_v3  ;;  %v1494_v15 = vadd.f32 %v3731_v13, %v1426_v5 }
 0x223   :  { %v1478_v21 = vadd.f32 %v3731_v13, %v1410_v63  ;;  %v1686_v56 = vadd.f32 %v2610_v10, %v1494_v15 }
 0x225   :  { %v1670_v45 = vadd.f32 %v2578_v4, %v1478_v21  ;;  %v1750_v14 = vmax.f32 %v1686_v56, 0.0 }
 0x227   :  { %v1734_v25 = vmax.f32 %v1670_v45, 0.0  ;;  %v2769_v48 = vpack.c.bf16 %v1750_v14, %v1749_v22 }
 0x229   :  { %v2729_v24 = vpack.c.bf16 %v1734_v25, %v1733_v20  ;;  %2832 = vst [vmem:[%s4024_s5 + $0xf8] sm:$0xff] %v2769_v48  }
 0x22b   :  { %2824 = vst [vmem:[%s4024_s5 + $0xb8] sm:$0xff] %v2729_v24  }

// kernel: forward.9
= control target key start
LH: loop header
LB: loop body
LE: loop exit
PB: predicated region body
PF: predicated region fallthrough
CT: control target
= control target key end

     0   :  { %s1284_s1 = inlined_call_operand.vmem [shape: bf16[384,128], index: 1, kind: input, shape index: {}]   ;;  %s1285_s0 = inlined_call_operand.vmem [shape: bf16[128,384], index: 0, kind: input, shape index: {}]   ;;  %s1286_s2 = inlined_call_operand.vmem [shape: f32[1,128], index: 2, kind: input, shape index: {}]   ;;  %s1287_s3 = inlined_call_operand.vmem [shape: f32[1,128], index: 3, kind: input, shape index: {}]   ;;  %s1288_s4 = inlined_call_operand.vmem [shape: bf16[128,128], index: 4, kind: output, shape index: {}]  }
   0x1   :  { %v831_v0 = vld [vmem:[%s1284_s1 + $0x38] sm:$0xff]  ;;  %v830_v3 = vld [vmem:[%s1284_s1 + $0x30] sm:$0xff]  ;;  %v829_v6 = vld [vmem:[%s1284_s1 + $0x28] sm:$0xff] }
   0x2   :  { %v952_v1 = vld [vmem:[%s1284_s1 + $0x78] sm:$0xff]  ;;  %369 = vmatpush.bf16.msra.mxu0 %v831_v0  ;;  %895 = vmatpush.bf16.msra.mxu3 %v831_v0  ;;  %v967_v4 = vld [vmem:[%s1284_s1 + $0x70] sm:$0xff]  ;;  %v837_v7 = vld [vmem:[%s1284_s1 + $0x68] sm:$0xff] }
   0x3   :  { %v957_v2 = vld [vmem:[%s1284_s1 + $0xb8] sm:$0xff]  ;;  %418 = vmatpush.bf16.msra.mxu1 %v952_v1  ;;  %v972_v5 = vld [vmem:[%s1284_s1 + $0xb0] sm:$0xff]  ;;  %v985_v8 = vld [vmem:[%s1284_s1 + $0xa8] sm:$0xff] }
   0x4   :  { %467 = vmatpush.bf16.msra.mxu2 %v957_v2  ;;  %v828_v9 = vld [vmem:[%s1284_s1 + $0x20] sm:$0xff]  ;;  %v827_v12 = vld [vmem:[%s1284_s1 + $0x18] sm:$0xff]  ;;  %v826_v15 = vld [vmem:[%s1284_s1 + $0x10] sm:$0xff] }
   0x5   :  { %v994_v10 = vld [vmem:[%s1284_s1 + $0x60] sm:$0xff]  ;;  %v835_v13 = vld [vmem:[%s1284_s1 + $0x58] sm:$0xff]  ;;  %v834_v16 = vld [vmem:[%s1284_s1 + $0x50] sm:$0xff] }
   0x6   :  { %370 = vmatpush.bf16.msra.mxu0 %v830_v3  ;;  %896 = vmatpush.bf16.msra.mxu3 %v830_v3  ;;  %v999_v11 = vld [vmem:[%s1284_s1 + $0xa0] sm:$0xff]  ;;  %v1012_v14 = vld [vmem:[%s1284_s1 + $0x98] sm:$0xff]  ;;  %v1024_v17 = vld [vmem:[%s1284_s1 + $0x90] sm:$0xff] }
   0x7   :  { %419 = vmatpush.bf16.msra.mxu1 %v967_v4  ;;  %v825_v18 = vld [vmem:[%s1284_s1 + $0x8] sm:$0xff]  ;;  %v824_v21 = vld [vmem:[%s1284_s1] sm:$0xff]  ;;  %v682_v26 = vld [vmem:[%s1285_s0 + $0x90] sm:$0xf] }
   0x8   :  { %468 = vmatpush.bf16.msra.mxu2 %v972_v5  ;;  %v833_v19 = vld [vmem:[%s1284_s1 + $0x48] sm:$0xff]  ;;  %v832_v22 = vld [vmem:[%s1284_s1 + $0x40] sm:$0xff]  ;;  %v819_v27 = vld [vmem:[%s1285_s0 + $0x98] sm:$0xf0] }
   0x9   :  { %v1036_v20 = vld [vmem:[%s1284_s1 + $0x88] sm:$0xff]  ;;  %v1047_v23 = vld [vmem:[%s1284_s1 + $0x80] sm:$0xff]  ;;  %v612_v29 = vld [vmem:[%s1285_s0 + $0xc] sm:$0xf0]  ;;  %v683_v33 = vor.u32 %v819_v27, %v682_v26 }
   0xa   :  { %371 = vmatpush.bf16.msra.mxu0 %v829_v6  ;;  %897 = vmatpush.bf16.msra.mxu3 %v829_v6  ;;  %v610_v24 = vld [vmem:[%s1285_s0] sm:$0xf]  ;;  %v801_v25 = vld [vmem:[%s1285_s0 + $0x8] sm:$0xf0]  ;;  %v800_v28 = vld [vmem:[%s1285_s0 + $0x4] sm:$0xf] }
   0xb   :  { %420 = vmatpush.bf16.msra.mxu1 %v837_v7  ;;  %v618_v30 = vld [vmem:[%s1285_s0 + $0x8] sm:$0xf]  ;;  %v802_v31 = vld [vmem:[%s1285_s0 + $0x10] sm:$0xf0]  ;;  %v611_v32 = vor.u32 %v801_v25, %v610_v24  ;;  %v615_v34 = vor.u32 %v800_v28, %v612_v29  ;;  %v622_v36 = vld [vmem:[%s1285_s0 + $0x18] sm:$0xf] }
   0xc   :  { %469 = vmatpush.bf16.msra.mxu2 %v985_v8  ;;  %v619_v35 = vor.u32 %v802_v31, %v618_v30  ;;  %v804_v37 = vld [vmem:[%s1285_s0 + $0x20] sm:$0xf0]  ;;  %v694_v38 = vld [vmem:[%s1285_s0 + $0xa8] sm:$0xf]  ;;  %v822_v39 = vld [vmem:[%s1285_s0 + $0xb0] sm:$0xf0] }
   0xd   :  { %v803_v40 = vld [vmem:[%s1285_s0 + $0x1c] sm:$0xf]  ;;  %v624_v41 = vld [vmem:[%s1285_s0 + $0x24] sm:$0xf0]  ;;  %v630_v42 = vld [vmem:[%s1285_s0 + $0x20] sm:$0xf]  ;;  %v623_v44 = vor.u32 %v804_v37, %v622_v36  ;;  %v695_v45 = vor.u32 %v822_v39, %v694_v38 }
   0xe   :  { %372 = vmatpush.bf16.msra.mxu0 %v828_v9  ;;  %898 = vmatpush.bf16.msra.mxu3 %v828_v9  ;;  %v805_v43 = vld [vmem:[%s1285_s0 + $0x28] sm:$0xf0]  ;;  %v627_v46 = vor.u32 %v803_v40, %v624_v41  ;;  %v634_v48 = vld [vmem:[%s1285_s0 + $0x30] sm:$0xf]  ;;  %v807_v49 = vld [vmem:[%s1285_s0 + $0x38] sm:$0xf0] }
   0xf   :  { %421 = vmatpush.bf16.msra.mxu1 %v994_v10  ;;  %v631_v47 = vor.u32 %v805_v43, %v630_v42  ;;  %v806_v50 = vld [vmem:[%s1285_s0 + $0x34] sm:$0xf]  ;;  %v684_v52 = vld [vmem:[%s1285_s0 + $0x9c] sm:$0xf0]  ;;  %v642_v54 = vld [vmem:[%s1285_s0 + $0x38] sm:$0xf]  ;;  %v635_v56 = vor.u32 %v807_v49, %v634_v48 }
  0x10   :  { %470 = vmatpush.bf16.msra.mxu2 %v999_v11  ;;  %v818_v51 = vld [vmem:[%s1285_s0 + $0x94] sm:$0xf]  ;;  %v636_v53 = vld [vmem:[%s1285_s0 + $0x3c] sm:$0xf0]  ;;  %v808_v55 = vld [vmem:[%s1285_s0 + $0x40] sm:$0xf0] }
  0x11   :  { %v687_v57 = vor.u32 %v818_v51, %v684_v52  ;;  %v639_v58 = vor.u32 %v806_v50, %v636_v53  ;;  %v643_v59 = vor.u32 %v808_v55, %v642_v54  ;;  %v646_v60 = vld [vmem:[%s1285_s0 + $0x48] sm:$0xf]  ;;  %v810_v61 = vld [vmem:[%s1285_s0 + $0x50] sm:$0xf0]  ;;  %v809_v62 = vld [vmem:[%s1285_s0 + $0x4c] sm:$0xf] }
  0x12   :  { %373 = vmatpush.bf16.msra.mxu0 %v827_v12  ;;  %899 = vmatpush.bf16.msra.mxu3 %v827_v12  ;;  %v821_v63 = vld [vmem:[%s1285_s0 + $0xac] sm:$0xf]  ;;  %v696_v0 = vld [vmem:[%s1285_s0 + $0xb4] sm:$0xf0]  ;;  %v811_v3 = vld [vmem:[%s1285_s0 + $0x58] sm:$0xf0] }
  0x13   :  { %422 = vmatpush.bf16.msra.mxu1 %v835_v13  ;;  %v813_v9 = vld [vmem:[%s1285_s0 + $0x68] sm:$0xf0]  ;;  %v820_v12 = vld [vmem:[%s1285_s0 + $0xa0] sm:$0xf0]  ;;  %v823_v24 = vld [vmem:[%s1285_s0 + $0xb8] sm:$0xf0] }
  0x14   :  { %471 = vmatpush.bf16.msra.mxu2 %v1012_v14  ;;  %v672_v25 = vld [vmem:[%s1285_s0 + $0x84] sm:$0xf0]  ;;  %v678_v26 = vld [vmem:[%s1285_s0 + $0x80] sm:$0xf]  ;;  %v817_v27 = vld [vmem:[%s1285_s0 + $0x88] sm:$0xf0] }
  0x15   :  { %v679_v31 = vor.u32 %v817_v27, %v678_v26  ;;  %v1211_v40 = vld [vmem:[%s1286_s2] ss:$0 sm:$0xff] }
  0x16   :  { %374 = vmatpush.bf16.msra.mxu0 %v826_v15  ;;  %900 = vmatpush.bf16.msra.mxu3 %v826_v15  ;;  %v814_v15 = vld [vmem:[%s1285_s0 + $0x70] sm:$0xf0]  ;;  %v1217_v42 = vld [vmem:[%s1287_s3] ss:$0 sm:$0xff] }
  0x17   :  { %423 = vmatpush.bf16.msra.mxu1 %v834_v16 }
  0x18   :  { %472 = vmatpush.bf16.msra.mxu2 %v1024_v17 }
  0x1a   :  { %375 = vmatpush.bf16.msra.mxu0 %v825_v18  ;;  %901 = vmatpush.bf16.msra.mxu3 %v825_v18 }
  0x1b   :  { %424 = vmatpush.bf16.msra.mxu1 %v833_v19 }
  0x1c   :  { %473 = vmatpush.bf16.msra.mxu2 %v1036_v20 }
  0x1e   :  { %376 = vmatpush.bf16.msra.mxu0 %v824_v21  ;;  %902 = vmatpush.bf16.msra.mxu3 %v824_v21  ;;  %v816_v21 = vld [vmem:[%s1285_s0 + $0x80] sm:$0xf0] }
  0x1f   :  { %425 = vmatpush.bf16.msra.mxu1 %v832_v22 }
  0x20   :  { %474 = vmatpush.bf16.msra.mxu2 %v1047_v23 }
  0x21   :  { %377 = vmatmul.bf16.vlgmr.msra.gmra.mxu0 %v611_v32  ;;  %407 = vmatmul.bf16.vlgmr.msra.gmra.mxu3 %v683_v33 }
  0x22   :  { %903 = vmatpush.bf16.msrb.mxu3 %v952_v1  ;;  %426 = vmatmul.bf16.vlgmr.msra.gmra.mxu1 %v615_v34  ;;  %v648_v1 = vld [vmem:[%s1285_s0 + $0x54] sm:$0xf0] }
  0x23   :  { %475 = vmatmul.bf16.vlgmr.msra.gmra.mxu2 %v619_v35  ;;  %v651_v6 = vor.u32 %v809_v62, %v648_v1 }
  0x26   :  { %904 = vmatpush.bf16.msrb.mxu3 %v967_v4  ;;  %v647_v4 = vor.u32 %v810_v61, %v646_v60 }
  0x2a   :  { %905 = vmatpush.bf16.msrb.mxu3 %v837_v7 }
  0x2e   :  { %906 = vmatpush.bf16.msrb.mxu3 %v994_v10  ;;  %v812_v10 = vld [vmem:[%s1285_s0 + $0x64] sm:$0xf] }
  0x31   :  { %382 = vmatmul.bf16.gmra.mxu0 %v623_v44  ;;  %412 = vmatmul.bf16.gmra.mxu3 %v695_v45 }
  0x32   :  { %907 = vmatpush.bf16.msrb.mxu3 %v835_v13  ;;  %431 = vmatmul.bf16.gmra.mxu1 %v627_v46  ;;  %v660_v13 = vld [vmem:[%s1285_s0 + $0x6c] sm:$0xf0] }
  0x33   :  { %480 = vmatmul.bf16.gmra.mxu2 %v631_v47  ;;  %v663_v18 = vor.u32 %v812_v10, %v660_v13 }
  0x36   :  { %908 = vmatpush.bf16.msrb.mxu3 %v834_v16 }
  0x3a   :  { %909 = vmatpush.bf16.msrb.mxu3 %v833_v19 }
  0x3e   :  { %910 = vmatpush.bf16.msrb.mxu3 %v832_v22  ;;  %v815_v22 = vld [vmem:[%s1285_s0 + $0x7c] sm:$0xf] }
  0x3f   :  { %v675_v30 = vor.u32 %v815_v22, %v672_v25 }
  0x41   :  { %387 = vmatmul.bf16.gmra.mxu0 %v635_v56  ;;  %456 = vmatmul.bf16.vlgmr.msrb.gmra.mxu3 %v687_v57 }
  0x42   :  { %911 = vmatpush.bf16.msra.mxu3 %v957_v2  ;;  %436 = vmatmul.bf16.gmra.mxu1 %v639_v58  ;;  %v654_v2 = vld [vmem:[%s1285_s0 + $0x50] sm:$0xf] }
  0x43   :  { %485 = vmatmul.bf16.gmra.mxu2 %v643_v59  ;;  %v655_v7 = vor.u32 %v811_v3, %v654_v2 }
  0x46   :  { %912 = vmatpush.bf16.msra.mxu3 %v972_v5  ;;  %v699_v5 = vor.u32 %v821_v63, %v696_v0 }
  0x4a   :  { %913 = vmatpush.bf16.msra.mxu3 %v985_v8  ;;  %v658_v8 = vld [vmem:[%s1285_s0 + $0x60] sm:$0xf] }
  0x4b   :  { %v659_v16 = vor.u32 %v813_v9, %v658_v8 }
  0x4e   :  { %914 = vmatpush.bf16.msra.mxu3 %v999_v11  ;;  %v690_v11 = vld [vmem:[%s1285_s0 + $0x98] sm:$0xf] }
  0x51   :  { %392 = vmatmul.bf16.gmra.mxu0 %v647_v4  ;;  %461 = vmatmul.bf16.gmra.mxu3 %v699_v5 }
  0x52   :  { %915 = vmatpush.bf16.msra.mxu3 %v1012_v14  ;;  %441 = vmatmul.bf16.gmra.mxu1 %v651_v6  ;;  %v666_v14 = vld [vmem:[%s1285_s0 + $0x68] sm:$0xf] }
  0x53   :  { %490 = vmatmul.bf16.gmra.mxu2 %v655_v7  ;;  %v667_v19 = vor.u32 %v814_v15, %v666_v14 }
  0x56   :  { %916 = vmatpush.bf16.msra.mxu3 %v1024_v17  ;;  %v691_v17 = vor.u32 %v820_v12, %v690_v11 }
  0x5a   :  { %917 = vmatpush.bf16.msra.mxu3 %v1036_v20  ;;  %v670_v20 = vld [vmem:[%s1285_s0 + $0x78] sm:$0xf] }
  0x5b   :  { %v671_v28 = vor.u32 %v816_v21, %v670_v20 }
  0x5e   :  { %918 = vmatpush.bf16.msra.mxu3 %v1047_v23  ;;  %v702_v23 = vld [vmem:[%s1285_s0 + $0xb0] sm:$0xf] }
  0x5f   :  { %v703_v29 = vor.u32 %v823_v24, %v702_v23 }
  0x61   :  { %397 = vmatmul.bf16.gmra.mxu0 %v659_v16  ;;  %505 = vmatmul.bf16.vlgmr.msra.gmra.mxu3 %v691_v17 }
  0x62   :  { %446 = vmatmul.bf16.gmra.mxu1 %v663_v18 }
  0x63   :  { %495 = vmatmul.bf16.gmra.mxu2 %v667_v19 }
  0x71   :  { %402 = vmatmul.bf16.gmra.mxu0 %v671_v28  ;;  %510 = vmatmul.bf16.gmra.mxu3 %v703_v29 }
  0x72   :  { %451 = vmatmul.bf16.gmra.mxu1 %v675_v30 }
  0x73   :  { %500 = vmatmul.bf16.gmra.mxu2 %v679_v31 }
  0x9e   :  { %v378_v32 = vpop.f32.mrf.mxu0 }
  0x9f   :  { %v427_v33 = vpop.f32.mrf.mxu1 }
  0xa0   :  { %v428_v34 = vadd.f32 %v427_v33, %v378_v32 }
  0xa4   :  { %v1206_v35 = vpop.f32.mrf.mxu3 }
  0xa6   :  { %v476_v36 = vpop.f32.mrf.mxu2  ;;  %v380_v37 = vpop.f32.mrf.mxu0 }
  0xa7   :  { %v429_v38 = vpop.f32.mrf.mxu1  ;;  %v477_v39 = vadd.f32 %v476_v36, %v428_v34 }
  0xa8   :  { %v430_v43 = vadd.f32 %v429_v38, %v380_v37 }
  0xa9   :  { %v520_v41 = vmul.f32 %v1211_v40, %v477_v39 }
  0xab   :  { %v540_v49 = vadd.f32 %v1217_v42, %v520_v41 }
  0xac   :  { %v1219_v44 = vpop.f32.mrf.mxu3 }
  0xad   :  { %v556_v52 = vmax.f32 %v540_v49, 0.0 }
  0xae   :  { %v478_v45 = vpop.f32.mrf.mxu2  ;;  %v383_v47 = vpop.f32.mrf.mxu0 }
  0xaf   :  { %v479_v46 = vadd.f32 %v478_v45, %v430_v43  ;;  %v432_v48 = vpop.f32.mrf.mxu1 }
  0xb0   :  { %v433_v54 = vadd.f32 %v432_v48, %v383_v47 }
  0xb1   :  { %v521_v50 = vmul.f32 %v1211_v40, %v479_v46 }
  0xb3   :  { %v541_v51 = vadd.f32 %v1217_v42, %v521_v50 }
  0xb4   :  { %v1224_v55 = vpop.f32.mrf.mxu3 }
  0xb5   :  { %v557_v53 = vmax.f32 %v541_v51, 0.0 }
  0xb6   :  { %v481_v56 = vpop.f32.mrf.mxu2  ;;  %v385_v58 = vpop.f32.mrf.mxu0 }
  0xb7   :  { %v851_v57 = vpack.c.bf16 %v557_v53, %v556_v52  ;;  %v434_v59 = vpop.f32.mrf.mxu1  ;;  %v482_v60 = vadd.f32 %v481_v56, %v433_v54 }
  0xb8   :  { %v435_v62 = vadd.f32 %v434_v59, %v385_v58 }
  0xb9   :  { %852 = vst [vmem:[%s1288_s4] sm:$0xff] %v851_v57   ;;  %v522_v61 = vmul.f32 %v1211_v40, %v482_v60 }
  0xbb   :  { %v542_v4 = vadd.f32 %v1217_v42, %v522_v61 }
  0xbc   :  { %v1230_v63 = vpop.f32.mrf.mxu3 }
  0xbd   :  { %v558_v7 = vmax.f32 %v542_v4, 0.0 }
  0xbe   :  { %v483_v0 = vpop.f32.mrf.mxu2  ;;  %v388_v2 = vpop.f32.mrf.mxu0 }
  0xbf   :  { %v484_v1 = vadd.f32 %v483_v0, %v435_v62  ;;  %v437_v3 = vpop.f32.mrf.mxu1 }
  0xc0   :  { %v438_v9 = vadd.f32 %v437_v3, %v388_v2 }
  0xc1   :  { %v523_v5 = vmul.f32 %v1211_v40, %v484_v1 }
  0xc3   :  { %v543_v6 = vadd.f32 %v1217_v42, %v523_v5 }
  0xc4   :  { %v457_v10 = vpop.f32.mrf.mxu3 }
  0xc5   :  { %v559_v8 = vmax.f32 %v543_v6, 0.0  ;;  %v458_v53 = vadd.f32 %v457_v10, %v1206_v35 }
  0xc6   :  { %v486_v11 = vpop.f32.mrf.mxu2  ;;  %v390_v13 = vpop.f32.mrf.mxu0 }
  0xc7   :  { %v856_v12 = vpack.c.bf16 %v559_v8, %v558_v7  ;;  %v439_v14 = vpop.f32.mrf.mxu1  ;;  %v487_v15 = vadd.f32 %v486_v11, %v438_v9 }
  0xc8   :  { %v440_v17 = vadd.f32 %v439_v14, %v390_v13 }
  0xc9   :  { %888 = vst [vmem:[%s1288_s4 + $0x8] sm:$0xff] %v856_v12   ;;  %v524_v16 = vmul.f32 %v1211_v40, %v487_v15 }
  0xcb   :  { %v544_v23 = vadd.f32 %v1217_v42, %v524_v16 }
  0xcc   :  { %v459_v18 = vpop.f32.mrf.mxu3 }
  0xcd   :  { %v560_v26 = vmax.f32 %v544_v23, 0.0  ;;  %v460_v61 = vadd.f32 %v459_v18, %v1219_v44 }
  0xce   :  { %v488_v19 = vpop.f32.mrf.mxu2  ;;  %v393_v21 = vpop.f32.mrf.mxu0 }
  0xcf   :  { %v489_v20 = vadd.f32 %v488_v19, %v440_v17  ;;  %v442_v22 = vpop.f32.mrf.mxu1 }
  0xd0   :  { %v443_v28 = vadd.f32 %v442_v22, %v393_v21 }
  0xd1   :  { %v525_v24 = vmul.f32 %v1211_v40, %v489_v20 }
  0xd3   :  { %v545_v25 = vadd.f32 %v1217_v42, %v525_v24 }
  0xd4   :  { %v462_v29 = vpop.f32.mrf.mxu3 }
  0xd5   :  { %v561_v27 = vmax.f32 %v545_v25, 0.0  ;;  %v463_v18 = vadd.f32 %v462_v29, %v1224_v55 }
  0xd6   :  { %v491_v30 = vpop.f32.mrf.mxu2  ;;  %v395_v32 = vpop.f32.mrf.mxu0 }
  0xd7   :  { %v861_v31 = vpack.c.bf16 %v561_v27, %v560_v26  ;;  %v444_v33 = vpop.f32.mrf.mxu1  ;;  %v492_v34 = vadd.f32 %v491_v30, %v443_v28 }
  0xd8   :  { %v445_v37 = vadd.f32 %v444_v33, %v395_v32 }
  0xd9   :  { %889 = vst [vmem:[%s1288_s4 + $0x10] sm:$0xff] %v861_v31   ;;  %v526_v36 = vmul.f32 %v1211_v40, %v492_v34 }
  0xdb   :  { %v546_v46 = vadd.f32 %v1217_v42, %v526_v36 }
  0xdc   :  { %v464_v38 = vpop.f32.mrf.mxu3 }
  0xdd   :  { %v562_v49 = vmax.f32 %v546_v46, 0.0  ;;  %v465_v26 = vadd.f32 %v464_v38, %v1230_v63 }
  0xde   :  { %v493_v39 = vpop.f32.mrf.mxu2  ;;  %v398_v43 = vpop.f32.mrf.mxu0 }
  0xdf   :  { %v494_v41 = vadd.f32 %v493_v39, %v445_v37  ;;  %v447_v45 = vpop.f32.mrf.mxu1 }
  0xe0   :  { %v448_v51 = vadd.f32 %v447_v45, %v398_v43 }
  0xe1   :  { %v527_v47 = vmul.f32 %v1211_v40, %v494_v41 }
  0xe3   :  { %v547_v48 = vadd.f32 %v1217_v42, %v527_v47 }
  0xe4   :  { %v506_v52 = vpop.f32.mrf.mxu3 }
  0xe5   :  { %v563_v50 = vmax.f32 %v547_v48, 0.0  ;;  %v507_v58 = vadd.f32 %v506_v52, %v458_v53 }
  0xe6   :  { %v496_v54 = vpop.f32.mrf.mxu2  ;;  %v400_v57 = vpop.f32.mrf.mxu0 }
  0xe7   :  { %v866_v56 = vpack.c.bf16 %v563_v50, %v562_v49  ;;  %v449_v59 = vpop.f32.mrf.mxu1  ;;  %v497_v60 = vadd.f32 %v496_v54, %v448_v51  ;;  %v532_v62 = vmul.f32 %v1211_v40, %v507_v58 }
  0xe8   :  { %v450_v1 = vadd.f32 %v449_v59, %v400_v57 }
  0xe9   :  { %890 = vst [vmem:[%s1288_s4 + $0x18] sm:$0xff] %v866_v56   ;;  %v528_v0 = vmul.f32 %v1211_v40, %v497_v60  ;;  %v552_v5 = vadd.f32 %v1217_v42, %v532_v62 }
  0xeb   :  { %v548_v9 = vadd.f32 %v1217_v42, %v528_v0  ;;  %v568_v12 = vmax.f32 %v552_v5, 0.0 }
  0xec   :  { %v508_v2 = vpop.f32.mrf.mxu3 }
  0xed   :  { %v509_v35 = vadd.f32 %v508_v2, %v460_v61  ;;  %v564_v14 = vmax.f32 %v548_v9, 0.0 }
  0xee   :  { %v498_v3 = vpop.f32.mrf.mxu2  ;;  %v403_v7 = vpop.f32.mrf.mxu0 }
  0xef   :  { %v499_v4 = vadd.f32 %v498_v3, %v450_v1  ;;  %v533_v6 = vmul.f32 %v1211_v40, %v509_v35  ;;  %v452_v8 = vpop.f32.mrf.mxu1 }
  0xf0   :  { %v453_v16 = vadd.f32 %v452_v8, %v403_v7 }
  0xf1   :  { %v529_v10 = vmul.f32 %v1211_v40, %v499_v4  ;;  %v553_v44 = vadd.f32 %v1217_v42, %v533_v6 }
  0xf3   :  { %v549_v11 = vadd.f32 %v1217_v42, %v529_v10  ;;  %v569_v13 = vmax.f32 %v553_v44, 0.0 }
  0xf4   :  { %v511_v17 = vpop.f32.mrf.mxu3 }
  0xf5   :  { %v565_v15 = vmax.f32 %v549_v11, 0.0  ;;  %v881_v19 = vpack.c.bf16 %v569_v13, %v568_v12  ;;  %v512_v22 = vadd.f32 %v511_v17, %v463_v18 }
  0xf6   :  { %v501_v20 = vpop.f32.mrf.mxu2  ;;  %v405_v24 = vpop.f32.mrf.mxu0 }
  0xf7   :  { %v871_v21 = vpack.c.bf16 %v565_v15, %v564_v14  ;;  %893 = vst [vmem:[%s1288_s4 + $0x30] sm:$0xff] %v881_v19   ;;  %v502_v23 = vadd.f32 %v501_v20, %v453_v16  ;;  %v454_v25 = vpop.f32.mrf.mxu1  ;;  %v534_v27 = vmul.f32 %v1211_v40, %v512_v22 }
  0xf8   :  { %v455_v28 = vadd.f32 %v454_v25, %v405_v24 }
  0xf9   :  { %891 = vst [vmem:[%s1288_s4 + $0x20] sm:$0xff] %v871_v21   ;;  %v530_v55 = vmul.f32 %v1211_v40, %v502_v23  ;;  %v554_v33 = vadd.f32 %v1217_v42, %v534_v27 }
  0xfb   :  { %v550_v36 = vadd.f32 %v1217_v42, %v530_v55  ;;  %v570_v38 = vmax.f32 %v554_v33, 0.0 }
  0xfc   :  { %v513_v29 = vpop.f32.mrf.mxu3 }
  0xfd   :  { %v514_v31 = vadd.f32 %v513_v29, %v465_v26  ;;  %v566_v43 = vmax.f32 %v550_v36, 0.0 }
  0xfe   :  { %v503_v30 = vpop.f32.mrf.mxu2 }
  0xff   :  { %v504_v32 = vadd.f32 %v503_v30, %v455_v28  ;;  %v535_v34 = vmul.f32 %v1211_v40, %v514_v31 }
 0x101   :  { %v531_v37 = vmul.f32 %v1211_v40, %v504_v32  ;;  %v555_v39 = vadd.f32 %v1217_v42, %v535_v34 }
 0x103   :  { %v551_v63 = vadd.f32 %v1217_v42, %v531_v37  ;;  %v571_v41 = vmax.f32 %v555_v39, 0.0 }
 0x105   :  { %v567_v45 = vmax.f32 %v551_v63, 0.0  ;;  %v886_v46 = vpack.c.bf16 %v571_v41, %v570_v38 }
 0x107   :  { %v876_v47 = vpack.c.bf16 %v567_v45, %v566_v43  ;;  %894 = vst [vmem:[%s1288_s4 + $0x38] sm:$0xff] %v886_v46  }
 0x109   :  { %892 = vst [vmem:[%s1288_s4 + $0x28] sm:$0xff] %v876_v47  }

// kernel: forward.11
= control target key start
LH: loop header
LB: loop body
LE: loop exit
PB: predicated region body
PF: predicated region fallthrough
CT: control target
= control target key end

     0   :  { %vm260_vm0 = vcmask 1041409   ;;  %vm262_vm1 = vcmask 1042434   ;;  %vm264_vm2 = vcmask 1043459   ;;  %vm266_vm3 = vcmask 1044484   ;;  %s909_s1 = inlined_call_operand.vmem [shape: bf16[128,128], index: 1, kind: input, shape index: {}]   ;;  %s910_s0 = inlined_call_operand.vmem [shape: bf16[8,64,128], index: 0, kind: input, shape index: {}]   ;;  %s911_s2 = inlined_call_operand.vmem [shape: f32[1,128], index: 2, kind: input, shape index: {}]   ;;  %s912_s3 = inlined_call_operand.vmem [shape: f32[8,128], index: 3, kind: output, shape index: {}]  }
   0x1   :  { %v408_v0 = vld [vmem:[%s909_s1 + $0x38] sm:$0xff]  ;;  %v407_v1 = vld [vmem:[%s909_s1 + $0x30] sm:$0xff]  ;;  %v598_v2 = vld [vmem:[%s910_s0] sm:$0xff]   ;;  %vm268_vm4 = vcmask 1045509   ;;  %vm270_vm5 = vcmask 1046534   ;;  %vm272_vm6 = vcmask 1047559  }
   0x2   :  { %351 = vmatpush.bf16.msra.mxu0 %v408_v0  ;;  %v411_v3 = vunpack.c.l.bf16 %v598_v2  ;;  %v412_v4 = vunpack.c.h.bf16 %v598_v2  ;;  %v605_v5 = vld [vmem:[%s910_s0 + $0x8] sm:$0xff]   ;;  %v610_v6 = vld [vmem:[%s910_s0 + $0x10] sm:$0xff]   ;;  %v615_v7 = vld [vmem:[%s910_s0 + $0x18] sm:$0xff]  }
   0x3   :  { %v406_v8 = vld [vmem:[%s909_s1 + $0x28] sm:$0xff]  ;;  %v415_v9 = vunpack.c.l.bf16 %v605_v5  ;;  %v627_v13 = vld [vmem:[%s910_s0 + $0x20] sm:$0xff]   ;;  %v637_v15 = vld [vmem:[%s910_s0 + $0x30] sm:$0xff]  }
   0x4   :  { %v632_v14 = vld [vmem:[%s910_s0 + $0x28] sm:$0xff]   ;;  %v427_v18 = vunpack.c.l.bf16 %v627_v13  ;;  %v428_v19 = vunpack.c.h.bf16 %v627_v13  ;;  %v646_v20 = vld [vmem:[%s910_s0 + $0x38] sm:$0xff]   ;;  %v651_v21 = vld [vmem:[%s910_s0 + $0x40] sm:$0xff]  }
   0x5   :  { %v656_v22 = vld [vmem:[%s910_s0 + $0x48] sm:$0xff]   ;;  %v431_v23 = vunpack.c.l.bf16 %v632_v14  ;;  %v665_v27 = vld [vmem:[%s910_s0 + $0x50] sm:$0xff]   ;;  %v670_v28 = vld [vmem:[%s910_s0 + $0x58] sm:$0xff]   ;;  %v443_v32 = vunpack.c.l.bf16 %v651_v21  ;;  %v444_v33 = vunpack.c.h.bf16 %v651_v21 }
   0x6   :  { %352 = vmatpush.bf16.msra.mxu0 %v407_v1  ;;  %v675_v29 = vld [vmem:[%s910_s0 + $0x60] sm:$0xff]   ;;  %v684_v34 = vld [vmem:[%s910_s0 + $0x68] sm:$0xff]   ;;  %v689_v35 = vld [vmem:[%s910_s0 + $0x70] sm:$0xff]   ;;  %v447_v36 = vunpack.c.l.bf16 %v656_v22 }
   0x7   :  { %v698_v40 = vld [vmem:[%s910_s0 + $0x78] sm:$0xff]   ;;  %v703_v41 = vld [vmem:[%s910_s0 + $0x80] sm:$0xff]   ;;  %v459_v44 = vunpack.c.l.bf16 %v675_v29  ;;  %v460_v45 = vunpack.c.h.bf16 %v675_v29  ;;  %v712_v46 = vld [vmem:[%s910_s0 + $0x88] sm:$0xff]   ;;  %v463_v49 = vunpack.c.l.bf16 %v684_v34 }
   0x8   :  { %v717_v47 = vld [vmem:[%s910_s0 + $0x90] sm:$0xff]   ;;  %v405_v48 = vld [vmem:[%s909_s1 + $0x20] sm:$0xff]  ;;  %v729_v53 = vld [vmem:[%s910_s0 + $0x98] sm:$0xff]   ;;  %v475_v57 = vunpack.c.l.bf16 %v703_v41  ;;  %v476_v58 = vunpack.c.h.bf16 %v703_v41  ;;  %v479_v61 = vunpack.c.l.bf16 %v712_v46 }
   0x9   :  { %v556_v54 = vld [vmem:[%s910_s0 + $0xa0] sm:$0xff]   ;;  %v741_v59 = vld [vmem:[%s910_s0 + $0xa8] sm:$0xff]   ;;  %v746_v60 = vld [vmem:[%s910_s0 + $0xb0] sm:$0xff]  }
   0xa   :  { %353 = vmatpush.bf16.msra.mxu0 %v406_v8  ;;  %v755_v1 = vld [vmem:[%s910_s0 + $0xb8] sm:$0xff]   ;;  %v560_v8 = vld [vmem:[%s910_s0 + $0xc0] sm:$0xff]   ;;  %v491_v43 = vunpack.c.l.bf16 %v556_v54  ;;  %v492_v31 = vunpack.c.h.bf16 %v556_v54  ;;  %v561_v17 = vld [vmem:[%s910_s0 + $0xc8] sm:$0xff]   ;;  %v495_v41 = vunpack.c.l.bf16 %v741_v59  ;;  %v496_v56 = vunpack.c.h.bf16 %v741_v59 }
   0xb   :  { %v768_v55 = vld [vmem:[%s910_s0 + $0xd0] sm:$0xff]   ;;  %v404_v42 = vld [vmem:[%s909_s1 + $0x18] sm:$0xff]  ;;  %v499_v54 = vunpack.c.l.bf16 %v746_v60  ;;  %v507_v39 = vunpack.c.l.bf16 %v560_v8  ;;  %v508_v26 = vunpack.c.h.bf16 %v560_v8  ;;  %v565_v59 = vld [vmem:[%s910_s0 + $0xe8] sm:$0xff]   ;;  %v511_v12 = vunpack.c.l.bf16 %v561_v17 }
   0xc   :  { %v780_v16 = vld [vmem:[%s910_s0 + $0xd8] sm:$0xff]   ;;  %v793_v30 = vld [vmem:[%s910_s0 + $0xf0] sm:$0xff]   ;;  %v512_v63 = vunpack.c.h.bf16 %v561_v17  ;;  %v515_v51 = vunpack.c.l.bf16 %v768_v55  ;;  %v516_v38 = vunpack.c.h.bf16 %v768_v55  ;;  %v527_v62 = vunpack.c.l.bf16 %v565_v59 }
   0xd   :  { %v800_v52 = vld [vmem:[%s910_s0 + $0xf8] sm:$0xff]   ;;  %v519_v8 = vunpack.c.l.bf16 %v780_v16  ;;  %v403_v17 = vld [vmem:[%s909_s1 + $0x10] sm:$0xff]  ;;  %v528_v50 = vunpack.c.h.bf16 %v565_v59  ;;  %v531_v55 = vunpack.c.l.bf16 %v793_v30  ;;  %v532_v37 = vunpack.c.h.bf16 %v793_v30 }
   0xe   :  { %354 = vmatpush.bf16.msra.mxu0 %v405_v48  ;;  %v564_v48 = vld [vmem:[%s910_s0 + $0xe0] sm:$0xff]   ;;  %v535_v24 = vunpack.c.l.bf16 %v800_v52  ;;  %v174_v59 = vadd.f32 %v444_v33, %v443_v32  ;;  %v187_v30 = vadd.f32 %v460_v45, %v459_v44  ;;  %v200_v10 = vadd.f32 %v476_v58, %v475_v57 }
   0xf   :  { %v523_v25 = vunpack.c.l.bf16 %v564_v48  ;;  %v524_v11 = vunpack.c.h.bf16 %v564_v48  ;;  %v148_v48 = vadd.f32 %v412_v4, %v411_v3  ;;  %v213_v0 = vadd.f32 %v492_v31, %v491_v43 }
  0x10   :  { %v226_v4 = vadd.f32 %v508_v26, %v507_v39  ;;  %v188_v21 = vadd.f32 %v463_v49, %v187_v30  ;;  %v201_v29 = vadd.f32 %v479_v61, %v200_v10  ;;  %v915_v33 = vunpack.c.h.bf16 %v656_v22 }
  0x11   :  { %v149_v2 = vadd.f32 %v415_v9, %v148_v48  ;;  %v239_v13 = vadd.f32 %v524_v11, %v523_v25  ;;  %v214_v31 = vadd.f32 %v495_v41, %v213_v0  ;;  %v913_v9 = vunpack.c.h.bf16 %v605_v5 }
  0x12   :  { %355 = vmatpush.bf16.msra.mxu0 %v404_v42  ;;  %v161_v42 = vadd.f32 %v428_v19, %v427_v18  ;;  %v402_v18 = vld [vmem:[%s909_s1 + $0x8] sm:$0xff]  ;;  %v175_v19 = vadd.f32 %v447_v36, %v174_v59  ;;  %v227_v11 = vadd.f32 %v511_v12, %v226_v4  ;;  %v916_v43 = vunpack.c.h.bf16 %v684_v34  ;;  %v401_v12 = vld [vmem:[%s909_s1] sm:$0xff] }
  0x13   :  { %v150_v32 = vadd.f32 %v913_v9, %v149_v2  ;;  %v240_v25 = vadd.f32 %v527_v62, %v239_v13  ;;  %v917_v36 = vunpack.c.h.bf16 %v712_v46  ;;  %v215_v49 = vadd.f32 %v496_v56, %v214_v31 }
  0x14   :  { %v162_v3 = vadd.f32 %v431_v23, %v161_v42  ;;  %v914_v23 = vunpack.c.h.bf16 %v632_v14  ;;  %v176_v39 = vadd.f32 %v915_v33, %v175_v19  ;;  %v189_v44 = vadd.f32 %v916_v43, %v188_v21 }
  0x15   :  { %v202_v45 = vadd.f32 %v917_v36, %v201_v29  ;;  %v918_v10 = vunpack.c.l.bf16 %v610_v6  ;;  %v919_v5 = vunpack.c.l.bf16 %v637_v15  ;;  %v228_v14 = vadd.f32 %v512_v63, %v227_v11 }
  0x16   :  { %356 = vmatpush.bf16.msra.mxu0 %v403_v17  ;;  %v163_v26 = vadd.f32 %v914_v23, %v162_v3  ;;  %v241_v61 = vadd.f32 %v528_v50, %v240_v25  ;;  %v920_v22 = vunpack.c.l.bf16 %v665_v27  ;;  %v921_v46 = vunpack.c.l.bf16 %v689_v35 }
  0x17   :  { %v151_v57 = vadd.f32 %v918_v10, %v150_v32  ;;  %v922_v56 = vunpack.c.l.bf16 %v717_v47  ;;  %v216_v41 = vadd.f32 %v499_v54, %v215_v49  ;;  %v923_v17 = vunpack.c.h.bf16 %v610_v6 }
  0x18   :  { %v164_v58 = vadd.f32 %v919_v5, %v163_v26  ;;  %v177_v34 = vadd.f32 %v920_v22, %v176_v39  ;;  %v190_v62 = vadd.f32 %v921_v46, %v189_v44  ;;  %v924_v50 = vunpack.c.h.bf16 %v637_v15 }
  0x19   :  { %v203_v0 = vadd.f32 %v922_v56, %v202_v45  ;;  %v152_v48 = vadd.f32 %v923_v17, %v151_v57  ;;  %v229_v42 = vadd.f32 %v515_v51, %v228_v14  ;;  %v242_v59 = vadd.f32 %v531_v55, %v241_v61 }
  0x1a   :  { %357 = vmatpush.bf16.msra.mxu0 %v402_v18  ;;  %v165_v63 = vadd.f32 %v924_v50, %v164_v58  ;;  %v925_v30 = vunpack.c.h.bf16 %v665_v27  ;;  %v926_v3 = vunpack.c.h.bf16 %v689_v35  ;;  %v927_v13 = vunpack.c.h.bf16 %v717_v47 }
  0x1b   :  { %v928_v19 = vunpack.c.h.bf16 %v746_v60  ;;  %v929_v6 = vunpack.c.l.bf16 %v615_v7  ;;  %v930_v15 = vunpack.c.l.bf16 %v646_v20  ;;  %v230_v51 = vadd.f32 %v516_v38, %v229_v42 }
  0x1c   :  { %v178_v2 = vadd.f32 %v925_v30, %v177_v34  ;;  %v191_v4 = vadd.f32 %v926_v3, %v190_v62  ;;  %v204_v18 = vadd.f32 %v927_v13, %v203_v0  ;;  %v243_v55 = vadd.f32 %v532_v37, %v242_v59 }
  0x1d   :  { %v217_v54 = vadd.f32 %v928_v19, %v216_v41  ;;  %v153_v21 = vadd.f32 %v929_v6, %v152_v48  ;;  %v166_v29 = vadd.f32 %v930_v15, %v165_v63  ;;  %v931_v27 = vunpack.c.l.bf16 %v670_v28 }
  0x1e   :  { %358 = vmatpush.bf16.msra.mxu0 %v401_v12  ;;  %v932_v35 = vunpack.c.l.bf16 %v698_v40  ;;  %v933_v47 = vunpack.c.l.bf16 %v729_v53  ;;  %v934_v60 = vunpack.c.l.bf16 %v755_v1  ;;  %v935_v26 = vunpack.c.h.bf16 %v615_v7 }
  0x1f   :  { %v179_v31 = vadd.f32 %v931_v27, %v178_v2  ;;  %v936_v25 = vunpack.c.h.bf16 %v646_v20  ;;  %v231_v37 = vadd.f32 %v519_v8, %v230_v51  ;;  %v244_v33 = vadd.f32 %v535_v24, %v243_v55 }
  0x20   :  { %v192_v9 = vadd.f32 %v932_v35, %v191_v4  ;;  %v205_v32 = vadd.f32 %v933_v47, %v204_v18  ;;  %v218_v23 = vadd.f32 %v934_v60, %v217_v54  ;;  %v154_v11 = vadd.f32 %v935_v26, %v153_v21 }
  0x21   :  { %v167_v38 = vadd.f32 %v936_v25, %v166_v29  ;;  %v937_v39 = vunpack.c.h.bf16 %v670_v28  ;;  %v938_v44 = vunpack.c.h.bf16 %v698_v40  ;;  %v939_v45 = vunpack.c.h.bf16 %v729_v53 }
  0x22   :  { %v940_v10 = vunpack.c.h.bf16 %v755_v1  ;;  %v155_v57 = vrot.slane %v154_v11, 4  ;;  %v941_v20 = vunpack.c.h.bf16 %v780_v16  ;;  %v942_v8 = vunpack.c.h.bf16 %v800_v52 }
  0x23   :  { %v180_v43 = vadd.f32 %v937_v39, %v179_v31  ;;  %v193_v36 = vadd.f32 %v938_v44, %v192_v9  ;;  %v206_v49 = vadd.f32 %v939_v45, %v205_v32  ;;  %v168_v5 = vrot.slane %v167_v38, 4 }
  0x24   :  { %v219_v7 = vadd.f32 %v940_v10, %v218_v23  ;;  %v232_v58 = vadd.f32 %v941_v20, %v231_v37  ;;  %v245_v24 = vadd.f32 %v942_v8, %v244_v33  ;;  %v156_v40 = vadd.f32 %v155_v57, %v154_v11 }
  0x25   :  { %v181_v14 = vrot.slane %v180_v43, 4  ;;  %v194_v28 = vrot.slane %v193_v36, 4  ;;  %v207_v61 = vrot.slane %v206_v49, 4  ;;  %v169_v22 = vadd.f32 %v168_v5, %v167_v38 }
  0x26   :  { %v220_v12 = vrot.slane %v219_v7, 4  ;;  %v233_v34 = vrot.slane %v232_v58, 4  ;;  %v246_v53 = vrot.slane %v245_v24, 4  ;;  %v157_v0 = vrot.slane %v156_v40, 2 }
  0x27   :  { %v182_v46 = vadd.f32 %v181_v14, %v180_v43  ;;  %v195_v62 = vadd.f32 %v194_v28, %v193_v36  ;;  %v208_v1 = vadd.f32 %v207_v61, %v206_v49  ;;  %v170_v41 = vrot.slane %v169_v22, 2  ;;  %v568_v49 = vld [vmem:[%s911_s2] ss:$0 sm:$0xff] }
  0x28   :  { %v221_v56 = vadd.f32 %v220_v12, %v219_v7  ;;  %v234_v17 = vadd.f32 %v233_v34, %v232_v58  ;;  %v247_v16 = vadd.f32 %v246_v53, %v245_v24  ;;  %v158_v42 = vadd.f32 %v157_v0, %v156_v40 }
  0x29   :  { %v183_v48 = vrot.slane %v182_v46, 2  ;;  %v196_v50 = vrot.slane %v195_v62, 2  ;;  %v209_v52 = vrot.slane %v208_v1, 2  ;;  %v171_v59 = vadd.f32 %v170_v41, %v169_v22 }
  0x2a   :  { %v222_v63 = vrot.slane %v221_v56, 2  ;;  %v235_v30 = vrot.slane %v234_v17, 2  ;;  %v248_v2 = vrot.slane %v247_v16, 2  ;;  %v159_v19 = vrot.slane %v158_v42, 1 }
  0x2b   :  { %v184_v3 = vadd.f32 %v183_v48, %v182_v46  ;;  %v197_v4 = vadd.f32 %v196_v50, %v195_v62  ;;  %v210_v13 = vadd.f32 %v209_v52, %v208_v1  ;;  %v172_v54 = vrot.slane %v171_v59, 1 }
  0x2c   :  { %v223_v18 = vadd.f32 %v222_v63, %v221_v56  ;;  %v236_v6 = vadd.f32 %v235_v30, %v234_v17  ;;  %v249_v21 = vadd.f32 %v248_v2, %v247_v16  ;;  %v160_v27 = vadd.f32 %v159_v19, %v158_v42 }
  0x2d   :  { %v185_v15 = vrot.slane %v184_v3, 1  ;;  %v198_v29 = vrot.slane %v197_v4, 1  ;;  %v211_v51 = vrot.slane %v210_v13, 1  ;;  %v173_v31 = vadd.f32 %v172_v54, %v171_v59 }
  0x2e   :  { %v224_v55 = vrot.slane %v223_v18, 1  ;;  %v237_v35 = vrot.slane %v236_v6, 1  ;;  %v250_v32 = vrot.slane %v249_v21, 1 }
  0x2f   :  { %v186_v9 = vadd.f32 %v185_v15, %v184_v3  ;;  %v199_v47 = vadd.f32 %v198_v29, %v197_v4  ;;  %v212_v60 = vadd.f32 %v211_v51, %v210_v13  ;;  %v261_v26 = vsel %vm260_vm0, %v173_v31, %v160_v27 }
  0x30   :  { %v225_v23 = vadd.f32 %v224_v55, %v223_v18  ;;  %v238_v11 = vadd.f32 %v237_v35, %v236_v6  ;;  %v251_v38 = vadd.f32 %v250_v32, %v249_v21 }
  0x31   :  { %v263_v25 = vsel %vm262_vm1, %v186_v9, %v261_v26 }
  0x32   :  { %v265_v37 = vsel %vm264_vm2, %v199_v47, %v263_v25 }
  0x33   :  { %v267_v33 = vsel %vm266_vm3, %v212_v60, %v265_v37 }
  0x34   :  { %v269_v39 = vsel %vm268_vm4, %v225_v23, %v267_v33 }
  0x35   :  { %v271_v43 = vsel %vm270_vm5, %v238_v11, %v269_v39 }
  0x36   :  { %v273_v44 = vsel %vm272_vm6, %v251_v38, %v271_v43 }
  0x37   :  { %v281_v36 = vmul.f32 0.015625, %v273_v44 }
  0x39   :  { %v282_v45 = vpack.c.bf16 %v281_v36, %v281_v36 }
  0x3b   :  { %359 = vmatmul.bf16.vlgmr.msra.gmra.mxu0 %v282_v45 }
  0xb8   :  { %v360_v10 = vpop.f32.mrf.mxu0 }
  0xb9   :  { %v361_v7 = vadd.f32 %v568_v49, %v360_v10 }
  0xbb   :  { %364 = vst [vmem:[%s912_s3] sm:$0xff] %v361_v7 }
  0xc0   :  { %v362_v57 = vpop.f32.mrf.mxu0 }

// kernel: forward.10
= control target key start
LH: loop header
LB: loop body
LE: loop exit
PB: predicated region body
PF: predicated region fallthrough
CT: control target
= control target key end

     0   :  { %s2355_s1 = inlined_call_operand.vmem [shape: bf16[640,128], index: 1, kind: input, shape index: {}]   ;;  %s2356_s0 = inlined_call_operand.vmem [shape: bf16[128,640], index: 0, kind: input, shape index: {}]   ;;  %s2357_s5 = inlined_call_operand.vmem [shape: bf16[128,128], index: 5, kind: input, shape index: {}]   ;;  %s2358_s4 = inlined_call_operand.vmem [shape: bf16[128,128], index: 4, kind: input, shape index: {}]   ;;  %s2359_s2 = inlined_call_operand.vmem [shape: f32[1,128], index: 2, kind: input, shape index: {}]   ;;  %s2360_s3 = inlined_call_operand.vmem [shape: f32[1,128], index: 3, kind: input, shape index: {}]   ;;  %s2361_s6 = inlined_call_operand.vmem [shape: f32[1,128], index: 6, kind: input, shape index: {}]   ;;  %s2362_s7 = inlined_call_operand.vmem [shape: f32[1,128], index: 7, kind: input, shape index: {}]   ;;  %s2363_s8 = inlined_call_operand.vmem [shape: bf16[128,128], index: 8, kind: output, shape index: {}]  }
   0x1   :  { %v1606_v0 = vld [vmem:[%s2355_s1 + $0x38] sm:$0xff]  ;;  %v1605_v2 = vld [vmem:[%s2355_s1 + $0x30] sm:$0xff]  ;;  %v1604_v4 = vld [vmem:[%s2355_s1 + $0x28] sm:$0xff] }
   0x2   :  { %v1614_v1 = vld [vmem:[%s2355_s1 + $0x78] sm:$0xff]  ;;  %1702 = vmatpush.bf16.msra.mxu2 %v1606_v0  ;;  %v1613_v3 = vld [vmem:[%s2355_s1 + $0x70] sm:$0xff]  ;;  %605 = vmatpush.bf16.msra.mxu0 %v1606_v0  ;;  %v1612_v5 = vld [vmem:[%s2355_s1 + $0x68] sm:$0xff] }
   0x3   :  { %1710 = vmatpush.bf16.msra.mxu3 %v1614_v1  ;;  %654 = vmatpush.bf16.msra.mxu1 %v1614_v1  ;;  %v1603_v6 = vld [vmem:[%s2355_s1 + $0x20] sm:$0xff]  ;;  %v1602_v8 = vld [vmem:[%s2355_s1 + $0x18] sm:$0xff]  ;;  %v1601_v10 = vld [vmem:[%s2355_s1 + $0x10] sm:$0xff] }
   0x4   :  { %v1611_v7 = vld [vmem:[%s2355_s1 + $0x60] sm:$0xff]  ;;  %v1610_v9 = vld [vmem:[%s2355_s1 + $0x58] sm:$0xff]  ;;  %v1609_v11 = vld [vmem:[%s2355_s1 + $0x50] sm:$0xff] }
   0x5   :  { %v1600_v12 = vld [vmem:[%s2355_s1 + $0x8] sm:$0xff]  ;;  %v1599_v14 = vld [vmem:[%s2355_s1] sm:$0xff]  ;;  %v1581_v17 = vld [vmem:[%s2356_s0 + $0xb0] sm:$0xf0] }
   0x6   :  { %1703 = vmatpush.bf16.msra.mxu2 %v1605_v2  ;;  %606 = vmatpush.bf16.msra.mxu0 %v1605_v2  ;;  %v1608_v13 = vld [vmem:[%s2355_s1 + $0x48] sm:$0xff]  ;;  %v1607_v15 = vld [vmem:[%s2355_s1 + $0x40] sm:$0xff]  ;;  %v1259_v19 = vld [vmem:[%s2356_s0 + $0xb4] sm:$0xf0] }
   0x7   :  { %1711 = vmatpush.bf16.msra.mxu3 %v1613_v3  ;;  %655 = vmatpush.bf16.msra.mxu1 %v1613_v3  ;;  %v1257_v16 = vld [vmem:[%s2356_s0 + $0xa0] sm:$0xf]  ;;  %v1579_v18 = vld [vmem:[%s2356_s0 + $0xa4] sm:$0xf]  ;;  %v1561_v21 = vld [vmem:[%s2356_s0 + $0x10] sm:$0xf0] }
   0x8   :  { %v1177_v20 = vld [vmem:[%s2356_s0] sm:$0xf]  ;;  %v1559_v22 = vld [vmem:[%s2356_s0 + $0x4] sm:$0xf]  ;;  %v1179_v23 = vld [vmem:[%s2356_s0 + $0x14] sm:$0xf0]  ;;  %v1258_v26 = vor.u32 %v1581_v17, %v1257_v16  ;;  %v1262_v27 = vor.u32 %v1579_v18, %v1259_v19 }
   0x9   :  { %v1622_v24 = vld [vmem:[%s2355_s1 + $0xb8] sm:$0xff]  ;;  %v1178_v28 = vor.u32 %v1561_v21, %v1177_v20  ;;  %v1182_v29 = vor.u32 %v1559_v22, %v1179_v23  ;;  %v1621_v32 = vld [vmem:[%s2355_s1 + $0xb0] sm:$0xff]  ;;  %v1620_v36 = vld [vmem:[%s2355_s1 + $0xa8] sm:$0xff] }
   0xa   :  { %1704 = vmatpush.bf16.msra.mxu2 %v1604_v4  ;;  %607 = vmatpush.bf16.msra.mxu0 %v1604_v4  ;;  %v1630_v25 = vld [vmem:[%s2355_s1 + $0xf8] sm:$0xff]  ;;  %v1629_v33 = vld [vmem:[%s2355_s1 + $0xf0] sm:$0xff]  ;;  %v1628_v37 = vld [vmem:[%s2355_s1 + $0xe8] sm:$0xff] }
   0xb   :  { %1712 = vmatpush.bf16.msra.mxu3 %v1612_v5  ;;  %656 = vmatpush.bf16.msra.mxu1 %v1612_v5  ;;  %v1638_v30 = vld [vmem:[%s2355_s1 + $0x138] sm:$0xff]  ;;  %v1637_v34 = vld [vmem:[%s2355_s1 + $0x130] sm:$0xff]  ;;  %v1636_v38 = vld [vmem:[%s2355_s1 + $0x128] sm:$0xff] }
   0xc   :  { %v1654_v31 = vld [vmem:[%s2357_s5 + $0x38] sm:$0xff]  ;;  %v1653_v35 = vld [vmem:[%s2357_s5 + $0x30] sm:$0xff]  ;;  %v1652_v39 = vld [vmem:[%s2357_s5 + $0x28] sm:$0xff] }
   0xd   :  { %v1277_v40 = vld [vmem:[%s2356_s0 + $0xc8] sm:$0xf]  ;;  %v1619_v41 = vld [vmem:[%s2355_s1 + $0xa0] sm:$0xff]  ;;  %v1586_v43 = vld [vmem:[%s2356_s0 + $0xd8] sm:$0xf0] }
   0xe   :  { %1705 = vmatpush.bf16.msra.mxu2 %v1603_v6  ;;  %608 = vmatpush.bf16.msra.mxu0 %v1603_v6  ;;  %v1627_v42 = vld [vmem:[%s2355_s1 + $0xe0] sm:$0xff]  ;;  %v1584_v44 = vld [vmem:[%s2356_s0 + $0xcc] sm:$0xf]  ;;  %v1197_v46 = vld [vmem:[%s2356_s0 + $0x28] sm:$0xf]  ;;  %v1278_v54 = vor.u32 %v1586_v43, %v1277_v40 }
   0xf   :  { %1713 = vmatpush.bf16.msra.mxu3 %v1611_v7  ;;  %657 = vmatpush.bf16.msra.mxu1 %v1611_v7  ;;  %v1279_v45 = vld [vmem:[%s2356_s0 + $0xdc] sm:$0xf0]  ;;  %v1566_v47 = vld [vmem:[%s2356_s0 + $0x38] sm:$0xf0]  ;;  %v1564_v48 = vld [vmem:[%s2356_s0 + $0x2c] sm:$0xf] }
  0x10   :  { %v1199_v49 = vld [vmem:[%s2356_s0 + $0x3c] sm:$0xf0]  ;;  %v1618_v52 = vld [vmem:[%s2355_s1 + $0x98] sm:$0xff]  ;;  %v1282_v55 = vor.u32 %v1584_v44, %v1279_v45  ;;  %v1198_v56 = vor.u32 %v1566_v47, %v1197_v46  ;;  %v1617_v60 = vld [vmem:[%s2355_s1 + $0x90] sm:$0xff] }
  0x11   :  { %v1635_v50 = vld [vmem:[%s2355_s1 + $0x120] sm:$0xff]  ;;  %v1626_v53 = vld [vmem:[%s2355_s1 + $0xd8] sm:$0xff]  ;;  %v1202_v57 = vor.u32 %v1564_v48, %v1199_v49  ;;  %v1625_v61 = vld [vmem:[%s2355_s1 + $0xd0] sm:$0xff] }
  0x12   :  { %1706 = vmatpush.bf16.msra.mxu2 %v1602_v8  ;;  %609 = vmatpush.bf16.msra.mxu0 %v1602_v8  ;;  %v1651_v51 = vld [vmem:[%s2357_s5 + $0x20] sm:$0xff]  ;;  %v1634_v58 = vld [vmem:[%s2355_s1 + $0x118] sm:$0xff]  ;;  %v1633_v62 = vld [vmem:[%s2355_s1 + $0x110] sm:$0xff] }
  0x13   :  { %1714 = vmatpush.bf16.msra.mxu3 %v1610_v9  ;;  %658 = vmatpush.bf16.msra.mxu1 %v1610_v9  ;;  %v1650_v59 = vld [vmem:[%s2357_s5 + $0x18] sm:$0xff]  ;;  %v1649_v63 = vld [vmem:[%s2357_s5 + $0x10] sm:$0xff]  ;;  %v1616_v0 = vld [vmem:[%s2355_s1 + $0x88] sm:$0xff] }
  0x14   :  { %v1624_v1 = vld [vmem:[%s2355_s1 + $0xc8] sm:$0xff]  ;;  %v1615_v4 = vld [vmem:[%s2355_s1 + $0x80] sm:$0xff]  ;;  %v1297_v6 = vld [vmem:[%s2356_s0 + $0xf0] sm:$0xf] }
  0x15   :  { %v1632_v2 = vld [vmem:[%s2355_s1 + $0x108] sm:$0xff]  ;;  %v1623_v5 = vld [vmem:[%s2355_s1 + $0xc0] sm:$0xff]  ;;  %v1589_v8 = vld [vmem:[%s2356_s0 + $0xf4] sm:$0xf] }
  0x16   :  { %1707 = vmatpush.bf16.msra.mxu2 %v1601_v10  ;;  %610 = vmatpush.bf16.msra.mxu0 %v1601_v10  ;;  %v1648_v3 = vld [vmem:[%s2357_s5 + $0x8] sm:$0xff]  ;;  %v1591_v7 = vld [vmem:[%s2356_s0 + $0x100] sm:$0xf0]  ;;  %v1217_v10 = vld [vmem:[%s2356_s0 + $0x50] sm:$0xf] }
  0x17   :  { %1715 = vmatpush.bf16.msra.mxu3 %v1609_v11  ;;  %659 = vmatpush.bf16.msra.mxu1 %v1609_v11  ;;  %v1299_v9 = vld [vmem:[%s2356_s0 + $0x104] sm:$0xf0]  ;;  %v1571_v11 = vld [vmem:[%s2356_s0 + $0x60] sm:$0xf0]  ;;  %v1317_v20 = vld [vmem:[%s2356_s0 + $0x118] sm:$0xf] }
  0x18   :  { %v1302_v16 = vor.u32 %v1589_v8, %v1299_v9  ;;  %v1218_v17 = vor.u32 %v1571_v11, %v1217_v10  ;;  %v1647_v19 = vld [vmem:[%s2357_s5] sm:$0xff]  ;;  %v1596_v21 = vld [vmem:[%s2356_s0 + $0x128] sm:$0xf0]  ;;  %v1594_v22 = vld [vmem:[%s2356_s0 + $0x11c] sm:$0xf] }
  0x19   :  { %v1319_v23 = vld [vmem:[%s2356_s0 + $0x12c] sm:$0xf0]  ;;  %v1567_v43 = vld [vmem:[%s2356_s0 + $0x40] sm:$0xf0]  ;;  %v1565_v44 = vld [vmem:[%s2356_s0 + $0x34] sm:$0xf] }
  0x1a   :  { %1708 = vmatpush.bf16.msra.mxu2 %v1600_v12  ;;  %611 = vmatpush.bf16.msra.mxu0 %v1600_v12  ;;  %v1569_v12 = vld [vmem:[%s2356_s0 + $0x54] sm:$0xf]  ;;  %v1207_v45 = vld [vmem:[%s2356_s0 + $0x44] sm:$0xf0]  ;;  %v1213_v46 = vld [vmem:[%s2356_s0 + $0x38] sm:$0xf] }
  0x1b   :  { %1716 = vmatpush.bf16.msra.mxu3 %v1608_v13  ;;  %660 = vmatpush.bf16.msra.mxu1 %v1608_v13  ;;  %v1219_v13 = vld [vmem:[%s2356_s0 + $0x64] sm:$0xf0]  ;;  %v1568_v47 = vld [vmem:[%s2356_s0 + $0x48] sm:$0xf0]  ;;  %v1210_v49 = vor.u32 %v1565_v44, %v1207_v45  ;;  %v1582_v9 = vld [vmem:[%s2356_s0 + $0xb8] sm:$0xf0] }
  0x1c   :  { %v1222_v18 = vor.u32 %v1569_v12, %v1219_v13  ;;  %v1265_v8 = vld [vmem:[%s2356_s0 + $0xa8] sm:$0xf]  ;;  %v1580_v10 = vld [vmem:[%s2356_s0 + $0xac] sm:$0xf]  ;;  %v1267_v11 = vld [vmem:[%s2356_s0 + $0xbc] sm:$0xf0] }
  0x1d   :  { %v1273_v12 = vld [vmem:[%s2356_s0 + $0xb0] sm:$0xf]  ;;  %v1583_v13 = vld [vmem:[%s2356_s0 + $0xc0] sm:$0xf0]  ;;  %v1305_v45 = vld [vmem:[%s2356_s0 + $0xf8] sm:$0xf] }
  0x1e   :  { %1709 = vmatpush.bf16.msra.mxu2 %v1599_v14  ;;  %612 = vmatpush.bf16.msra.mxu0 %v1599_v14  ;;  %v1631_v14 = vld [vmem:[%s2355_s1 + $0x100] sm:$0xff] }
  0x1f   :  { %1717 = vmatpush.bf16.msra.mxu3 %v1607_v15  ;;  %661 = vmatpush.bf16.msra.mxu1 %v1607_v15  ;;  %v1298_v15 = vor.u32 %v1591_v7, %v1297_v6  ;;  %v1642_v7 = vld [vmem:[%s2358_s4 + $0x18] sm:$0xff] }
  0x21   :  { %633 = vmatmul.bf16.vlgmr.msra.gmra.mxu2 %v1258_v26  ;;  %613 = vmatmul.bf16.vlgmr.msra.gmra.mxu0 %v1178_v28  ;;  %v1574_v26 = vld [vmem:[%s2356_s0 + $0x7c] sm:$0xf]  ;;  %v1318_v28 = vor.u32 %v1596_v21, %v1317_v20 }
  0x22   :  { %703 = vmatpush.bf16.msrb.mxu2 %v1622_v24  ;;  %682 = vmatmul.bf16.vlgmr.msra.gmra.mxu3 %v1262_v27  ;;  %v1237_v24 = vld [vmem:[%s2356_s0 + $0x78] sm:$0xf]  ;;  %v1239_v27 = vld [vmem:[%s2356_s0 + $0x8c] sm:$0xf0] }
  0x23   :  { %752 = vmatpush.bf16.msrb.mxu3 %v1630_v25  ;;  %662 = vmatmul.bf16.vlgmr.msra.gmra.mxu1 %v1182_v29  ;;  %v1576_v25 = vld [vmem:[%s2356_s0 + $0x88] sm:$0xf0]  ;;  %v1322_v29 = vor.u32 %v1594_v22, %v1319_v23 }
  0x24   :  { %801 = vmatpush.bf16.msrb.mxu0 %v1638_v30  ;;  %1018 = vmatpush.bf16.msrb.mxu1 %v1654_v31  ;;  %v1238_v30 = vor.u32 %v1576_v25, %v1237_v24  ;;  %v1242_v31 = vor.u32 %v1574_v26, %v1239_v27  ;;  %v1285_v25 = vld [vmem:[%s2356_s0 + $0xd0] sm:$0xf]  ;;  %v1587_v26 = vld [vmem:[%s2356_s0 + $0xe0] sm:$0xf0]  ;;  %v1585_v27 = vld [vmem:[%s2356_s0 + $0xd4] sm:$0xf] }
  0x26   :  { %704 = vmatpush.bf16.msrb.mxu2 %v1621_v32  ;;  %v1185_v32 = vld [vmem:[%s2356_s0 + $0x8] sm:$0xf] }
  0x27   :  { %753 = vmatpush.bf16.msrb.mxu3 %v1629_v33  ;;  %v1562_v33 = vld [vmem:[%s2356_s0 + $0x18] sm:$0xf0] }
  0x28   :  { %802 = vmatpush.bf16.msrb.mxu0 %v1637_v34  ;;  %1019 = vmatpush.bf16.msrb.mxu1 %v1653_v35  ;;  %v1560_v34 = vld [vmem:[%s2356_s0 + $0xc] sm:$0xf]  ;;  %v1187_v35 = vld [vmem:[%s2356_s0 + $0x1c] sm:$0xf0] }
  0x2a   :  { %705 = vmatpush.bf16.msrb.mxu2 %v1620_v36  ;;  %v1193_v36 = vld [vmem:[%s2356_s0 + $0x10] sm:$0xf] }
  0x2b   :  { %754 = vmatpush.bf16.msrb.mxu3 %v1628_v37  ;;  %v1563_v37 = vld [vmem:[%s2356_s0 + $0x20] sm:$0xf0] }
  0x2c   :  { %803 = vmatpush.bf16.msrb.mxu0 %v1636_v38  ;;  %1020 = vmatpush.bf16.msrb.mxu1 %v1652_v39  ;;  %v1186_v38 = vor.u32 %v1562_v33, %v1185_v32  ;;  %v1190_v39 = vor.u32 %v1560_v34, %v1187_v35  ;;  %v1194_v40 = vor.u32 %v1563_v37, %v1193_v36  ;;  %v1644_v37 = vld [vmem:[%s2358_s4 + $0x28] sm:$0xff] }
  0x2d   :  { %v1286_v34 = vor.u32 %v1587_v26, %v1285_v25 }
  0x2e   :  { %706 = vmatpush.bf16.msrb.mxu2 %v1619_v41  ;;  %v1639_v41 = vld [vmem:[%s2358_s4] sm:$0xff] }
  0x2f   :  { %755 = vmatpush.bf16.msrb.mxu3 %v1627_v42  ;;  %v1205_v42 = vld [vmem:[%s2356_s0 + $0x30] sm:$0xf] }
  0x30   :  { %804 = vmatpush.bf16.msrb.mxu0 %v1635_v50  ;;  %1021 = vmatpush.bf16.msrb.mxu1 %v1651_v51  ;;  %v1206_v48 = vor.u32 %v1567_v43, %v1205_v42  ;;  %v1214_v50 = vor.u32 %v1568_v47, %v1213_v46  ;;  %v1640_v51 = vld [vmem:[%s2358_s4 + $0x8] sm:$0xff]  ;;  %v1590_v47 = vld [vmem:[%s2356_s0 + $0xfc] sm:$0xf] }
  0x31   :  { %638 = vmatmul.bf16.gmra.mxu2 %v1278_v54  ;;  %618 = vmatmul.bf16.gmra.mxu0 %v1198_v56  ;;  %v1570_v54 = vld [vmem:[%s2356_s0 + $0x5c] sm:$0xf]  ;;  %v1233_v56 = vld [vmem:[%s2356_s0 + $0x60] sm:$0xf]  ;;  %v1592_v46 = vld [vmem:[%s2356_s0 + $0x108] sm:$0xf0] }
  0x32   :  { %707 = vmatpush.bf16.msrb.mxu2 %v1618_v52  ;;  %687 = vmatmul.bf16.gmra.mxu3 %v1282_v55  ;;  %v1225_v52 = vld [vmem:[%s2356_s0 + $0x58] sm:$0xf]  ;;  %v1227_v55 = vld [vmem:[%s2356_s0 + $0x6c] sm:$0xf0] }
  0x33   :  { %756 = vmatpush.bf16.msrb.mxu3 %v1626_v53  ;;  %667 = vmatmul.bf16.gmra.mxu1 %v1202_v57  ;;  %v1572_v53 = vld [vmem:[%s2356_s0 + $0x68] sm:$0xf0]  ;;  %v1573_v57 = vld [vmem:[%s2356_s0 + $0x70] sm:$0xf0] }
  0x34   :  { %805 = vmatpush.bf16.msrb.mxu0 %v1634_v58  ;;  %1022 = vmatpush.bf16.msrb.mxu1 %v1650_v59  ;;  %v1226_v58 = vor.u32 %v1572_v53, %v1225_v52  ;;  %v1230_v59 = vor.u32 %v1570_v54, %v1227_v55  ;;  %v1306_v54 = vor.u32 %v1592_v46, %v1305_v45 }
  0x36   :  { %708 = vmatpush.bf16.msrb.mxu2 %v1617_v60  ;;  %v1234_v60 = vor.u32 %v1573_v57, %v1233_v56  ;;  %v1645_v57 = vld [vmem:[%s2358_s4 + $0x30] sm:$0xff] }
  0x37   :  { %757 = vmatpush.bf16.msrb.mxu3 %v1625_v61  ;;  %v1641_v61 = vld [vmem:[%s2358_s4 + $0x10] sm:$0xff] }
  0x38   :  { %806 = vmatpush.bf16.msrb.mxu0 %v1633_v62  ;;  %1023 = vmatpush.bf16.msrb.mxu1 %v1649_v63  ;;  %v1245_v62 = vld [vmem:[%s2356_s0 + $0x80] sm:$0xf]  ;;  %v1577_v63 = vld [vmem:[%s2356_s0 + $0x90] sm:$0xf0] }
  0x3a   :  { %709 = vmatpush.bf16.msrb.mxu2 %v1616_v0  ;;  %v1575_v0 = vld [vmem:[%s2356_s0 + $0x84] sm:$0xf] }
  0x3b   :  { %758 = vmatpush.bf16.msrb.mxu3 %v1624_v1  ;;  %v1247_v1 = vld [vmem:[%s2356_s0 + $0x94] sm:$0xf0] }
  0x3c   :  { %807 = vmatpush.bf16.msrb.mxu0 %v1632_v2  ;;  %1024 = vmatpush.bf16.msrb.mxu1 %v1648_v3  ;;  %v1253_v2 = vld [vmem:[%s2356_s0 + $0x88] sm:$0xf]  ;;  %v1578_v3 = vld [vmem:[%s2356_s0 + $0x98] sm:$0xf0] }
  0x3d   :  { %v1254_v6 = vor.u32 %v1578_v3, %v1253_v2  ;;  %v1597_v2 = vld [vmem:[%s2356_s0 + $0x130] sm:$0xf0]  ;;  %v1595_v3 = vld [vmem:[%s2356_s0 + $0x124] sm:$0xf] }
  0x3e   :  { %710 = vmatpush.bf16.msrb.mxu2 %v1615_v4  ;;  %v1246_v4 = vor.u32 %v1577_v63, %v1245_v62 }
  0x3f   :  { %759 = vmatpush.bf16.msrb.mxu3 %v1623_v5  ;;  %v1250_v5 = vor.u32 %v1575_v0, %v1247_v1  ;;  %v1325_v1 = vld [vmem:[%s2356_s0 + $0x120] sm:$0xf] }
  0x40   :  { %808 = vmatpush.bf16.msrb.mxu0 %v1631_v14  ;;  %1025 = vmatpush.bf16.msrb.mxu1 %v1647_v19  ;;  %v1266_v14 = vor.u32 %v1582_v9, %v1265_v8 }
  0x41   :  { %643 = vmatmul.bf16.gmra.mxu2 %v1298_v15  ;;  %623 = vmatmul.bf16.gmra.mxu0 %v1218_v17  ;;  %v1270_v15 = vor.u32 %v1580_v10, %v1267_v11  ;;  %v1643_v17 = vld [vmem:[%s2358_s4 + $0x20] sm:$0xff]  ;;  %v1326_v10 = vor.u32 %v1597_v2, %v1325_v1 }
  0x42   :  { %692 = vmatmul.bf16.gmra.mxu3 %v1302_v16  ;;  %v1274_v16 = vor.u32 %v1583_v13, %v1273_v12  ;;  %v1646_v13 = vld [vmem:[%s2358_s4 + $0x38] sm:$0xff] }
  0x43   :  { %672 = vmatmul.bf16.gmra.mxu1 %v1222_v18 }
  0x51   :  { %648 = vmatmul.bf16.gmra.mxu2 %v1318_v28  ;;  %628 = vmatmul.bf16.gmra.mxu0 %v1238_v30  ;;  %v1287_v28 = vld [vmem:[%s2356_s0 + $0xe4] sm:$0xf0]  ;;  %v1588_v30 = vld [vmem:[%s2356_s0 + $0xe8] sm:$0xf0] }
  0x52   :  { %697 = vmatmul.bf16.gmra.mxu3 %v1322_v29  ;;  %v1293_v29 = vld [vmem:[%s2356_s0 + $0xd8] sm:$0xf]  ;;  %v1290_v35 = vor.u32 %v1585_v27, %v1287_v28 }
  0x53   :  { %677 = vmatmul.bf16.gmra.mxu1 %v1242_v31  ;;  %v1294_v36 = vor.u32 %v1588_v30, %v1293_v29 }
  0x61   :  { %711 = vmatmul.bf16.vlgmr.msrb.gmra.mxu2 %v1186_v38  ;;  %809 = vmatmul.bf16.vlgmr.msrb.gmra.mxu0 %v1194_v40 }
  0x62   :  { %760 = vmatmul.bf16.vlgmr.msrb.gmra.mxu3 %v1190_v39 }
  0x63   :  { %1026 = vmatmul.bf16.vlgmr.msrb.gmra.mxu1 %v1639_v41 }
  0x71   :  { %716 = vmatmul.bf16.gmra.mxu2 %v1206_v48  ;;  %814 = vmatmul.bf16.gmra.mxu0 %v1214_v50  ;;  %v1307_v48 = vld [vmem:[%s2356_s0 + $0x10c] sm:$0xf0]  ;;  %v1593_v50 = vld [vmem:[%s2356_s0 + $0x110] sm:$0xf0] }
  0x72   :  { %765 = vmatmul.bf16.gmra.mxu3 %v1210_v49  ;;  %v1313_v49 = vld [vmem:[%s2356_s0 + $0x100] sm:$0xf]  ;;  %v1310_v55 = vor.u32 %v1590_v47, %v1307_v48 }
  0x73   :  { %1031 = vmatmul.bf16.gmra.mxu1 %v1640_v51  ;;  %v1314_v56 = vor.u32 %v1593_v50, %v1313_v49 }
  0x81   :  { %721 = vmatmul.bf16.gmra.mxu2 %v1226_v58  ;;  %819 = vmatmul.bf16.gmra.mxu0 %v1234_v60 }
  0x82   :  { %770 = vmatmul.bf16.gmra.mxu3 %v1230_v59 }
  0x83   :  { %1036 = vmatmul.bf16.gmra.mxu1 %v1641_v61 }
  0x91   :  { %726 = vmatmul.bf16.gmra.mxu2 %v1246_v4  ;;  %824 = vmatmul.bf16.gmra.mxu0 %v1254_v6  ;;  %v1327_v4 = vld [vmem:[%s2356_s0 + $0x134] sm:$0xf0]  ;;  %v1598_v6 = vld [vmem:[%s2356_s0 + $0x138] sm:$0xf0] }
  0x92   :  { %775 = vmatmul.bf16.gmra.mxu3 %v1250_v5  ;;  %v1333_v5 = vld [vmem:[%s2356_s0 + $0x128] sm:$0xf]  ;;  %v1330_v11 = vor.u32 %v1595_v3, %v1327_v4 }
  0x93   :  { %1041 = vmatmul.bf16.gmra.mxu1 %v1642_v7  ;;  %v1334_v12 = vor.u32 %v1598_v6, %v1333_v5 }
  0x9e   :  { %v2112_v18 = vpop.f32.mrf.mxu0 }
  0xa0   :  { %v2114_v19 = vpop.f32.mrf.mxu1 }
  0xa1   :  { %731 = vmatmul.bf16.gmra.mxu2 %v1266_v14  ;;  %829 = vmatmul.bf16.gmra.mxu0 %v1274_v16 }
  0xa2   :  { %780 = vmatmul.bf16.gmra.mxu3 %v1270_v15 }
  0xa3   :  { %1046 = vmatmul.bf16.gmra.mxu1 %v1643_v17 }
  0xa4   :  { %v634_v20 = vpop.f32.mrf.mxu2 }
  0xa5   :  { %v683_v21 = vpop.f32.mrf.mxu3 }
  0xa6   :  { %v2116_v22 = vadd.f32 %v683_v21, %v634_v20  ;;  %v2118_v23 = vpop.f32.mrf.mxu0 }
  0xa8   :  { %v2120_v24 = vpop.f32.mrf.mxu1 }
  0xa9   :  { %v666_v46 = vadd.f32 %v2120_v24, %v2118_v23 }
  0xac   :  { %v636_v31 = vpop.f32.mrf.mxu2 }
  0xad   :  { %v685_v32 = vpop.f32.mrf.mxu3 }
  0xae   :  { %v2140_v33 = vadd.f32 %v685_v32, %v636_v31  ;;  %v2145_v38 = vpop.f32.mrf.mxu0  ;;  %v664_v31 = vadd.f32 %v2114_v19, %v2112_v18  ;;  %v2236_v18 = vld [vmem:[%s2360_s3] ss:$0 sm:$0xff] }
  0xaf   :  { %v2241_v19 = vld [vmem:[%s2361_s6] ss:$0 sm:$0xff] }
  0xb0   :  { %v2147_v39 = vpop.f32.mrf.mxu1 }
  0xb1   :  { %736 = vmatmul.bf16.gmra.mxu2 %v1286_v34  ;;  %834 = vmatmul.bf16.gmra.mxu0 %v1294_v36 }
  0xb2   :  { %785 = vmatmul.bf16.gmra.mxu3 %v1290_v35 }
  0xb3   :  { %1051 = vmatmul.bf16.gmra.mxu1 %v1644_v37  ;;  %v2228_v37 = vld [vmem:[%s2359_s2] ss:$0 sm:$0xff] }
  0xb4   :  { %v639_v40 = vpop.f32.mrf.mxu2 }
  0xb5   :  { %v688_v41 = vpop.f32.mrf.mxu3 }
  0xb6   :  { %v2149_v42 = vadd.f32 %v688_v41, %v639_v40  ;;  %v2151_v43 = vpop.f32.mrf.mxu0 }
  0xb8   :  { %v2153_v44 = vpop.f32.mrf.mxu1 }
  0xbc   :  { %v641_v51 = vpop.f32.mrf.mxu2 }
  0xbd   :  { %v690_v52 = vpop.f32.mrf.mxu3 }
  0xbe   :  { %v2173_v53 = vadd.f32 %v690_v52, %v641_v51  ;;  %v2178_v58 = vpop.f32.mrf.mxu0 }
  0xc0   :  { %v2180_v59 = vpop.f32.mrf.mxu1 }
  0xc1   :  { %741 = vmatmul.bf16.gmra.mxu2 %v1306_v54  ;;  %839 = vmatmul.bf16.gmra.mxu0 %v1314_v56  ;;  %v669_v56 = vadd.f32 %v2147_v39, %v2145_v38 }
  0xc2   :  { %790 = vmatmul.bf16.gmra.mxu3 %v1310_v55 }
  0xc3   :  { %1056 = vmatmul.bf16.gmra.mxu1 %v1645_v57 }
  0xc4   :  { %v644_v60 = vpop.f32.mrf.mxu2 }
  0xc5   :  { %v693_v61 = vpop.f32.mrf.mxu3 }
  0xc6   :  { %v2182_v62 = vadd.f32 %v693_v61, %v644_v60  ;;  %v2184_v63 = vpop.f32.mrf.mxu0  ;;  %v2250_v60 = vld [vmem:[%s2362_s7] ss:$0 sm:$0xff] }
  0xc8   :  { %v2186_v0 = vpop.f32.mrf.mxu1 }
  0xcc   :  { %v646_v7 = vpop.f32.mrf.mxu2 }
  0xcd   :  { %v695_v8 = vpop.f32.mrf.mxu3 }
  0xce   :  { %v2206_v9 = vadd.f32 %v695_v8, %v646_v7  ;;  %v2211_v14 = vpop.f32.mrf.mxu0 }
  0xd0   :  { %v2213_v15 = vpop.f32.mrf.mxu1 }
  0xd1   :  { %746 = vmatmul.bf16.gmra.mxu2 %v1326_v10  ;;  %844 = vmatmul.bf16.gmra.mxu0 %v1334_v12  ;;  %v671_v12 = vadd.f32 %v2153_v44, %v2151_v43  ;;  %v674_v44 = vadd.f32 %v2180_v59, %v2178_v58  ;;  %v676_v58 = vadd.f32 %v2186_v0, %v2184_v63 }
  0xd2   :  { %795 = vmatmul.bf16.gmra.mxu3 %v1330_v11  ;;  %v679_v0 = vadd.f32 %v2213_v15, %v2211_v14 }
  0xd3   :  { %1061 = vmatmul.bf16.gmra.mxu1 %v1646_v13 }
  0xd4   :  { %v649_v16 = vpop.f32.mrf.mxu2 }
  0xd5   :  { %v698_v17 = vpop.f32.mrf.mxu3 }
  0xd6   :  { %v2215_v20 = vadd.f32 %v698_v17, %v649_v16  ;;  %v2217_v21 = vpop.f32.mrf.mxu0 }
  0xd8   :  { %v2219_v25 = vpop.f32.mrf.mxu1 }
  0xd9   :  { %v681_v14 = vadd.f32 %v2219_v25, %v2217_v21 }
  0xdc   :  { %v651_v26 = vpop.f32.mrf.mxu2 }
  0xdd   :  { %v700_v27 = vpop.f32.mrf.mxu3 }
  0xde   :  { %v2221_v28 = vadd.f32 %v700_v27, %v651_v26  ;;  %v810_v29 = vpop.f32.mrf.mxu0 }
  0xe0   :  { %v1027_v30 = vpop.f32.mrf.mxu1 }
  0xe1   :  { %v1071_v52 = vmul.f32 %v2241_v19, %v1027_v30 }
  0xe4   :  { %v712_v32 = vpop.f32.mrf.mxu2 }
  0xe5   :  { %v761_v34 = vpop.f32.mrf.mxu3  ;;  %v713_v35 = vadd.f32 %v712_v32, %v664_v31 }
  0xe6   :  { %v812_v40 = vpop.f32.mrf.mxu0 }
  0xe7   :  { %v762_v36 = vadd.f32 %v761_v34, %v713_v35 }
  0xe8   :  { %v1029_v41 = vpop.f32.mrf.mxu1 }
  0xe9   :  { %v811_v45 = vadd.f32 %v810_v29, %v762_v36  ;;  %v1072_v4 = vmul.f32 %v2241_v19, %v1029_v41 }
  0xeb   :  { %v854_v47 = vmul.f32 %v2228_v37, %v811_v45 }
  0xec   :  { %v714_v48 = vpop.f32.mrf.mxu2 }
  0xed   :  { %v763_v49 = vpop.f32.mrf.mxu3  ;;  %v715_v50 = vadd.f32 %v714_v48, %v666_v46  ;;  %v874_v51 = vadd.f32 %v2236_v18, %v854_v47 }
  0xee   :  { %v815_v24 = vpop.f32.mrf.mxu0 }
  0xef   :  { %v764_v23 = vadd.f32 %v763_v49, %v715_v50  ;;  %v1087_v57 = vadd.f32 %v1071_v52, %v874_v51 }
  0xf0   :  { %v1032_v54 = vpop.f32.mrf.mxu1 }
  0xf1   :  { %v813_v55 = vadd.f32 %v812_v40, %v764_v23  ;;  %v1107_v6 = vadd.f32 %v2250_v60, %v1087_v57  ;;  %v1073_v32 = vmul.f32 %v2241_v19, %v1032_v54 }
  0xf3   :  { %v855_v61 = vmul.f32 %v2228_v37, %v813_v55  ;;  %v1123_v13 = vmax.f32 %v1107_v6, 0.0 }
  0xf4   :  { %v717_v1 = vpop.f32.mrf.mxu2 }
  0xf5   :  { %v766_v2 = vpop.f32.mrf.mxu3  ;;  %v875_v3 = vadd.f32 %v2236_v18, %v855_v61  ;;  %v718_v5 = vadd.f32 %v717_v1, %v669_v56 }
  0xf6   :  { %v817_v38 = vpop.f32.mrf.mxu0 }
  0xf7   :  { %v1088_v7 = vadd.f32 %v1072_v4, %v875_v3  ;;  %v767_v8 = vadd.f32 %v766_v2, %v718_v5 }
  0xf8   :  { %v1034_v39 = vpop.f32.mrf.mxu1 }
  0xf9   :  { %v1108_v10 = vadd.f32 %v2250_v60, %v1088_v7  ;;  %v816_v11 = vadd.f32 %v815_v24, %v767_v8  ;;  %v1074_v48 = vmul.f32 %v2241_v19, %v1034_v39 }
  0xfb   :  { %v1124_v16 = vmax.f32 %v1108_v10, 0.0  ;;  %v856_v17 = vmul.f32 %v2228_v37, %v816_v11 }
  0xfc   :  { %v719_v26 = vpop.f32.mrf.mxu2 }
  0xfd   :  { %v768_v27 = vpop.f32.mrf.mxu3  ;;  %v1658_v29 = vpack.c.bf16 %v1124_v16, %v1123_v13  ;;  %v720_v30 = vadd.f32 %v719_v26, %v671_v12  ;;  %v876_v31 = vadd.f32 %v2236_v18, %v856_v17 }
  0xfe   :  { %v820_v35 = vpop.f32.mrf.mxu0 }
  0xff   :  { %1659 = vst [vmem:[%s2363_s8] sm:$0xff] %v1658_v29   ;;  %v769_v34 = vadd.f32 %v768_v27, %v720_v30  ;;  %v1089_v40 = vadd.f32 %v1073_v32, %v876_v31 }
 0x100   :  { %v1037_v36 = vpop.f32.mrf.mxu1 }
 0x101   :  { %v818_v43 = vadd.f32 %v817_v38, %v769_v34  ;;  %v1109_v50 = vadd.f32 %v2250_v60, %v1089_v40  ;;  %v1075_v5 = vmul.f32 %v2241_v19, %v1037_v36 }
 0x103   :  { %v857_v41 = vmul.f32 %v2228_v37, %v818_v43  ;;  %v1125_v59 = vmax.f32 %v1109_v50, 0.0 }
 0x104   :  { %v722_v45 = vpop.f32.mrf.mxu2 }
 0x105   :  { %v771_v46 = vpop.f32.mrf.mxu3  ;;  %v877_v47 = vadd.f32 %v2236_v18, %v857_v41  ;;  %v723_v49 = vadd.f32 %v722_v45, %v674_v44 }
 0x106   :  { %v822_v23 = vpop.f32.mrf.mxu0 }
 0x107   :  { %v1090_v51 = vadd.f32 %v1074_v48, %v877_v47  ;;  %v772_v52 = vadd.f32 %v771_v46, %v723_v49 }
 0x108   :  { %v1039_v24 = vpop.f32.mrf.mxu1 }
 0x109   :  { %v1110_v54 = vadd.f32 %v2250_v60, %v1090_v51  ;;  %v821_v55 = vadd.f32 %v820_v35, %v772_v52  ;;  %v1076_v13 = vmul.f32 %v2241_v19, %v1039_v24 }
 0x10b   :  { %v1126_v56 = vmax.f32 %v1110_v54, 0.0  ;;  %v858_v57 = vmul.f32 %v2228_v37, %v821_v55 }
 0x10c   :  { %v724_v61 = vpop.f32.mrf.mxu2 }
 0x10d   :  { %v773_v1 = vpop.f32.mrf.mxu3  ;;  %v1663_v2 = vpack.c.bf16 %v1126_v56, %v1125_v59  ;;  %v725_v3 = vadd.f32 %v724_v61, %v676_v58  ;;  %v878_v4 = vadd.f32 %v2236_v18, %v858_v57 }
 0x10e   :  { %v825_v7 = vpop.f32.mrf.mxu0 }
 0x10f   :  { %1695 = vst [vmem:[%s2363_s8 + $0x8] sm:$0xff] %v1663_v2   ;;  %v774_v6 = vadd.f32 %v773_v1, %v725_v3  ;;  %v1091_v38 = vadd.f32 %v1075_v5, %v878_v4 }
 0x110   :  { %v1042_v8 = vpop.f32.mrf.mxu1 }
 0x111   :  { %v823_v63 = vadd.f32 %v822_v23, %v774_v6  ;;  %v1111_v17 = vadd.f32 %v2250_v60, %v1091_v38  ;;  %v1077_v45 = vmul.f32 %v2241_v19, %v1042_v8 }
 0x113   :  { %v859_v39 = vmul.f32 %v2228_v37, %v823_v63  ;;  %v1127_v15 = vmax.f32 %v1111_v17, 0.0 }
 0x114   :  { %v727_v10 = vpop.f32.mrf.mxu2 }
 0x115   :  { %v776_v11 = vpop.f32.mrf.mxu3  ;;  %v879_v12 = vadd.f32 %v2236_v18, %v859_v39  ;;  %v728_v16 = vadd.f32 %v727_v10, %v679_v0 }
 0x116   :  { %v827_v29 = vpop.f32.mrf.mxu0 }
 0x117   :  { %v1092_v26 = vadd.f32 %v1076_v13, %v879_v12  ;;  %v777_v27 = vadd.f32 %v776_v11, %v728_v16 }
 0x118   :  { %v1044_v30 = vpop.f32.mrf.mxu1 }
 0x119   :  { %v1112_v31 = vadd.f32 %v2250_v60, %v1092_v26  ;;  %v826_v32 = vadd.f32 %v825_v7, %v777_v27  ;;  %v1078_v23 = vmul.f32 %v2241_v19, %v1044_v30 }
 0x11b   :  { %v1128_v34 = vmax.f32 %v1112_v31, 0.0  ;;  %v860_v35 = vmul.f32 %v2228_v37, %v826_v32 }
 0x11c   :  { %v729_v36 = vpop.f32.mrf.mxu2 }
 0x11d   :  { %v778_v43 = vpop.f32.mrf.mxu3  ;;  %v1668_v44 = vpack.c.bf16 %v1128_v34, %v1127_v15  ;;  %v730_v40 = vadd.f32 %v729_v36, %v681_v14  ;;  %v880_v41 = vadd.f32 %v2236_v18, %v860_v35 }
 0x11e   :  { %v830_v47 = vpop.f32.mrf.mxu0 }
 0x11f   :  { %1696 = vst [vmem:[%s2363_s8 + $0x10] sm:$0xff] %v1668_v44   ;;  %v779_v46 = vadd.f32 %v778_v43, %v730_v40  ;;  %v1093_v25 = vadd.f32 %v1077_v45, %v880_v41 }
 0x120   :  { %v1047_v48 = vpop.f32.mrf.mxu1 }
 0x121   :  { %v828_v21 = vadd.f32 %v827_v29, %v779_v46  ;;  %v1113_v54 = vadd.f32 %v2250_v60, %v1093_v25  ;;  %v1079_v8 = vmul.f32 %v2241_v19, %v1047_v48 }
 0x123   :  { %v861_v49 = vmul.f32 %v2228_v37, %v828_v21  ;;  %v1129_v1 = vmax.f32 %v1113_v54, 0.0 }
 0x124   :  { %v732_v50 = vpop.f32.mrf.mxu2 }
 0x125   :  { %v781_v51 = vpop.f32.mrf.mxu3  ;;  %v881_v52 = vadd.f32 %v2236_v18, %v861_v49  ;;  %v733_v24 = vadd.f32 %v732_v50, %v2116_v22 }
 0x126   :  { %v832_v59 = vpop.f32.mrf.mxu0 }
 0x127   :  { %v1094_v55 = vadd.f32 %v1078_v23, %v881_v52  ;;  %v782_v58 = vadd.f32 %v781_v51, %v733_v24 }
 0x128   :  { %v1049_v56 = vpop.f32.mrf.mxu1 }
 0x129   :  { %v1114_v57 = vadd.f32 %v2250_v60, %v1094_v55  ;;  %v831_v61 = vadd.f32 %v830_v47, %v782_v58 }
 0x12b   :  { %v1130_v2 = vmax.f32 %v1114_v57, 0.0  ;;  %v862_v3 = vmul.f32 %v2228_v37, %v831_v61 }
 0x12c   :  { %v734_v4 = vpop.f32.mrf.mxu2 }
 0x12d   :  { %v783_v5 = vpop.f32.mrf.mxu3  ;;  %v1673_v6 = vpack.c.bf16 %v1130_v2, %v1129_v1  ;;  %v735_v7 = vadd.f32 %v734_v4, %v2140_v33  ;;  %v882_v22 = vadd.f32 %v2236_v18, %v862_v3  ;;  %v1080_v33 = vmul.f32 %v2241_v19, %v1049_v56 }
 0x12e   :  { %v835_v0 = vpop.f32.mrf.mxu0 }
 0x12f   :  { %1697 = vst [vmem:[%s2363_s8 + $0x18] sm:$0xff] %v1673_v6   ;;  %v784_v63 = vadd.f32 %v783_v5, %v735_v7  ;;  %v1095_v10 = vadd.f32 %v1079_v8, %v882_v22 }
 0x130   :  { %v1052_v38 = vpop.f32.mrf.mxu1 }
 0x131   :  { %v833_v39 = vadd.f32 %v832_v59, %v784_v63  ;;  %v1115_v26 = vadd.f32 %v2250_v60, %v1095_v10  ;;  %v1081_v41 = vmul.f32 %v2241_v19, %v1052_v38 }
 0x133   :  { %v863_v11 = vmul.f32 %v2228_v37, %v833_v39  ;;  %v1131_v15 = vmax.f32 %v1115_v26, 0.0 }
 0x134   :  { %v737_v12 = vpop.f32.mrf.mxu2 }
 0x135   :  { %v786_v13 = vpop.f32.mrf.mxu3  ;;  %v883_v16 = vadd.f32 %v2236_v18, %v863_v11  ;;  %v738_v17 = vadd.f32 %v737_v12, %v2149_v42 }
 0x136   :  { %v837_v30 = vpop.f32.mrf.mxu0 }
 0x137   :  { %v1096_v27 = vadd.f32 %v1080_v33, %v883_v16  ;;  %v787_v29 = vadd.f32 %v786_v13, %v738_v17 }
 0x138   :  { %v1054_v14 = vpop.f32.mrf.mxu1 }
 0x139   :  { %v1116_v31 = vadd.f32 %v2250_v60, %v1096_v27  ;;  %v836_v32 = vadd.f32 %v835_v0, %v787_v29 }
 0x13b   :  { %v1132_v34 = vmax.f32 %v1116_v31, 0.0  ;;  %v864_v35 = vmul.f32 %v2228_v37, %v836_v32 }
 0x13c   :  { %v739_v36 = vpop.f32.mrf.mxu2 }
 0x13d   :  { %v788_v43 = vpop.f32.mrf.mxu3  ;;  %v1678_v44 = vpack.c.bf16 %v1132_v34, %v1131_v15  ;;  %v740_v40 = vadd.f32 %v739_v36, %v2173_v53  ;;  %v884_v42 = vadd.f32 %v2236_v18, %v864_v35  ;;  %v1082_v53 = vmul.f32 %v2241_v19, %v1054_v14 }
 0x13e   :  { %v840_v47 = vpop.f32.mrf.mxu0 }
 0x13f   :  { %1698 = vst [vmem:[%s2363_s8 + $0x20] sm:$0xff] %v1678_v44   ;;  %v789_v45 = vadd.f32 %v788_v43, %v740_v40  ;;  %v1097_v48 = vadd.f32 %v1081_v41, %v884_v42 }
 0x140   :  { %v1057_v25 = vpop.f32.mrf.mxu1 }
 0x141   :  { %v838_v46 = vadd.f32 %v837_v30, %v789_v45  ;;  %v1117_v23 = vadd.f32 %v2250_v60, %v1097_v48  ;;  %v1083_v6 = vmul.f32 %v2241_v19, %v1057_v25 }
 0x143   :  { %v865_v21 = vmul.f32 %v2228_v37, %v838_v46  ;;  %v1133_v59 = vmax.f32 %v1117_v23, 0.0 }
 0x144   :  { %v742_v49 = vpop.f32.mrf.mxu2 }
 0x145   :  { %v791_v50 = vpop.f32.mrf.mxu3  ;;  %v885_v51 = vadd.f32 %v2236_v18, %v865_v21  ;;  %v743_v52 = vadd.f32 %v742_v49, %v2182_v62 }
 0x146   :  { %v842_v61 = vpop.f32.mrf.mxu0 }
 0x147   :  { %v1098_v24 = vadd.f32 %v1082_v53, %v885_v51  ;;  %v792_v54 = vadd.f32 %v791_v50, %v743_v52 }
 0x148   :  { %v1059_v5 = vpop.f32.mrf.mxu1 }
 0x149   :  { %v1118_v55 = vadd.f32 %v2250_v60, %v1098_v24  ;;  %v841_v58 = vadd.f32 %v840_v47, %v792_v54 }
 0x14b   :  { %v1134_v56 = vmax.f32 %v1118_v55, 0.0  ;;  %v866_v57 = vmul.f32 %v2228_v37, %v841_v58 }
 0x14c   :  { %v744_v1 = vpop.f32.mrf.mxu2 }
 0x14d   :  { %v793_v2 = vpop.f32.mrf.mxu3  ;;  %v1683_v3 = vpack.c.bf16 %v1134_v56, %v1133_v59  ;;  %v745_v4 = vadd.f32 %v744_v1, %v2206_v9  ;;  %v886_v62 = vadd.f32 %v2236_v18, %v866_v57  ;;  %v1084_v9 = vmul.f32 %v2241_v19, %v1059_v5 }
 0x14e   :  { %v845_v11 = vpop.f32.mrf.mxu0 }
 0x14f   :  { %1699 = vst [vmem:[%s2363_s8 + $0x28] sm:$0xff] %v1683_v3   ;;  %v794_v7 = vadd.f32 %v793_v2, %v745_v4  ;;  %v1099_v8 = vadd.f32 %v1083_v6, %v886_v62 }
 0x150   :  { %v1062_v33 = vpop.f32.mrf.mxu1 }
 0x151   :  { %v843_v22 = vadd.f32 %v842_v61, %v794_v7  ;;  %v1119_v12 = vadd.f32 %v2250_v60, %v1099_v8  ;;  %v1085_v34 = vmul.f32 %v2241_v19, %v1062_v33 }
 0x153   :  { %v867_v63 = vmul.f32 %v2228_v37, %v843_v22  ;;  %v1135_v27 = vmax.f32 %v1119_v12, 0.0 }
 0x154   :  { %v747_v0 = vpop.f32.mrf.mxu2 }
 0x155   :  { %v796_v38 = vpop.f32.mrf.mxu3  ;;  %v887_v39 = vadd.f32 %v2236_v18, %v867_v63  ;;  %v748_v10 = vadd.f32 %v747_v0, %v2215_v20 }
 0x156   :  { %v847_v36 = vpop.f32.mrf.mxu0 }
 0x157   :  { %v1100_v13 = vadd.f32 %v1084_v9, %v887_v39  ;;  %v797_v16 = vadd.f32 %v796_v38, %v748_v10 }
 0x158   :  { %v1064_v44 = vpop.f32.mrf.mxu1 }
 0x159   :  { %v1120_v17 = vadd.f32 %v2250_v60, %v1100_v13  ;;  %v846_v26 = vadd.f32 %v845_v11, %v797_v16 }
 0x15b   :  { %v1136_v29 = vmax.f32 %v1120_v17, 0.0  ;;  %v868_v30 = vmul.f32 %v2228_v37, %v846_v26 }
 0x15c   :  { %v749_v31 = vpop.f32.mrf.mxu2 }
 0x15d   :  { %v1688_v32 = vpack.c.bf16 %v1136_v29, %v1135_v27  ;;  %v750_v14 = vadd.f32 %v749_v31, %v2221_v28  ;;  %v798_v15 = vpop.f32.mrf.mxu3  ;;  %v888_v20 = vadd.f32 %v2236_v18, %v868_v30  ;;  %v1086_v28 = vmul.f32 %v2241_v19, %v1064_v44 }
 0x15f   :  { %1700 = vst [vmem:[%s2363_s8 + $0x30] sm:$0xff] %v1688_v32   ;;  %v799_v35 = vadd.f32 %v798_v15, %v750_v14  ;;  %v1101_v40 = vadd.f32 %v1085_v34, %v888_v20 }
 0x161   :  { %v848_v43 = vadd.f32 %v847_v36, %v799_v35  ;;  %v1121_v45 = vadd.f32 %v2250_v60, %v1101_v40 }
 0x163   :  { %v869_v42 = vmul.f32 %v2228_v37, %v848_v43  ;;  %v1137_v48 = vmax.f32 %v1121_v45, 0.0 }
 0x165   :  { %v889_v41 = vadd.f32 %v2236_v18, %v869_v42 }
 0x167   :  { %v1102_v46 = vadd.f32 %v1086_v28, %v889_v41 }
 0x169   :  { %v1122_v47 = vadd.f32 %v2250_v60, %v1102_v46 }
 0x16b   :  { %v1138_v21 = vmax.f32 %v1122_v47, 0.0 }
 0x16d   :  { %v1693_v25 = vpack.c.bf16 %v1138_v21, %v1137_v48 }
 0x16f   :  { %1701 = vst [vmem:[%s2363_s8 + $0x38] sm:$0xff] %v1693_v25  }

</bundles_post_ra>
